<compile_context>
chip_gen: v6e
topology: v6e:2x2x1
jax: 0.10.0
libtpu: 0.0.40
codegen_flags: <defaults>
</compile_context>

<pallas_src>
import jax
import jax.numpy as jnp
from jax.experimental import pallas as pl
from jax.experimental.pallas import tpu as pltpu


def _chip_has_two_tensorcores() -> bool:
    """v7x has 2 TensorCores per chip; v5e/v6e have 1 (fused MLP is better there)."""
    try:
        kind = jax.devices()[0].device_kind.lower()
    except Exception:
        return False
    return ("v7" in kind) or ("7x" in kind)


_SPLIT_FC1 = _chip_has_two_tensorcores()


# --------------------------------------------------------------------------- #
# Fused conv + ReLU + 2x2 max-pool kernel (transposed im2col matmul)
# --------------------------------------------------------------------------- #
def _conv_relu_pool_kernel(p_ref, w_ref, b_ref, o_ref):
    """p_ref: (4, K, TM) bf16 patches (one slab per 2x2 pool position);
    w_ref: (Cout, K) bf16; b_ref: (Cout, 1) f32; o_ref: (Cout, TM) bf16.
    out = relu( max_q (W @ P_q) + b )   (bias/ReLU hoisted: monotone, identical)."""
    w = w_ref[...]
    acc = jnp.dot(w, p_ref[0], preferred_element_type=jnp.float32)
    for q in range(1, 4):  # static unroll over the 2x2 pool window
        acc = jnp.maximum(acc, jnp.dot(w, p_ref[q], preferred_element_type=jnp.float32))
    o_ref[...] = jnp.maximum(acc + b_ref[...], 0.0).astype(o_ref.dtype)


def conv_relu_pool(x, w, b, *, tm_max=2048):
    """x: (N, Cin, H, W); w: (Cout, Cin, KH, KW); b: (Cout,)
    -> maxpool2x2(relu(conv2d_valid(x, w) + b)), shape (N, Cout, Ho//2, Wo//2), bf16."""
    x = x.astype(jnp.bfloat16)
    w = w.astype(jnp.bfloat16)
    N, Cin, H, W = x.shape
    Cout, _, KH, KW = w.shape
    Ho, Wo = H - KH + 1, W - KW + 1
    Hp, Wp = Ho // 2, Wo // 2
    K = Cin * KH * KW
    M = N * Hp * Wp

    # Build the patch tensor directly in *pooled* coordinates via stride-2 slices
    # (no 25x-expanded intermediate + stride-2 minor-dim de-interleave transpose):
    #   P[q, k, m] = x[n, ci, 2*ip + r + u, 2*jp + s + v]
    #   q = 2*r + s, k = ci*KH*KW + u*KW + v (matches w.reshape(Cout, K)),
    #   m = n*Hp*Wp + ip*Wp + jp.
    slabs = []
    for r in range(2):
        for s in range(2):
            for u in range(KH):
                for v in range(KW):
                    slabs.append(x[:, :, r + u: r + u + 2 * Hp: 2,
                                         s + v: s + v + 2 * Wp: 2])
    patches = jnp.stack(slabs, axis=0)                     # (4*KH*KW, N, Cin, Hp, Wp)
    patches = patches.reshape(4, KH * KW, N, Cin, Hp, Wp)
    # Only the small Cin axis moves; the minor (Hp, Wp) block stays contiguous.
    patches = patches.transpose(0, 3, 1, 2, 4, 5)          # (4, Cin, KH*KW, N, Hp, Wp)
    patches = patches.reshape(4, K, M)

    # Batch-scalable M tiling: fixed lane tile (<= tm_max), grid = cdiv(M, tm).
    tm = min(int(tm_max), pl.cdiv(M, 128) * 128)
    grid_m = pl.cdiv(M, tm)
    m_pad = grid_m * tm
    if m_pad != M:
        patches = jnp.pad(patches, ((0, 0), (0, 0), (0, m_pad - M)))

    w_mat = w.reshape(Cout, K)
    b_col = b.reshape(Cout, 1).astype(jnp.float32)

    # Double-buffered block footprint + slack (keeps headroom on v7x's 64 MiB VMEM).
    in_bytes = 4 * K * tm * patches.dtype.itemsize
    out_bytes = Cout * tm * 2
    w_bytes = Cout * K * 2 + Cout * 4
    vmem_limit = int(2 * (in_bytes + out_bytes + w_bytes) + (4 << 20))

    out = pl.pallas_call(
        _conv_relu_pool_kernel,
        out_shape=jax.ShapeDtypeStruct((Cout, m_pad), jnp.bfloat16),
        grid=(grid_m,),
        in_specs=[
            pl.BlockSpec((4, K, tm), lambda i: (0, 0, i)),   # patches: tiled over M
            pl.BlockSpec((Cout, K), lambda i: (0, 0)),       # weights: resident (tiny)
            pl.BlockSpec((Cout, 1), lambda i: (0, 0)),       # bias: resident
        ],
        out_specs=pl.BlockSpec((Cout, tm), lambda i: (0, i)),
        compiler_params=pltpu.CompilerParams(
            dimension_semantics=("parallel",),
            vmem_limit_bytes=vmem_limit,
        ),
    )(patches, w_mat, b_col)

    # Padded M columns hold relu(b) garbage; sliced off before the reshape.
    out = out[:, :M].reshape(Cout, N, Hp, Wp).transpose(1, 0, 2, 3)
    return out                                               # (N, Cout, Hp, Wp) bf16


# --------------------------------------------------------------------------- #
# MLP head kernels
# --------------------------------------------------------------------------- #
def _mlp_fused_kernel(x_ref, w1_ref, b1_ref, w2_ref, b2_ref, w3_ref, b3_ref, o_ref):
    h = jnp.dot(x_ref[...], w1_ref[...], preferred_element_type=jnp.float32)
    h = jnp.maximum(h + b1_ref[...], 0.0).astype(jnp.bfloat16)
    h = jnp.dot(h, w2_ref[...], preferred_element_type=jnp.float32)
    h = jnp.maximum(h + b2_ref[...], 0.0).astype(jnp.bfloat16)
    y = jnp.dot(h, w3_ref[...], preferred_element_type=jnp.float32) + b3_ref[...]
    y = y - jnp.max(y, axis=-1, keepdims=True)
    y = y - jnp.log(jnp.sum(jnp.exp(y), axis=-1, keepdims=True))
    o_ref[...] = y.astype(o_ref.dtype)


def _fc1_relu_kernel(x_ref, w_ref, b_ref, o_ref):
    h = jnp.dot(x_ref[...], w_ref[...], preferred_element_type=jnp.float32)
    o_ref[...] = jnp.maximum(h + b_ref[...], 0.0).astype(o_ref.dtype)


def _fc23_logsoftmax_kernel(h_ref, w2_ref, b2_ref, w3_ref, b3_ref, o_ref):
    h = jnp.dot(h_ref[...], w2_ref[...], preferred_element_type=jnp.float32)
    h = jnp.maximum(h + b2_ref[...], 0.0).astype(jnp.bfloat16)
    y = jnp.dot(h, w3_ref[...], preferred_element_type=jnp.float32) + b3_ref[...]
    y = y - jnp.max(y, axis=-1, keepdims=True)
    y = y - jnp.log(jnp.sum(jnp.exp(y), axis=-1, keepdims=True))
    o_ref[...] = y.astype(o_ref.dtype)


def _mlp_fused(x, params):
    """Single gridless call, all (bf16) weights resident single-buffered in VMEM."""
    n_rows = x.shape[0]
    n_out = params["fc3_w"].shape[1]
    return pl.pallas_call(
        _mlp_fused_kernel,
        out_shape=jax.ShapeDtypeStruct((n_rows, n_out), jnp.float32),
        in_specs=[pl.BlockSpec(memory_space=pltpu.MemorySpace.VMEM)] * 7,
        out_specs=pl.BlockSpec(memory_space=pltpu.MemorySpace.VMEM),
        compiler_params=pltpu.CompilerParams(vmem_limit_bytes=16 * 1024 * 1024),
    )(x.astype(jnp.bfloat16),
      params["fc1_w"].astype(jnp.bfloat16), params["fc1_b"].reshape(1, -1),
      params["fc2_w"].astype(jnp.bfloat16), params["fc2_b"].reshape(1, -1),
      params["fc3_w"].astype(jnp.bfloat16), params["fc3_b"].reshape(1, -1))


def _mlp_split_fc1(x, params, *, col_tiles=2):
    """v7x path: shard the dominant fc1 weight stream across the 2 TensorCores
    via a parallel column grid, then a tiny fused fc2/fc3+log_softmax call."""
    n_rows, d_in = x.shape
    h_dim = params["fc1_w"].shape[1]
    tn = pl.cdiv(h_dim, col_tiles * 128) * 128
    h_pad = tn * col_tiles

    w1 = jnp.pad(params["fc1_w"].astype(jnp.bfloat16), ((0, 0), (0, h_pad - h_dim)))
    b1 = jnp.pad(params["fc1_b"].astype(jnp.float32), (0, h_pad - h_dim)).reshape(1, h_pad)

    h = pl.pallas_call(
        _fc1_relu_kernel,
        out_shape=jax.ShapeDtypeStruct((n_rows, h_pad), jnp.bfloat16),
        grid=(col_tiles,),
        in_specs=[
            pl.BlockSpec((n_rows, d_in), lambda j: (0, 0)),   # activations: resident
            pl.BlockSpec((d_in, tn), lambda j: (0, j)),       # fc1 weight column tile
            pl.BlockSpec((1, tn), lambda j: (0, j)),
        ],
        out_specs=pl.BlockSpec((n_rows, tn), lambda j: (0, j)),
        compiler_params=pltpu.CompilerParams(
            dimension_semantics=("parallel",),
            vmem_limit_bytes=12 * 1024 * 1024,
        ),
    )(x.astype(jnp.bfloat16), w1, b1)

    h = h[:, :h_dim]                          # drop zero-padded fc1 columns
    n_out = params["fc3_w"].shape[1]
    return pl.pallas_call(
        _fc23_logsoftmax_kernel,
        out_shape=jax.ShapeDtypeStruct((n_rows, n_out), jnp.float32),
        in_specs=[pl.BlockSpec(memory_space=pltpu.MemorySpace.VMEM)] * 5,
        out_specs=pl.BlockSpec(memory_space=pltpu.MemorySpace.VMEM),
        compiler_params=pltpu.CompilerParams(vmem_limit_bytes=8 * 1024 * 1024),
    )(h,
      params["fc2_w"].astype(jnp.bfloat16), params["fc2_b"].reshape(1, -1),
      params["fc3_w"].astype(jnp.bfloat16), params["fc3_b"].reshape(1, -1))


def mlp_head(x, params):
    """x: (N, 2028) -> log-probs (N, 8)."""
    if _SPLIT_FC1:
        return _mlp_split_fc1(x, params)
    return _mlp_fused(x, params)


# --------------------------------------------------------------------------- #
# Parameters (deterministic, PyTorch-default-style uniform init, stored f32)
# --------------------------------------------------------------------------- #
def _uniform(key, shape, fan_in):
    bound = 1.0 / jnp.sqrt(float(fan_in))
    return jax.random.uniform(key, shape, jnp.float32, -bound, bound)


def init_params(key):
    ks = jax.random.split(key, 10)
    return {
        "conv1_w": _uniform(ks[0], (9, 3, 5, 5), 3 * 25),
        "conv1_b": _uniform(ks[1], (9,), 3 * 25),
        "conv2_w": _uniform(ks[2], (12, 9, 5, 5), 9 * 25),
        "conv2_b": _uniform(ks[3], (12,), 9 * 25),
        "fc1_w": _uniform(ks[4], (2028, 1000), 2028),   # stored (in, out)
        "fc1_b": _uniform(ks[5], (1000,), 2028),
        "fc2_w": _uniform(ks[6], (1000, 500), 1000),
        "fc2_b": _uniform(ks[7], (500,), 1000),
        "fc3_w": _uniform(ks[8], (500, 8), 500),
        "fc3_b": _uniform(ks[9], (8,), 500),
    }


# --------------------------------------------------------------------------- #
# Forward pass (matches Net.forward)
# --------------------------------------------------------------------------- #
def net_forward(params, x):
    x = conv_relu_pool(x, params["conv1_w"], params["conv1_b"])   # (N, 9, 30, 30)
    x = conv_relu_pool(x, params["conv2_w"], params["conv2_b"])   # (N, 12, 13, 13)
    x = x.reshape(x.shape[0], -1)          # NCHW flatten == torch .view(-1, 2028)
    return mlp_head(x, params)             # (N, 8) log-probabilities


if __name__ == "__main__":
    key = jax.random.PRNGKey(0)
    pkey, xkey = jax.random.split(key)
    params = init_params(pkey)
    # Input must be (N, 3, 64, 64): fc1 expects 2028 = 12 * 13 * 13 flattened features.
    x = jax.random.normal(xkey, (2, 3, 64, 64), dtype=jnp.float32)
    out = jax.jit(net_forward)(params, x)
    out = jax.block_until_ready(out)
    assert out.shape == (2, 8) and bool(jnp.all(jnp.isfinite(out)))
    print("KERNEL_OK")
</pallas_src>

<mosaic_0001>
module attributes {stable_mosaic.version = 11 : i64} {
  func.func @_conv_relu_pool_kernel(%arg0: i32, %arg1: memref<4x75x1920xbf16, #tpu.memory_space<vmem>>, %arg2: memref<9x75xbf16, #tpu.memory_space<vmem>>, %arg3: memref<9x1xf32, #tpu.memory_space<vmem>>, %arg4: memref<9x1920xbf16, #tpu.memory_space<vmem>>) attributes {dimension_semantics = [#tpu.dimension_semantics<parallel>], iteration_bounds = array<i64: 1>, scalar_prefetch = 0 : i64, scratch_operands = 0 : i64, tpu.core_type = #tpu.core_type<tc>, window_params = [{transform_indices = @transform_0, window_bounds = array<i64: 4, 75, 1920>}, {pipeline_mode = #tpu.pipeline_mode<synchronous>, transform_indices = @transform_1, window_bounds = array<i64: 9, 75>}, {pipeline_mode = #tpu.pipeline_mode<synchronous>, transform_indices = @transform_2, window_bounds = array<i64: 9, 1>}, {transform_indices = @transform_3, window_bounds = array<i64: 9, 1920>}]} {
    %c0 = arith.constant 0 : index
    %c0_0 = arith.constant 0 : index
    %0 = vector.load %arg2[%c0, %c0_0] : memref<9x75xbf16, #tpu.memory_space<vmem>>, vector<9x75xbf16>
    %c0_1 = arith.constant 0 : index
    %c0_2 = arith.constant 0 : index
    %c0_3 = arith.constant 0 : index
    %1 = vector.load %arg1[%c0_1, %c0_2, %c0_3] : memref<4x75x1920xbf16, #tpu.memory_space<vmem>>, vector<1x75x1920xbf16>
    %2 = vector.shape_cast %1 : vector<1x75x1920xbf16> to vector<75x1920xbf16>
    %cst = arith.constant dense<0.000000e+00> : vector<9x1920xf32>
    %3 = tpu.matmul %0, %2, %cst {dimension_numbers = #tpu.dot_dimension_numbers<[1], [0], [0], [1], [0, 0, 1, 1], [], []>} : vector<9x75xbf16>, vector<75x1920xbf16>, vector<9x1920xf32> -> vector<9x1920xf32>
    %c1 = arith.constant 1 : index
    %c0_4 = arith.constant 0 : index
    %c0_5 = arith.constant 0 : index
    %4 = vector.load %arg1[%c1, %c0_4, %c0_5] : memref<4x75x1920xbf16, #tpu.memory_space<vmem>>, vector<1x75x1920xbf16>
    %5 = vector.shape_cast %4 : vector<1x75x1920xbf16> to vector<75x1920xbf16>
    %cst_6 = arith.constant dense<0.000000e+00> : vector<9x1920xf32>
    %6 = tpu.matmul %0, %5, %cst_6 {dimension_numbers = #tpu.dot_dimension_numbers<[1], [0], [0], [1], [0, 0, 1, 1], [], []>} : vector<9x75xbf16>, vector<75x1920xbf16>, vector<9x1920xf32> -> vector<9x1920xf32>
    %7 = arith.maximumf %3, %6 : vector<9x1920xf32>
    %c2 = arith.constant 2 : index
    %c0_7 = arith.constant 0 : index
    %c0_8 = arith.constant 0 : index
    %8 = vector.load %arg1[%c2, %c0_7, %c0_8] : memref<4x75x1920xbf16, #tpu.memory_space<vmem>>, vector<1x75x1920xbf16>
    %9 = vector.shape_cast %8 : vector<1x75x1920xbf16> to vector<75x1920xbf16>
    %cst_9 = arith.constant dense<0.000000e+00> : vector<9x1920xf32>
    %10 = tpu.matmul %0, %9, %cst_9 {dimension_numbers = #tpu.dot_dimension_numbers<[1], [0], [0], [1], [0, 0, 1, 1], [], []>} : vector<9x75xbf16>, vector<75x1920xbf16>, vector<9x1920xf32> -> vector<9x1920xf32>
    %11 = arith.maximumf %7, %10 : vector<9x1920xf32>
    %c3 = arith.constant 3 : index
    %c0_10 = arith.constant 0 : index
    %c0_11 = arith.constant 0 : index
    %12 = vector.load %arg1[%c3, %c0_10, %c0_11] : memref<4x75x1920xbf16, #tpu.memory_space<vmem>>, vector<1x75x1920xbf16>
    %13 = vector.shape_cast %12 : vector<1x75x1920xbf16> to vector<75x1920xbf16>
    %cst_12 = arith.constant dense<0.000000e+00> : vector<9x1920xf32>
    %14 = tpu.matmul %0, %13, %cst_12 {dimension_numbers = #tpu.dot_dimension_numbers<[1], [0], [0], [1], [0, 0, 1, 1], [], []>} : vector<9x75xbf16>, vector<75x1920xbf16>, vector<9x1920xf32> -> vector<9x1920xf32>
    %15 = arith.maximumf %11, %14 : vector<9x1920xf32>
    %c0_13 = arith.constant 0 : index
    %c0_14 = arith.constant 0 : index
    %16 = vector.load %arg3[%c0_13, %c0_14] : memref<9x1xf32, #tpu.memory_space<vmem>>, vector<9x1xf32>
    %17 = vector.broadcast %16 : vector<9x1xf32> to vector<9x1920xf32>
    %18 = arith.addf %15, %17 : vector<9x1920xf32>
    %cst_15 = arith.constant 0.000000e+00 : f32
    %19 = vector.broadcast %cst_15 : f32 to vector<9x1920xf32>
    %20 = arith.maximumf %18, %19 : vector<9x1920xf32>
    %21 = arith.truncf %20 : vector<9x1920xf32> to vector<9x1920xbf16>
    %c0_16 = arith.constant 0 : index
    %c0_17 = arith.constant 0 : index
    %22 = vector.load %arg4[%c0_16, %c0_17] : memref<9x1920xbf16, #tpu.memory_space<vmem>>, vector<9x1920xbf16>
    tpu.vector_store %arg4[%c0_16, %c0_17], %21 {strides = array<i32>} : memref<9x1920xbf16, #tpu.memory_space<vmem>>, vector<9x1920xbf16>,
    return
  }
  func.func @transform_0(%arg0: i32) -> (i32, i32, i32) {
    %c0_i32 = arith.constant 0 : i32
    %c0_i32_0 = arith.constant 0 : i32
    %c0_i32_1 = arith.constant 0 : i32
    return %c0_i32, %c0_i32_0, %arg0 : i32, i32, i32
  }
  func.func @transform_1(%arg0: i32) -> (i32, i32) {
    %c0_i32 = arith.constant 0 : i32
    %c0_i32_0 = arith.constant 0 : i32
    %c0_i32_1 = arith.constant 0 : i32
    return %c0_i32, %c0_i32_0 : i32, i32
  }
  func.func @transform_2(%arg0: i32) -> (i32, i32) {
    %c0_i32 = arith.constant 0 : i32
    %c0_i32_0 = arith.constant 0 : i32
    %c0_i32_1 = arith.constant 0 : i32
    return %c0_i32, %c0_i32_0 : i32, i32
  }
  func.func @transform_3(%arg0: i32) -> (i32, i32) {
    %c0_i32 = arith.constant 0 : i32
    %c0_i32_0 = arith.constant 0 : i32
    return %c0_i32, %arg0 : i32, i32
  }
}

module attributes {stable_mosaic.version = 11 : i64} {
  func.func @_conv_relu_pool_kernel(%arg0: i32, %arg1: memref<4x225x384xbf16, #tpu.memory_space<vmem>>, %arg2: memref<12x225xbf16, #tpu.memory_space<vmem>>, %arg3: memref<12x1xf32, #tpu.memory_space<vmem>>, %arg4: memref<12x384xbf16, #tpu.memory_space<vmem>>) attributes {dimension_semantics = [#tpu.dimension_semantics<parallel>], iteration_bounds = array<i64: 1>, scalar_prefetch = 0 : i64, scratch_operands = 0 : i64, tpu.core_type = #tpu.core_type<tc>, window_params = [{transform_indices = @transform_0, window_bounds = array<i64: 4, 225, 384>}, {pipeline_mode = #tpu.pipeline_mode<synchronous>, transform_indices = @transform_1, window_bounds = array<i64: 12, 225>}, {pipeline_mode = #tpu.pipeline_mode<synchronous>, transform_indices = @transform_2, window_bounds = array<i64: 12, 1>}, {transform_indices = @transform_3, window_bounds = array<i64: 12, 384>}]} {
    %c0 = arith.constant 0 : index
    %c0_0 = arith.constant 0 : index
    %0 = vector.load %arg2[%c0, %c0_0] : memref<12x225xbf16, #tpu.memory_space<vmem>>, vector<12x225xbf16>
    %c0_1 = arith.constant 0 : index
    %c0_2 = arith.constant 0 : index
    %c0_3 = arith.constant 0 : index
    %1 = vector.load %arg1[%c0_1, %c0_2, %c0_3] : memref<4x225x384xbf16, #tpu.memory_space<vmem>>, vector<1x225x384xbf16>
    %2 = vector.shape_cast %1 : vector<1x225x384xbf16> to vector<225x384xbf16>
    %cst = arith.constant dense<0.000000e+00> : vector<12x384xf32>
    %3 = tpu.matmul %0, %2, %cst {dimension_numbers = #tpu.dot_dimension_numbers<[1], [0], [0], [1], [0, 0, 1, 1], [], []>} : vector<12x225xbf16>, vector<225x384xbf16>, vector<12x384xf32> -> vector<12x384xf32>
    %c1 = arith.constant 1 : index
    %c0_4 = arith.constant 0 : index
    %c0_5 = arith.constant 0 : index
    %4 = vector.load %arg1[%c1, %c0_4, %c0_5] : memref<4x225x384xbf16, #tpu.memory_space<vmem>>, vector<1x225x384xbf16>
    %5 = vector.shape_cast %4 : vector<1x225x384xbf16> to vector<225x384xbf16>
    %cst_6 = arith.constant dense<0.000000e+00> : vector<12x384xf32>
    %6 = tpu.matmul %0, %5, %cst_6 {dimension_numbers = #tpu.dot_dimension_numbers<[1], [0], [0], [1], [0, 0, 1, 1], [], []>} : vector<12x225xbf16>, vector<225x384xbf16>, vector<12x384xf32> -> vector<12x384xf32>
    %7 = arith.maximumf %3, %6 : vector<12x384xf32>
    %c2 = arith.constant 2 : index
    %c0_7 = arith.constant 0 : index
    %c0_8 = arith.constant 0 : index
    %8 = vector.load %arg1[%c2, %c0_7, %c0_8] : memref<4x225x384xbf16, #tpu.memory_space<vmem>>, vector<1x225x384xbf16>
    %9 = vector.shape_cast %8 : vector<1x225x384xbf16> to vector<225x384xbf16>
    %cst_9 = arith.constant dense<0.000000e+00> : vector<12x384xf32>
    %10 = tpu.matmul %0, %9, %cst_9 {dimension_numbers = #tpu.dot_dimension_numbers<[1], [0], [0], [1], [0, 0, 1, 1], [], []>} : vector<12x225xbf16>, vector<225x384xbf16>, vector<12x384xf32> -> vector<12x384xf32>
    %11 = arith.maximumf %7, %10 : vector<12x384xf32>
    %c3 = arith.constant 3 : index
    %c0_10 = arith.constant 0 : index
    %c0_11 = arith.constant 0 : index
    %12 = vector.load %arg1[%c3, %c0_10, %c0_11] : memref<4x225x384xbf16, #tpu.memory_space<vmem>>, vector<1x225x384xbf16>
    %13 = vector.shape_cast %12 : vector<1x225x384xbf16> to vector<225x384xbf16>
    %cst_12 = arith.constant dense<0.000000e+00> : vector<12x384xf32>
    %14 = tpu.matmul %0, %13, %cst_12 {dimension_numbers = #tpu.dot_dimension_numbers<[1], [0], [0], [1], [0, 0, 1, 1], [], []>} : vector<12x225xbf16>, vector<225x384xbf16>, vector<12x384xf32> -> vector<12x384xf32>
    %15 = arith.maximumf %11, %14 : vector<12x384xf32>
    %c0_13 = arith.constant 0 : index
    %c0_14 = arith.constant 0 : index
    %16 = vector.load %arg3[%c0_13, %c0_14] : memref<12x1xf32, #tpu.memory_space<vmem>>, vector<12x1xf32>
    %17 = vector.broadcast %16 : vector<12x1xf32> to vector<12x384xf32>
    %18 = arith.addf %15, %17 : vector<12x384xf32>
    %cst_15 = arith.constant 0.000000e+00 : f32
    %19 = vector.broadcast %cst_15 : f32 to vector<12x384xf32>
    %20 = arith.maximumf %18, %19 : vector<12x384xf32>
    %21 = arith.truncf %20 : vector<12x384xf32> to vector<12x384xbf16>
    %c0_16 = arith.constant 0 : index
    %c0_17 = arith.constant 0 : index
    %22 = vector.load %arg4[%c0_16, %c0_17] : memref<12x384xbf16, #tpu.memory_space<vmem>>, vector<12x384xbf16>
    tpu.vector_store %arg4[%c0_16, %c0_17], %21 {strides = array<i32>} : memref<12x384xbf16, #tpu.memory_space<vmem>>, vector<12x384xbf16>,
    return
  }
  func.func @transform_0(%arg0: i32) -> (i32, i32, i32) {
    %c0_i32 = arith.constant 0 : i32
    %c0_i32_0 = arith.constant 0 : i32
    %c0_i32_1 = arith.constant 0 : i32
    return %c0_i32, %c0_i32_0, %arg0 : i32, i32, i32
  }
  func.func @transform_1(%arg0: i32) -> (i32, i32) {
    %c0_i32 = arith.constant 0 : i32
    %c0_i32_0 = arith.constant 0 : i32
    %c0_i32_1 = arith.constant 0 : i32
    return %c0_i32, %c0_i32_0 : i32, i32
  }
  func.func @transform_2(%arg0: i32) -> (i32, i32) {
    %c0_i32 = arith.constant 0 : i32
    %c0_i32_0 = arith.constant 0 : i32
    %c0_i32_1 = arith.constant 0 : i32
    return %c0_i32, %c0_i32_0 : i32, i32
  }
  func.func @transform_3(%arg0: i32) -> (i32, i32) {
    %c0_i32 = arith.constant 0 : i32
    %c0_i32_0 = arith.constant 0 : i32
    return %c0_i32, %arg0 : i32, i32
  }
}

module attributes {stable_mosaic.version = 11 : i64} {
  func.func @_mlp_fused_kernel(%arg0: memref<2x2028xbf16, #tpu.memory_space<vmem>>, %arg1: memref<2028x1000xbf16, #tpu.memory_space<vmem>>, %arg2: memref<1x1000xf32, #tpu.memory_space<vmem>>, %arg3: memref<1000x500xbf16, #tpu.memory_space<vmem>>, %arg4: memref<1x500xf32, #tpu.memory_space<vmem>>, %arg5: memref<500x8xbf16, #tpu.memory_space<vmem>>, %arg6: memref<1x8xf32, #tpu.memory_space<vmem>>, %arg7: memref<2x8xf32, #tpu.memory_space<vmem>>) attributes {dimension_semantics = [], scalar_prefetch = 0 : i64, scratch_operands = 0 : i64, tpu.core_type = #tpu.core_type<tc>} {
    %c0 = arith.constant 0 : index
    %c0_0 = arith.constant 0 : index
    %0 = vector.load %arg0[%c0, %c0_0] : memref<2x2028xbf16, #tpu.memory_space<vmem>>, vector<2x2028xbf16>
    %c0_1 = arith.constant 0 : index
    %c0_2 = arith.constant 0 : index
    %1 = vector.load %arg1[%c0_1, %c0_2] : memref<2028x1000xbf16, #tpu.memory_space<vmem>>, vector<2028x1000xbf16>
    %cst = arith.constant dense<0.000000e+00> : vector<2x1000xf32>
    %2 = tpu.matmul %0, %1, %cst {dimension_numbers = #tpu.dot_dimension_numbers<[1], [0], [0], [1], [0, 0, 1, 1], [], []>} : vector<2x2028xbf16>, vector<2028x1000xbf16>, vector<2x1000xf32> -> vector<2x1000xf32>
    %c0_3 = arith.constant 0 : index
    %c0_4 = arith.constant 0 : index
    %3 = vector.load %arg2[%c0_3, %c0_4] : memref<1x1000xf32, #tpu.memory_space<vmem>>, vector<1x1000xf32>
    %4 = vector.broadcast %3 : vector<1x1000xf32> to vector<2x1000xf32>
    %5 = arith.addf %2, %4 : vector<2x1000xf32>
    %cst_5 = arith.constant 0.000000e+00 : f32
    %6 = vector.broadcast %cst_5 : f32 to vector<2x1000xf32>
    %7 = arith.maximumf %5, %6 : vector<2x1000xf32>
    %8 = arith.truncf %7 : vector<2x1000xf32> to vector<2x1000xbf16>
    %c0_6 = arith.constant 0 : index
    %c0_7 = arith.constant 0 : index
    %9 = vector.load %arg3[%c0_6, %c0_7] : memref<1000x500xbf16, #tpu.memory_space<vmem>>, vector<1000x500xbf16>
    %cst_8 = arith.constant dense<0.000000e+00> : vector<2x500xf32>
    %10 = tpu.matmul %8, %9, %cst_8 {dimension_numbers = #tpu.dot_dimension_numbers<[1], [0], [0], [1], [0, 0, 1, 1], [], []>} : vector<2x1000xbf16>, vector<1000x500xbf16>, vector<2x500xf32> -> vector<2x500xf32>
    %c0_9 = arith.constant 0 : index
    %c0_10 = arith.constant 0 : index
    %11 = vector.load %arg4[%c0_9, %c0_10] : memref<1x500xf32, #tpu.memory_space<vmem>>, vector<1x500xf32>
    %12 = vector.broadcast %11 : vector<1x500xf32> to vector<2x500xf32>
    %13 = arith.addf %10, %12 : vector<2x500xf32>
    %cst_11 = arith.constant 0.000000e+00 : f32
    %14 = vector.broadcast %cst_11 : f32 to vector<2x500xf32>
    %15 = arith.maximumf %13, %14 : vector<2x500xf32>
    %16 = arith.truncf %15 : vector<2x500xf32> to vector<2x500xbf16>
    %c0_12 = arith.constant 0 : index
    %c0_13 = arith.constant 0 : index
    %17 = vector.load %arg5[%c0_12, %c0_13] : memref<500x8xbf16, #tpu.memory_space<vmem>>, vector<500x8xbf16>
    %cst_14 = arith.constant dense<0.000000e+00> : vector<2x8xf32>
    %18 = tpu.matmul %16, %17, %cst_14 {dimension_numbers = #tpu.dot_dimension_numbers<[1], [0], [0], [1], [0, 0, 1, 1], [], []>} : vector<2x500xbf16>, vector<500x8xbf16>, vector<2x8xf32> -> vector<2x8xf32>
    %c0_15 = arith.constant 0 : index
    %c0_16 = arith.constant 0 : index
    %19 = vector.load %arg6[%c0_15, %c0_16] : memref<1x8xf32, #tpu.memory_space<vmem>>, vector<1x8xf32>
    %20 = vector.broadcast %19 : vector<1x8xf32> to vector<2x8xf32>
    %21 = arith.addf %18, %20 : vector<2x8xf32>
    %cst_17 = arith.constant dense<0xFF800000> : vector<2xf32>
    %22 = vector.multi_reduction <maximumf>, %21, %cst_17 [1] : vector<2x8xf32> to vector<2xf32>
    %23 = vector.shape_cast %22 : vector<2xf32> to vector<2x1xf32>
    %24 = vector.broadcast %23 : vector<2x1xf32> to vector<2x8xf32>
    %25 = arith.subf %21, %24 : vector<2x8xf32>
    %26 = math.exp %25 : vector<2x8xf32>
    %cst_18 = arith.constant dense<0.000000e+00> : vector<2xf32>
    %27 = vector.multi_reduction <add>, %26, %cst_18 [1] : vector<2x8xf32> to vector<2xf32>
    %28 = vector.shape_cast %27 : vector<2xf32> to vector<2x1xf32>
    %29 = math.log %28 : vector<2x1xf32>
    %30 = vector.broadcast %29 : vector<2x1xf32> to vector<2x8xf32>
    %31 = arith.subf %25, %30 : vector<2x8xf32>
    %c0_19 = arith.constant 0 : index
    %c0_20 = arith.constant 0 : index
    %32 = vector.load %arg7[%c0_19, %c0_20] : memref<2x8xf32, #tpu.memory_space<vmem>>, vector<2x8xf32>
    tpu.vector_store %arg7[%c0_19, %c0_20], %31 {strides = array<i32>} : memref<2x8xf32, #tpu.memory_space<vmem>>, vector<2x8xf32>,
    return
  }
}

</mosaic_0001>

<bundles_post_ra>
// kernel: net_forward.3
= control target key start
LH: loop header
LB: loop body
LE: loop exit
PB: predicated region body
PF: predicated region fallthrough
CT: control target
= control target key end

     0   :  { %vm471_vm0 = vcmask 1044480   ;;  %vm472_vm1 = vcmask 1045504   ;;  %v4790_v1 = vmov 0   ;;  %v4791_v2 = vmov 65535   ;;  %s6280_s0 = inlined_call_operand.vmem [shape: bf16[4,75,1920], index: 0, kind: input, shape index: {}]   ;;  %s6281_s1 = inlined_call_operand.vmem [shape: bf16[9,75], index: 1, kind: input, shape index: {}]   ;;  %s6282_s2 = inlined_call_operand.vmem [shape: f32[9,1], index: 2, kind: input, shape index: {}]   ;;  %s6283_s3 = inlined_call_operand.vmem [shape: bf16[9,1920], index: 3, kind: output, shape index: {}]  }
   0x1   :  { %v4348_v0 = vld [vmem:[%s6280_s0 + $0x1e4] ss:$60 sps:$4 sm:$0x3f]   ;;  %552 = vmatprep.mubr.bf16.mxu0 %v4790_v1  ;;  %595 = vmatprep.mubr.bf16.mxu1 %v4790_v1  ;;  %v473_v3 = vsel %vm471_vm0, 4294967295, %v4791_v2  ;;  %v4354_v10 = vld [vmem:[%s6280_s0 + $0x16c] ss:$60 sps:$4 sm:$0xff]  }
   0x2   :  { %4347 = vset.pattern.permute.xlu0 %v4790_v1  ;;  %v4820_v4 = vsel %vm472_vm1, %v473_v3, 0  ;;  %v4350_v5 = vld [vmem:[%s6280_s0 + $0x1ec] ss:$60 sps:$4 sm:$0x3f]   ;;  %v4356_v11 = vld [vmem:[%s6280_s0 + $0x174] ss:$60 sps:$4 sm:$0xff]  }
   0x3   :  { %v479_v6 = vand.u32 %v4348_v0, %v4820_v4  ;;  %v4352_v7 = vld [vmem:[%s6280_s0 + $0x1e0] ss:$60 sps:$4 sm:$0x3f]   ;;  %v4353_v8 = vld [vmem:[%s6280_s0 + $0x1e8] ss:$60 sps:$4 sm:$0x3f]   ;;  %v485_v9 = vand.u32 %v4350_v5, %v4820_v4 }
   0x4   :  { %v476_v12 = vand.u32 %v4352_v7, %v4820_v4  ;;  %v482_v13 = vand.u32 %v4353_v8, %v4820_v4  ;;  %v4358_v14 = vld [vmem:[%s6280_s0 + $0x168] ss:$60 sps:$4 sm:$0xff]   ;;  %v4359_v15 = vld [vmem:[%s6280_s0 + $0x170] ss:$60 sps:$4 sm:$0xff]   ;;  %v4362_v17 = vld [vmem:[%s6280_s0 + $0xfc] ss:$60 sps:$4 sm:$0xff]  }
   0x5   :  { %526 = vmatprep.subr.bf16.mxu0 %v479_v6  ;;  %569 = vmatprep.subr.bf16.mxu1 %v485_v9  ;;  %v4360_v16 = vld [vmem:[%s6280_s0 + $0xf4] ss:$60 sps:$4 sm:$0xff]   ;;  %v4366_v20 = vld [vmem:[%s6280_s0 + $0x7c] ss:$60 sps:$4 sm:$0xff]   ;;  %v4368_v21 = vld [vmem:[%s6280_s0 + $0x84] ss:$60 sps:$4 sm:$0xff]  }
   0x6   :  { %527 = vmatpush1.bf16.msra.mxu0 %v476_v12  ;;  %570 = vmatpush1.bf16.msra.mxu1 %v482_v13  ;;  %v4364_v18 = vld [vmem:[%s6280_s0 + $0xf0] ss:$60 sps:$4 sm:$0xff]   ;;  %v4365_v19 = vld [vmem:[%s6280_s0 + $0xf8] ss:$60 sps:$4 sm:$0xff]   ;;  %v4371_v23 = vld [vmem:[%s6280_s0 + $0x80] ss:$60 sps:$4 sm:$0xff]  }
   0x7   :  { %528 = vmatprep.subr.bf16.mxu0 %v4354_v10  ;;  %571 = vmatprep.subr.bf16.mxu1 %v4356_v11  ;;  %v4370_v22 = vld [vmem:[%s6280_s0 + $0x78] ss:$60 sps:$4 sm:$0xff]   ;;  %v4372_v24 = vld [vmem:[%s6280_s0 + $0x4] ss:$60 sps:$4 sm:$0xff]   ;;  %v4374_v25 = vld [vmem:[%s6280_s0 + $0xc] ss:$60 sps:$4 sm:$0xff]  }
   0x8   :  { %v4381_v26 = vld [vmem:[%s6280_s0 + $0x1f4] ss:$60 sps:$4 sm:$0x3f]   ;;  %v4376_v27 = vld [vmem:[%s6280_s0] ss:$60 sps:$4 sm:$0xff]   ;;  %vm467_vm2 = vcmask 613376  }
   0x9   :  { %v4384_v28 = vld [vmem:[%s6280_s0 + $0x1fc] ss:$60 sps:$4 sm:$0x3f]   ;;  %v4377_v29 = vld [vmem:[%s6280_s0 + $0x8] ss:$60 sps:$4 sm:$0xff]   ;;  %v491_v32 = vand.u32 %v4381_v26, %v4820_v4  ;;  %vm4793_vm3 = vmmov 0  }
   0xa   :  { %529 = vmatpush1.bf16.msra.mxu0 %v4358_v14  ;;  %572 = vmatpush1.bf16.msra.mxu1 %v4359_v15  ;;  %v4379_v30 = vld [vmem:[%s6280_s0 + $0x1f0] ss:$60 sps:$4 sm:$0x3f]   ;;  %v4382_v31 = vld [vmem:[%s6280_s0 + $0x1f8] ss:$60 sps:$4 sm:$0x3f]   ;;  %v497_v33 = vand.u32 %v4384_v28, %v4820_v4 }
   0xb   :  { %530 = vmatprep.subr.bf16.mxu0 %v4360_v16  ;;  %573 = vmatprep.subr.bf16.mxu1 %v4362_v17  ;;  %v4900_v34 = vld [vmem:[%s6281_s1] sm:$0x1f]   ;;  %v488_v35 = vand.u32 %v4379_v30, %v4820_v4  ;;  %v494_v36 = vand.u32 %v4382_v31, %v4820_v4  ;;  %v4387_v37 = vld [vmem:[%s6280_s0 + $0x17c] ss:$60 sps:$4 sm:$0xff]   ;;  %v4396_v42 = vld [vmem:[%s6280_s0 + $0x10c] ss:$60 sps:$4 sm:$0xff]  }
   0xc   :  { %v4390_v38 = vld [vmem:[%s6280_s0 + $0x184] ss:$60 sps:$4 sm:$0xff]   ;;  %v4385_v39 = vld [vmem:[%s6280_s0 + $0x178] ss:$60 sps:$4 sm:$0xff]   ;;  %v4399_v45 = vld [vmem:[%s6280_s0 + $0x8c] ss:$60 sps:$4 sm:$0xff]  }
   0xd   :  { %v4388_v40 = vld [vmem:[%s6280_s0 + $0x180] ss:$60 sps:$4 sm:$0xff]   ;;  %v4394_v44 = vld [vmem:[%s6280_s0 + $0x108] ss:$60 sps:$4 sm:$0xff]   ;;  %v4402_v46 = vld [vmem:[%s6280_s0 + $0x94] ss:$60 sps:$4 sm:$0xff]  }
   0xe   :  { %531 = vmatpush1.bf16.msra.mxu0 %v4364_v18  ;;  %574 = vmatpush1.bf16.msra.mxu1 %v4365_v19  ;;  %v4393_v41 = vld [vmem:[%s6280_s0 + $0x104] ss:$60 sps:$4 sm:$0xff]   ;;  %v4400_v48 = vld [vmem:[%s6280_s0 + $0x90] ss:$60 sps:$4 sm:$0xff]   ;;  %v4408_v51 = vld [vmem:[%s6280_s0 + $0x1c] ss:$60 sps:$4 sm:$0xff]  }
   0xf   :  { %532 = vmatprep.subr.bf16.mxu0 %v4366_v20  ;;  %575 = vmatprep.subr.bf16.mxu1 %v4368_v21  ;;  %v4391_v43 = vld [vmem:[%s6280_s0 + $0x100] ss:$60 sps:$4 sm:$0xff]   ;;  %v4397_v47 = vld [vmem:[%s6280_s0 + $0x88] ss:$60 sps:$4 sm:$0xff]   ;;  %v4405_v49 = vld [vmem:[%s6280_s0 + $0x14] ss:$60 sps:$4 sm:$0xff]  }
  0x10   :  { %v4411_v50 = vld [vmem:[%s6280_s0 + $0x204] ss:$60 sps:$4 sm:$0x3f]   ;;  %v4414_v52 = vld [vmem:[%s6280_s0 + $0x20c] ss:$60 sps:$4 sm:$0x3f]  }
  0x11   :  { %v4403_v53 = vld [vmem:[%s6280_s0 + $0x10] ss:$60 sps:$4 sm:$0xff]   ;;  %v4406_v54 = vld [vmem:[%s6280_s0 + $0x18] ss:$60 sps:$4 sm:$0xff]   ;;  %v503_v57 = vand.u32 %v4411_v50, %v4820_v4  ;;  %v509_v58 = vand.u32 %v4414_v52, %v4820_v4  ;;  %v4415_v63 = vld [vmem:[%s6280_s0 + $0x188] ss:$60 sps:$4 sm:$0xff]  }
  0x12   :  { %533 = vmatpush1.bf16.msra.mxu0 %v4370_v22  ;;  %576 = vmatpush1.bf16.msra.mxu1 %v4371_v23  ;;  %v4409_v55 = vld [vmem:[%s6280_s0 + $0x200] ss:$60 sps:$4 sm:$0x3f]   ;;  %v4412_v56 = vld [vmem:[%s6280_s0 + $0x208] ss:$60 sps:$4 sm:$0x3f]  }
  0x13   :  { %534 = vmatprep.subr.bf16.mxu0 %v4372_v24  ;;  %577 = vmatprep.subr.bf16.mxu1 %v4374_v25  ;;  %v500_v59 = vand.u32 %v4409_v55, %v4820_v4  ;;  %v506_v60 = vand.u32 %v4412_v56, %v4820_v4  ;;  %v4417_v61 = vld [vmem:[%s6280_s0 + $0x18c] ss:$60 sps:$4 sm:$0xff]   ;;  %v4420_v62 = vld [vmem:[%s6280_s0 + $0x194] ss:$60 sps:$4 sm:$0xff]   ;;  %v4426_v3 = vld [vmem:[%s6280_s0 + $0x11c] ss:$60 sps:$4 sm:$0xff]  }
  0x14   :  { %v4418_v0 = vld [vmem:[%s6280_s0 + $0x190] ss:$60 sps:$4 sm:$0xff]   ;;  %v4424_v6 = vld [vmem:[%s6280_s0 + $0x118] ss:$60 sps:$4 sm:$0xff]   ;;  %v4432_v8 = vld [vmem:[%s6280_s0 + $0xa4] ss:$60 sps:$4 sm:$0xff]  }
  0x15   :  { %v4423_v2 = vld [vmem:[%s6280_s0 + $0x114] ss:$60 sps:$4 sm:$0xff]   ;;  %v4429_v7 = vld [vmem:[%s6280_s0 + $0x9c] ss:$60 sps:$4 sm:$0xff]   ;;  %v4435_v11 = vld [vmem:[%s6280_s0 + $0x24] ss:$60 sps:$4 sm:$0xff]  }
  0x16   :  { %535 = vmatpush1.bf16.msra.mxu0 %v4376_v27  ;;  %578 = vmatpush1.bf16.msra.mxu1 %v4377_v29  ;;  %v4421_v5 = vld [vmem:[%s6280_s0 + $0x110] ss:$60 sps:$4 sm:$0xff]   ;;  %v4427_v9 = vld [vmem:[%s6280_s0 + $0x98] ss:$60 sps:$4 sm:$0xff]   ;;  %v4430_v10 = vld [vmem:[%s6280_s0 + $0xa0] ss:$60 sps:$4 sm:$0xff]  }
  0x17   :  { %612 = vmatprep.subr.bf16.mxu0 %v491_v32  ;;  %655 = vmatprep.subr.bf16.mxu1 %v497_v33  ;;  %v4438_v12 = vld [vmem:[%s6280_s0 + $0x2c] ss:$60 sps:$4 sm:$0xff]   ;;  %v4441_v13 = vld [vmem:[%s6280_s0 + $0x214] ss:$60 sps:$4 sm:$0x3f]   ;;  %v4792_v21 = vmov 0.0  }
  0x18   :  { %v4433_v14 = vld [vmem:[%s6280_s0 + $0x20] ss:$60 sps:$4 sm:$0xff]   ;;  %v4436_v15 = vld [vmem:[%s6280_s0 + $0x28] ss:$60 sps:$4 sm:$0xff]   ;;  %v515_v18 = vand.u32 %v4441_v13, %v4820_v4  ;;  %v4443_v23 = vld [vmem:[%s6280_s0 + $0x198] ss:$60 sps:$4 sm:$0xff]  }
  0x19   :  { %3734 = vmatmul.mubr.msk.bf16.vlgmr.msra.gmra.mxu0 %vm467_vm2, %v4900_v34  ;;  %3735 = vmatmul.mubr.msk.bf16.vlgmr.msra.gmra.mxu1 %vm467_vm2, %v4900_v34  ;;  %v4439_v16 = vld [vmem:[%s6280_s0 + $0x210] ss:$60 sps:$4 sm:$0x3f]   ;;  %v4442_v17 = vld [vmem:[%s6280_s0 + $0x218] ss:$60 sps:$4 sm:$0x3f]  }
  0x1a   :  { %613 = vmatpush1.bf16.msra.mxu0 %v488_v35  ;;  %656 = vmatpush1.bf16.msra.mxu1 %v494_v36  ;;  %v512_v19 = vand.u32 %v4439_v16, %v4820_v4  ;;  %v518_v20 = vand.u32 %v4442_v17, %v4820_v4  ;;  %v4445_v22 = vld [vmem:[%s6280_s0 + $0x19c] ss:$60 sps:$4 sm:$0xff]   ;;  %v4449_v25 = vld [vmem:[%s6280_s0 + $0x124] ss:$60 sps:$4 sm:$0xff]   ;;  %v4453_v28 = vld [vmem:[%s6280_s0 + $0xac] ss:$60 sps:$4 sm:$0xff]  }
  0x1b   :  { %614 = vmatprep.subr.bf16.mxu0 %v4387_v37  ;;  %657 = vmatprep.subr.bf16.mxu1 %v4390_v38  ;;  %v4446_v24 = vld [vmem:[%s6280_s0 + $0x1a0] ss:$60 sps:$4 sm:$0xff]   ;;  %v4450_v27 = vld [vmem:[%s6280_s0 + $0x128] ss:$60 sps:$4 sm:$0xff]   ;;  %v4454_v30 = vld [vmem:[%s6280_s0 + $0xb0] ss:$60 sps:$4 sm:$0xff]  }
  0x1c   :  { %638 = vmatprep.mubr.bf16.mxu0 %v4790_v1  ;;  %681 = vmatprep.mubr.bf16.mxu1 %v4790_v1  ;;  %v4447_v26 = vld [vmem:[%s6280_s0 + $0x120] ss:$60 sps:$4 sm:$0xff]   ;;  %v4451_v29 = vld [vmem:[%s6280_s0 + $0xa8] ss:$60 sps:$4 sm:$0xff]   ;;  %v4457_v32 = vld [vmem:[%s6280_s0 + $0x34] ss:$60 sps:$4 sm:$0xff]  }
  0x1d   :  { %v4461_v31 = vld [vmem:[%s6280_s0 + $0x43c] ss:$60 sps:$4 sm:$0x3f]   ;;  %v4464_v33 = vld [vmem:[%s6280_s0 + $0x444] ss:$60 sps:$4 sm:$0x3f]  }
  0x1e   :  { %615 = vmatpush1.bf16.msra.mxu0 %v4385_v39  ;;  %658 = vmatpush1.bf16.msra.mxu1 %v4388_v40  ;;  %v4455_v35 = vld [vmem:[%s6280_s0 + $0x30] ss:$60 sps:$4 sm:$0xff]   ;;  %v4459_v36 = vld [vmem:[%s6280_s0 + $0x438] ss:$60 sps:$4 sm:$0x3f]   ;;  %v1312_v39 = vand.u32 %v4461_v31, %v4820_v4  ;;  %v1318_v40 = vand.u32 %v4464_v33, %v4820_v4  ;;  %vm3623_vm4 = vcmask 1040384  }
  0x1f   :  { %616 = vmatprep.subr.bf16.mxu0 %v4393_v41  ;;  %659 = vmatprep.subr.bf16.mxu1 %v4396_v42  ;;  %v4458_v37 = vld [vmem:[%s6280_s0 + $0x38] ss:$60 sps:$4 sm:$0xff]   ;;  %v4462_v38 = vld [vmem:[%s6280_s0 + $0x440] ss:$60 sps:$4 sm:$0x3f]   ;;  %v1309_v41 = vand.u32 %v4459_v36, %v4820_v4  ;;  %vm3626_vm6 = vcmask 1044484  }
  0x20   :  { %v1315_v42 = vand.u32 %v4462_v38, %v4820_v4  ;;  %v4474_v50 = vld [vmem:[%s6280_s0 + $0x350] ss:$60 sps:$4 sm:$0xff]   ;;  %v4482_v52 = vld [vmem:[%s6280_s0 + $0x2dc] ss:$60 sps:$4 sm:$0xff]   ;;  %v4488_v56 = vld [vmem:[%s6280_s0 + $0x264] ss:$60 sps:$4 sm:$0xff]  }
  0x21   :  { %v4485_v55 = vld [vmem:[%s6280_s0 + $0x25c] ss:$60 sps:$4 sm:$0xff]   ;;  %v4509_v13 = vld [vmem:[%s6280_s0 + $0x2e4] ss:$60 sps:$4 sm:$0xff]   ;;  %v4515_v17 = vld [vmem:[%s6280_s0 + $0x26c] ss:$60 sps:$4 sm:$0xff]  }
  0x22   :  { %617 = vmatpush1.bf16.msra.mxu0 %v4391_v43  ;;  %660 = vmatpush1.bf16.msra.mxu1 %v4394_v44  ;;  %v4467_v43 = vld [vmem:[%s6280_s0 + $0x3c4] ss:$60 sps:$4 sm:$0xff]   ;;  %v4470_v44 = vld [vmem:[%s6280_s0 + $0x3cc] ss:$60 sps:$4 sm:$0xff]   ;;  %v4536_v36 = vld [vmem:[%s6280_s0 + $0x374] ss:$60 sps:$4 sm:$0xff]  }
  0x23   :  { %618 = vmatprep.subr.bf16.mxu0 %v4399_v45  ;;  %661 = vmatprep.subr.bf16.mxu1 %v4402_v46  ;;  %v4465_v45 = vld [vmem:[%s6280_s0 + $0x3c0] ss:$60 sps:$4 sm:$0xff]   ;;  %v4468_v46 = vld [vmem:[%s6280_s0 + $0x3c8] ss:$60 sps:$4 sm:$0xff]   ;;  %v4534_v38 = vld [vmem:[%s6280_s0 + $0x370] ss:$60 sps:$4 sm:$0xff]  }
  0x24   :  { %v4510_v16 = vld [vmem:[%s6280_s0 + $0x2e8] ss:$60 sps:$4 sm:$0xff]   ;;  %vm3624_vm5 = vsmask.f32 256  ;;  %vm3627_vm7 = vsmask.f32 4352 }
  0x25   :  { %v4530_v31 = vld [vmem:[%s6280_s0 + $0x3ec] ss:$60 sps:$4 sm:$0xff]   ;;  %vm6110_vm8 = vmand %vm3623_vm4, %vm3624_vm5 }
  0x26   :  { %619 = vmatpush1.bf16.msra.mxu0 %v4397_v47  ;;  %662 = vmatpush1.bf16.msra.mxu1 %v4400_v48  ;;  %v4473_v47 = vld [vmem:[%s6280_s0 + $0x34c] ss:$60 sps:$4 sm:$0xff]   ;;  %v4476_v48 = vld [vmem:[%s6280_s0 + $0x354] ss:$60 sps:$4 sm:$0xff]   ;;  %vm3628_vm9 = vmand %vm3626_vm6, %vm3627_vm7 }
  0x27   :  { %620 = vmatprep.subr.bf16.mxu0 %v4405_v49  ;;  %663 = vmatprep.subr.bf16.mxu1 %v4408_v51  ;;  %v4471_v49 = vld [vmem:[%s6280_s0 + $0x348] ss:$60 sps:$4 sm:$0xff]   ;;  %v4479_v51 = vld [vmem:[%s6280_s0 + $0x2d4] ss:$60 sps:$4 sm:$0xff]   ;;  %vm6126_vm10 = vmor %vm3628_vm9, %vm6110_vm8 }
  0x28   :  { %v4528_v33 = vld [vmem:[%s6280_s0 + $0x3e8] ss:$60 sps:$4 sm:$0xff]  }
  0x2a   :  { %621 = vmatpush1.bf16.msra.mxu0 %v4403_v53  ;;  %664 = vmatpush1.bf16.msra.mxu1 %v4406_v54  ;;  %v4477_v53 = vld [vmem:[%s6280_s0 + $0x2d0] ss:$60 sps:$4 sm:$0xff]   ;;  %v4480_v54 = vld [vmem:[%s6280_s0 + $0x2d8] ss:$60 sps:$4 sm:$0xff]  }
  0x2b   :  { %698 = vmatprep.subr.bf16.mxu0 %v503_v57  ;;  %741 = vmatprep.subr.bf16.mxu1 %v509_v58  ;;  %v4491_v57 = vld [vmem:[%s6280_s0 + $0x44c] ss:$60 sps:$4 sm:$0x3f]   ;;  %v4494_v58 = vld [vmem:[%s6280_s0 + $0x454] ss:$60 sps:$4 sm:$0x3f]  }
  0x2d   :  { %3736 = vmatmul.mubr.msk.bf16.vlgmr.msra.gmra.mxu0 %vm467_vm2, %v4900_v34  ;;  %3737 = vmatmul.mubr.msk.bf16.vlgmr.msra.gmra.mxu1 %vm467_vm2, %v4900_v34 }
  0x2e   :  { %699 = vmatpush1.bf16.msra.mxu0 %v500_v59  ;;  %742 = vmatpush1.bf16.msra.mxu1 %v506_v60  ;;  %v4483_v59 = vld [vmem:[%s6280_s0 + $0x258] ss:$60 sps:$4 sm:$0xff]   ;;  %v4486_v60 = vld [vmem:[%s6280_s0 + $0x260] ss:$60 sps:$4 sm:$0xff]  }
  0x2f   :  { %700 = vmatprep.subr.bf16.mxu0 %v4417_v61  ;;  %743 = vmatprep.subr.bf16.mxu1 %v4420_v62  ;;  %v4489_v61 = vld [vmem:[%s6280_s0 + $0x448] ss:$60 sps:$4 sm:$0x3f]   ;;  %v4492_v62 = vld [vmem:[%s6280_s0 + $0x450] ss:$60 sps:$4 sm:$0x3f]  }
  0x30   :  { %724 = vmatprep.mubr.bf16.mxu0 %v4790_v1  ;;  %767 = vmatprep.mubr.bf16.mxu1 %v4790_v1 }
  0x32   :  { %701 = vmatpush1.bf16.msra.mxu0 %v4415_v63  ;;  %744 = vmatpush1.bf16.msra.mxu1 %v4418_v0  ;;  %v1324_v63 = vand.u32 %v4491_v57, %v4820_v4  ;;  %v1330_v0 = vand.u32 %v4494_v58, %v4820_v4  ;;  %v4560_v57 = vld [vmem:[%s6280_s0 + $0x380] ss:$60 sps:$4 sm:$0xff]  }
  0x33   :  { %702 = vmatprep.subr.bf16.mxu0 %v4423_v2  ;;  %745 = vmatprep.subr.bf16.mxu1 %v4426_v3  ;;  %v1321_v2 = vand.u32 %v4489_v61, %v4820_v4  ;;  %v1327_v3 = vand.u32 %v4492_v62, %v4820_v4  ;;  %v4563_v58 = vld [vmem:[%s6280_s0 + $0x304] ss:$60 sps:$4 sm:$0xff]   ;;  %v4574_v62 = vld [vmem:[%s6280_s0 + $0x69c] ss:$60 sps:$4 sm:$0x3f]  }
  0x34   :  { %v4564_v61 = vld [vmem:[%s6280_s0 + $0x308] ss:$60 sps:$4 sm:$0xff]  }
  0x36   :  { %703 = vmatpush1.bf16.msra.mxu0 %v4421_v5  ;;  %746 = vmatpush1.bf16.msra.mxu1 %v4424_v6  ;;  %v4497_v5 = vld [vmem:[%s6280_s0 + $0x3d4] ss:$60 sps:$4 sm:$0xff]   ;;  %v4500_v6 = vld [vmem:[%s6280_s0 + $0x3dc] ss:$60 sps:$4 sm:$0xff]  }
  0x37   :  { %704 = vmatprep.subr.bf16.mxu0 %v4429_v7  ;;  %747 = vmatprep.subr.bf16.mxu1 %v4432_v8  ;;  %v4495_v7 = vld [vmem:[%s6280_s0 + $0x3d0] ss:$60 sps:$4 sm:$0xff]   ;;  %v4498_v8 = vld [vmem:[%s6280_s0 + $0x3d8] ss:$60 sps:$4 sm:$0xff]  }
  0x3a   :  { %705 = vmatpush1.bf16.msra.mxu0 %v4427_v9  ;;  %748 = vmatpush1.bf16.msra.mxu1 %v4430_v10  ;;  %v4503_v9 = vld [vmem:[%s6280_s0 + $0x35c] ss:$60 sps:$4 sm:$0xff]   ;;  %v4506_v10 = vld [vmem:[%s6280_s0 + $0x364] ss:$60 sps:$4 sm:$0xff]  }
  0x3b   :  { %706 = vmatprep.subr.bf16.mxu0 %v4435_v11  ;;  %749 = vmatprep.subr.bf16.mxu1 %v4438_v12  ;;  %v4501_v11 = vld [vmem:[%s6280_s0 + $0x358] ss:$60 sps:$4 sm:$0xff]   ;;  %v4504_v12 = vld [vmem:[%s6280_s0 + $0x360] ss:$60 sps:$4 sm:$0xff]  }
  0x3e   :  { %707 = vmatpush1.bf16.msra.mxu0 %v4433_v14  ;;  %750 = vmatpush1.bf16.msra.mxu1 %v4436_v15  ;;  %v4512_v14 = vld [vmem:[%s6280_s0 + $0x2ec] ss:$60 sps:$4 sm:$0xff]   ;;  %v4507_v15 = vld [vmem:[%s6280_s0 + $0x2e0] ss:$60 sps:$4 sm:$0xff]  }
  0x3f   :  { %784 = vmatprep.subr.bf16.mxu0 %v515_v18  ;;  %4287 = vmatprep.subr.bf16.mxu1 %v4792_v21  ;;  %v4518_v18 = vld [vmem:[%s6280_s0 + $0x274] ss:$60 sps:$4 sm:$0xff]  }
  0x41   :  { %3738 = vmatmul.mubr.msk.bf16.vlgmr.msra.gmra.mxu0 %vm467_vm2, %v4900_v34  ;;  %3739 = vmatmul.mubr.msk.bf16.vlgmr.msra.gmra.mxu1 %vm467_vm2, %v4900_v34 }
  0x42   :  { %785 = vmatpush1.bf16.msra.mxu0 %v512_v19  ;;  %4288 = vmatpush3.bf16.msra.mxu1 %v518_v20  ;;  %v4521_v19 = vld [vmem:[%s6280_s0 + $0x45c] ss:$60 sps:$4 sm:$0x3f]   ;;  %v4524_v20 = vld [vmem:[%s6280_s0 + $0x464] ss:$60 sps:$4 sm:$0x3f]  }
  0x43   :  { %786 = vmatprep.subr.bf16.mxu0 %v4445_v22  ;;  %4289 = vmatprep.subr.bf16.mxu1 %v4792_v21  ;;  %v4513_v22 = vld [vmem:[%s6280_s0 + $0x268] ss:$60 sps:$4 sm:$0xff]  }
  0x44   :  { %810 = vmatprep.mubr.bf16.mxu0 %v4790_v1  ;;  %4297 = vmatprep.mubr.msk.bf16.mxu1 %vm4793_vm3, %v4792_v21 }
  0x46   :  { %787 = vmatpush1.bf16.msra.mxu0 %v4443_v23  ;;  %4290 = vmatpush3.bf16.msra.mxu1 %v4446_v24  ;;  %v4519_v23 = vld [vmem:[%s6280_s0 + $0x458] ss:$60 sps:$4 sm:$0x3f]   ;;  %v4516_v24 = vld [vmem:[%s6280_s0 + $0x270] ss:$60 sps:$4 sm:$0xff]  }
  0x47   :  { %788 = vmatprep.subr.bf16.mxu0 %v4449_v25  ;;  %4291 = vmatprep.subr.bf16.mxu1 %v4792_v21  ;;  %v4522_v25 = vld [vmem:[%s6280_s0 + $0x460] ss:$60 sps:$4 sm:$0x3f]  }
  0x4a   :  { %789 = vmatpush1.bf16.msra.mxu0 %v4447_v26  ;;  %4292 = vmatpush3.bf16.msra.mxu1 %v4450_v27  ;;  %v1336_v26 = vand.u32 %v4521_v19, %v4820_v4  ;;  %v1342_v27 = vand.u32 %v4524_v20, %v4820_v4  ;;  %v4589_v19 = vld [vmem:[%s6280_s0 + $0x52c] ss:$60 sps:$4 sm:$0xff]   ;;  %v4592_v20 = vld [vmem:[%s6280_s0 + $0x534] ss:$60 sps:$4 sm:$0xff]  }
  0x4b   :  { %790 = vmatprep.subr.bf16.mxu0 %v4453_v28  ;;  %4293 = vmatprep.subr.bf16.mxu1 %v4792_v21  ;;  %v1333_v28 = vand.u32 %v4519_v23, %v4820_v4  ;;  %v4590_v23 = vld [vmem:[%s6280_s0 + $0x530] ss:$60 sps:$4 sm:$0xff]  }
  0x4e   :  { %791 = vmatpush1.bf16.msra.mxu0 %v4451_v29  ;;  %4294 = vmatpush3.bf16.msra.mxu1 %v4454_v30  ;;  %v1339_v29 = vand.u32 %v4522_v25, %v4820_v4  ;;  %v4527_v30 = vld [vmem:[%s6280_s0 + $0x3e4] ss:$60 sps:$4 sm:$0xff]   ;;  %v4598_v25 = vld [vmem:[%s6280_s0 + $0x4bc] ss:$60 sps:$4 sm:$0xff]  }
  0x4f   :  { %792 = vmatprep.subr.bf16.mxu0 %v4457_v32  ;;  %4295 = vmatprep.subr.bf16.mxu1 %v4792_v21  ;;  %v4525_v32 = vld [vmem:[%s6280_s0 + $0x3e0] ss:$60 sps:$4 sm:$0xff]  }
  0x52   :  { %793 = vmatpush1.bf16.msra.mxu0 %v4455_v35  ;;  %4296 = vmatpush3.bf16.msra.mxu1 %v4458_v37  ;;  %v4533_v35 = vld [vmem:[%s6280_s0 + $0x36c] ss:$60 sps:$4 sm:$0xff]  }
  0x53   :  { %1359 = vmatprep.subr.bf16.mxu0 %v1312_v39  ;;  %1402 = vmatprep.subr.bf16.mxu1 %v1318_v40  ;;  %v4531_v37 = vld [vmem:[%s6280_s0 + $0x368] ss:$60 sps:$4 sm:$0xff]   ;;  %v4539_v39 = vld [vmem:[%s6280_s0 + $0x2f4] ss:$60 sps:$4 sm:$0xff]   ;;  %v4542_v40 = vld [vmem:[%s6280_s0 + $0x2fc] ss:$60 sps:$4 sm:$0xff]  }
  0x55   :  { %3740 = vmatmul.mubr.msk.bf16.vlgmr.msra.gmra.mxu0 %vm467_vm2, %v4900_v34  ;;  %4298 = vmatmul.mubr.msk.bf16.vlgmr.msra.gmra.mxu1 %vm467_vm2, %v4900_v34 }
  0x56   :  { %1360 = vmatpush1.bf16.msra.mxu0 %v1309_v41  ;;  %1403 = vmatpush1.bf16.msra.mxu1 %v1315_v42  ;;  %v4537_v41 = vld [vmem:[%s6280_s0 + $0x2f0] ss:$60 sps:$4 sm:$0xff]   ;;  %v4540_v42 = vld [vmem:[%s6280_s0 + $0x2f8] ss:$60 sps:$4 sm:$0xff]  }
  0x57   :  { %1361 = vmatprep.subr.bf16.mxu0 %v4467_v43  ;;  %1404 = vmatprep.subr.bf16.mxu1 %v4470_v44  ;;  %v4545_v43 = vld [vmem:[%s6280_s0 + $0x27c] ss:$60 sps:$4 sm:$0xff]   ;;  %v4548_v44 = vld [vmem:[%s6280_s0 + $0x284] ss:$60 sps:$4 sm:$0xff]  }
  0x58   :  { %1385 = vmatprep.mubr.bf16.mxu0 %v4790_v1  ;;  %1428 = vmatprep.mubr.bf16.mxu1 %v4790_v1 }
  0x5a   :  { %1362 = vmatpush1.bf16.msra.mxu0 %v4465_v45  ;;  %1405 = vmatpush1.bf16.msra.mxu1 %v4468_v46  ;;  %v4551_v45 = vld [vmem:[%s6280_s0 + $0x46c] ss:$60 sps:$4 sm:$0x3f]   ;;  %v4543_v46 = vld [vmem:[%s6280_s0 + $0x278] ss:$60 sps:$4 sm:$0xff]  }
  0x5b   :  { %1363 = vmatprep.subr.bf16.mxu0 %v4473_v47  ;;  %1406 = vmatprep.subr.bf16.mxu1 %v4476_v48  ;;  %v4546_v47 = vld [vmem:[%s6280_s0 + $0x280] ss:$60 sps:$4 sm:$0xff]   ;;  %v4549_v48 = vld [vmem:[%s6280_s0 + $0x468] ss:$60 sps:$4 sm:$0x3f]  }
  0x5e   :  { %1364 = vmatpush1.bf16.msra.mxu0 %v4471_v49  ;;  %1407 = vmatpush1.bf16.msra.mxu1 %v4474_v50  ;;  %v4552_v49 = vld [vmem:[%s6280_s0 + $0x470] ss:$60 sps:$4 sm:$0x3f]   ;;  %v1348_v50 = vand.u32 %v4551_v45, %v4820_v4  ;;  %v4619_v45 = vld [vmem:[%s6280_s0 + $0x53c] ss:$60 sps:$4 sm:$0xff]  }
  0x5f   :  { %1365 = vmatprep.subr.bf16.mxu0 %v4479_v51  ;;  %1408 = vmatprep.subr.bf16.mxu1 %v4482_v52  ;;  %v1345_v51 = vand.u32 %v4549_v48, %v4820_v4  ;;  %v1351_v52 = vand.u32 %v4552_v49, %v4820_v4  ;;  %v4620_v48 = vld [vmem:[%s6280_s0 + $0x540] ss:$60 sps:$4 sm:$0xff]  }
  0x60   :  { %v4625_v49 = vld [vmem:[%s6280_s0 + $0x4c4] ss:$60 sps:$4 sm:$0xff]  }
  0x62   :  { %1366 = vmatpush1.bf16.msra.mxu0 %v4477_v53  ;;  %1409 = vmatpush1.bf16.msra.mxu1 %v4480_v54  ;;  %v4555_v53 = vld [vmem:[%s6280_s0 + $0x3f4] ss:$60 sps:$4 sm:$0xff]  }
  0x63   :  { %1367 = vmatprep.subr.bf16.mxu0 %v4485_v55  ;;  %1410 = vmatprep.subr.bf16.mxu1 %v4488_v56  ;;  %v4553_v54 = vld [vmem:[%s6280_s0 + $0x3f0] ss:$60 sps:$4 sm:$0xff]   ;;  %v4556_v55 = vld [vmem:[%s6280_s0 + $0x3f8] ss:$60 sps:$4 sm:$0xff]  }
  0x64   :  { %v4559_v56 = vld [vmem:[%s6280_s0 + $0x37c] ss:$60 sps:$4 sm:$0xff]  }
  0x66   :  { %1368 = vmatpush1.bf16.msra.mxu0 %v4483_v59  ;;  %1411 = vmatpush1.bf16.msra.mxu1 %v4486_v60  ;;  %v4561_v59 = vld [vmem:[%s6280_s0 + $0x300] ss:$60 sps:$4 sm:$0xff]   ;;  %v4571_v60 = vld [vmem:[%s6280_s0 + $0x694] ss:$60 sps:$4 sm:$0x3f]  }
  0x67   :  { %1445 = vmatprep.subr.bf16.mxu0 %v1324_v63  ;;  %1488 = vmatprep.subr.bf16.mxu1 %v1330_v0  ;;  %v4567_v63 = vld [vmem:[%s6280_s0 + $0x28c] ss:$60 sps:$4 sm:$0xff]  }
  0x68   :  { %v4565_v0 = vld [vmem:[%s6280_s0 + $0x288] ss:$60 sps:$4 sm:$0xff]  }
  0x69   :  { %3897 = vmatmul.mubr.msk.bf16.vlgmr.msra.gmra.mxu0 %vm467_vm2, %v4900_v34  ;;  %3898 = vmatmul.mubr.msk.bf16.vlgmr.msra.gmra.mxu1 %vm467_vm2, %v4900_v34 }
  0x6a   :  { %1446 = vmatpush1.bf16.msra.mxu0 %v1321_v2  ;;  %1489 = vmatpush1.bf16.msra.mxu1 %v1327_v3  ;;  %v4569_v2 = vld [vmem:[%s6280_s0 + $0x690] ss:$60 sps:$4 sm:$0x3f]  }
  0x6b   :  { %1447 = vmatprep.subr.bf16.mxu0 %v4497_v5  ;;  %1490 = vmatprep.subr.bf16.mxu1 %v4500_v6  ;;  %v4568_v3 = vld [vmem:[%s6280_s0 + $0x290] ss:$60 sps:$4 sm:$0xff]   ;;  %v4572_v5 = vld [vmem:[%s6280_s0 + $0x698] ss:$60 sps:$4 sm:$0x3f]   ;;  %v2175_v6 = vand.u32 %v4571_v60, %v4820_v4 }
  0x6c   :  { %1471 = vmatprep.mubr.bf16.mxu0 %v4790_v1  ;;  %1514 = vmatprep.mubr.bf16.mxu1 %v4790_v1  ;;  %v4637_v60 = vld [vmem:[%s6280_s0 + $0x63c] ss:$60 sps:$4 sm:$0xff]  }
  0x6e   :  { %1448 = vmatpush1.bf16.msra.mxu0 %v4495_v7  ;;  %1491 = vmatpush1.bf16.msra.mxu1 %v4498_v8  ;;  %v2181_v7 = vand.u32 %v4574_v62, %v4820_v4  ;;  %v2172_v8 = vand.u32 %v4569_v2, %v4820_v4  ;;  %v4635_v62 = vld [vmem:[%s6280_s0 + $0x638] ss:$60 sps:$4 sm:$0xff]   ;;  %v4646_v2 = vld [vmem:[%s6280_s0 + $0x5cc] ss:$60 sps:$4 sm:$0xff]  }
  0x6f   :  { %1449 = vmatprep.subr.bf16.mxu0 %v4503_v9  ;;  %1492 = vmatprep.subr.bf16.mxu1 %v4506_v10  ;;  %v2178_v9 = vand.u32 %v4572_v5, %v4820_v4  ;;  %v4577_v10 = vld [vmem:[%s6280_s0 + $0x61c] ss:$60 sps:$4 sm:$0xff]   ;;  %v4644_v5 = vld [vmem:[%s6280_s0 + $0x5c8] ss:$60 sps:$4 sm:$0xff]  }
  0x72   :  { %1450 = vmatpush1.bf16.msra.mxu0 %v4501_v11  ;;  %1493 = vmatpush1.bf16.msra.mxu1 %v4504_v12  ;;  %v4580_v11 = vld [vmem:[%s6280_s0 + $0x624] ss:$60 sps:$4 sm:$0xff]  }
  0x73   :  { %1451 = vmatprep.subr.bf16.mxu0 %v4509_v13  ;;  %1494 = vmatprep.subr.bf16.mxu1 %v4512_v14  ;;  %v5383_v12 = vld [vmem:[%s6281_s1] sm:$0x1f]   ;;  %v4575_v13 = vld [vmem:[%s6280_s0 + $0x618] ss:$60 sps:$4 sm:$0xff]  }
  0x74   :  { %v4578_v14 = vld [vmem:[%s6280_s0 + $0x620] ss:$60 sps:$4 sm:$0xff]  }
  0x76   :  { %1452 = vmatpush1.bf16.msra.mxu0 %v4507_v15  ;;  %1495 = vmatpush1.bf16.msra.mxu1 %v4510_v16  ;;  %v4583_v15 = vld [vmem:[%s6280_s0 + $0x5a4] ss:$60 sps:$4 sm:$0xff]   ;;  %v4586_v16 = vld [vmem:[%s6280_s0 + $0x5ac] ss:$60 sps:$4 sm:$0xff]  }
  0x77   :  { %1453 = vmatprep.subr.bf16.mxu0 %v4515_v17  ;;  %1496 = vmatprep.subr.bf16.mxu1 %v4518_v18  ;;  %v4581_v17 = vld [vmem:[%s6280_s0 + $0x5a0] ss:$60 sps:$4 sm:$0xff]   ;;  %v4584_v18 = vld [vmem:[%s6280_s0 + $0x5a8] ss:$60 sps:$4 sm:$0xff]  }
  0x7a   :  { %1454 = vmatpush1.bf16.msra.mxu0 %v4513_v22  ;;  %1497 = vmatpush1.bf16.msra.mxu1 %v4516_v24  ;;  %v4587_v22 = vld [vmem:[%s6280_s0 + $0x528] ss:$60 sps:$4 sm:$0xff]   ;;  %v4595_v24 = vld [vmem:[%s6280_s0 + $0x4b4] ss:$60 sps:$4 sm:$0xff]  }
  0x7b   :  { %1531 = vmatprep.subr.bf16.mxu0 %v1336_v26  ;;  %1574 = vmatprep.subr.bf16.mxu1 %v1342_v27  ;;  %v4601_v26 = vld [vmem:[%s6280_s0 + $0x6a4] ss:$60 sps:$4 sm:$0x3f]   ;;  %v4604_v27 = vld [vmem:[%s6280_s0 + $0x6ac] ss:$60 sps:$4 sm:$0x3f]  }
  0x7d   :  { %3899 = vmatmul.mubr.msk.bf16.vlgmr.msra.gmra.mxu0 %vm467_vm2, %v4900_v34  ;;  %3900 = vmatmul.mubr.msk.bf16.vlgmr.msra.gmra.mxu1 %vm467_vm2, %v4900_v34 }
  0x7e   :  { %1532 = vmatpush1.bf16.msra.mxu0 %v1333_v28  ;;  %1575 = vmatpush1.bf16.msra.mxu1 %v1339_v29  ;;  %v4593_v28 = vld [vmem:[%s6280_s0 + $0x4b0] ss:$60 sps:$4 sm:$0xff]   ;;  %v4599_v29 = vld [vmem:[%s6280_s0 + $0x6a0] ss:$60 sps:$4 sm:$0x3f]  }
  0x7f   :  { %1533 = vmatprep.subr.bf16.mxu0 %v4527_v30  ;;  %1576 = vmatprep.subr.bf16.mxu1 %v4530_v31  ;;  %v4596_v30 = vld [vmem:[%s6280_s0 + $0x4b8] ss:$60 sps:$4 sm:$0xff]   ;;  %v4602_v31 = vld [vmem:[%s6280_s0 + $0x6a8] ss:$60 sps:$4 sm:$0x3f]  }
  0x80   :  { %1557 = vmatprep.mubr.bf16.mxu0 %v4790_v1  ;;  %1600 = vmatprep.mubr.bf16.mxu1 %v4790_v1 }
  0x82   :  { %1534 = vmatpush1.bf16.msra.mxu0 %v4525_v32  ;;  %1577 = vmatpush1.bf16.msra.mxu1 %v4528_v33  ;;  %v2187_v32 = vand.u32 %v4601_v26, %v4820_v4  ;;  %v2193_v33 = vand.u32 %v4604_v27, %v4820_v4  ;;  %v4666_v26 = vld [vmem:[%s6280_s0 + $0x650] ss:$60 sps:$4 sm:$0xff]  }
  0x83   :  { %1535 = vmatprep.subr.bf16.mxu0 %v4533_v35  ;;  %1578 = vmatprep.subr.bf16.mxu1 %v4536_v36  ;;  %v2184_v35 = vand.u32 %v4599_v29, %v4820_v4  ;;  %v2190_v36 = vand.u32 %v4602_v31, %v4820_v4  ;;  %v4669_v27 = vld [vmem:[%s6280_s0 + $0x5d4] ss:$60 sps:$4 sm:$0xff]  }
  0x84   :  { %v4670_v29 = vld [vmem:[%s6280_s0 + $0x5d8] ss:$60 sps:$4 sm:$0xff]  }
  0x85   :  { %v4671_v31 = vld [vmem:[%s6280_s0 + $0x558] ss:$60 sps:$4 sm:$0xff]  }
  0x86   :  { %1536 = vmatpush1.bf16.msra.mxu0 %v4531_v37  ;;  %1579 = vmatpush1.bf16.msra.mxu1 %v4534_v38  ;;  %v4607_v37 = vld [vmem:[%s6280_s0 + $0x62c] ss:$60 sps:$4 sm:$0xff]   ;;  %v4610_v38 = vld [vmem:[%s6280_s0 + $0x634] ss:$60 sps:$4 sm:$0xff]  }
  0x87   :  { %1537 = vmatprep.subr.bf16.mxu0 %v4539_v39  ;;  %1580 = vmatprep.subr.bf16.mxu1 %v4542_v40  ;;  %v4605_v39 = vld [vmem:[%s6280_s0 + $0x628] ss:$60 sps:$4 sm:$0xff]   ;;  %v4608_v40 = vld [vmem:[%s6280_s0 + $0x630] ss:$60 sps:$4 sm:$0xff]  }
  0x8a   :  { %1538 = vmatpush1.bf16.msra.mxu0 %v4537_v41  ;;  %1581 = vmatpush1.bf16.msra.mxu1 %v4540_v42  ;;  %v4613_v41 = vld [vmem:[%s6280_s0 + $0x5b4] ss:$60 sps:$4 sm:$0xff]   ;;  %v4616_v42 = vld [vmem:[%s6280_s0 + $0x5bc] ss:$60 sps:$4 sm:$0xff]  }
  0x8b   :  { %1539 = vmatprep.subr.bf16.mxu0 %v4545_v43  ;;  %1582 = vmatprep.subr.bf16.mxu1 %v4548_v44  ;;  %v4611_v43 = vld [vmem:[%s6280_s0 + $0x5b0] ss:$60 sps:$4 sm:$0xff]   ;;  %v4614_v44 = vld [vmem:[%s6280_s0 + $0x5b8] ss:$60 sps:$4 sm:$0xff]  }
  0x8e   :  { %1540 = vmatpush1.bf16.msra.mxu0 %v4543_v46  ;;  %1583 = vmatpush1.bf16.msra.mxu1 %v4546_v47  ;;  %v4622_v46 = vld [vmem:[%s6280_s0 + $0x544] ss:$60 sps:$4 sm:$0xff]   ;;  %v4617_v47 = vld [vmem:[%s6280_s0 + $0x538] ss:$60 sps:$4 sm:$0xff]  }
  0x8f   :  { %1617 = vmatprep.subr.bf16.mxu0 %v1348_v50  ;;  %4301 = vmatprep.subr.bf16.mxu1 %v4792_v21  ;;  %v4628_v50 = vld [vmem:[%s6280_s0 + $0x4cc] ss:$60 sps:$4 sm:$0xff]  }
  0x91   :  { %3901 = vmatmul.mubr.msk.bf16.vlgmr.msra.gmra.mxu0 %vm467_vm2, %v4900_v34  ;;  %3902 = vmatmul.mubr.msk.bf16.vlgmr.msra.gmra.mxu1 %vm467_vm2, %v4900_v34  ;;  %v4557_v34 = vld [vmem:[%s6280_s0 + $0x378] ss:$60 sps:$4 sm:$0xff]  }
  0x92   :  { %1618 = vmatpush1.bf16.msra.mxu0 %v1345_v51  ;;  %4302 = vmatpush3.bf16.msra.mxu1 %v1351_v52  ;;  %v4631_v51 = vld [vmem:[%s6280_s0 + $0x6b4] ss:$60 sps:$4 sm:$0x3f]   ;;  %v4634_v52 = vld [vmem:[%s6280_s0 + $0x6bc] ss:$60 sps:$4 sm:$0x3f]  }
  0x93   :  { %1619 = vmatprep.subr.bf16.mxu0 %v4555_v53  ;;  %4303 = vmatprep.subr.bf16.mxu1 %v4792_v21  ;;  %v4623_v53 = vld [vmem:[%s6280_s0 + $0x4c0] ss:$60 sps:$4 sm:$0xff]  }
  0x94   :  { %1643 = vmatprep.mubr.bf16.mxu0 %v4790_v1  ;;  %4311 = vmatprep.mubr.msk.bf16.mxu1 %vm4793_vm3, %v4792_v21 }
  0x96   :  { %1620 = vmatpush1.bf16.msra.mxu0 %v4553_v54  ;;  %4304 = vmatpush3.bf16.msra.mxu1 %v4556_v55  ;;  %v4626_v54 = vld [vmem:[%s6280_s0 + $0x4c8] ss:$60 sps:$4 sm:$0xff]   ;;  %v4629_v55 = vld [vmem:[%s6280_s0 + $0x6b0] ss:$60 sps:$4 sm:$0x3f]  }
  0x97   :  { %1621 = vmatprep.subr.bf16.mxu0 %v4559_v56  ;;  %4305 = vmatprep.subr.bf16.mxu1 %v4792_v21  ;;  %v4632_v56 = vld [vmem:[%s6280_s0 + $0x6b8] ss:$60 sps:$4 sm:$0x3f]  }
  0x9a   :  { %1622 = vmatpush1.bf16.msra.mxu0 %v4557_v34  ;;  %4306 = vmatpush3.bf16.msra.mxu1 %v4560_v57  ;;  %v2199_v34 = vand.u32 %v4631_v51, %v4820_v4  ;;  %v2205_v57 = vand.u32 %v4634_v52, %v4820_v4  ;;  %v4688_v51 = vld [vmem:[%s6280_s0 + $0x878] ss:$60 sps:$4 sm:$0xff]  }
  0x9b   :  { %1623 = vmatprep.subr.bf16.mxu0 %v4563_v58  ;;  %4307 = vmatprep.subr.bf16.mxu1 %v4792_v21  ;;  %v2196_v58 = vand.u32 %v4629_v55, %v4820_v4 }
  0x9e   :  { %1624 = vmatpush1.bf16.msra.mxu0 %v4561_v59  ;;  %4308 = vmatpush3.bf16.msra.mxu1 %v4564_v61  ;;  %v2202_v59 = vand.u32 %v4632_v56, %v4820_v4  ;;  %v4640_v61 = vld [vmem:[%s6280_s0 + $0x644] ss:$60 sps:$4 sm:$0xff]   ;;  %v4691_v56 = vld [vmem:[%s6280_s0 + $0x7f8] ss:$60 sps:$4 sm:$0xff]  }
  0x9f   :  { %1625 = vmatprep.subr.bf16.mxu0 %v4567_v63  ;;  %4309 = vmatprep.subr.bf16.mxu1 %v4792_v21  ;;  %v4638_v63 = vld [vmem:[%s6280_s0 + $0x640] ss:$60 sps:$4 sm:$0xff]  }
  0xa2   :  { %1626 = vmatpush1.bf16.msra.mxu0 %v4565_v0  ;;  %4310 = vmatpush3.bf16.msra.mxu1 %v4568_v3  ;;  %v4643_v0 = vld [vmem:[%s6280_s0 + $0x5c4] ss:$60 sps:$4 sm:$0xff]  }
  0xa3   :  { %2222 = vmatprep.subr.bf16.mxu0 %v2175_v6  ;;  %2265 = vmatprep.subr.bf16.mxu1 %v2181_v7  ;;  %v4641_v3 = vld [vmem:[%s6280_s0 + $0x5c0] ss:$60 sps:$4 sm:$0xff]   ;;  %v4649_v6 = vld [vmem:[%s6280_s0 + $0x54c] ss:$60 sps:$4 sm:$0xff]   ;;  %v4652_v7 = vld [vmem:[%s6280_s0 + $0x554] ss:$60 sps:$4 sm:$0xff]  }
  0xa5   :  { %3903 = vmatmul.mubr.msk.bf16.vlgmr.msra.gmra.mxu0 %vm467_vm2, %v5383_v12  ;;  %4312 = vmatmul.mubr.msk.bf16.vlgmr.msra.gmra.mxu1 %vm467_vm2, %v5383_v12 }
  0xa6   :  { %2223 = vmatpush1.bf16.msra.mxu0 %v2172_v8  ;;  %2266 = vmatpush1.bf16.msra.mxu1 %v2178_v9  ;;  %v3452_v8 = vld [vmem:[%s6282_s2 + $0x8] sm:$0x1]  ;;  %v3451_v9 = vld [vmem:[%s6282_s2] sm:$0xff] }
  0xa7   :  { %2224 = vmatprep.subr.bf16.mxu0 %v4577_v10  ;;  %2267 = vmatprep.subr.bf16.mxu1 %v4580_v11  ;;  %v4647_v10 = vld [vmem:[%s6280_s0 + $0x548] ss:$60 sps:$4 sm:$0xff]   ;;  %v4650_v11 = vld [vmem:[%s6280_s0 + $0x550] ss:$60 sps:$4 sm:$0xff]  }
  0xa8   :  { %2248 = vmatprep.mubr.bf16.mxu0 %v4790_v1  ;;  %2291 = vmatprep.mubr.bf16.mxu1 %v4790_v1 }
  0xa9   :  { %3460 = vperm.xlu0 %4347, %v3452_v8   ;;  %v4712_v8 = vld [vmem:[%s6280_s0 + $0x900] ss:$60 sps:$4 sm:$0x3f]  }
  0xaa   :  { %2225 = vmatpush1.bf16.msra.mxu0 %v4575_v13  ;;  %2268 = vmatpush1.bf16.msra.mxu1 %v4578_v14  ;;  %v4655_v13 = vld [vmem:[%s6280_s0 + $0x4d4] ss:$60 sps:$4 sm:$0xff]   ;;  %v4658_v14 = vld [vmem:[%s6280_s0 + $0x4dc] ss:$60 sps:$4 sm:$0xff]  }
  0xab   :  { %2226 = vmatprep.subr.bf16.mxu0 %v4583_v15  ;;  %2269 = vmatprep.subr.bf16.mxu1 %v4586_v16  ;;  %v4661_v15 = vld [vmem:[%s6280_s0 + $0x6c4] ss:$60 sps:$4 sm:$0x3f]   ;;  %v4653_v16 = vld [vmem:[%s6280_s0 + $0x4d0] ss:$60 sps:$4 sm:$0xff]  }
  0xad   :  { %3455 = vperm.xlu0 %4347, %v3451_v9  }
  0xae   :  { %2227 = vmatpush1.bf16.msra.mxu0 %v4581_v17  ;;  %2270 = vmatpush1.bf16.msra.mxu1 %v4584_v18  ;;  %v4656_v17 = vld [vmem:[%s6280_s0 + $0x4d8] ss:$60 sps:$4 sm:$0xff]   ;;  %v4659_v18 = vld [vmem:[%s6280_s0 + $0x6c0] ss:$60 sps:$4 sm:$0x3f]  }
  0xaf   :  { %2228 = vmatprep.subr.bf16.mxu0 %v4589_v19  ;;  %2271 = vmatprep.subr.bf16.mxu1 %v4592_v20  ;;  %v4662_v19 = vld [vmem:[%s6280_s0 + $0x6c8] ss:$60 sps:$4 sm:$0x3f]   ;;  %v2211_v20 = vand.u32 %v4661_v15, %v4820_v4 }
  0xb2   :  { %2229 = vmatpush1.bf16.msra.mxu0 %v4587_v22  ;;  %2272 = vmatpush1.bf16.msra.mxu1 %v4590_v23  ;;  %v2208_v22 = vand.u32 %v4659_v18, %v4820_v4  ;;  %v2214_v23 = vand.u32 %v4662_v19, %v4820_v4  ;;  %v4715_v18 = vld [vmem:[%s6280_s0 + $0x880] ss:$60 sps:$4 sm:$0xff]   ;;  %v4718_v19 = vld [vmem:[%s6280_s0 + $0x888] ss:$60 sps:$4 sm:$0xff]  }
  0xb3   :  { %2230 = vmatprep.subr.bf16.mxu0 %v4595_v24  ;;  %2273 = vmatprep.subr.bf16.mxu1 %v4598_v25  ;;  %v4665_v24 = vld [vmem:[%s6280_s0 + $0x64c] ss:$60 sps:$4 sm:$0xff]  }
  0xb4   :  { %v4663_v25 = vld [vmem:[%s6280_s0 + $0x648] ss:$60 sps:$4 sm:$0xff]  }
  0xb6   :  { %2231 = vmatpush1.bf16.msra.mxu0 %v4593_v28  ;;  %2274 = vmatpush1.bf16.msra.mxu1 %v4596_v30  ;;  %v4667_v28 = vld [vmem:[%s6280_s0 + $0x5d0] ss:$60 sps:$4 sm:$0xff]   ;;  %v4673_v30 = vld [vmem:[%s6280_s0 + $0x55c] ss:$60 sps:$4 sm:$0xff]  }
  0xb7   :  { %2308 = vmatprep.subr.bf16.mxu0 %v2187_v32  ;;  %2351 = vmatprep.subr.bf16.mxu1 %v2193_v33  ;;  %v4674_v32 = vld [vmem:[%s6280_s0 + $0x560] ss:$60 sps:$4 sm:$0xff]  }
  0xb8   :  { %v4677_v33 = vld [vmem:[%s6280_s0 + $0x4e4] ss:$60 sps:$4 sm:$0xff]  }
  0xb9   :  { %4060 = vmatmul.mubr.msk.bf16.vlgmr.msra.gmra.mxu0 %vm467_vm2, %v5383_v12  ;;  %4061 = vmatmul.mubr.msk.bf16.vlgmr.msra.gmra.mxu1 %vm467_vm2, %v5383_v12 }
  0xba   :  { %2309 = vmatpush1.bf16.msra.mxu0 %v2184_v35  ;;  %2352 = vmatpush1.bf16.msra.mxu1 %v2190_v36  ;;  %v4681_v36 = vld [vmem:[%s6280_s0 + $0x8ec] ss:$60 sps:$4 sm:$0x3f]  }
  0xbb   :  { %2310 = vmatprep.subr.bf16.mxu0 %v4607_v37  ;;  %2353 = vmatprep.subr.bf16.mxu1 %v4610_v38  ;;  %v4684_v37 = vld [vmem:[%s6280_s0 + $0x8f4] ss:$60 sps:$4 sm:$0x3f]   ;;  %v4675_v38 = vld [vmem:[%s6280_s0 + $0x4e0] ss:$60 sps:$4 sm:$0xff]  }
  0xbc   :  { %2334 = vmatprep.mubr.bf16.mxu0 %v4790_v1  ;;  %2377 = vmatprep.mubr.bf16.mxu1 %v4790_v1 }
  0xbe   :  { %2311 = vmatpush1.bf16.msra.mxu0 %v4605_v39  ;;  %2354 = vmatpush1.bf16.msra.mxu1 %v4608_v40  ;;  %v4678_v39 = vld [vmem:[%s6280_s0 + $0x4e8] ss:$60 sps:$4 sm:$0xff]  }
  0xbf   :  { %2312 = vmatprep.subr.bf16.mxu0 %v4613_v41  ;;  %2355 = vmatprep.subr.bf16.mxu1 %v4616_v42  ;;  %v4679_v40 = vld [vmem:[%s6280_s0 + $0x8e8] ss:$60 sps:$4 sm:$0x3f]   ;;  %v4682_v41 = vld [vmem:[%s6280_s0 + $0x8f0] ss:$60 sps:$4 sm:$0x3f]  }
  0xc2   :  { %2313 = vmatpush1.bf16.msra.mxu0 %v4611_v43  ;;  %2356 = vmatpush1.bf16.msra.mxu1 %v4614_v44  ;;  %v3038_v43 = vand.u32 %v4681_v36, %v4820_v4  ;;  %v3044_v44 = vand.u32 %v4684_v37, %v4820_v4  ;;  %v4741_v36 = vld [vmem:[%s6280_s0 + $0x90c] ss:$60 sps:$4 sm:$0x3f]   ;;  %v4744_v37 = vld [vmem:[%s6280_s0 + $0x914] ss:$60 sps:$4 sm:$0x3f]  }
  0xc3   :  { %2314 = vmatprep.subr.bf16.mxu0 %v4619_v45  ;;  %2357 = vmatprep.subr.bf16.mxu1 %v4622_v46  ;;  %v3035_v45 = vand.u32 %v4679_v40, %v4820_v4  ;;  %v3041_v46 = vand.u32 %v4682_v41, %v4820_v4  ;;  %v4736_v40 = vld [vmem:[%s6280_s0 + $0x720] ss:$60 sps:$4 sm:$0xff]   ;;  %v4739_v41 = vld [vmem:[%s6280_s0 + $0x908] ss:$60 sps:$4 sm:$0x3f]  }
  0xc6   :  { %2315 = vmatpush1.bf16.msra.mxu0 %v4617_v47  ;;  %2358 = vmatpush1.bf16.msra.mxu1 %v4620_v48  ;;  %v4687_v48 = vld [vmem:[%s6280_s0 + $0x874] ss:$60 sps:$4 sm:$0xff]  }
  0xc7   :  { %2316 = vmatprep.subr.bf16.mxu0 %v4625_v49  ;;  %2359 = vmatprep.subr.bf16.mxu1 %v4628_v50  ;;  %v4690_v49 = vld [vmem:[%s6280_s0 + $0x87c] ss:$60 sps:$4 sm:$0xff]   ;;  %v4685_v50 = vld [vmem:[%s6280_s0 + $0x870] ss:$60 sps:$4 sm:$0xff]  }
  0xca   :  { %2317 = vmatpush1.bf16.msra.mxu0 %v4623_v53  ;;  %2360 = vmatpush1.bf16.msra.mxu1 %v4626_v54  ;;  %v4693_v53 = vld [vmem:[%s6280_s0 + $0x7fc] ss:$60 sps:$4 sm:$0xff]   ;;  %v4696_v54 = vld [vmem:[%s6280_s0 + $0x804] ss:$60 sps:$4 sm:$0xff]  }
  0xcb   :  { %2394 = vmatprep.subr.bf16.mxu0 %v2199_v34  ;;  %2437 = vmatprep.subr.bf16.mxu1 %v2205_v57  ;;  %v4694_v34 = vld [vmem:[%s6280_s0 + $0x800] ss:$60 sps:$4 sm:$0xff]  }
  0xcc   :  { %v4699_v57 = vld [vmem:[%s6280_s0 + $0x784] ss:$60 sps:$4 sm:$0xff]  }
  0xcd   :  { %4062 = vmatmul.mubr.msk.bf16.vlgmr.msra.gmra.mxu0 %vm467_vm2, %v5383_v12  ;;  %4063 = vmatmul.mubr.msk.bf16.vlgmr.msra.gmra.mxu1 %vm467_vm2, %v5383_v12 }
  0xce   :  { %2395 = vmatpush1.bf16.msra.mxu0 %v2196_v58  ;;  %2438 = vmatpush1.bf16.msra.mxu1 %v2202_v59  ;;  %v4702_v58 = vld [vmem:[%s6280_s0 + $0x78c] ss:$60 sps:$4 sm:$0xff]  }
  0xcf   :  { %2396 = vmatprep.subr.bf16.mxu0 %v4637_v60  ;;  %2439 = vmatprep.subr.bf16.mxu1 %v4640_v61  ;;  %v4697_v60 = vld [vmem:[%s6280_s0 + $0x780] ss:$60 sps:$4 sm:$0xff]   ;;  %v4700_v61 = vld [vmem:[%s6280_s0 + $0x788] ss:$60 sps:$4 sm:$0xff]  }
  0xd0   :  { %2420 = vmatprep.mubr.bf16.mxu0 %v4790_v1  ;;  %2463 = vmatprep.mubr.bf16.mxu1 %v4790_v1 }
  0xd2   :  { %2397 = vmatpush1.bf16.msra.mxu0 %v4635_v62  ;;  %2440 = vmatpush1.bf16.msra.mxu1 %v4638_v63  ;;  %v4705_v62 = vld [vmem:[%s6280_s0 + $0x70c] ss:$60 sps:$4 sm:$0xff]   ;;  %v4708_v63 = vld [vmem:[%s6280_s0 + $0x714] ss:$60 sps:$4 sm:$0xff]  }
  0xd3   :  { %2398 = vmatprep.subr.bf16.mxu0 %v4643_v0  ;;  %2441 = vmatprep.subr.bf16.mxu1 %v4646_v2  ;;  %v4711_v0 = vld [vmem:[%s6280_s0 + $0x8fc] ss:$60 sps:$4 sm:$0x3f]   ;;  %v4714_v2 = vld [vmem:[%s6280_s0 + $0x904] ss:$60 sps:$4 sm:$0x3f]  }
  0xd4   :  { %v3050_v9 = vand.u32 %v4711_v0, %v4820_v4 }
  0xd6   :  { %2399 = vmatpush1.bf16.msra.mxu0 %v4641_v3  ;;  %2442 = vmatpush1.bf16.msra.mxu1 %v4644_v5  ;;  %v4703_v5 = vld [vmem:[%s6280_s0 + $0x708] ss:$60 sps:$4 sm:$0xff]  }
  0xd7   :  { %2400 = vmatprep.subr.bf16.mxu0 %v4649_v6  ;;  %2443 = vmatprep.subr.bf16.mxu1 %v4652_v7  ;;  %v4706_v6 = vld [vmem:[%s6280_s0 + $0x710] ss:$60 sps:$4 sm:$0xff]   ;;  %v4709_v7 = vld [vmem:[%s6280_s0 + $0x8f8] ss:$60 sps:$4 sm:$0x3f]  }
  0xd9   :  { %v5631_v35 = vpop.f32.mrf.mxu1 }
  0xda   :  { %2401 = vmatpush1.bf16.msra.mxu0 %v4647_v10  ;;  %2444 = vmatpush1.bf16.msra.mxu1 %v4650_v11  ;;  %v3056_v10 = vand.u32 %v4714_v2, %v4820_v4  ;;  %v4759_v2 = vld [vmem:[%s6280_s0 + $0x7a4] ss:$60 sps:$4 sm:$0xff]  }
  0xdb   :  { %2402 = vmatprep.subr.bf16.mxu0 %v4655_v13  ;;  %2445 = vmatprep.subr.bf16.mxu1 %v4658_v14  ;;  %v5652_v42 = vpop.f32.mrf.mxu1  ;;  %v3047_v13 = vand.u32 %v4709_v7, %v4820_v4  ;;  %v3053_v14 = vand.u32 %v4712_v8, %v4820_v4  ;;  %v4760_v7 = vld [vmem:[%s6280_s0 + $0x7a8] ss:$60 sps:$4 sm:$0xff]  }
  0xdc   :  { %v4765_v8 = vld [vmem:[%s6280_s0 + $0x72c] ss:$60 sps:$4 sm:$0xff]  }
  0xdd   :  { %v5659_v47 = vpop.f32.mrf.mxu1 }
  0xde   :  { %2403 = vmatpush1.bf16.msra.mxu0 %v4653_v16  ;;  %2446 = vmatpush1.bf16.msra.mxu1 %v4656_v17  ;;  %v4717_v16 = vld [vmem:[%s6280_s0 + $0x884] ss:$60 sps:$4 sm:$0xff]   ;;  %v4720_v17 = vld [vmem:[%s6280_s0 + $0x88c] ss:$60 sps:$4 sm:$0xff]  }
  0xdf   :  { %2480 = vmatprep.subr.bf16.mxu0 %v2211_v20  ;;  %4315 = vmatprep.subr.bf16.mxu1 %v4792_v21  ;;  %v5677_v52 = vpop.f32.mrf.mxu1 }
  0xe1   :  { %4064 = vmatmul.mubr.msk.bf16.vlgmr.msra.gmra.mxu0 %vm467_vm2, %v5383_v12  ;;  %4065 = vmatmul.mubr.msk.bf16.vlgmr.msra.gmra.mxu1 %vm467_vm2, %v5383_v12 }
  0xe2   :  { %2481 = vmatpush1.bf16.msra.mxu0 %v2208_v22  ;;  %4316 = vmatpush3.bf16.msra.mxu1 %v2214_v23  ;;  %v4723_v22 = vld [vmem:[%s6280_s0 + $0x80c] ss:$60 sps:$4 sm:$0xff]   ;;  %v4726_v23 = vld [vmem:[%s6280_s0 + $0x814] ss:$60 sps:$4 sm:$0xff]  }
  0xe3   :  { %2482 = vmatprep.subr.bf16.mxu0 %v4665_v24  ;;  %4317 = vmatprep.subr.bf16.mxu1 %v4792_v21  ;;  %v4721_v24 = vld [vmem:[%s6280_s0 + $0x808] ss:$60 sps:$4 sm:$0xff]  }
  0xe4   :  { %2506 = vmatprep.mubr.bf16.mxu0 %v4790_v1  ;;  %4325 = vmatprep.mubr.msk.bf16.mxu1 %vm4793_vm3, %v4792_v21 }
  0xe6   :  { %2483 = vmatpush1.bf16.msra.mxu0 %v4663_v25  ;;  %4318 = vmatpush3.bf16.msra.mxu1 %v4666_v26  ;;  %v4724_v25 = vld [vmem:[%s6280_s0 + $0x810] ss:$60 sps:$4 sm:$0xff]  }
  0xe7   :  { %2484 = vmatprep.subr.bf16.mxu0 %v4669_v27  ;;  %4319 = vmatprep.subr.bf16.mxu1 %v4792_v21  ;;  %v4729_v27 = vld [vmem:[%s6280_s0 + $0x794] ss:$60 sps:$4 sm:$0xff]  }
  0xea   :  { %2485 = vmatpush1.bf16.msra.mxu0 %v4667_v28  ;;  %4320 = vmatpush3.bf16.msra.mxu1 %v4670_v29  ;;  %v4732_v28 = vld [vmem:[%s6280_s0 + $0x79c] ss:$60 sps:$4 sm:$0xff]   ;;  %v4727_v29 = vld [vmem:[%s6280_s0 + $0x790] ss:$60 sps:$4 sm:$0xff]  }
  0xeb   :  { %2486 = vmatprep.subr.bf16.mxu0 %v4673_v30  ;;  %4321 = vmatprep.subr.bf16.mxu1 %v4792_v21  ;;  %v4730_v30 = vld [vmem:[%s6280_s0 + $0x798] ss:$60 sps:$4 sm:$0xff]  }
  0xed   :  { %v5687_v55 = vpop.f32.mrf.mxu1 }
  0xee   :  { %2487 = vmatpush1.bf16.msra.mxu0 %v4671_v31  ;;  %4322 = vmatpush3.bf16.msra.mxu1 %v4674_v32  ;;  %v4735_v31 = vld [vmem:[%s6280_s0 + $0x71c] ss:$60 sps:$4 sm:$0xff]   ;;  %v4738_v32 = vld [vmem:[%s6280_s0 + $0x724] ss:$60 sps:$4 sm:$0xff]  }
  0xef   :  { %2488 = vmatprep.subr.bf16.mxu0 %v4677_v33  ;;  %4323 = vmatprep.subr.bf16.mxu1 %v4792_v21  ;;  %v5701_v59 = vpop.f32.mrf.mxu1 }
  0xf1   :  { %v5721_v3 = vpop.f32.mrf.mxu1 }
  0xf2   :  { %2489 = vmatpush1.bf16.msra.mxu0 %v4675_v38  ;;  %4324 = vmatpush3.bf16.msra.mxu1 %v4678_v39  ;;  %6284 = vst [vmem:[#allocation2_spill] sm:$0xff] %v5721_v3  ;;  %v4733_v39 = vld [vmem:[%s6280_s0 + $0x718] ss:$60 sps:$4 sm:$0xff]  }
  0xf3   :  { %3085 = vmatprep.subr.bf16.mxu0 %v3038_v43  ;;  %3128 = vmatprep.subr.bf16.mxu1 %v3044_v44  ;;  %v5737_v11 = vpop.f32.mrf.mxu1  ;;  %v4742_v43 = vld [vmem:[%s6280_s0 + $0x910] ss:$60 sps:$4 sm:$0x3f]  }
  0xf4   :  { %6285 = vst [vmem:[#allocation3_spill] sm:$0xff] %v5737_v11 }
  0xf5   :  { %4066 = vmatmul.mubr.msk.bf16.vlgmr.msra.gmra.mxu0 %vm467_vm2, %v5383_v12  ;;  %4326 = vmatmul.mubr.msk.bf16.vlgmr.msra.gmra.mxu1 %vm467_vm2, %v5383_v12 }
  0xf6   :  { %3086 = vmatpush1.bf16.msra.mxu0 %v3035_v45  ;;  %3129 = vmatpush1.bf16.msra.mxu1 %v3041_v46  ;;  %v3062_v45 = vand.u32 %v4741_v36, %v4820_v4  ;;  %v3068_v46 = vand.u32 %v4744_v37, %v4820_v4  ;;  %v4780_v36 = vld [vmem:[%s6280_s0 + $0x830] ss:$60 sps:$4 sm:$0xff]  }
  0xf7   :  { %3087 = vmatprep.subr.bf16.mxu0 %v4687_v48  ;;  %3130 = vmatprep.subr.bf16.mxu1 %v4690_v49  ;;  %v3059_v49 = vand.u32 %v4739_v41, %v4820_v4 }
  0xf8   :  { %3111 = vmatprep.mubr.bf16.mxu0 %v4790_v1  ;;  %3154 = vmatprep.mubr.bf16.mxu1 %v4790_v1 }
  0xfa   :  { %3088 = vmatpush1.bf16.msra.mxu0 %v4685_v50  ;;  %3131 = vmatpush1.bf16.msra.mxu1 %v4688_v51  ;;  %v3065_v50 = vand.u32 %v4742_v43, %v4820_v4  ;;  %v5823_v51 = vpop.f32.mrf.mxu0 }
  0xfb   :  { %3089 = vmatprep.subr.bf16.mxu0 %v4693_v53  ;;  %3132 = vmatprep.subr.bf16.mxu1 %v4696_v54  ;;  %v4747_v54 = vld [vmem:[%s6280_s0 + $0x894] ss:$60 sps:$4 sm:$0xff]  }
  0xfe   :  { %3090 = vmatpush1.bf16.msra.mxu0 %v4691_v56  ;;  %3133 = vmatpush1.bf16.msra.mxu1 %v4694_v34  ;;  %v4750_v56 = vld [vmem:[%s6280_s0 + $0x89c] ss:$60 sps:$4 sm:$0xff]   ;;  %v4745_v34 = vld [vmem:[%s6280_s0 + $0x890] ss:$60 sps:$4 sm:$0xff]  }
  0xff   :  { %3091 = vmatprep.subr.bf16.mxu0 %v4699_v57  ;;  %3134 = vmatprep.subr.bf16.mxu1 %v4702_v58  ;;  %v4748_v57 = vld [vmem:[%s6280_s0 + $0x898] ss:$60 sps:$4 sm:$0xff]   ;;  %v5841_v58 = vpop.f32.mrf.mxu0 }
 0x101   :  { %v5741_v15 = vpop.f32.mrf.mxu1  ;;  %v5857_v0 = vpop.f32.mrf.mxu0 }
 0x102   :  { %3092 = vmatpush1.bf16.msra.mxu0 %v4697_v60  ;;  %3135 = vmatpush1.bf16.msra.mxu1 %v4700_v61  ;;  %v4753_v60 = vld [vmem:[%s6280_s0 + $0x81c] ss:$60 sps:$4 sm:$0xff]   ;;  %v4756_v61 = vld [vmem:[%s6280_s0 + $0x824] ss:$60 sps:$4 sm:$0xff]  }
 0x103   :  { %3093 = vmatprep.subr.bf16.mxu0 %v4705_v62  ;;  %3136 = vmatprep.subr.bf16.mxu1 %v4708_v63  ;;  %v5759_v20 = vpop.f32.mrf.mxu1  ;;  %v4751_v62 = vld [vmem:[%s6280_s0 + $0x818] ss:$60 sps:$4 sm:$0xff]   ;;  %v4754_v63 = vld [vmem:[%s6280_s0 + $0x820] ss:$60 sps:$4 sm:$0xff]  }
 0x105   :  { %v5775_v26 = vpop.f32.mrf.mxu1 }
 0x106   :  { %3094 = vmatpush1.bf16.msra.mxu0 %v4703_v5  ;;  %3137 = vmatpush1.bf16.msra.mxu1 %v4706_v6  ;;  %v4762_v5 = vld [vmem:[%s6280_s0 + $0x7ac] ss:$60 sps:$4 sm:$0xff]   ;;  %v4757_v6 = vld [vmem:[%s6280_s0 + $0x7a0] ss:$60 sps:$4 sm:$0xff]  }
 0x107   :  { %3171 = vmatprep.subr.bf16.mxu0 %v3050_v9  ;;  %3214 = vmatprep.subr.bf16.mxu1 %v3056_v10  ;;  %v5795_v33 = vpop.f32.mrf.mxu1  ;;  %v5874_v9 = vpop.f32.mrf.mxu0  ;;  %v4768_v10 = vld [vmem:[%s6280_s0 + $0x734] ss:$60 sps:$4 sm:$0xff]  }
 0x109   :  { %4223 = vmatmul.mubr.msk.bf16.vlgmr.msra.gmra.mxu0 %vm467_vm2, %v5383_v12  ;;  %4224 = vmatmul.mubr.msk.bf16.vlgmr.msra.gmra.mxu1 %vm467_vm2, %v5383_v12 }
 0x10a   :  { %3172 = vmatpush1.bf16.msra.mxu0 %v3047_v13  ;;  %3215 = vmatpush1.bf16.msra.mxu1 %v3053_v14  ;;  %v4771_v13 = vld [vmem:[%s6280_s0 + $0x91c] ss:$60 sps:$4 sm:$0x3f]   ;;  %v5882_v14 = vpop.f32.mrf.mxu0 }
 0x10b   :  { %3173 = vmatprep.subr.bf16.mxu0 %v4717_v16  ;;  %3216 = vmatprep.subr.bf16.mxu1 %v4720_v17  ;;  %v4763_v16 = vld [vmem:[%s6280_s0 + $0x728] ss:$60 sps:$4 sm:$0xff]   ;;  %v4766_v17 = vld [vmem:[%s6280_s0 + $0x730] ss:$60 sps:$4 sm:$0xff]  }
 0x10c   :  { %3197 = vmatprep.mubr.bf16.mxu0 %v4790_v1  ;;  %3240 = vmatprep.mubr.bf16.mxu1 %v4790_v1 }
 0x10e   :  { %3174 = vmatpush1.bf16.msra.mxu0 %v4715_v18  ;;  %3217 = vmatpush1.bf16.msra.mxu1 %v4718_v19  ;;  %v4769_v18 = vld [vmem:[%s6280_s0 + $0x918] ss:$60 sps:$4 sm:$0x3f]   ;;  %v4772_v19 = vld [vmem:[%s6280_s0 + $0x920] ss:$60 sps:$4 sm:$0x3f]  }
 0x10f   :  { %3175 = vmatprep.subr.bf16.mxu0 %v4723_v22  ;;  %3218 = vmatprep.subr.bf16.mxu1 %v4726_v23  ;;  %v3074_v22 = vand.u32 %v4771_v13, %v4820_v4  ;;  %v5897_v23 = vpop.f32.mrf.mxu0 }
 0x112   :  { %3176 = vmatpush1.bf16.msra.mxu0 %v4721_v24  ;;  %3219 = vmatpush1.bf16.msra.mxu1 %v4724_v25  ;;  %v3071_v24 = vand.u32 %v4769_v18, %v4820_v4  ;;  %v3077_v25 = vand.u32 %v4772_v19, %v4820_v4  ;;  %v4773_v4 = vld [vmem:[%s6280_s0 + $0x8a0] ss:$60 sps:$4 sm:$0xff]  }
 0x113   :  { %3177 = vmatprep.subr.bf16.mxu0 %v4729_v27  ;;  %3220 = vmatprep.subr.bf16.mxu1 %v4732_v28  ;;  %v4775_v27 = vld [vmem:[%s6280_s0 + $0x8a4] ss:$60 sps:$4 sm:$0xff]   ;;  %v5905_v28 = vpop.f32.mrf.mxu0 }
 0x114   :  { %6286 = vst [vmem:[#allocation4_spill] sm:$0xff] %v5905_v28 }
 0x115   :  { %v5803_v38 = vpop.f32.mrf.mxu1 }
 0x116   :  { %3178 = vmatpush1.bf16.msra.mxu0 %v4727_v29  ;;  %3221 = vmatpush1.bf16.msra.mxu1 %v4730_v30  ;;  %v4776_v29 = vld [vmem:[%s6280_s0 + $0x8a8] ss:$60 sps:$4 sm:$0xff]  }
 0x117   :  { %v4299_v44 = vpop.f32.mrf.mxu1  ;;  %3179 = vmatprep.subr.bf16.mxu0 %v4735_v31  ;;  %3222 = vmatprep.subr.bf16.mxu1 %v4738_v32  ;;  %v4779_v30 = vld [vmem:[%s6280_s0 + $0x82c] ss:$60 sps:$4 sm:$0xff]   ;;  %v5924_v31 = vpop.f32.mrf.mxu0 }
 0x118   :  { %6287 = vst [vmem:[#allocation5_spill] sm:$0xff] %v5924_v31  ;;  %v4777_v32 = vld [vmem:[%s6280_s0 + $0x828] ss:$60 sps:$4 sm:$0xff]   ;;  %v4787_v44 = vld [vmem:[%s6280_s0 + $0x73c] ss:$60 sps:$4 sm:$0xff]  }
 0x119   :  { %v5819_v48 = vpop.f32.mrf.mxu1  ;;  %v5932_v37 = vpop.f32.mrf.mxu0 }
 0x11a   :  { %3180 = vmatpush1.bf16.msra.mxu0 %v4733_v39  ;;  %3223 = vmatpush1.bf16.msra.mxu1 %v4736_v40  ;;  %6288 = vst [vmem:[#allocation6_spill] sm:$0xff] %v5932_v37  ;;  %v4781_v39 = vld [vmem:[%s6280_s0 + $0x7b0] ss:$60 sps:$4 sm:$0xff]   ;;  %v4784_v40 = vld [vmem:[%s6280_s0 + $0x7b8] ss:$60 sps:$4 sm:$0xff]  }
 0x11b   :  { %v4300_v53 = vpop.f32.mrf.mxu1  ;;  %3257 = vmatprep.subr.bf16.mxu0 %v3062_v45  ;;  %3300 = vmatprep.subr.bf16.mxu1 %v3068_v46  ;;  %v5944_v41 = vpop.f32.mrf.mxu0  ;;  %v4785_v45 = vld [vmem:[%s6280_s0 + $0x738] ss:$60 sps:$4 sm:$0xff]   ;;  %v4788_v46 = vld [vmem:[%s6280_s0 + $0x740] ss:$60 sps:$4 sm:$0xff]  }
 0x11c   :  { %6289 = vst [vmem:[#allocation7_spill] sm:$0xff] %v5944_v41 }
 0x11d   :  { %4225 = vmatmul.mubr.msk.bf16.vlgmr.msra.gmra.mxu0 %vm467_vm2, %v5383_v12  ;;  %4226 = vmatmul.mubr.msk.bf16.vlgmr.msra.gmra.mxu1 %vm467_vm2, %v5383_v12 }
 0x11e   :  { %3258 = vmatpush1.bf16.msra.mxu0 %v3059_v49  ;;  %3301 = vmatpush1.bf16.msra.mxu1 %v3065_v50  ;;  %v5958_v49 = vpop.f32.mrf.mxu0 }
 0x11f   :  { %3259 = vmatprep.subr.bf16.mxu0 %v4747_v54  ;;  %3302 = vmatprep.subr.bf16.mxu1 %v4750_v56  ;;  %6290 = vst [vmem:[#allocation8_spill] sm:$0xff] %v5958_v49 }
 0x120   :  { %3283 = vmatprep.mubr.bf16.mxu0 %v4790_v1  ;;  %3326 = vmatprep.mubr.bf16.mxu1 %v4790_v1  ;;  %v5963_v53 = vpop.f32.mrf.mxu0 }
 0x121   :  { %6291 = vst [vmem:[#allocation9_spill] sm:$0xff] %v5963_v53 }
 0x122   :  { %3260 = vmatpush1.bf16.msra.mxu0 %v4745_v34  ;;  %3303 = vmatpush1.bf16.msra.mxu1 %v4748_v57  ;;  %v5967_v56 = vpop.f32.mrf.mxu0 }
 0x123   :  { %3261 = vmatprep.subr.bf16.mxu0 %v4753_v60  ;;  %3304 = vmatprep.subr.bf16.mxu1 %v4756_v61 }
 0x124   :  { %v5975_v57 = vpop.f32.mrf.mxu0 }
 0x126   :  { %3262 = vmatpush1.bf16.msra.mxu0 %v4751_v62  ;;  %3305 = vmatpush1.bf16.msra.mxu1 %v4754_v63 }
 0x127   :  { %3263 = vmatprep.subr.bf16.mxu0 %v4759_v2  ;;  %3306 = vmatprep.subr.bf16.mxu1 %v4762_v5 }
 0x129   :  { %v5946_v43 = vpop.f32.mrf.mxu1 }
 0x12a   :  { %3264 = vmatpush1.bf16.msra.mxu0 %v4757_v6  ;;  %3307 = vmatpush1.bf16.msra.mxu1 %v4760_v7 }
 0x12b   :  { %3265 = vmatprep.subr.bf16.mxu0 %v4765_v8  ;;  %3308 = vmatprep.subr.bf16.mxu1 %v4768_v10  ;;  %v5960_v50 = vpop.f32.mrf.mxu1 }
 0x12d   :  { %v5965_v54 = vpop.f32.mrf.mxu1 }
 0x12e   :  { %3266 = vmatpush1.bf16.msra.mxu0 %v4763_v16  ;;  %3309 = vmatpush1.bf16.msra.mxu1 %v4766_v17 }
 0x12f   :  { %3343 = vmatprep.subr.bf16.mxu0 %v3074_v22  ;;  %4329 = vmatprep.subr.bf16.mxu1 %v4792_v21  ;;  %v5973_v34 = vpop.f32.mrf.mxu1 }
 0x131   :  { %4227 = vmatmul.mubr.msk.bf16.vlgmr.msra.gmra.mxu0 %vm467_vm2, %v5383_v12  ;;  %4228 = vmatmul.mubr.msk.bf16.vlgmr.msra.gmra.mxu1 %vm467_vm2, %v5383_v12 }
 0x132   :  { %3344 = vmatpush1.bf16.msra.mxu0 %v3071_v24  ;;  %4330 = vmatpush3.bf16.msra.mxu1 %v3077_v25 }
 0x133   :  { %3345 = vmatprep.subr.bf16.mxu0 %v4775_v27  ;;  %4331 = vmatprep.subr.bf16.mxu1 %v4792_v21 }
 0x134   :  { %3369 = vmatprep.mubr.bf16.mxu0 %v4790_v1  ;;  %4339 = vmatprep.mubr.msk.bf16.mxu1 %vm4793_vm3, %v4792_v21  ;;  %v4783_v1 = vld [vmem:[%s6280_s0 + $0x7b4] ss:$60 sps:$4 sm:$0xff]  }
 0x136   :  { %3346 = vmatpush1.bf16.msra.mxu0 %v4773_v4  ;;  %4332 = vmatpush3.bf16.msra.mxu1 %v4776_v29 }
 0x137   :  { %3347 = vmatprep.subr.bf16.mxu0 %v4779_v30  ;;  %4333 = vmatprep.subr.bf16.mxu1 %v4792_v21 }
 0x13a   :  { %3348 = vmatpush1.bf16.msra.mxu0 %v4777_v32  ;;  %4334 = vmatpush3.bf16.msra.mxu1 %v4780_v36 }
 0x13b   :  { %3349 = vmatprep.subr.bf16.mxu0 %v4783_v1  ;;  %4335 = vmatprep.subr.bf16.mxu1 %v4792_v21 }
 0x13d   :  { %v5977_v60 = vpop.f32.mrf.mxu1 }
 0x13e   :  { %3350 = vmatpush1.bf16.msra.mxu0 %v4781_v39  ;;  %4336 = vmatpush3.bf16.msra.mxu1 %v4784_v40 }
 0x13f   :  { %3351 = vmatprep.subr.bf16.mxu0 %v4787_v44  ;;  %4337 = vmatprep.subr.bf16.mxu1 %v4792_v21  ;;  %v5979_v21 = vpop.f32.mrf.mxu0  ;;  %v5981_v61 = vpop.f32.mrf.mxu1 }
 0x141   :  { %v5983_v62 = vpop.f32.mrf.mxu0  ;;  %v5985_v63 = vpop.f32.mrf.mxu1 }
 0x142   :  { %3352 = vmatpush1.bf16.msra.mxu0 %v4785_v45  ;;  %4338 = vmatpush3.bf16.msra.mxu1 %v4788_v46  ;;  %6292 = vst [vmem:[#allocation10_spill] sm:$0xff] %v5985_v63 }
 0x143   :  { %v5987_v2 = vpop.f32.mrf.mxu0  ;;  %v5989_v5 = vpop.f32.mrf.mxu1 }
 0x144   :  { %6293 = vst [vmem:[#allocation11_spill] sm:$0xff] %v5989_v5 }
 0x145   :  { %4229 = vmatmul.mubr.msk.bf16.vlgmr.msra.gmra.mxu0 %vm467_vm2, %v5383_v12  ;;  %4340 = vmatmul.mubr.msk.bf16.vlgmr.msra.gmra.mxu1 %vm467_vm2, %v5383_v12  ;;  %v5991_v6 = vpop.f32.mrf.mxu0 }
 0x147   :  { %v5993_v7 = vpop.f32.mrf.mxu0 }
 0x149   :  { %v5995_v10 = vpop.f32.mrf.mxu0 }
 0x14b   :  { %v5997_v16 = vpop.f32.mrf.mxu0 }
 0x14d   :  { %v5999_v18 = vpop.f32.mrf.mxu0 }
 0x14f   :  { %v6001_v24 = vpop.f32.mrf.mxu0 }
 0x150   :  { %6294 = vst [vmem:[#allocation12_spill] sm:$0xff] %v6001_v24 }
 0x151   :  { %v1602_v12 = vpop.f32.mrf.mxu1  ;;  %v6003_v4 = vpop.f32.mrf.mxu0 }
 0x152   :  { %6295 = vst [vmem:[#allocation13_spill] sm:$0xff] %v6003_v4  ;;  %v1705_v31 = vmax.f32 %v5741_v15, %v1602_v12 }
 0x153   :  { %v1604_v8 = vpop.f32.mrf.mxu1  ;;  %v6005_v29 = vpop.f32.mrf.mxu0 }
 0x154   :  { %6296 = vst [vmem:[#allocation14_spill] sm:$0xff] %v6005_v29  ;;  %v1706_v63 = vmax.f32 %v5759_v20, %v1604_v8 }
 0x155   :  { %v1606_v13 = vpop.f32.mrf.mxu1  ;;  %v6007_v30 = vpop.f32.mrf.mxu0 }
 0x156   :  { %6297 = vst [vmem:[#allocation15_spill] sm:$0xff] %v6007_v30 }
 0x157   :  { %v1608_v17 = vpop.f32.mrf.mxu1  ;;  %v6009_v32 = vpop.f32.mrf.mxu0 }
 0x158   :  { %6298 = vst [vmem:[#allocation16_spill] sm:$0xff] %v6009_v32 }
 0x159   :  { %v6011_v36 = vpop.f32.mrf.mxu0 }
 0x15a   :  { %6299 = vst [vmem:[#allocation17_spill] sm:$0xff] %v6011_v36 }
 0x165   :  { %v1688_v19 = vpop.f32.mrf.mxu1  ;;  %v1645_v1 = vpop.f32.mrf.mxu0 }
 0x167   :  { %v4313_v22 = vpop.f32.mrf.mxu1  ;;  %v1647_v39 = vpop.f32.mrf.mxu0 }
 0x169   :  { %v1691_v25 = vpop.f32.mrf.mxu1  ;;  %v1649_v40 = vpop.f32.mrf.mxu0 }
 0x16b   :  { %v4314_v27 = vpop.f32.mrf.mxu1  ;;  %v1651_v45 = vpop.f32.mrf.mxu0 }
 0x179   :  { %v2293_v44 = vpop.f32.mrf.mxu1  ;;  %v2250_v22 = vpop.f32.mrf.mxu0 }
 0x17b   :  { %v6013_v46 = vpop.f32.mrf.mxu1  ;;  %v2252_v27 = vpop.f32.mrf.mxu0 }
 0x17d   :  { %v6015_v53 = vpop.f32.mrf.mxu1  ;;  %v6019_v41 = vpop.f32.mrf.mxu0 }
 0x17f   :  { %v6017_v49 = vpop.f32.mrf.mxu1  ;;  %v6023_v32 = vpop.f32.mrf.mxu0 }
 0x18d   :  { %v6021_v30 = vpop.f32.mrf.mxu1  ;;  %v6027_v37 = vpop.f32.mrf.mxu0 }
 0x18e   :  { %6300 = vst [vmem:[#allocation18_spill] sm:$0xff] %v6021_v30  ;;  %6302 = vst [vmem:[#allocation20_spill] sm:$0xff] %v6027_v37 }
 0x18f   :  { %v6025_v36 = vpop.f32.mrf.mxu1  ;;  %v6031_v11 = vpop.f32.mrf.mxu0 }
 0x190   :  { %6301 = vst [vmem:[#allocation19_spill] sm:$0xff] %v6025_v36  ;;  %6304 = vst [vmem:[#allocation22_spill] sm:$0xff] %v6031_v11  ;;  %v1720_v36 = vmax.f32 %v5775_v26, %v1606_v13  ;;  %v1721_v11 = vmax.f32 %v5795_v33, %v1608_v17  ;;  %v1707_v26 = vmax.f32 %v5967_v56, %v1645_v1 }
 0x191   :  { %v6029_v29 = vpop.f32.mrf.mxu1  ;;  %v6036_v4 = vpop.f32.mrf.mxu0  ;;  %v1708_v33 = vmax.f32 %v5975_v57, %v1647_v39 }
 0x192   :  { %6303 = vst [vmem:[#allocation21_spill] sm:$0xff] %v6029_v29  ;;  %6306 = vst [vmem:[#allocation24_spill] sm:$0xff] %v6036_v4 }
 0x193   :  { %v6033_v5 = vpop.f32.mrf.mxu1  ;;  %v6044_v37 = vpop.f32.mrf.mxu0 }
 0x194   :  { %6305 = vst [vmem:[#allocation23_spill] sm:$0xff] %v6033_v5 }
 0x1a1   :  { %v2465_v3 = vpop.f32.mrf.mxu1  ;;  %v6049_v15 = vpop.f32.mrf.mxu0 }
 0x1a2   :  { %v6039_v28 = vmax.f32 %v1705_v31, %v2465_v3 }
 0x1a3   :  { %v2467_v24 = vpop.f32.mrf.mxu1  ;;  %v6053_v20 = vpop.f32.mrf.mxu0 }
 0x1a4   :  { %v6042_v30 = vmax.f32 %v1706_v63, %v2467_v24  ;;  %v1709_v63 = vmax.f32 %v5803_v38, %v1688_v19  ;;  %v1723_v38 = vmax.f32 %v5983_v62, %v1651_v45  ;;  %v1698_v62 = vmax.f32 %v5652_v42, %v5960_v50 }
 0x1a5   :  { %v2469_v29 = vpop.f32.mrf.mxu1  ;;  %v6055_v3 = vpop.f32.mrf.mxu0  ;;  %v1711_v42 = vmax.f32 %v5874_v9, %v5995_v10  ;;  %v1713_v50 = vmax.f32 %v5677_v52, %v5973_v34 }
 0x1a6   :  { %v6047_v5 = vmax.f32 %v1720_v36, %v2469_v29  ;;  %v1722_v36 = vmax.f32 %v5979_v21, %v1649_v40  ;;  %v1695_v21 = vmax.f32 %v5823_v51, %v5987_v2 }
 0x1a7   :  { %v2471_v12 = vpop.f32.mrf.mxu1  ;;  %v6057_v31 = vpop.f32.mrf.mxu0  ;;  %v2574_v52 = vmax.f32 %v1711_v42, %v6023_v32  ;;  %v2576_v9 = vmax.f32 %v1713_v50, %v6017_v49 }
 0x1a8   :  { %6307 = vst [vmem:[#allocation25_spill] sm:$0xff] %v6047_v5  ;;  %v6051_v4 = vmax.f32 %v1721_v11, %v2471_v12  ;;  %v1724_v12 = vmax.f32 %v5819_v48, %v1691_v25  ;;  %v1697_v48 = vmax.f32 %v5631_v35, %v5946_v43  ;;  %v1696_v25 = vmax.f32 %v5841_v58, %v5991_v6 }
 0x1a9   :  { %v2561_v35 = vmax.f32 %v1698_v62, %v6013_v46 }
 0x1aa   :  { %6308 = vst [vmem:[#allocation26_spill] sm:$0xff] %v6051_v4  ;;  %v2560_v40 = vmax.f32 %v1697_v48, %v2293_v44 }
 0x1b5   :  { %v2508_v8 = vpop.f32.mrf.mxu0  ;;  %v2551_v13 = vpop.f32.mrf.mxu1 }
 0x1b6   :  { %v6062_v17 = vmax.f32 %v1707_v26, %v2508_v8  ;;  %v6064_v24 = vmax.f32 %v1709_v63, %v2551_v13  ;;  %v6077_v63 = vpop.permute.xlu0 %3460  ;;  %v1710_v8 = vmax.f32 %v5857_v0, %v5993_v7  ;;  %v1712_v13 = vmax.f32 %v5659_v47, %v5965_v54 }
 0x1b7   :  { %v2510_v11 = vpop.f32.mrf.mxu0  ;;  %v4327_v29 = vpop.f32.mrf.mxu1 }
 0x1b8   :  { %v6068_v4 = vmax.f32 %v1708_v33, %v2510_v11  ;;  %v2559_v33 = vmax.f32 %v1696_v25, %v2252_v27  ;;  %v2573_v46 = vmax.f32 %v1710_v8, %v6019_v41 }
 0x1b9   :  { %v2512_v5 = vpop.f32.mrf.mxu0  ;;  %v2554_v56 = vpop.f32.mrf.mxu1 }
 0x1ba   :  { %v6071_v19 = vmax.f32 %v1722_v36, %v2512_v5  ;;  %v6073_v1 = vmax.f32 %v1724_v12, %v2554_v56  ;;  %v2558_v5 = vmax.f32 %v1695_v21, %v2250_v22  ;;  %v6087_v45 = vpop.permute.xlu0 %3455  ;;  %v2575_v22 = vmax.f32 %v1712_v13, %v6015_v53 }
 0x1bb   :  { %v2514_v57 = vpop.f32.mrf.mxu0  ;;  %v4328_v39 = vpop.f32.mrf.mxu1 }
 0x1bc   :  { %v6075_v26 = vmax.f32 %v1723_v38, %v2514_v57 }
 0x1c9   :  { %v3113_v51 = vpop.f32.mrf.mxu0  ;;  %v3156_v2 = vpop.f32.mrf.mxu1 }
 0x1ca   :  { %v3421_v43 = vmax.f32 %v2558_v5, %v3113_v51  ;;  %v3423_v58 = vmax.f32 %v2560_v40, %v3156_v2 }
 0x1cb   :  { %v3115_v6 = vpop.f32.mrf.mxu0  ;;  %v3158_v44 = vpop.f32.mrf.mxu1 }
 0x1cc   :  { %v3422_v0 = vmax.f32 %v2559_v33, %v3115_v6  ;;  %v3463_v47 = vadd.f32 %v6087_v45, %v3421_v43  ;;  %v3424_v54 = vmax.f32 %v2561_v35, %v3158_v44  ;;  %v3465_v7 = vadd.f32 %v6087_v45, %v3423_v58  ;;  %v3630_v35 = vld [vmem:[%s6283_s3 + $0x3c] sm:$0x11]  ;;  %v3633_v43 = vld [vmem:[%s6283_s3 + $0x44] sm:$0x11] }
 0x1cd   :  { %v3117_v27 = vpop.f32.mrf.mxu0  ;;  %v3160_v11 = vpop.f32.mrf.mxu1  ;;  %v1699_v44 = vmax.f32 %v5882_v14, %v5997_v16 }
 0x1ce   :  { %v3464_v34 = vadd.f32 %v6087_v45, %v3422_v0  ;;  %v3466_v10 = vadd.f32 %v6087_v45, %v3424_v54  ;;  %v3493_v29 = vmax.f32 %v3463_v47, 0.0  ;;  %v3495_v36 = vmax.f32 %v3465_v7, 0.0  ;;  %v6313_v7 = vld [vmem:[#allocation20_spill] sm:$0xff] }
 0x1cf   :  { %v3436_v12 = vmax.f32 %v2573_v46, %v3117_v27  ;;  %v3438_v56 = vmax.f32 %v2575_v22, %v3160_v11  ;;  %v3119_v38 = vpop.f32.mrf.mxu0  ;;  %v3162_v41 = vpop.f32.mrf.mxu1  ;;  %v1701_v0 = vmax.f32 %v5687_v55, %v5977_v60  ;;  %v1700_v47 = vmax.f32 %v5897_v23, %v5999_v18  ;;  %v6314_v22 = vld [vmem:[#allocation18_spill] sm:$0xff]  ;;  %v6318_v55 = vld [vmem:[#allocation4_spill] sm:$0xff] }
 0x1d0   :  { %v3494_v57 = vmax.f32 %v3464_v34, 0.0  ;;  %v3496_v53 = vmax.f32 %v3466_v10, 0.0  ;;  %v3437_v39 = vmax.f32 %v2574_v52, %v3119_v38  ;;  %v3439_v21 = vmax.f32 %v2576_v9, %v3162_v41  ;;  %v6315_v9 = vld [vmem:[#allocation22_spill] sm:$0xff]  ;;  %v6316_v10 = vld [vmem:[#allocation19_spill] sm:$0xff] }
 0x1d1   :  { %v3478_v48 = vadd.f32 %v6077_v63, %v3436_v12  ;;  %v3480_v32 = vadd.f32 %v6077_v63, %v3438_v56  ;;  %v1702_v54 = vmax.f32 %v5701_v59, %v5981_v61  ;;  %v2562_v46 = vmax.f32 %v1699_v44, %v6313_v7  ;;  %v6319_v12 = vld [vmem:[#allocation10_spill] sm:$0xff]  ;;  %v6321_v56 = vld [vmem:[#allocation13_spill] sm:$0xff]  ;;  %v6323_v38 = vld [vmem:[#allocation11_spill] sm:$0xff] }
 0x1d2   :  { %v4247_v25 = vpack.c.bf16 %v3494_v57, %v3493_v29  ;;  %v4248_v62 = vpack.c.bf16 %v3496_v53, %v3495_v36  ;;  %v3479_v5 = vadd.f32 %v6077_v63, %v3437_v39  ;;  %v3481_v40 = vadd.f32 %v6077_v63, %v3439_v21  ;;  %v6317_v36 = vld [vmem:[#allocation12_spill] sm:$0xff]  ;;  %v6320_v23 = vld [vmem:[#allocation2_spill] sm:$0xff]  ;;  %v6322_v59 = vld [vmem:[#allocation5_spill] sm:$0xff] }
 0x1d3   :  { %v3508_v8 = vmax.f32 %v3478_v48, 0.0  ;;  %v3510_v13 = vmax.f32 %v3480_v32, 0.0  ;;  %v2564_v27 = vmax.f32 %v1701_v0, %v6314_v22  ;;  %v2563_v34 = vmax.f32 %v1700_v47, %v6315_v9  ;;  %v6324_v41 = vld [vmem:[#allocation3_spill] sm:$0xff] }
 0x1d4   :  { %3615 = vst [vmem:[%s6283_s3] sm:$0xff] %v4247_v25  ;;  %3616 = vst [vmem:[%s6283_s3 + $0x8] sm:$0xff] %v4248_v62  ;;  %v3509_v51 = vmax.f32 %v3479_v5, 0.0  ;;  %v3511_v2 = vmax.f32 %v3481_v40, 0.0  ;;  %v2565_v29 = vmax.f32 %v1702_v54, %v6316_v10  ;;  %v1714_v60 = vmax.f32 %v6318_v55, %v6317_v36  ;;  %v6325_v62 = vld [vmem:[#allocation24_spill] sm:$0xff]  ;;  %v6326_v40 = vld [vmem:[#allocation21_spill] sm:$0xff] }
 0x1d5   :  { %v1716_v18 = vmax.f32 %v6320_v23, %v6319_v12  ;;  %v1715_v61 = vmax.f32 %v6322_v59, %v6321_v56  ;;  %v1717_v57 = vmax.f32 %v6324_v41, %v6323_v38  ;;  %v3636_v55 = vld [vmem:[%s6283_s3 + $0x4c] sm:$0x11]  ;;  %v6328_v59 = vld [vmem:[#allocation14_spill] sm:$0xff] }
 0x1d6   :  { %v4255_v58 = vpack.c.bf16 %v3509_v51, %v3508_v8  ;;  %v4256_v42 = vpack.c.bf16 %v3511_v2, %v3510_v13  ;;  %v2577_v5 = vmax.f32 %v1714_v60, %v6325_v62  ;;  %v3639_v60 = vld [vmem:[%s6283_s3 + $0x54] sm:$0x11]  ;;  %v6330_v41 = vld [vmem:[#allocation15_spill] sm:$0xff] }
 0x1d7   :  { %v2579_v8 = vmax.f32 %v1716_v18, %v6326_v40  ;;  %v2578_v2 = vmax.f32 %v1715_v61, %v6044_v37  ;;  %v6329_v61 = vld [vmem:[#allocation6_spill] sm:$0xff]  ;;  %v6333_v40 = vld [vmem:[#allocation8_spill] sm:$0xff] }
 0x1d8   :  { %v3631_v50 = vsel %vm6126_vm10, %v4255_v58, %v3630_v35  ;;  %v3634_v6 = vsel %vm6126_vm10, %v4256_v42, %v3633_v43  ;;  %v6327_v35 = vld [vmem:[#allocation23_spill] sm:$0xff]  ;;  %v1703_v38 = vmax.f32 %v6329_v61, %v6328_v59 }
 0x1d9   :  { %3632 = vst [vmem:[%s6283_s3 + $0x3c] sm:$0x11] %v3631_v50  ;;  %3635 = vst [vmem:[%s6283_s3 + $0x44] sm:$0x11] %v3634_v6  ;;  %v2580_v43 = vmax.f32 %v1717_v57, %v6327_v35  ;;  %v6331_v57 = vld [vmem:[#allocation7_spill] sm:$0xff] }
 0x1dd   :  { %v3199_v11 = vpop.f32.mrf.mxu0  ;;  %v3242_v52 = vpop.f32.mrf.mxu1 }
 0x1de   :  { %v3425_v14 = vmax.f32 %v2562_v46, %v3199_v11  ;;  %v3427_v16 = vmax.f32 %v2564_v27, %v3242_v52 }
 0x1df   :  { %v3201_v53 = vpop.f32.mrf.mxu0  ;;  %v3244_v39 = vpop.f32.mrf.mxu1 }
 0x1e0   :  { %v3467_v21 = vadd.f32 %v6087_v45, %v3425_v14  ;;  %v3469_v48 = vadd.f32 %v6087_v45, %v3427_v16  ;;  %v3426_v32 = vmax.f32 %v2563_v34, %v3201_v53  ;;  %v3428_v25 = vmax.f32 %v2565_v29, %v3244_v39 }
 0x1e1   :  { %v3203_v13 = vpop.f32.mrf.mxu0  ;;  %v3246_v51 = vpop.f32.mrf.mxu1  ;;  %v1704_v53 = vmax.f32 %v6331_v57, %v6330_v41  ;;  %v2566_v39 = vmax.f32 %v1703_v38, %v6049_v15 }
 0x1e2   :  { %v3468_v58 = vadd.f32 %v6087_v45, %v3426_v32  ;;  %v3470_v42 = vadd.f32 %v6087_v45, %v3428_v25  ;;  %v3497_v50 = vmax.f32 %v3467_v21, 0.0  ;;  %v3499_v6 = vmax.f32 %v3469_v48, 0.0 }
 0x1e3   :  { %v3440_v44 = vmax.f32 %v2577_v5, %v3203_v13  ;;  %v3442_v0 = vmax.f32 %v2579_v8, %v3246_v51  ;;  %v3205_v47 = vpop.f32.mrf.mxu0  ;;  %v3248_v54 = vpop.f32.mrf.mxu1  ;;  %v2567_v32 = vmax.f32 %v1704_v53, %v6053_v20  ;;  %v6332_v5 = vld [vmem:[#allocation16_spill] sm:$0xff]  ;;  %v6334_v13 = vld [vmem:[#allocation17_spill] sm:$0xff] }
 0x1e4   :  { %v3498_v7 = vmax.f32 %v3468_v58, 0.0  ;;  %v3500_v46 = vmax.f32 %v3470_v42, 0.0  ;;  %v3441_v22 = vmax.f32 %v2578_v2, %v3205_v47  ;;  %v3443_v27 = vmax.f32 %v2580_v43, %v3248_v54  ;;  %v6335_v51 = vld [vmem:[#allocation9_spill] sm:$0xff] }
 0x1e5   :  { %v3482_v11 = vadd.f32 %v6077_v63, %v3440_v44  ;;  %v3484_v37 = vadd.f32 %v6077_v63, %v3442_v0  ;;  %v1718_v8 = vmax.f32 %v6333_v40, %v6332_v5  ;;  %v1719_v2 = vmax.f32 %v6335_v51, %v6334_v13 }
 0x1e6   :  { %v4249_v52 = vpack.c.bf16 %v3498_v7, %v3497_v50  ;;  %v4250_v9 = vpack.c.bf16 %v3500_v46, %v3499_v6  ;;  %v3483_v34 = vadd.f32 %v6077_v63, %v3441_v22  ;;  %v3485_v10 = vadd.f32 %v6077_v63, %v3443_v27  ;;  %v6336_v22 = vld [vmem:[#allocation25_spill] sm:$0xff] }
 0x1e7   :  { %v3512_v29 = vmax.f32 %v3482_v11, 0.0  ;;  %v3514_v14 = vmax.f32 %v3484_v37, 0.0  ;;  %v2581_v20 = vmax.f32 %v1718_v8, %v6055_v3 }
 0x1e8   :  { %3617 = vst [vmem:[%s6283_s3 + $0x10] sm:$0xff] %v4249_v52  ;;  %3618 = vst [vmem:[%s6283_s3 + $0x18] sm:$0xff] %v4250_v9  ;;  %v3513_v16 = vmax.f32 %v3483_v34, 0.0  ;;  %v3515_v36 = vmax.f32 %v3485_v10, 0.0  ;;  %v6337_v34 = vld [vmem:[#allocation26_spill] sm:$0xff] }
 0x1ea   :  { %v4257_v12 = vpack.c.bf16 %v3513_v16, %v3512_v29  ;;  %v4258_v23 = vpack.c.bf16 %v3515_v36, %v3514_v14 }
 0x1ec   :  { %v3637_v18 = vsel %vm6126_vm10, %v4257_v12, %v3636_v55  ;;  %v3640_v56 = vsel %vm6126_vm10, %v4258_v23, %v3639_v60 }
 0x1ed   :  { %3638 = vst [vmem:[%s6283_s3 + $0x4c] sm:$0x11] %v3637_v18  ;;  %3641 = vst [vmem:[%s6283_s3 + $0x54] sm:$0x11] %v3640_v56  ;;  %v3642_v18 = vld [vmem:[%s6283_s3 + $0x5c] sm:$0x11] }
 0x1ee   :  { %v3645_v56 = vld [vmem:[%s6283_s3 + $0x64] sm:$0x11] }
 0x1f1   :  { %v3285_v21 = vpop.f32.mrf.mxu0  ;;  %v3328_v48 = vpop.f32.mrf.mxu1 }
 0x1f2   :  { %v3429_v25 = vmax.f32 %v2566_v39, %v3285_v21  ;;  %v3431_v62 = vmax.f32 %v6039_v28, %v3328_v48  ;;  %v2582_v28 = vmax.f32 %v1719_v2, %v6057_v31 }
 0x1f3   :  { %v3287_v35 = vpop.f32.mrf.mxu0  ;;  %v3330_v43 = vpop.f32.mrf.mxu1 }
 0x1f4   :  { %v3471_v58 = vadd.f32 %v6087_v45, %v3429_v25  ;;  %v3473_v42 = vadd.f32 %v6087_v45, %v3431_v62  ;;  %v3430_v15 = vmax.f32 %v2567_v32, %v3287_v35  ;;  %v3432_v50 = vmax.f32 %v6042_v30, %v3330_v43 }
 0x1f5   :  { %v3289_v6 = vpop.f32.mrf.mxu0  ;;  %v3332_v44 = vpop.f32.mrf.mxu1 }
 0x1f6   :  { %v3472_v0 = vadd.f32 %v6087_v45, %v3430_v15  ;;  %v3474_v47 = vadd.f32 %v6087_v45, %v3432_v50  ;;  %v3501_v54 = vmax.f32 %v3471_v58, 0.0  ;;  %v3503_v7 = vmax.f32 %v3473_v42, 0.0 }
 0x1f7   :  { %v3444_v46 = vmax.f32 %v2581_v20, %v3289_v6  ;;  %v3446_v27 = vmax.f32 %v6336_v22, %v3332_v44  ;;  %v3291_v11 = vpop.f32.mrf.mxu0  ;;  %v3334_v37 = vpop.f32.mrf.mxu1  ;;  %v3651_v6 = vld [vmem:[%s6283_s3 + $0x74] sm:$0x1] }
 0x1f8   :  { %v3502_v52 = vmax.f32 %v3472_v0, 0.0  ;;  %v3504_v9 = vmax.f32 %v3474_v47, 0.0  ;;  %v3445_v30 = vmax.f32 %v2582_v28, %v3291_v11  ;;  %v3447_v3 = vmax.f32 %v6337_v34, %v3334_v37  ;;  %v3648_v28 = vld [vmem:[%s6283_s3 + $0x6c] sm:$0x11] }
 0x1f9   :  { %v3486_v10 = vadd.f32 %v6077_v63, %v3444_v46  ;;  %v3488_v31 = vadd.f32 %v6077_v63, %v3446_v27 }
 0x1fa   :  { %v4251_v29 = vpack.c.bf16 %v3502_v52, %v3501_v54  ;;  %v4252_v14 = vpack.c.bf16 %v3504_v9, %v3503_v7  ;;  %v3487_v16 = vadd.f32 %v6077_v63, %v3445_v30  ;;  %v3489_v36 = vadd.f32 %v6077_v63, %v3447_v3 }
 0x1fb   :  { %v3516_v55 = vmax.f32 %v3486_v10, 0.0  ;;  %v3518_v60 = vmax.f32 %v3488_v31, 0.0 }
 0x1fc   :  { %3619 = vst [vmem:[%s6283_s3 + $0x20] sm:$0xff] %v4251_v29  ;;  %3620 = vst [vmem:[%s6283_s3 + $0x28] sm:$0xff] %v4252_v14  ;;  %v3517_v12 = vmax.f32 %v3487_v16, 0.0  ;;  %v3519_v23 = vmax.f32 %v3489_v36, 0.0 }
 0x1fe   :  { %v4259_v59 = vpack.c.bf16 %v3517_v12, %v3516_v55  ;;  %v4260_v61 = vpack.c.bf16 %v3519_v23, %v3518_v60 }
 0x200   :  { %v3643_v38 = vsel %vm6126_vm10, %v4259_v59, %v3642_v18  ;;  %v3646_v41 = vsel %vm6126_vm10, %v4260_v61, %v3645_v56 }
 0x201   :  { %3644 = vst [vmem:[%s6283_s3 + $0x5c] sm:$0x11] %v3643_v38  ;;  %3647 = vst [vmem:[%s6283_s3 + $0x64] sm:$0x11] %v3646_v41 }
 0x205   :  { %v3371_v57 = vpop.f32.mrf.mxu0  ;;  %v3414_v53 = vpop.f32.mrf.mxu1 }
 0x206   :  { %v3433_v39 = vmax.f32 %v6062_v17, %v3371_v57  ;;  %v3435_v21 = vmax.f32 %v6064_v24, %v3414_v53 }
 0x207   :  { %v3373_v48 = vpop.f32.mrf.mxu0  ;;  %v4341_v32 = vpop.f32.mrf.mxu1 }
 0x208   :  { %v3475_v25 = vadd.f32 %v6087_v45, %v3433_v39  ;;  %v3477_v62 = vadd.f32 %v6087_v45, %v3435_v21  ;;  %v3434_v5 = vmax.f32 %v6068_v4, %v3373_v48 }
 0x209   :  { %v3375_v40 = vpop.f32.mrf.mxu0  ;;  %v3417_v8 = vpop.f32.mrf.mxu1 }
 0x20a   :  { %v3507_v13 = vmax.f32 %v3477_v62, 0.0  ;;  %v3476_v51 = vadd.f32 %v6087_v45, %v3434_v5  ;;  %v3448_v2 = vmax.f32 %v6071_v19, %v3375_v40  ;;  %v3505_v35 = vmax.f32 %v3475_v25, 0.0 }
 0x20b   :  { %v3450_v17 = vmax.f32 %v6073_v1, %v3417_v8  ;;  %v3377_v43 = vpop.f32.mrf.mxu0  ;;  %v4342_v24 = vpop.f32.mrf.mxu1 }
 0x20c   :  { %v4254_v58 = vpack.c.bf16 %v3507_v13, %v3507_v13  ;;  %v3506_v42 = vmax.f32 %v3476_v51, 0.0  ;;  %v3490_v15 = vadd.f32 %v6077_v63, %v3448_v2  ;;  %v3449_v50 = vmax.f32 %v6075_v26, %v3377_v43 }
 0x20d   :  { %v3492_v4 = vadd.f32 %v6077_v63, %v3450_v17 }
 0x20e   :  { %3622 = vst [vmem:[%s6283_s3 + $0x38] sm:$0xf] %v4254_v58  ;;  %v4253_v45 = vpack.c.bf16 %v3506_v42, %v3505_v35  ;;  %v3491_v19 = vadd.f32 %v6077_v63, %v3449_v50  ;;  %v3520_v1 = vmax.f32 %v3490_v15, 0.0 }
 0x20f   :  { %v3522_v20 = vmax.f32 %v3492_v4, 0.0 }
 0x210   :  { %3621 = vst [vmem:[%s6283_s3 + $0x30] sm:$0xff] %v4253_v45  ;;  %v3521_v26 = vmax.f32 %v3491_v19, 0.0 }
 0x211   :  { %v4262_v44 = vpack.c.bf16 %v3522_v20, %v3522_v20 }
 0x212   :  { %v4261_v0 = vpack.c.bf16 %v3521_v26, %v3520_v1 }
 0x213   :  { %v3652_v63 = vsel %vm6110_vm8, %v4262_v44, %v3651_v6 }
 0x214   :  { %3653 = vst [vmem:[%s6283_s3 + $0x74] sm:$0x1] %v3652_v63  ;;  %v3649_v47 = vsel %vm6126_vm10, %v4261_v0, %v3648_v28 }
 0x215   :  { %3650 = vst [vmem:[%s6283_s3 + $0x6c] sm:$0x11] %v3649_v47 }

// kernel: net_forward.4
= control target key start
LH: loop header
LB: loop body
LE: loop exit
PB: predicated region body
PF: predicated region fallthrough
CT: control target
= control target key end

     0   :  { %v2251_v0 = vmov 0   ;;  %vm320_vm0 = vcmask 1040384   ;;  %vm316_vm1 = vcmask 793600   ;;  %s2928_s0 = inlined_call_operand.vmem [shape: bf16[4,225,384], index: 0, kind: input, shape index: {}]   ;;  %s2929_s1 = inlined_call_operand.vmem [shape: bf16[12,225], index: 1, kind: input, shape index: {}]   ;;  %s2930_s2 = inlined_call_operand.vmem [shape: f32[12,1], index: 2, kind: input, shape index: {}]   ;;  %s2931_s3 = inlined_call_operand.vmem [shape: bf16[12,384], index: 3, kind: output, shape index: {}]  }
   0x1   :  { %375 = vmatprep.subr.bf16.mxu1 %v2251_v0  ;;  %v2012_v1 = vld [vmem:[%s2928_s0 + $0xac] ss:$12 sps:$4 sm:$0xff]   ;;  %2011 = vset.pattern.permute.xlu0 %v2251_v0  ;;  %v2014_v2 = vld [vmem:[%s2928_s0 + $0xb0] ss:$12 sps:$4 sm:$0xff]   ;;  %v2015_v3 = vld [vmem:[%s2928_s0 + $0xa8] ss:$12 sps:$4 sm:$0xff]  }
   0x2   :  { %332 = vmatprep.subr.bf16.mxu0 %v2012_v1  ;;  %376 = vmatpush1.bf16.msra.mxu1 %v2014_v2  ;;  %v2016_v4 = vld [vmem:[%s2928_s0 + $0x94] ss:$12 sps:$4 sm:$0xff]   ;;  %v2018_v5 = vld [vmem:[%s2928_s0 + $0x98] ss:$12 sps:$4 sm:$0xff]   ;;  %v2019_v6 = vld [vmem:[%s2928_s0 + $0x90] ss:$12 sps:$4 sm:$0xff]  }
   0x3   :  { %333 = vmatpush1.bf16.msra.mxu0 %v2015_v3  ;;  %377 = vmatprep.subr.bf16.mxu1 %v2251_v0  ;;  %v2020_v7 = vld [vmem:[%s2928_s0 + $0x7c] ss:$12 sps:$4 sm:$0xff]   ;;  %v2022_v8 = vld [vmem:[%s2928_s0 + $0x80] ss:$12 sps:$4 sm:$0xff]   ;;  %v2023_v9 = vld [vmem:[%s2928_s0 + $0x78] ss:$12 sps:$4 sm:$0xff]  }
   0x4   :  { %334 = vmatprep.subr.bf16.mxu0 %v2016_v4  ;;  %v2024_v10 = vld [vmem:[%s2928_s0 + $0x64] ss:$12 sps:$4 sm:$0xff]   ;;  %v2026_v11 = vld [vmem:[%s2928_s0 + $0x68] ss:$12 sps:$4 sm:$0xff]   ;;  %v2027_v12 = vld [vmem:[%s2928_s0 + $0x60] ss:$12 sps:$4 sm:$0xff]  }
   0x5   :  { %v2028_v13 = vld [vmem:[%s2928_s0 + $0x4c] ss:$12 sps:$4 sm:$0xff]   ;;  %v2030_v14 = vld [vmem:[%s2928_s0 + $0x50] ss:$12 sps:$4 sm:$0xff]   ;;  %v2031_v15 = vld [vmem:[%s2928_s0 + $0x48] ss:$12 sps:$4 sm:$0xff]  }
   0x6   :  { %378 = vmatpush1.bf16.msra.mxu1 %v2018_v5  ;;  %v2032_v16 = vld [vmem:[%s2928_s0 + $0x34] ss:$12 sps:$4 sm:$0xff]   ;;  %v2034_v17 = vld [vmem:[%s2928_s0 + $0x38] ss:$12 sps:$4 sm:$0xff]   ;;  %v2035_v18 = vld [vmem:[%s2928_s0 + $0x30] ss:$12 sps:$4 sm:$0xff]  }
   0x7   :  { %335 = vmatpush1.bf16.msra.mxu0 %v2019_v6  ;;  %379 = vmatprep.subr.bf16.mxu1 %v2251_v0  ;;  %v2036_v19 = vld [vmem:[%s2928_s0 + $0x1c] ss:$12 sps:$4 sm:$0xff]   ;;  %v73_v20 = vld [vmem:[%s2928_s0 + $0x150] sm:$0x11]  ;;  %v2038_v21 = vld [vmem:[%s2928_s0 + $0x20] ss:$12 sps:$4 sm:$0xff]  }
   0x8   :  { %336 = vmatprep.subr.bf16.mxu0 %v2020_v7  ;;  %v2039_v22 = vld [vmem:[%s2928_s0 + $0x18] ss:$12 sps:$4 sm:$0xff]   ;;  %v1683_v24 = vcombine.high %v73_v20, %v73_v20  ;;  %v2042_v25 = vld [vmem:[%s2928_s0 + $0x8] ss:$12 sps:$4 sm:$0xff]   ;;  %v2353_v26 = vsel %vm320_vm0, 65535, %v2251_v0  ;;  %v1682_v29 = vcombine.low %v73_v20, %v73_v20 }
   0x9   :  { %v2040_v23 = vld [vmem:[%s2928_s0 + $0x4] ss:$12 sps:$4 sm:$0xff]   ;;  %v2045_v27 = vld [vmem:[%s2928_s0 + $0x158] ss:$0 sps:$4 sm:$0x11]  }
   0xa   :  { %380 = vmatpush1.bf16.msra.mxu1 %v2022_v8  ;;  %v2043_v28 = vld [vmem:[%s2928_s0] ss:$12 sps:$4 sm:$0xff]   ;;  %v327_v30 = vand.u32 %v1683_v24, %v2353_v26  ;;  %v330_v31 = vand.u32 %v2045_v27, %v2353_v26  ;;  %v324_v32 = vand.u32 %v1682_v29, %v2353_v26  ;;  %v2047_v33 = vld [vmem:[%s2928_s0 + $0x13c] ss:$12 sps:$4 sm:$0xff]   ;;  %v2050_v36 = vld [vmem:[%s2928_s0 + $0x138] ss:$12 sps:$4 sm:$0xff]  }
   0xb   :  { %337 = vmatpush1.bf16.msra.mxu0 %v2023_v9  ;;  %381 = vmatprep.subr.bf16.mxu1 %v2251_v0  ;;  %v2372_v34 = vld [vmem:[%s2929_s1 + $0x4] ss:$8 sps:$4 sm:$0x3f]   ;;  %v2053_v38 = vld [vmem:[%s2928_s0 + $0x128] ss:$12 sps:$4 sm:$0xff]  }
   0xc   :  { %338 = vmatprep.subr.bf16.mxu0 %v2024_v10  ;;  %v2049_v35 = vld [vmem:[%s2928_s0 + $0x140] ss:$12 sps:$4 sm:$0xff]   ;;  %v2051_v37 = vld [vmem:[%s2928_s0 + $0x124] ss:$12 sps:$4 sm:$0xff]   ;;  %1686 = vmatprep.mubr.msk.bf16.mxu1 %vm316_vm1, %v2372_v34  ;;  %v2058_v42 = vld [vmem:[%s2928_s0 + $0x108] ss:$12 sps:$4 sm:$0xff]  }
   0xd   :  { %1685 = vmatprep.mubr.msk.bf16.mxu0 %vm316_vm1, %v2372_v34  ;;  %v2054_v39 = vld [vmem:[%s2928_s0 + $0x120] ss:$12 sps:$4 sm:$0xff]   ;;  %v2057_v41 = vld [vmem:[%s2928_s0 + $0x110] ss:$12 sps:$4 sm:$0xff]   ;;  %v2061_v44 = vld [vmem:[%s2928_s0 + $0xf8] ss:$12 sps:$4 sm:$0xff]  }
   0xe   :  { %382 = vmatpush1.bf16.msra.mxu1 %v2026_v11  ;;  %v2055_v40 = vld [vmem:[%s2928_s0 + $0x10c] ss:$12 sps:$4 sm:$0xff]   ;;  %v2059_v43 = vld [vmem:[%s2928_s0 + $0xf4] ss:$12 sps:$4 sm:$0xff]   ;;  %v2062_v45 = vld [vmem:[%s2928_s0 + $0xf0] ss:$12 sps:$4 sm:$0xff]  }
   0xf   :  { %339 = vmatpush1.bf16.msra.mxu0 %v2027_v12  ;;  %383 = vmatprep.subr.bf16.mxu1 %v2251_v0  ;;  %v2063_v46 = vld [vmem:[%s2928_s0 + $0xdc] ss:$12 sps:$4 sm:$0xff]   ;;  %v2065_v47 = vld [vmem:[%s2928_s0 + $0xe0] ss:$12 sps:$4 sm:$0xff]   ;;  %v2066_v48 = vld [vmem:[%s2928_s0 + $0xd8] ss:$12 sps:$4 sm:$0xff]  }
  0x10   :  { %340 = vmatprep.subr.bf16.mxu0 %v2028_v13  ;;  %v2067_v49 = vld [vmem:[%s2928_s0 + $0xc4] ss:$12 sps:$4 sm:$0xff]   ;;  %v2069_v50 = vld [vmem:[%s2928_s0 + $0xc8] ss:$12 sps:$4 sm:$0xff]   ;;  %v2070_v51 = vld [vmem:[%s2928_s0 + $0xc0] ss:$12 sps:$4 sm:$0xff]  }
  0x11   :  { %v2438_v52 = vld [vmem:[%s2929_s1] ss:$8 sps:$4 sm:$0x3f]   ;;  %v2077_v54 = vld [vmem:[%s2928_s0 + $0x20c] ss:$12 sps:$4 sm:$0xff]  }
  0x12   :  { %384 = vmatpush1.bf16.msra.mxu1 %v2030_v14  ;;  %v2076_v53 = vld [vmem:[%s2928_s0 + $0x208] ss:$12 sps:$4 sm:$0xff]   ;;  %v2074_v55 = vld [vmem:[%s2928_s0 + $0x204] ss:$12 sps:$4 sm:$0xff]   ;;  %v2078_v58 = vld [vmem:[%s2928_s0 + $0x1ec] ss:$12 sps:$4 sm:$0xff]  }
  0x13   :  { %341 = vmatpush1.bf16.msra.mxu0 %v2031_v15  ;;  %385 = vmatprep.subr.bf16.mxu1 %v2251_v0  ;;  %v2080_v56 = vld [vmem:[%s2928_s0 + $0x1f0] ss:$12 sps:$4 sm:$0xff]   ;;  %v2081_v57 = vld [vmem:[%s2928_s0 + $0x1f4] ss:$12 sps:$4 sm:$0xff]   ;;  %v2084_v59 = vld [vmem:[%s2928_s0 + $0x1d8] ss:$12 sps:$4 sm:$0xff]  }
  0x14   :  { %342 = vmatprep.subr.bf16.mxu0 %v2032_v16  ;;  %v2085_v60 = vld [vmem:[%s2928_s0 + $0x1dc] ss:$12 sps:$4 sm:$0xff]   ;;  %v2082_v61 = vld [vmem:[%s2928_s0 + $0x1d4] ss:$12 sps:$4 sm:$0xff]   ;;  %v2089_v63 = vld [vmem:[%s2928_s0 + $0x1c4] ss:$12 sps:$4 sm:$0xff]  }
  0x15   :  { %v2088_v62 = vld [vmem:[%s2928_s0 + $0x1c0] ss:$12 sps:$4 sm:$0xff]   ;;  %v2086_v1 = vld [vmem:[%s2928_s0 + $0x1bc] ss:$12 sps:$4 sm:$0xff]   ;;  %v2090_v4 = vld [vmem:[%s2928_s0 + $0x1a4] ss:$12 sps:$4 sm:$0xff]  }
  0x16   :  { %386 = vmatpush1.bf16.msra.mxu1 %v2034_v17  ;;  %v2092_v2 = vld [vmem:[%s2928_s0 + $0x1a8] ss:$12 sps:$4 sm:$0xff]   ;;  %v2093_v3 = vld [vmem:[%s2928_s0 + $0x1ac] ss:$12 sps:$4 sm:$0xff]   ;;  %v2096_v5 = vld [vmem:[%s2928_s0 + $0x190] ss:$12 sps:$4 sm:$0xff]  }
  0x17   :  { %343 = vmatpush1.bf16.msra.mxu0 %v2035_v18  ;;  %387 = vmatprep.subr.bf16.mxu1 %v2251_v0  ;;  %v2097_v6 = vld [vmem:[%s2928_s0 + $0x194] ss:$12 sps:$4 sm:$0xff]   ;;  %v2094_v7 = vld [vmem:[%s2928_s0 + $0x18c] ss:$12 sps:$4 sm:$0xff]   ;;  %v2101_v10 = vld [vmem:[%s2928_s0 + $0x17c] ss:$12 sps:$4 sm:$0xff]  }
  0x18   :  { %344 = vmatprep.subr.bf16.mxu0 %v2036_v19  ;;  %v2100_v8 = vld [vmem:[%s2928_s0 + $0x178] ss:$12 sps:$4 sm:$0xff]   ;;  %v1743_v9 = vld [vmem:[%s2928_s0 + $0x2ac] sm:$0x11]  ;;  %v2098_v11 = vld [vmem:[%s2928_s0 + $0x174] ss:$12 sps:$4 sm:$0xff]  }
  0x19   :  { %v2104_v12 = vld [vmem:[%s2928_s0 + $0x160] ss:$12 sps:$4 sm:$0xff]   ;;  %v1788_v13 = vcombine.high %v1743_v9, %v1743_v9  ;;  %v2105_v14 = vld [vmem:[%s2928_s0 + $0x164] ss:$12 sps:$4 sm:$0xff]   ;;  %v2102_v16 = vld [vmem:[%s2928_s0 + $0x15c] ss:$12 sps:$4 sm:$0xff]   ;;  %v1787_v17 = vcombine.low %v1743_v9, %v1743_v9 }
  0x1a   :  { %388 = vmatpush1.bf16.msra.mxu1 %v2038_v21  ;;  %v2108_v15 = vld [vmem:[%s2928_s0 + $0x2b4] ss:$0 sps:$4 sm:$0x11]   ;;  %v2111_v21 = vld [vmem:[%s2928_s0 + $0x298] ss:$12 sps:$4 sm:$0xff]  }
  0x1b   :  { %345 = vmatpush1.bf16.msra.mxu0 %v2039_v22  ;;  %389 = vmatprep.subr.bf16.mxu1 %v2251_v0  ;;  %v711_v18 = vand.u32 %v1788_v13, %v2353_v26  ;;  %v714_v19 = vand.u32 %v2108_v15, %v2353_v26  ;;  %v708_v20 = vand.u32 %v1787_v17, %v2353_v26  ;;  %v2112_v22 = vld [vmem:[%s2928_s0 + $0x29c] ss:$12 sps:$4 sm:$0xff]   ;;  %v2115_v24 = vld [vmem:[%s2928_s0 + $0x280] ss:$12 sps:$4 sm:$0xff]   ;;  %v2178_v17 = vld [vmem:[%s2928_s0 + $0x3c4] ss:$12 sps:$4 sm:$0xff]  }
  0x1c   :  { %346 = vmatprep.subr.bf16.mxu0 %v2040_v23  ;;  %v2109_v23 = vld [vmem:[%s2928_s0 + $0x294] ss:$12 sps:$4 sm:$0xff]   ;;  %v2113_v27 = vld [vmem:[%s2928_s0 + $0x27c] ss:$12 sps:$4 sm:$0xff]   ;;  %v2120_v29 = vld [vmem:[%s2928_s0 + $0x26c] ss:$12 sps:$4 sm:$0xff]  }
  0x1d   :  { %v2168_v13 = vld [vmem:[%s2928_s0 + $0x3f0] ss:$12 sps:$4 sm:$0xff]   ;;  %v2175_v15 = vld [vmem:[%s2928_s0 + $0x3e0] ss:$12 sps:$4 sm:$0xff]  }
  0x1e   :  { %390 = vmatpush1.bf16.msra.mxu1 %v2042_v25  ;;  %v2116_v25 = vld [vmem:[%s2928_s0 + $0x284] ss:$12 sps:$4 sm:$0xff]  }
  0x1f   :  { %347 = vmatpush1.bf16.msra.mxu0 %v2043_v28  ;;  %393 = vmatprep.subr.bf16.mxu1 %v2251_v0  ;;  %v2119_v28 = vld [vmem:[%s2928_s0 + $0x268] ss:$12 sps:$4 sm:$0xff]  }
  0x20   :  { %350 = vmatprep.subr.bf16.mxu0 %v327_v30  ;;  %v2117_v30 = vld [vmem:[%s2928_s0 + $0x264] ss:$12 sps:$4 sm:$0xff]  }
  0x22   :  { %394 = vmatpush2.bf16.msra.mxu1 %v330_v31  ;;  %v2123_v31 = vld [vmem:[%s2928_s0 + $0x250] ss:$12 sps:$4 sm:$0xff]  }
  0x23   :  { %351 = vmatpush2.bf16.msra.mxu0 %v324_v32  ;;  %395 = vmatprep.subr.bf16.mxu1 %v2251_v0  ;;  %v2124_v32 = vld [vmem:[%s2928_s0 + $0x254] ss:$12 sps:$4 sm:$0xff]  }
  0x24   :  { %352 = vmatprep.subr.bf16.mxu0 %v2047_v33  ;;  %v2121_v33 = vld [vmem:[%s2928_s0 + $0x24c] ss:$12 sps:$4 sm:$0xff]  }
  0x26   :  { %396 = vmatpush2.bf16.msra.mxu1 %v2049_v35  ;;  %v2127_v35 = vld [vmem:[%s2928_s0 + $0x238] ss:$12 sps:$4 sm:$0xff]  }
  0x27   :  { %353 = vmatpush2.bf16.msra.mxu0 %v2050_v36  ;;  %397 = vmatprep.subr.bf16.mxu1 %v2251_v0  ;;  %v2128_v36 = vld [vmem:[%s2928_s0 + $0x23c] ss:$12 sps:$4 sm:$0xff]  }
  0x28   :  { %354 = vmatprep.subr.bf16.mxu0 %v2051_v37  ;;  %v2125_v37 = vld [vmem:[%s2928_s0 + $0x234] ss:$12 sps:$4 sm:$0xff]  }
  0x2a   :  { %398 = vmatpush2.bf16.msra.mxu1 %v2053_v38  ;;  %v2131_v38 = vld [vmem:[%s2928_s0 + $0x220] ss:$12 sps:$4 sm:$0xff]  }
  0x2b   :  { %355 = vmatpush2.bf16.msra.mxu0 %v2054_v39  ;;  %399 = vmatprep.subr.bf16.mxu1 %v2251_v0  ;;  %v2132_v39 = vld [vmem:[%s2928_s0 + $0x224] ss:$12 sps:$4 sm:$0xff]  }
  0x2c   :  { %356 = vmatprep.subr.bf16.mxu0 %v2055_v40  ;;  %v2129_v40 = vld [vmem:[%s2928_s0 + $0x21c] ss:$12 sps:$4 sm:$0xff]  }
  0x2e   :  { %400 = vmatpush2.bf16.msra.mxu1 %v2057_v41  ;;  %v2135_v41 = vld [vmem:[%s2928_s0 + $0x364] ss:$12 sps:$4 sm:$0xff]  }
  0x2f   :  { %357 = vmatpush2.bf16.msra.mxu0 %v2058_v42  ;;  %401 = vmatprep.subr.bf16.mxu1 %v2251_v0  ;;  %v2136_v42 = vld [vmem:[%s2928_s0 + $0x368] ss:$12 sps:$4 sm:$0xff]  }
  0x30   :  { %358 = vmatprep.subr.bf16.mxu0 %v2059_v43  ;;  %v2133_v43 = vld [vmem:[%s2928_s0 + $0x360] ss:$12 sps:$4 sm:$0xff]  }
  0x32   :  { %402 = vmatpush2.bf16.msra.mxu1 %v2061_v44  ;;  %v2139_v44 = vld [vmem:[%s2928_s0 + $0x34c] ss:$12 sps:$4 sm:$0xff]  }
  0x33   :  { %359 = vmatpush2.bf16.msra.mxu0 %v2062_v45  ;;  %403 = vmatprep.subr.bf16.mxu1 %v2251_v0  ;;  %v2140_v45 = vld [vmem:[%s2928_s0 + $0x350] ss:$12 sps:$4 sm:$0xff]  }
  0x34   :  { %360 = vmatprep.subr.bf16.mxu0 %v2063_v46  ;;  %v2137_v46 = vld [vmem:[%s2928_s0 + $0x348] ss:$12 sps:$4 sm:$0xff]  }
  0x36   :  { %404 = vmatpush2.bf16.msra.mxu1 %v2065_v47  ;;  %v2143_v47 = vld [vmem:[%s2928_s0 + $0x334] ss:$12 sps:$4 sm:$0xff]  }
  0x37   :  { %361 = vmatpush2.bf16.msra.mxu0 %v2066_v48  ;;  %405 = vmatprep.subr.bf16.mxu1 %v2251_v0  ;;  %v2144_v48 = vld [vmem:[%s2928_s0 + $0x338] ss:$12 sps:$4 sm:$0xff]  }
  0x38   :  { %362 = vmatprep.subr.bf16.mxu0 %v2067_v49  ;;  %v2141_v49 = vld [vmem:[%s2928_s0 + $0x330] ss:$12 sps:$4 sm:$0xff]  }
  0x3a   :  { %406 = vmatpush2.bf16.msra.mxu1 %v2069_v50  ;;  %v2147_v50 = vld [vmem:[%s2928_s0 + $0x31c] ss:$12 sps:$4 sm:$0xff]  }
  0x3b   :  { %363 = vmatpush2.bf16.msra.mxu0 %v2070_v51  ;;  %759 = vmatprep.subr.bf16.mxu1 %v2251_v0  ;;  %v2148_v51 = vld [vmem:[%s2928_s0 + $0x320] ss:$12 sps:$4 sm:$0xff]  }
  0x3c   :  { %716 = vmatprep.subr.bf16.mxu0 %v2076_v53  ;;  %v2145_v53 = vld [vmem:[%s2928_s0 + $0x318] ss:$12 sps:$4 sm:$0xff]  }
  0x3d   :  { %408 = vmatmul.mubr.bf16.vlgmr.msra.gmra.mxu1 %v2438_v52 }
  0x3e   :  { %365 = vmatmul.mubr.bf16.vlgmr.msra.gmra.mxu0 %v2438_v52  ;;  %760 = vmatpush1.bf16.msra.mxu1 %v2077_v54  ;;  %v2151_v54 = vld [vmem:[%s2928_s0 + $0x304] ss:$12 sps:$4 sm:$0xff]  }
  0x3f   :  { %717 = vmatpush1.bf16.msra.mxu0 %v2074_v55  ;;  %761 = vmatprep.subr.bf16.mxu1 %v2251_v0  ;;  %v2152_v55 = vld [vmem:[%s2928_s0 + $0x308] ss:$12 sps:$4 sm:$0xff]  }
  0x40   :  { %718 = vmatprep.subr.bf16.mxu0 %v2080_v56  ;;  %1791 = vmatprep.mubr.msk.bf16.mxu1 %vm316_vm1, %v2372_v34  ;;  %v2149_v56 = vld [vmem:[%s2928_s0 + $0x300] ss:$12 sps:$4 sm:$0xff]  }
  0x41   :  { %1790 = vmatprep.mubr.msk.bf16.mxu0 %vm316_vm1, %v2372_v34 }
  0x42   :  { %762 = vmatpush1.bf16.msra.mxu1 %v2081_v57  ;;  %v1586_v57 = vld [vmem:[%s2930_s2] sm:$0xff] }
  0x43   :  { %719 = vmatpush1.bf16.msra.mxu0 %v2078_v58  ;;  %763 = vmatprep.subr.bf16.mxu1 %v2251_v0  ;;  %v2155_v58 = vld [vmem:[%s2928_s0 + $0x2ec] ss:$12 sps:$4 sm:$0xff]  }
  0x44   :  { %720 = vmatprep.subr.bf16.mxu0 %v2084_v59  ;;  %1590 = vperm.xlu0 %2011, %v1586_v57   ;;  %v2156_v59 = vld [vmem:[%s2928_s0 + $0x2f0] ss:$12 sps:$4 sm:$0xff]   ;;  %v2226_v57 = vld [vmem:[%s2928_s0 + $0x56c] ss:$0 sps:$4 sm:$0x11]  }
  0x46   :  { %764 = vmatpush1.bf16.msra.mxu1 %v2085_v60  ;;  %v2153_v60 = vld [vmem:[%s2928_s0 + $0x2e8] ss:$12 sps:$4 sm:$0xff]  }
  0x47   :  { %721 = vmatpush1.bf16.msra.mxu0 %v2082_v61  ;;  %765 = vmatprep.subr.bf16.mxu1 %v2251_v0  ;;  %v2159_v61 = vld [vmem:[%s2928_s0 + $0x2d4] ss:$12 sps:$4 sm:$0xff]  }
  0x48   :  { %722 = vmatprep.subr.bf16.mxu0 %v2088_v62  ;;  %v1848_v62 = vld [vmem:[%s2928_s0 + $0x408] sm:$0x11] }
  0x4a   :  { %766 = vmatpush1.bf16.msra.mxu1 %v2089_v63  ;;  %v2160_v63 = vld [vmem:[%s2928_s0 + $0x2d8] ss:$12 sps:$4 sm:$0xff]  }
  0x4b   :  { %723 = vmatpush1.bf16.msra.mxu0 %v2086_v1  ;;  %767 = vmatprep.subr.bf16.mxu1 %v2251_v0  ;;  %v2157_v1 = vld [vmem:[%s2928_s0 + $0x2d0] ss:$12 sps:$4 sm:$0xff]  }
  0x4c   :  { %724 = vmatprep.subr.bf16.mxu0 %v2092_v2  ;;  %v2163_v2 = vld [vmem:[%s2928_s0 + $0x2bc] ss:$12 sps:$4 sm:$0xff]  }
  0x4e   :  { %768 = vmatpush1.bf16.msra.mxu1 %v2093_v3  ;;  %v1893_v3 = vcombine.high %v1848_v62, %v1848_v62 }
  0x4f   :  { %725 = vmatpush1.bf16.msra.mxu0 %v2090_v4  ;;  %769 = vmatprep.subr.bf16.mxu1 %v2251_v0  ;;  %v2164_v4 = vld [vmem:[%s2928_s0 + $0x2c0] ss:$12 sps:$4 sm:$0xff]  }
  0x50   :  { %726 = vmatprep.subr.bf16.mxu0 %v2096_v5  ;;  %v2167_v5 = vld [vmem:[%s2928_s0 + $0x410] ss:$0 sps:$4 sm:$0x11]  }
  0x51   :  { %v1104_v9 = vand.u32 %v2167_v5, %v2353_v26  ;;  %v2237_v5 = vld [vmem:[%s2928_s0 + $0x520] ss:$12 sps:$4 sm:$0xff]  }
  0x52   :  { %770 = vmatpush1.bf16.msra.mxu1 %v2097_v6  ;;  %v2161_v6 = vld [vmem:[%s2928_s0 + $0x2b8] ss:$12 sps:$4 sm:$0xff]  }
  0x53   :  { %727 = vmatpush1.bf16.msra.mxu0 %v2094_v7  ;;  %771 = vmatprep.subr.bf16.mxu1 %v2251_v0  ;;  %v1892_v7 = vcombine.low %v1848_v62, %v1848_v62 }
  0x54   :  { %728 = vmatprep.subr.bf16.mxu0 %v2100_v8  ;;  %v1101_v8 = vand.u32 %v1893_v3, %v2353_v26  ;;  %v2234_v3 = vld [vmem:[%s2928_s0 + $0x53c] ss:$12 sps:$4 sm:$0xff]  }
  0x56   :  { %772 = vmatpush1.bf16.msra.mxu1 %v2101_v10  ;;  %v1098_v10 = vand.u32 %v1892_v7, %v2353_v26  ;;  %v2235_v7 = vld [vmem:[%s2928_s0 + $0x51c] ss:$12 sps:$4 sm:$0xff]  }
  0x57   :  { %729 = vmatpush1.bf16.msra.mxu0 %v2098_v11  ;;  %773 = vmatprep.subr.bf16.mxu1 %v2251_v0  ;;  %v2170_v11 = vld [vmem:[%s2928_s0 + $0x3f4] ss:$12 sps:$4 sm:$0xff]  }
  0x58   :  { %730 = vmatprep.subr.bf16.mxu0 %v2104_v12  ;;  %v2171_v12 = vld [vmem:[%s2928_s0 + $0x3f8] ss:$12 sps:$4 sm:$0xff]  }
  0x5a   :  { %774 = vmatpush1.bf16.msra.mxu1 %v2105_v14  ;;  %v2174_v14 = vld [vmem:[%s2928_s0 + $0x3dc] ss:$12 sps:$4 sm:$0xff]  }
  0x5b   :  { %731 = vmatpush1.bf16.msra.mxu0 %v2102_v16  ;;  %777 = vmatprep.subr.bf16.mxu1 %v2251_v0  ;;  %v2172_v16 = vld [vmem:[%s2928_s0 + $0x3d8] ss:$12 sps:$4 sm:$0xff]  }
  0x5c   :  { %734 = vmatprep.subr.bf16.mxu0 %v711_v18  ;;  %v2179_v18 = vld [vmem:[%s2928_s0 + $0x3c8] ss:$12 sps:$4 sm:$0xff]  }
  0x5e   :  { %778 = vmatpush2.bf16.msra.mxu1 %v714_v19  ;;  %v2176_v19 = vld [vmem:[%s2928_s0 + $0x3c0] ss:$12 sps:$4 sm:$0xff]  }
  0x5f   :  { %735 = vmatpush2.bf16.msra.mxu0 %v708_v20  ;;  %779 = vmatprep.subr.bf16.mxu1 %v2251_v0  ;;  %v2182_v20 = vld [vmem:[%s2928_s0 + $0x3ac] ss:$12 sps:$4 sm:$0xff]  }
  0x60   :  { %736 = vmatprep.subr.bf16.mxu0 %v2111_v21  ;;  %v2183_v21 = vld [vmem:[%s2928_s0 + $0x3b0] ss:$12 sps:$4 sm:$0xff]  }
  0x62   :  { %780 = vmatpush2.bf16.msra.mxu1 %v2112_v22  ;;  %v2180_v22 = vld [vmem:[%s2928_s0 + $0x3a8] ss:$12 sps:$4 sm:$0xff]  }
  0x63   :  { %737 = vmatpush2.bf16.msra.mxu0 %v2109_v23  ;;  %781 = vmatprep.subr.bf16.mxu1 %v2251_v0  ;;  %v2186_v23 = vld [vmem:[%s2928_s0 + $0x394] ss:$12 sps:$4 sm:$0xff]  }
  0x64   :  { %738 = vmatprep.subr.bf16.mxu0 %v2115_v24  ;;  %v2187_v24 = vld [vmem:[%s2928_s0 + $0x398] ss:$12 sps:$4 sm:$0xff]  }
  0x66   :  { %782 = vmatpush2.bf16.msra.mxu1 %v2116_v25  ;;  %v2184_v25 = vld [vmem:[%s2928_s0 + $0x390] ss:$12 sps:$4 sm:$0xff]  }
  0x67   :  { %739 = vmatpush2.bf16.msra.mxu0 %v2113_v27  ;;  %783 = vmatprep.subr.bf16.mxu1 %v2251_v0  ;;  %v2190_v27 = vld [vmem:[%s2928_s0 + $0x37c] ss:$12 sps:$4 sm:$0xff]  }
  0x68   :  { %740 = vmatprep.subr.bf16.mxu0 %v2119_v28  ;;  %v2191_v28 = vld [vmem:[%s2928_s0 + $0x380] ss:$12 sps:$4 sm:$0xff]  }
  0x6a   :  { %784 = vmatpush2.bf16.msra.mxu1 %v2120_v29  ;;  %v2188_v29 = vld [vmem:[%s2928_s0 + $0x378] ss:$12 sps:$4 sm:$0xff]  }
  0x6b   :  { %741 = vmatpush2.bf16.msra.mxu0 %v2117_v30  ;;  %785 = vmatprep.subr.bf16.mxu1 %v2251_v0  ;;  %v2194_v30 = vld [vmem:[%s2928_s0 + $0x4c0] ss:$12 sps:$4 sm:$0xff]  }
  0x6c   :  { %742 = vmatprep.subr.bf16.mxu0 %v2123_v31  ;;  %v2195_v31 = vld [vmem:[%s2928_s0 + $0x4c4] ss:$12 sps:$4 sm:$0xff]  }
  0x6e   :  { %786 = vmatpush2.bf16.msra.mxu1 %v2124_v32  ;;  %v2192_v32 = vld [vmem:[%s2928_s0 + $0x4bc] ss:$12 sps:$4 sm:$0xff]  }
  0x6f   :  { %743 = vmatpush2.bf16.msra.mxu0 %v2121_v33  ;;  %787 = vmatprep.subr.bf16.mxu1 %v2251_v0  ;;  %v2198_v33 = vld [vmem:[%s2928_s0 + $0x4a8] ss:$12 sps:$4 sm:$0xff]  }
  0x70   :  { %744 = vmatprep.subr.bf16.mxu0 %v2127_v35  ;;  %v2199_v35 = vld [vmem:[%s2928_s0 + $0x4ac] ss:$12 sps:$4 sm:$0xff]  }
  0x72   :  { %788 = vmatpush2.bf16.msra.mxu1 %v2128_v36  ;;  %v2196_v36 = vld [vmem:[%s2928_s0 + $0x4a4] ss:$12 sps:$4 sm:$0xff]  }
  0x73   :  { %745 = vmatpush2.bf16.msra.mxu0 %v2125_v37  ;;  %789 = vmatprep.subr.bf16.mxu1 %v2251_v0  ;;  %v2202_v37 = vld [vmem:[%s2928_s0 + $0x490] ss:$12 sps:$4 sm:$0xff]  }
  0x74   :  { %746 = vmatprep.subr.bf16.mxu0 %v2131_v38  ;;  %v2203_v38 = vld [vmem:[%s2928_s0 + $0x494] ss:$12 sps:$4 sm:$0xff]  }
  0x76   :  { %790 = vmatpush2.bf16.msra.mxu1 %v2132_v39  ;;  %v1587_v39 = vld [vmem:[%s2930_s2 + $0x8] sm:$0xf] }
  0x77   :  { %747 = vmatpush2.bf16.msra.mxu0 %v2129_v40  ;;  %1149 = vmatprep.subr.bf16.mxu1 %v2251_v0  ;;  %v2200_v40 = vld [vmem:[%s2928_s0 + $0x48c] ss:$12 sps:$4 sm:$0xff]  }
  0x78   :  { %1106 = vmatprep.subr.bf16.mxu0 %v2135_v41  ;;  %1595 = vperm.xlu0 %2011, %v1587_v39   ;;  %v2207_v41 = vld [vmem:[%s2928_s0 + $0x47c] ss:$12 sps:$4 sm:$0xff]  }
  0x79   :  { %792 = vmatmul.mubr.bf16.vlgmr.msra.gmra.mxu1 %v2438_v52 }
  0x7a   :  { %749 = vmatmul.mubr.bf16.vlgmr.msra.gmra.mxu0 %v2438_v52  ;;  %1150 = vmatpush1.bf16.msra.mxu1 %v2136_v42  ;;  %v2204_v42 = vld [vmem:[%s2928_s0 + $0x474] ss:$12 sps:$4 sm:$0xff]  }
  0x7b   :  { %1107 = vmatpush1.bf16.msra.mxu0 %v2133_v43  ;;  %1151 = vmatprep.subr.bf16.mxu1 %v2251_v0  ;;  %v2210_v43 = vld [vmem:[%s2928_s0 + $0x460] ss:$12 sps:$4 sm:$0xff]  }
  0x7c   :  { %1108 = vmatprep.subr.bf16.mxu0 %v2139_v44  ;;  %1896 = vmatprep.mubr.msk.bf16.mxu1 %vm316_vm1, %v2372_v34  ;;  %v2211_v44 = vld [vmem:[%s2928_s0 + $0x464] ss:$12 sps:$4 sm:$0xff]  }
  0x7d   :  { %1895 = vmatprep.mubr.msk.bf16.mxu0 %vm316_vm1, %v2372_v34 }
  0x7e   :  { %1152 = vmatpush1.bf16.msra.mxu1 %v2140_v45  ;;  %v2208_v45 = vld [vmem:[%s2928_s0 + $0x45c] ss:$12 sps:$4 sm:$0xff]  }
  0x7f   :  { %1109 = vmatpush1.bf16.msra.mxu0 %v2137_v46  ;;  %1153 = vmatprep.subr.bf16.mxu1 %v2251_v0  ;;  %v2214_v46 = vld [vmem:[%s2928_s0 + $0x448] ss:$12 sps:$4 sm:$0xff]  }
  0x80   :  { %1110 = vmatprep.subr.bf16.mxu0 %v2143_v47  ;;  %v2215_v47 = vld [vmem:[%s2928_s0 + $0x44c] ss:$12 sps:$4 sm:$0xff]  }
  0x82   :  { %1154 = vmatpush1.bf16.msra.mxu1 %v2144_v48  ;;  %v2212_v48 = vld [vmem:[%s2928_s0 + $0x444] ss:$12 sps:$4 sm:$0xff]  }
  0x83   :  { %1111 = vmatpush1.bf16.msra.mxu0 %v2141_v49  ;;  %1155 = vmatprep.subr.bf16.mxu1 %v2251_v0  ;;  %v2218_v49 = vld [vmem:[%s2928_s0 + $0x430] ss:$12 sps:$4 sm:$0xff]  }
  0x84   :  { %1112 = vmatprep.subr.bf16.mxu0 %v2147_v50  ;;  %v1953_v50 = vld [vmem:[%s2928_s0 + $0x564] sm:$0x11] }
  0x86   :  { %1156 = vmatpush1.bf16.msra.mxu1 %v2148_v51  ;;  %v2219_v51 = vld [vmem:[%s2928_s0 + $0x434] ss:$12 sps:$4 sm:$0xff]  }
  0x87   :  { %1113 = vmatpush1.bf16.msra.mxu0 %v2145_v53  ;;  %1157 = vmatprep.subr.bf16.mxu1 %v2251_v0  ;;  %v2216_v53 = vld [vmem:[%s2928_s0 + $0x42c] ss:$12 sps:$4 sm:$0xff]  }
  0x88   :  { %1114 = vmatprep.subr.bf16.mxu0 %v2151_v54  ;;  %v2222_v54 = vld [vmem:[%s2928_s0 + $0x418] ss:$12 sps:$4 sm:$0xff]  }
  0x8a   :  { %1158 = vmatpush1.bf16.msra.mxu1 %v2152_v55  ;;  %v1998_v55 = vcombine.high %v1953_v50, %v1953_v50 }
  0x8b   :  { %1115 = vmatpush1.bf16.msra.mxu0 %v2149_v56  ;;  %1159 = vmatprep.subr.bf16.mxu1 %v2251_v0  ;;  %v2223_v56 = vld [vmem:[%s2928_s0 + $0x41c] ss:$12 sps:$4 sm:$0xff]  }
  0x8c   :  { %1116 = vmatprep.subr.bf16.mxu0 %v2155_v58  ;;  %v2220_v58 = vld [vmem:[%s2928_s0 + $0x414] ss:$12 sps:$4 sm:$0xff]  }
  0x8e   :  { %1160 = vmatpush1.bf16.msra.mxu1 %v2156_v59  ;;  %v1997_v59 = vcombine.low %v1953_v50, %v1953_v50 }
  0x8f   :  { %1117 = vmatpush1.bf16.msra.mxu0 %v2153_v60  ;;  %1161 = vmatprep.subr.bf16.mxu1 %v2251_v0  ;;  %v1491_v60 = vand.u32 %v1998_v55, %v2353_v26 }
  0x90   :  { %1118 = vmatprep.subr.bf16.mxu0 %v2159_v61  ;;  %v1494_v61 = vand.u32 %v2226_v57, %v2353_v26  ;;  %v1488_v62 = vand.u32 %v1997_v59, %v2353_v26  ;;  %v2233_v26 = vld [vmem:[%s2928_s0 + $0x538] ss:$12 sps:$4 sm:$0xff]  }
  0x92   :  { %1162 = vmatpush1.bf16.msra.mxu1 %v2160_v63  ;;  %v2229_v63 = vld [vmem:[%s2928_s0 + $0x550] ss:$12 sps:$4 sm:$0xff]  }
  0x93   :  { %1119 = vmatpush1.bf16.msra.mxu0 %v2157_v1  ;;  %1163 = vmatprep.subr.bf16.mxu1 %v2251_v0  ;;  %v2230_v1 = vld [vmem:[%s2928_s0 + $0x554] ss:$12 sps:$4 sm:$0xff]  }
  0x94   :  { %1120 = vmatprep.subr.bf16.mxu0 %v2163_v2  ;;  %v2227_v2 = vld [vmem:[%s2928_s0 + $0x54c] ss:$12 sps:$4 sm:$0xff]  }
  0x96   :  { %1164 = vmatpush1.bf16.msra.mxu1 %v2164_v4  ;;  %v2231_v4 = vld [vmem:[%s2928_s0 + $0x534] ss:$12 sps:$4 sm:$0xff]  }
  0x97   :  { %1121 = vmatpush1.bf16.msra.mxu0 %v2161_v6  ;;  %1167 = vmatprep.subr.bf16.mxu1 %v2251_v0  ;;  %v2238_v6 = vld [vmem:[%s2928_s0 + $0x524] ss:$12 sps:$4 sm:$0xff]  }
  0x98   :  { %1124 = vmatprep.subr.bf16.mxu0 %v1101_v8  ;;  %v2241_v8 = vld [vmem:[%s2928_s0 + $0x508] ss:$12 sps:$4 sm:$0xff]  }
  0x9a   :  { %1168 = vmatpush2.bf16.msra.mxu1 %v1104_v9  ;;  %v2242_v9 = vld [vmem:[%s2928_s0 + $0x50c] ss:$12 sps:$4 sm:$0xff]  }
  0x9b   :  { %1125 = vmatpush2.bf16.msra.mxu0 %v1098_v10  ;;  %1169 = vmatprep.subr.bf16.mxu1 %v2251_v0  ;;  %v2239_v10 = vld [vmem:[%s2928_s0 + $0x504] ss:$12 sps:$4 sm:$0xff]  }
  0x9c   :  { %1126 = vmatprep.subr.bf16.mxu0 %v2170_v11  ;;  %v2245_v11 = vld [vmem:[%s2928_s0 + $0x4f0] ss:$12 sps:$4 sm:$0xff]  }
  0x9e   :  { %1170 = vmatpush2.bf16.msra.mxu1 %v2171_v12  ;;  %v2246_v12 = vld [vmem:[%s2928_s0 + $0x4f4] ss:$12 sps:$4 sm:$0xff]  }
  0x9f   :  { %1127 = vmatpush2.bf16.msra.mxu0 %v2168_v13  ;;  %1171 = vmatprep.subr.bf16.mxu1 %v2251_v0  ;;  %v2243_v13 = vld [vmem:[%s2928_s0 + $0x4ec] ss:$12 sps:$4 sm:$0xff]  }
  0xa0   :  { %1128 = vmatprep.subr.bf16.mxu0 %v2174_v14  ;;  %v2249_v14 = vld [vmem:[%s2928_s0 + $0x4d8] ss:$12 sps:$4 sm:$0xff]  }
  0xa2   :  { %1172 = vmatpush2.bf16.msra.mxu1 %v2175_v15  ;;  %v2250_v15 = vld [vmem:[%s2928_s0 + $0x4dc] ss:$12 sps:$4 sm:$0xff]  }
  0xa3   :  { %1129 = vmatpush2.bf16.msra.mxu0 %v2172_v16  ;;  %1173 = vmatprep.subr.bf16.mxu1 %v2251_v0  ;;  %v2247_v16 = vld [vmem:[%s2928_s0 + $0x4d4] ss:$12 sps:$4 sm:$0xff]  }
  0xa4   :  { %1130 = vmatprep.subr.bf16.mxu0 %v2178_v17 }
  0xa6   :  { %1174 = vmatpush2.bf16.msra.mxu1 %v2179_v18 }
  0xa7   :  { %1131 = vmatpush2.bf16.msra.mxu0 %v2176_v19  ;;  %1175 = vmatprep.subr.bf16.mxu1 %v2251_v0 }
  0xa8   :  { %1132 = vmatprep.subr.bf16.mxu0 %v2182_v20 }
  0xaa   :  { %1176 = vmatpush2.bf16.msra.mxu1 %v2183_v21 }
  0xab   :  { %1133 = vmatpush2.bf16.msra.mxu0 %v2180_v22  ;;  %1177 = vmatprep.subr.bf16.mxu1 %v2251_v0 }
  0xac   :  { %1134 = vmatprep.subr.bf16.mxu0 %v2186_v23 }
  0xae   :  { %1178 = vmatpush2.bf16.msra.mxu1 %v2187_v24 }
  0xaf   :  { %1135 = vmatpush2.bf16.msra.mxu0 %v2184_v25  ;;  %1179 = vmatprep.subr.bf16.mxu1 %v2251_v0 }
  0xb0   :  { %1136 = vmatprep.subr.bf16.mxu0 %v2190_v27 }
  0xb2   :  { %1180 = vmatpush2.bf16.msra.mxu1 %v2191_v28 }
  0xb3   :  { %1137 = vmatpush2.bf16.msra.mxu0 %v2188_v29  ;;  %1539 = vmatprep.subr.bf16.mxu1 %v2251_v0 }
  0xb4   :  { %1496 = vmatprep.subr.bf16.mxu0 %v2194_v30 }
  0xb5   :  { %1182 = vmatmul.mubr.bf16.vlgmr.msra.gmra.mxu1 %v2438_v52 }
  0xb6   :  { %1139 = vmatmul.mubr.bf16.vlgmr.msra.gmra.mxu0 %v2438_v52  ;;  %1540 = vmatpush1.bf16.msra.mxu1 %v2195_v31 }
  0xb7   :  { %1497 = vmatpush1.bf16.msra.mxu0 %v2192_v32  ;;  %1541 = vmatprep.subr.bf16.mxu1 %v2251_v0 }
  0xb8   :  { %1498 = vmatprep.subr.bf16.mxu0 %v2198_v33  ;;  %2001 = vmatprep.mubr.msk.bf16.mxu1 %vm316_vm1, %v2372_v34 }
  0xb9   :  { %2000 = vmatprep.mubr.msk.bf16.mxu0 %vm316_vm1, %v2372_v34  ;;  %v2206_v34 = vld [vmem:[%s2928_s0 + $0x478] ss:$12 sps:$4 sm:$0xff]  }
  0xba   :  { %1542 = vmatpush1.bf16.msra.mxu1 %v2199_v35 }
  0xbb   :  { %1499 = vmatpush1.bf16.msra.mxu0 %v2196_v36  ;;  %1543 = vmatprep.subr.bf16.mxu1 %v2251_v0 }
  0xbc   :  { %1500 = vmatprep.subr.bf16.mxu0 %v2202_v37 }
  0xbe   :  { %1544 = vmatpush1.bf16.msra.mxu1 %v2203_v38 }
  0xbf   :  { %1501 = vmatpush1.bf16.msra.mxu0 %v2200_v40  ;;  %1545 = vmatprep.subr.bf16.mxu1 %v2251_v0 }
  0xc0   :  { %1502 = vmatprep.subr.bf16.mxu0 %v2206_v34 }
  0xc2   :  { %1546 = vmatpush1.bf16.msra.mxu1 %v2207_v41 }
  0xc3   :  { %1503 = vmatpush1.bf16.msra.mxu0 %v2204_v42  ;;  %1547 = vmatprep.subr.bf16.mxu1 %v2251_v0  ;;  %v1591_v42 = vpop.permute.xlu0 %1590 }
  0xc4   :  { %1504 = vmatprep.subr.bf16.mxu0 %v2210_v43 }
  0xc6   :  { %1548 = vmatpush1.bf16.msra.mxu1 %v2211_v44 }
  0xc7   :  { %1505 = vmatpush1.bf16.msra.mxu0 %v2208_v45  ;;  %1549 = vmatprep.subr.bf16.mxu1 %v2251_v0 }
  0xc8   :  { %1506 = vmatprep.subr.bf16.mxu0 %v2214_v46 }
  0xca   :  { %1550 = vmatpush1.bf16.msra.mxu1 %v2215_v47 }
  0xcb   :  { %1507 = vmatpush1.bf16.msra.mxu0 %v2212_v48  ;;  %1551 = vmatprep.subr.bf16.mxu1 %v2251_v0 }
  0xcc   :  { %1508 = vmatprep.subr.bf16.mxu0 %v2218_v49 }
  0xce   :  { %1552 = vmatpush1.bf16.msra.mxu1 %v2219_v51 }
  0xcf   :  { %1509 = vmatpush1.bf16.msra.mxu0 %v2216_v53  ;;  %1553 = vmatprep.subr.bf16.mxu1 %v2251_v0 }
  0xd0   :  { %1510 = vmatprep.subr.bf16.mxu0 %v2222_v54 }
  0xd2   :  { %1554 = vmatpush1.bf16.msra.mxu1 %v2223_v56 }
  0xd3   :  { %1511 = vmatpush1.bf16.msra.mxu0 %v2220_v58  ;;  %1557 = vmatprep.subr.bf16.mxu1 %v2251_v0 }
  0xd4   :  { %1514 = vmatprep.subr.bf16.mxu0 %v1491_v60 }
  0xd6   :  { %1558 = vmatpush2.bf16.msra.mxu1 %v1494_v61 }
  0xd7   :  { %1515 = vmatpush2.bf16.msra.mxu0 %v1488_v62  ;;  %1559 = vmatprep.subr.bf16.mxu1 %v2251_v0 }
  0xd8   :  { %1516 = vmatprep.subr.bf16.mxu0 %v2229_v63 }
  0xda   :  { %1560 = vmatpush2.bf16.msra.mxu1 %v2230_v1 }
  0xdb   :  { %1517 = vmatpush2.bf16.msra.mxu0 %v2227_v2  ;;  %1561 = vmatprep.subr.bf16.mxu1 %v2251_v0 }
  0xdc   :  { %1518 = vmatprep.subr.bf16.mxu0 %v2233_v26 }
  0xde   :  { %1562 = vmatpush2.bf16.msra.mxu1 %v2234_v3 }
  0xdf   :  { %1519 = vmatpush2.bf16.msra.mxu0 %v2231_v4  ;;  %1563 = vmatprep.subr.bf16.mxu1 %v2251_v0 }
  0xe0   :  { %1520 = vmatprep.subr.bf16.mxu0 %v2237_v5 }
  0xe2   :  { %1564 = vmatpush2.bf16.msra.mxu1 %v2238_v6 }
  0xe3   :  { %1521 = vmatpush2.bf16.msra.mxu0 %v2235_v7  ;;  %1565 = vmatprep.subr.bf16.mxu1 %v2251_v0 }
  0xe4   :  { %1522 = vmatprep.subr.bf16.mxu0 %v2241_v8 }
  0xe6   :  { %1566 = vmatpush2.bf16.msra.mxu1 %v2242_v9 }
  0xe7   :  { %1523 = vmatpush2.bf16.msra.mxu0 %v2239_v10  ;;  %1567 = vmatprep.subr.bf16.mxu1 %v2251_v0 }
  0xe8   :  { %1524 = vmatprep.subr.bf16.mxu0 %v2245_v11 }
  0xea   :  { %1568 = vmatpush2.bf16.msra.mxu1 %v2246_v12 }
  0xeb   :  { %1525 = vmatpush2.bf16.msra.mxu0 %v2243_v13  ;;  %1569 = vmatprep.subr.bf16.mxu1 %v2251_v0 }
  0xec   :  { %1526 = vmatprep.subr.bf16.mxu0 %v2249_v14 }
  0xee   :  { %1570 = vmatpush2.bf16.msra.mxu1 %v2250_v15 }
  0xef   :  { %1527 = vmatpush2.bf16.msra.mxu0 %v2247_v16 }
  0xf1   :  { %1572 = vmatmul.mubr.bf16.vlgmr.msra.gmra.mxu1 %v2438_v52 }
  0xf2   :  { %1529 = vmatmul.mubr.bf16.vlgmr.msra.gmra.mxu0 %v2438_v52 }
  0xf3   :  { %v1596_v63 = vpop.permute.xlu0 %1595 }
  0xfd   :  { %v409_v17 = vpop.f32.mrf.mxu1 }
  0xfe   :  { %v366_v31 = vpop.f32.mrf.mxu0 }
  0xff   :  { %v411_v18 = vpop.f32.mrf.mxu1 }
 0x100   :  { %v368_v32 = vpop.f32.mrf.mxu0 }
 0x101   :  { %v412_v19 = vpop.f32.mrf.mxu1 }
 0x102   :  { %v370_v33 = vpop.f32.mrf.mxu0 }
 0x103   :  { %v414_v20 = vpop.f32.mrf.mxu1 }
 0x104   :  { %v372_v35 = vpop.f32.mrf.mxu0 }
 0x139   :  { %v793_v21 = vpop.f32.mrf.mxu1 }
 0x13a   :  { %v802_v22 = vmax.f32 %v409_v17, %v793_v21  ;;  %v750_v36 = vpop.f32.mrf.mxu0 }
 0x13b   :  { %v795_v23 = vpop.f32.mrf.mxu1  ;;  %v800_v41 = vmax.f32 %v366_v31, %v750_v36 }
 0x13c   :  { %v752_v52 = vpop.f32.mrf.mxu0 }
 0x13d   :  { %v796_v24 = vpop.f32.mrf.mxu1  ;;  %v801_v45 = vmax.f32 %v368_v32, %v752_v52 }
 0x13e   :  { %v805_v0 = vmax.f32 %v412_v19, %v796_v24  ;;  %v754_v37 = vpop.f32.mrf.mxu0 }
 0x13f   :  { %v798_v25 = vpop.f32.mrf.mxu1  ;;  %v803_v50 = vmax.f32 %v370_v33, %v754_v37 }
 0x140   :  { %v756_v38 = vpop.f32.mrf.mxu0 }
 0x141   :  { %v804_v58 = vmax.f32 %v372_v35, %v756_v38 }
 0x175   :  { %v1183_v27 = vpop.f32.mrf.mxu1 }
 0x176   :  { %v1140_v39 = vpop.f32.mrf.mxu0  ;;  %v1192_v43 = vmax.f32 %v802_v22, %v1183_v27 }
 0x177   :  { %v1185_v28 = vpop.f32.mrf.mxu1  ;;  %v1190_v46 = vmax.f32 %v800_v41, %v1140_v39 }
 0x178   :  { %v1142_v40 = vpop.f32.mrf.mxu0 }
 0x179   :  { %v1186_v29 = vpop.f32.mrf.mxu1  ;;  %v1191_v51 = vmax.f32 %v801_v45, %v1142_v40 }
 0x17a   :  { %v1144_v34 = vpop.f32.mrf.mxu0  ;;  %v1195_v55 = vmax.f32 %v805_v0, %v1186_v29 }
 0x17b   :  { %v1188_v30 = vpop.f32.mrf.mxu1  ;;  %v1193_v59 = vmax.f32 %v803_v50, %v1144_v34 }
 0x17c   :  { %v1146_v44 = vpop.f32.mrf.mxu0 }
 0x17d   :  { %v1194_v3 = vmax.f32 %v804_v58, %v1146_v44 }
 0x1b1   :  { %v1573_v47 = vpop.f32.mrf.mxu1 }
 0x1b2   :  { %v1582_v48 = vmax.f32 %v1192_v43, %v1573_v47  ;;  %v1530_v49 = vpop.f32.mrf.mxu0 }
 0x1b3   :  { %v1580_v53 = vmax.f32 %v1190_v46, %v1530_v49  ;;  %v1575_v54 = vpop.f32.mrf.mxu1 }
 0x1b4   :  { %v1600_v56 = vadd.f32 %v1591_v42, %v1582_v48  ;;  %v1532_v57 = vpop.f32.mrf.mxu0 }
 0x1b5   :  { %v1598_v60 = vadd.f32 %v1591_v42, %v1580_v53  ;;  %v1581_v61 = vmax.f32 %v1191_v51, %v1532_v57  ;;  %v1576_v62 = vpop.f32.mrf.mxu1 }
 0x1b6   :  { %v1606_v1 = vmax.f32 %v1600_v56, 0.0  ;;  %v1585_v2 = vmax.f32 %v1195_v55, %v1576_v62  ;;  %v1534_v26 = vpop.f32.mrf.mxu0 }
 0x1b7   :  { %v1599_v4 = vadd.f32 %v1591_v42, %v1581_v61  ;;  %v1583_v5 = vmax.f32 %v1193_v59, %v1534_v26  ;;  %v1578_v6 = vpop.f32.mrf.mxu1  ;;  %v1604_v10 = vmax.f32 %v1598_v60, 0.0 }
 0x1b8   :  { %v2007_v7 = vpack.c.bf16 %v1606_v1, %v1606_v1  ;;  %v1603_v8 = vadd.f32 %v1596_v63, %v1585_v2  ;;  %v1536_v9 = vpop.f32.mrf.mxu0 }
 0x1b9   :  { %v1605_v11 = vmax.f32 %v1599_v4, 0.0  ;;  %v1601_v12 = vadd.f32 %v1596_v63, %v1583_v5  ;;  %v1584_v13 = vmax.f32 %v1194_v3, %v1536_v9 }
 0x1ba   :  { %1631 = vst [vmem:[%s2931_s3 + $0x8] sm:$0xf] %v2007_v7  ;;  %v1609_v14 = vmax.f32 %v1603_v8, 0.0 }
 0x1bb   :  { %v2006_v15 = vpack.c.bf16 %v1605_v11, %v1604_v10  ;;  %v1602_v16 = vadd.f32 %v1596_v63, %v1584_v13  ;;  %v1607_v18 = vmax.f32 %v1601_v12, 0.0 }
 0x1bc   :  { %v2009_v17 = vpack.c.bf16 %v1609_v14, %v1609_v14 }
 0x1bd   :  { %1630 = vst [vmem:[%s2931_s3] sm:$0xff] %v2006_v15  ;;  %v1608_v19 = vmax.f32 %v1602_v16, 0.0 }
 0x1be   :  { %1633 = vst [vmem:[%s2931_s3 + $0x14] sm:$0x3] %v2009_v17 }
 0x1bf   :  { %v2008_v20 = vpack.c.bf16 %v1608_v19, %v1607_v18 }
 0x1c1   :  { %1632 = vst [vmem:[%s2931_s3 + $0xc] sm:$0x33] %v2008_v20 }

// kernel: net_forward.5
= control target key start
LH: loop header
LB: loop body
LE: loop exit
PB: predicated region body
PF: predicated region fallthrough
CT: control target
= control target key end

     0   :  { %v1048_v32 = vlaneseq  ;;  %v11682_v33 = vmov 1966171168   ;;  %vm6275_vm0 = vcmask 883712   ;;  %s15983_s0 = inlined_call_operand.vmem [shape: bf16[2,2028], index: 0, kind: input, shape index: {}]   ;;  %s15984_s1 = inlined_call_operand.vmem [shape: bf16[2028,1000], index: 1, kind: input, shape index: {}]   ;;  %s15985_s2 = inlined_call_operand.vmem [shape: f32[1,1000], index: 2, kind: input, shape index: {}]   ;;  %s15986_s3 = inlined_call_operand.vmem [shape: bf16[1000,500], index: 3, kind: input, shape index: {}]   ;;  %s15987_s4 = inlined_call_operand.vmem [shape: f32[1,500], index: 4, kind: input, shape index: {}]   ;;  %s15988_s5 = inlined_call_operand.vmem [shape: bf16[500,8], index: 5, kind: input, shape index: {}]   ;;  %s15989_s6 = inlined_call_operand.vmem [shape: f32[1,8], index: 6, kind: input, shape index: {}]   ;;  %s15990_s7 = inlined_call_operand.hbm [shape: f32[2,8], index: 7, kind: output, shape index: {}]  }
   0x1   :  { %v86_v0 = vld [vmem:[%s15984_s1 + $0x1c0] sm:$0xff]  ;;  %v1092_v34 = vunpack.c.l.s4 %v11682_v33 }
   0x2   :  { %v90_v1 = vld [vmem:[%s15984_s1 + $0x1e0] sm:$0xff]  ;;  %v11790_v43 = vshrl.u32 %v1048_v32, 7 }
   0x3   :  { %v214_v2 = vld [vmem:[%s15984_s1 + $0x5c0] sm:$0xff]  ;;  %v9939_v3 = vcombine.high %v86_v0, %v90_v1  ;;  %v9938_v5 = vcombine.low %v86_v0, %v90_v1  ;;  %v1093_v44 = vunpack.c.0.s8 %v1092_v34 }
   0x4   :  { %v218_v4 = vld [vmem:[%s15984_s1 + $0x5e0] sm:$0xff] }
   0x5   :  { %v78_v6 = vld [vmem:[%s15984_s1 + $0x180] sm:$0xff]  ;;  %v10067_v8 = vcombine.high %v214_v2, %v218_v4  ;;  %v10066_v9 = vcombine.low %v214_v2, %v218_v4  ;;  %6304 = vmatprep.subr.bf16.mxu0 %v9939_v3  ;;  %v11805_v53 = vsub.s32 %v1093_v44, %v11790_v43 }
   0x6   :  { %v82_v7 = vld [vmem:[%s15984_s1 + $0x1a0] sm:$0xff]  ;;  %6305 = vmatpush1.bf16.msra.mxu0 %v9938_v5 }
   0x7   :  { %v9931_v10 = vcombine.high %v78_v6, %v82_v7  ;;  %v206_v11 = vld [vmem:[%s15984_s1 + $0x580] sm:$0xff]  ;;  %6345 = vmatprep.subr.bf16.mxu1 %v10067_v8  ;;  %v9930_v18 = vcombine.low %v78_v6, %v82_v7 }
   0x8   :  { %v210_v12 = vld [vmem:[%s15984_s1 + $0x5a0] sm:$0xff]  ;;  %6346 = vmatpush1.bf16.msra.mxu1 %v10066_v9 }
   0x9   :  { %v70_v13 = vld [vmem:[%s15984_s1 + $0x140] sm:$0xff]  ;;  %v10059_v14 = vcombine.high %v206_v11, %v210_v12  ;;  %6306 = vmatprep.subr.bf16.mxu0 %v9931_v10  ;;  %v10058_v19 = vcombine.low %v206_v11, %v210_v12 }
   0xa   :  { %v74_v15 = vld [vmem:[%s15984_s1 + $0x160] sm:$0xff]  ;;  %6307 = vmatpush1.bf16.msra.mxu0 %v9930_v18 }
   0xb   :  { %v198_v16 = vld [vmem:[%s15984_s1 + $0x540] sm:$0xff]  ;;  %v9923_v20 = vcombine.high %v70_v13, %v74_v15  ;;  %6347 = vmatprep.subr.bf16.mxu1 %v10059_v14  ;;  %v9922_v26 = vcombine.low %v70_v13, %v74_v15 }
   0xc   :  { %v202_v17 = vld [vmem:[%s15984_s1 + $0x560] sm:$0xff]  ;;  %6348 = vmatpush1.bf16.msra.mxu1 %v10058_v19 }
   0xd   :  { %v10051_v21 = vcombine.high %v198_v16, %v202_v17  ;;  %v62_v22 = vld [vmem:[%s15984_s1 + $0x100] sm:$0xff]  ;;  %6308 = vmatprep.subr.bf16.mxu0 %v9923_v20  ;;  %v10050_v27 = vcombine.low %v198_v16, %v202_v17 }
   0xe   :  { %v66_v23 = vld [vmem:[%s15984_s1 + $0x120] sm:$0xff]  ;;  %6309 = vmatpush1.bf16.msra.mxu0 %v9922_v26 }
   0xf   :  { %v190_v24 = vld [vmem:[%s15984_s1 + $0x500] sm:$0xff]  ;;  %v9915_v28 = vcombine.high %v62_v22, %v66_v23  ;;  %6349 = vmatprep.subr.bf16.mxu1 %v10051_v21  ;;  %v9914_v37 = vcombine.low %v62_v22, %v66_v23 }
  0x10   :  { %v194_v25 = vld [vmem:[%s15984_s1 + $0x520] sm:$0xff]  ;;  %6350 = vmatpush1.bf16.msra.mxu1 %v10050_v27 }
  0x11   :  { %v10043_v29 = vcombine.high %v190_v24, %v194_v25  ;;  %v54_v30 = vld [vmem:[%s15984_s1 + $0xc0] sm:$0xff]  ;;  %6310 = vmatprep.subr.bf16.mxu0 %v9915_v28  ;;  %v10042_v38 = vcombine.low %v190_v24, %v194_v25 }
  0x12   :  { %v58_v31 = vld [vmem:[%s15984_s1 + $0xe0] sm:$0xff]  ;;  %6311 = vmatpush1.bf16.msra.mxu0 %v9914_v37 }
  0x13   :  { %v182_v35 = vld [vmem:[%s15984_s1 + $0x4c0] sm:$0xff]  ;;  %v9907_v39 = vcombine.high %v54_v30, %v58_v31  ;;  %6351 = vmatprep.subr.bf16.mxu1 %v10043_v29  ;;  %v9906_v47 = vcombine.low %v54_v30, %v58_v31 }
  0x14   :  { %v186_v36 = vld [vmem:[%s15984_s1 + $0x4e0] sm:$0xff]  ;;  %6352 = vmatpush1.bf16.msra.mxu1 %v10042_v38 }
  0x15   :  { %v10035_v40 = vcombine.high %v182_v35, %v186_v36  ;;  %v46_v41 = vld [vmem:[%s15984_s1 + $0x80] sm:$0xff]  ;;  %6312 = vmatprep.subr.bf16.mxu0 %v9907_v39  ;;  %v10034_v48 = vcombine.low %v182_v35, %v186_v36 }
  0x16   :  { %v50_v42 = vld [vmem:[%s15984_s1 + $0xa0] sm:$0xff]  ;;  %6313 = vmatpush1.bf16.msra.mxu0 %v9906_v47 }
  0x17   :  { %v174_v45 = vld [vmem:[%s15984_s1 + $0x480] sm:$0xff]  ;;  %v9899_v49 = vcombine.high %v46_v41, %v50_v42  ;;  %6353 = vmatprep.subr.bf16.mxu1 %v10035_v40  ;;  %v9898_v56 = vcombine.low %v46_v41, %v50_v42 }
  0x18   :  { %v178_v46 = vld [vmem:[%s15984_s1 + $0x4a0] sm:$0xff]  ;;  %6354 = vmatpush1.bf16.msra.mxu1 %v10034_v48 }
  0x19   :  { %v10027_v50 = vcombine.high %v174_v45, %v178_v46  ;;  %v38_v51 = vld [vmem:[%s15984_s1 + $0x40] sm:$0xff]  ;;  %6314 = vmatprep.subr.bf16.mxu0 %v9899_v49  ;;  %v10026_v57 = vcombine.low %v174_v45, %v178_v46 }
  0x1a   :  { %v42_v52 = vld [vmem:[%s15984_s1 + $0x60] sm:$0xff]  ;;  %6315 = vmatpush1.bf16.msra.mxu0 %v9898_v56 }
  0x1b   :  { %v166_v54 = vld [vmem:[%s15984_s1 + $0x440] sm:$0xff]  ;;  %v9891_v58 = vcombine.high %v38_v51, %v42_v52  ;;  %6355 = vmatprep.subr.bf16.mxu1 %v10027_v50  ;;  %v9890_v2 = vcombine.low %v38_v51, %v42_v52 }
  0x1c   :  { %v170_v55 = vld [vmem:[%s15984_s1 + $0x460] sm:$0xff]  ;;  %6356 = vmatpush1.bf16.msra.mxu1 %v10026_v57 }
  0x1d   :  { %v11816_v59 = vld [vmem:[%s15983_s0] sm:$0xff]  ;;  %v10019_v60 = vcombine.high %v166_v54, %v170_v55  ;;  %6316 = vmatprep.subr.bf16.mxu0 %v9891_v58  ;;  %v10018_v4 = vcombine.low %v166_v54, %v170_v55 }
  0x1e   :  { %v30_v61 = vld [vmem:[%s15984_s1] sm:$0xff]  ;;  %v11826_v63 = vrot.slane %v11816_v59, %v11805_v53  ;;  %6317 = vmatpush1.bf16.msra.mxu0 %v9890_v2 }
  0x1f   :  { %v34_v62 = vld [vmem:[%s15984_s1 + $0x20] sm:$0xff]  ;;  %6357 = vmatprep.subr.bf16.mxu1 %v10019_v60 }
  0x20   :  { %v158_v0 = vld [vmem:[%s15984_s1 + $0x400] sm:$0xff]  ;;  %v1105_v3 = vcombine.high %v11826_v63, %v11826_v63  ;;  %v9883_v5 = vcombine.high %v30_v61, %v34_v62  ;;  %v9882_v12 = vcombine.low %v30_v61, %v34_v62  ;;  %6358 = vmatpush1.bf16.msra.mxu1 %v10018_v4 }
  0x21   :  { %v162_v1 = vld [vmem:[%s15984_s1 + $0x420] sm:$0xff] }
  0x22   :  { %v10011_v6 = vcombine.high %v158_v0, %v162_v1  ;;  %v150_v7 = vld [vmem:[%s15984_s1 + $0x3c0] sm:$0xff]  ;;  %v11843_v9 = vrot.slane %v1105_v3, %v11805_v53  ;;  %6318 = vmatprep.subr.bf16.mxu0 %v9883_v5  ;;  %v10010_v14 = vcombine.low %v158_v0, %v162_v1  ;;  %v1090_v1 = vcombine.high %v11816_v59, %v11816_v59 }
  0x23   :  { %v154_v8 = vld [vmem:[%s15984_s1 + $0x3e0] sm:$0xff]  ;;  %6319 = vmatpush1.bf16.msra.mxu0 %v9882_v12 }
  0x24   :  { %v278_v10 = vld [vmem:[%s15984_s1 + $0x7c0] sm:$0xff]  ;;  %6336 = vmatprep.mubr.bf16.mxu0 %v11843_v9  ;;  %v11854_v13 = vcombine.high %v11843_v9, %v11843_v9  ;;  %v10003_v15 = vcombine.high %v150_v7, %v154_v8  ;;  %6359 = vmatprep.subr.bf16.mxu1 %v10011_v6  ;;  %v10002_v21 = vcombine.low %v150_v7, %v154_v8 }
  0x25   :  { %v282_v11 = vld [vmem:[%s15984_s1 + $0x7e0] sm:$0xff]  ;;  %6360 = vmatpush1.bf16.msra.mxu1 %v10010_v14 }
  0x26   :  { %v10131_v16 = vcombine.high %v278_v10, %v282_v11  ;;  %v142_v17 = vld [vmem:[%s15984_s1 + $0x380] sm:$0xff]  ;;  %6377 = vmatprep.mubr.bf16.mxu1 %v11854_v13  ;;  %6320 = vmatprep.subr.bf16.mxu0 %v10003_v15  ;;  %v10130_v22 = vcombine.low %v278_v10, %v282_v11  ;;  %v11944_v10 = vrot.slane %v1090_v1, %v11805_v53 }
  0x27   :  { %v146_v18 = vld [vmem:[%s15984_s1 + $0x3a0] sm:$0xff]  ;;  %6321 = vmatpush2.bf16.msra.mxu0 %v10002_v21 }
  0x28   :  { %v270_v19 = vld [vmem:[%s15984_s1 + $0x780] sm:$0xff]  ;;  %v9995_v23 = vcombine.high %v142_v17, %v146_v18  ;;  %6361 = vmatprep.subr.bf16.mxu1 %v10131_v16  ;;  %v9994_v29 = vcombine.low %v142_v17, %v146_v18 }
  0x29   :  { %v274_v20 = vld [vmem:[%s15984_s1 + $0x7a0] sm:$0xff]  ;;  %6362 = vmatpush2.bf16.msra.mxu1 %v10130_v22  ;;  %v11962_v22 = vrot.slane %v11826_v63, %v11805_v53 }
  0x2a   :  { %v10123_v24 = vcombine.high %v270_v19, %v274_v20  ;;  %v134_v25 = vld [vmem:[%s15984_s1 + $0x340] sm:$0xff]  ;;  %6322 = vmatprep.subr.bf16.mxu0 %v9995_v23  ;;  %v10122_v30 = vcombine.low %v270_v19, %v274_v20  ;;  %v1106_v20 = vcombine.high %v11944_v10, %v11944_v10 }
  0x2b   :  { %v138_v26 = vld [vmem:[%s15984_s1 + $0x360] sm:$0xff]  ;;  %6323 = vmatpush2.bf16.msra.mxu0 %v9994_v29 }
  0x2c   :  { %v262_v27 = vld [vmem:[%s15984_s1 + $0x740] sm:$0xff]  ;;  %v9987_v31 = vcombine.high %v134_v25, %v138_v26  ;;  %6363 = vmatprep.subr.bf16.mxu1 %v10123_v24  ;;  %v9986_v37 = vcombine.low %v134_v25, %v138_v26  ;;  %v11977_v29 = vrot.slane %v1106_v20, %v11805_v53 }
  0x2d   :  { %v266_v28 = vld [vmem:[%s15984_s1 + $0x760] sm:$0xff]  ;;  %6364 = vmatpush2.bf16.msra.mxu1 %v10122_v30  ;;  %v11981_v30 = vcombine.high %v11962_v22, %v11962_v22 }
  0x2e   :  { %v10115_v32 = vcombine.high %v262_v27, %v266_v28  ;;  %v126_v33 = vld [vmem:[%s15984_s1 + $0x300] sm:$0xff]  ;;  %6324 = vmatprep.subr.bf16.mxu0 %v9987_v31  ;;  %v10114_v38 = vcombine.low %v262_v27, %v266_v28 }
  0x2f   :  { %v130_v34 = vld [vmem:[%s15984_s1 + $0x320] sm:$0xff]  ;;  %6325 = vmatpush2.bf16.msra.mxu0 %v9986_v37 }
  0x30   :  { %v254_v35 = vld [vmem:[%s15984_s1 + $0x700] sm:$0xff]  ;;  %v9979_v39 = vcombine.high %v126_v33, %v130_v34  ;;  %6365 = vmatprep.subr.bf16.mxu1 %v10115_v32  ;;  %v9978_v46 = vcombine.low %v126_v33, %v130_v34 }
  0x31   :  { %v258_v36 = vld [vmem:[%s15984_s1 + $0x720] sm:$0xff]  ;;  %6366 = vmatpush2.bf16.msra.mxu1 %v10114_v38 }
  0x32   :  { %v10107_v40 = vcombine.high %v254_v35, %v258_v36  ;;  %v118_v41 = vld [vmem:[%s15984_s1 + $0x2c0] sm:$0xff]  ;;  %6326 = vmatprep.subr.bf16.mxu0 %v9979_v39  ;;  %v10106_v47 = vcombine.low %v254_v35, %v258_v36  ;;  %v11998_v39 = vcombine.high %v11977_v29, %v11977_v29 }
  0x33   :  { %v122_v42 = vld [vmem:[%s15984_s1 + $0x2e0] sm:$0xff]  ;;  %6327 = vmatpush2.bf16.msra.mxu0 %v9978_v46 }
  0x34   :  { %v246_v44 = vld [vmem:[%s15984_s1 + $0x6c0] sm:$0xff]  ;;  %v9971_v48 = vcombine.high %v118_v41, %v122_v42  ;;  %6367 = vmatprep.subr.bf16.mxu1 %v10107_v40  ;;  %v9970_v55 = vcombine.low %v118_v41, %v122_v42 }
  0x35   :  { %v250_v45 = vld [vmem:[%s15984_s1 + $0x6e0] sm:$0xff]  ;;  %6368 = vmatpush2.bf16.msra.mxu1 %v10106_v47 }
  0x36   :  { %v10099_v49 = vcombine.high %v246_v44, %v250_v45  ;;  %v110_v50 = vld [vmem:[%s15984_s1 + $0x280] sm:$0xff]  ;;  %6328 = vmatprep.subr.bf16.mxu0 %v9971_v48  ;;  %v10098_v56 = vcombine.low %v246_v44, %v250_v45 }
  0x37   :  { %v114_v51 = vld [vmem:[%s15984_s1 + $0x2a0] sm:$0xff]  ;;  %6329 = vmatpush2.bf16.msra.mxu0 %v9970_v55 }
  0x38   :  { %v238_v52 = vld [vmem:[%s15984_s1 + $0x680] sm:$0xff]  ;;  %v9963_v57 = vcombine.high %v110_v50, %v114_v51  ;;  %6369 = vmatprep.subr.bf16.mxu1 %v10099_v49  ;;  %v9962_v2 = vcombine.low %v110_v50, %v114_v51 }
  0x39   :  { %v242_v54 = vld [vmem:[%s15984_s1 + $0x6a0] sm:$0xff]  ;;  %6370 = vmatpush2.bf16.msra.mxu1 %v10098_v56 }
  0x3a   :  { %v10091_v58 = vcombine.high %v238_v52, %v242_v54  ;;  %v102_v60 = vld [vmem:[%s15984_s1 + $0x240] sm:$0xff]  ;;  %6330 = vmatprep.subr.bf16.mxu0 %v9963_v57  ;;  %v10090_v3 = vcombine.low %v238_v52, %v242_v54 }
  0x3b   :  { %v106_v61 = vld [vmem:[%s15984_s1 + $0x260] sm:$0xff]  ;;  %6331 = vmatpush2.bf16.msra.mxu0 %v9962_v2 }
  0x3c   :  { %v230_v62 = vld [vmem:[%s15984_s1 + $0x640] sm:$0xff]  ;;  %v9955_v4 = vcombine.high %v102_v60, %v106_v61  ;;  %6371 = vmatprep.subr.bf16.mxu1 %v10091_v58  ;;  %v9954_v11 = vcombine.low %v102_v60, %v106_v61 }
  0x3d   :  { %v234_v0 = vld [vmem:[%s15984_s1 + $0x660] sm:$0xff]  ;;  %6372 = vmatpush2.bf16.msra.mxu1 %v10090_v3 }
  0x3e   :  { %v10083_v5 = vcombine.high %v230_v62, %v234_v0  ;;  %v94_v6 = vld [vmem:[%s15984_s1 + $0x200] sm:$0xff]  ;;  %6332 = vmatprep.subr.bf16.mxu0 %v9955_v4  ;;  %v10082_v12 = vcombine.low %v230_v62, %v234_v0 }
  0x3f   :  { %v98_v7 = vld [vmem:[%s15984_s1 + $0x220] sm:$0xff]  ;;  %6333 = vmatpush2.bf16.msra.mxu0 %v9954_v11 }
  0x40   :  { %v222_v59 = vld [vmem:[%s15984_s1 + $0x600] sm:$0xff]  ;;  %v9947_v14 = vcombine.high %v94_v6, %v98_v7  ;;  %6373 = vmatprep.subr.bf16.mxu1 %v10083_v5  ;;  %v9946_v21 = vcombine.low %v94_v6, %v98_v7 }
  0x41   :  { %v226_v8 = vld [vmem:[%s15984_s1 + $0x620] sm:$0xff]  ;;  %6374 = vmatpush2.bf16.msra.mxu1 %v10082_v12 }
  0x42   :  { %v10075_v15 = vcombine.high %v222_v59, %v226_v8  ;;  %v342_v16 = vld [vmem:[%s15984_s1 + $0x9c0] sm:$0xff]  ;;  %6334 = vmatprep.subr.bf16.mxu0 %v9947_v14  ;;  %v10074_v23 = vcombine.low %v222_v59, %v226_v8 }
  0x43   :  { %v346_v17 = vld [vmem:[%s15984_s1 + $0x9e0] sm:$0xff]  ;;  %6335 = vmatpush2.bf16.msra.mxu0 %v9946_v21 }
  0x44   :  { %v470_v18 = vld [vmem:[%s15984_s1 + $0xdc0] sm:$0xff]  ;;  %v10195_v24 = vcombine.high %v342_v16, %v346_v17  ;;  %6375 = vmatprep.subr.bf16.mxu1 %v10075_v15  ;;  %v10194_v31 = vcombine.low %v342_v16, %v346_v17 }
  0x45   :  { %v474_v19 = vld [vmem:[%s15984_s1 + $0xde0] sm:$0xff]  ;;  %6376 = vmatpush2.bf16.msra.mxu1 %v10074_v23 }
  0x46   :  { %v10323_v25 = vcombine.high %v470_v18, %v474_v19  ;;  %v334_v26 = vld [vmem:[%s15984_s1 + $0x980] sm:$0xff]  ;;  %6386 = vmatprep.subr.bf16.mxu0 %v10195_v24  ;;  %v10322_v32 = vcombine.low %v470_v18, %v474_v19  ;;  %6337 = vmatmul.mubr.bf16.vlgmr.msra.gmra.mxu0 %v11962_v22 }
  0x47   :  { %v338_v27 = vld [vmem:[%s15984_s1 + $0x9a0] sm:$0xff]  ;;  %6387 = vmatpush1.bf16.msra.mxu0 %v10194_v31  ;;  %6418 = vmatprep.mubr.bf16.mxu0 %v11977_v29 }
  0x48   :  { %v462_v28 = vld [vmem:[%s15984_s1 + $0xd80] sm:$0xff]  ;;  %v10187_v33 = vcombine.high %v334_v26, %v338_v27  ;;  %6427 = vmatprep.subr.bf16.mxu1 %v10323_v25  ;;  %6378 = vmatmul.mubr.bf16.vlgmr.msra.gmra.mxu1 %v11981_v30  ;;  %v10186_v40 = vcombine.low %v334_v26, %v338_v27 }
  0x49   :  { %v466_v63 = vld [vmem:[%s15984_s1 + $0xda0] sm:$0xff]  ;;  %6428 = vmatpush1.bf16.msra.mxu1 %v10322_v32  ;;  %6459 = vmatprep.mubr.bf16.mxu1 %v11998_v39 }
  0x4a   :  { %v326_v34 = vld [vmem:[%s15984_s1 + $0x940] sm:$0xff]  ;;  %v10315_v37 = vcombine.high %v462_v28, %v466_v63  ;;  %6388 = vmatprep.subr.bf16.mxu0 %v10187_v33  ;;  %v10314_v41 = vcombine.low %v462_v28, %v466_v63 }
  0x4b   :  { %v330_v35 = vld [vmem:[%s15984_s1 + $0x960] sm:$0xff]  ;;  %6389 = vmatpush1.bf16.msra.mxu0 %v10186_v40 }
  0x4c   :  { %v454_v36 = vld [vmem:[%s15984_s1 + $0xd40] sm:$0xff]  ;;  %v10179_v42 = vcombine.high %v326_v34, %v330_v35  ;;  %6429 = vmatprep.subr.bf16.mxu1 %v10315_v37  ;;  %v10178_v49 = vcombine.low %v326_v34, %v330_v35 }
  0x4d   :  { %v458_v38 = vld [vmem:[%s15984_s1 + $0xd60] sm:$0xff]  ;;  %6430 = vmatpush1.bf16.msra.mxu1 %v10314_v41 }
  0x4e   :  { %v318_v44 = vld [vmem:[%s15984_s1 + $0x900] sm:$0xff]  ;;  %v10307_v47 = vcombine.high %v454_v36, %v458_v38  ;;  %6390 = vmatprep.subr.bf16.mxu0 %v10179_v42  ;;  %v10306_v50 = vcombine.low %v454_v36, %v458_v38 }
  0x4f   :  { %v322_v45 = vld [vmem:[%s15984_s1 + $0x920] sm:$0xff]  ;;  %6391 = vmatpush1.bf16.msra.mxu0 %v10178_v49 }
  0x50   :  { %v446_v46 = vld [vmem:[%s15984_s1 + $0xd00] sm:$0xff]  ;;  %v10171_v51 = vcombine.high %v318_v44, %v322_v45  ;;  %6431 = vmatprep.subr.bf16.mxu1 %v10307_v47  ;;  %v10170_v58 = vcombine.low %v318_v44, %v322_v45 }
  0x51   :  { %v450_v48 = vld [vmem:[%s15984_s1 + $0xd20] sm:$0xff]  ;;  %6432 = vmatpush1.bf16.msra.mxu1 %v10306_v50 }
  0x52   :  { %v310_v52 = vld [vmem:[%s15984_s1 + $0x8c0] sm:$0xff]  ;;  %v10299_v56 = vcombine.high %v446_v46, %v450_v48  ;;  %6392 = vmatprep.subr.bf16.mxu0 %v10171_v51  ;;  %v10298_v60 = vcombine.low %v446_v46, %v450_v48 }
  0x53   :  { %v314_v54 = vld [vmem:[%s15984_s1 + $0x8e0] sm:$0xff]  ;;  %6393 = vmatpush1.bf16.msra.mxu0 %v10170_v58 }
  0x54   :  { %v438_v55 = vld [vmem:[%s15984_s1 + $0xcc0] sm:$0xff]  ;;  %v10163_v61 = vcombine.high %v310_v52, %v314_v54  ;;  %6433 = vmatprep.subr.bf16.mxu1 %v10299_v56  ;;  %v10162_v4 = vcombine.low %v310_v52, %v314_v54 }
  0x55   :  { %v442_v57 = vld [vmem:[%s15984_s1 + $0xce0] sm:$0xff]  ;;  %6434 = vmatpush1.bf16.msra.mxu1 %v10298_v60 }
  0x56   :  { %v302_v62 = vld [vmem:[%s15984_s1 + $0x880] sm:$0xff]  ;;  %v10291_v2 = vcombine.high %v438_v55, %v442_v57  ;;  %6394 = vmatprep.subr.bf16.mxu0 %v10163_v61  ;;  %v10290_v5 = vcombine.low %v438_v55, %v442_v57 }
  0x57   :  { %v306_v0 = vld [vmem:[%s15984_s1 + $0x8a0] sm:$0xff]  ;;  %6395 = vmatpush1.bf16.msra.mxu0 %v10162_v4 }
  0x58   :  { %v430_v1 = vld [vmem:[%s15984_s1 + $0xc80] sm:$0xff]  ;;  %v10155_v6 = vcombine.high %v302_v62, %v306_v0  ;;  %6435 = vmatprep.subr.bf16.mxu1 %v10291_v2  ;;  %v10154_v14 = vcombine.low %v302_v62, %v306_v0 }
  0x59   :  { %v434_v3 = vld [vmem:[%s15984_s1 + $0xca0] sm:$0xff]  ;;  %6436 = vmatpush1.bf16.msra.mxu1 %v10290_v5 }
  0x5a   :  { %v294_v7 = vld [vmem:[%s15984_s1 + $0x840] sm:$0xff]  ;;  %v10283_v11 = vcombine.high %v430_v1, %v434_v3  ;;  %6396 = vmatprep.subr.bf16.mxu0 %v10155_v6  ;;  %v10282_v15 = vcombine.low %v430_v1, %v434_v3 }
  0x5b   :  { %v298_v59 = vld [vmem:[%s15984_s1 + $0x860] sm:$0xff]  ;;  %6397 = vmatpush1.bf16.msra.mxu0 %v10154_v14 }
  0x5c   :  { %v422_v8 = vld [vmem:[%s15984_s1 + $0xc40] sm:$0xff]  ;;  %v10147_v16 = vcombine.high %v294_v7, %v298_v59  ;;  %6437 = vmatprep.subr.bf16.mxu1 %v10283_v11  ;;  %v10146_v23 = vcombine.low %v294_v7, %v298_v59 }
  0x5d   :  { %v426_v12 = vld [vmem:[%s15984_s1 + $0xc60] sm:$0xff]  ;;  %6438 = vmatpush1.bf16.msra.mxu1 %v10282_v15 }
  0x5e   :  { %v286_v17 = vld [vmem:[%s15984_s1 + $0x800] sm:$0xff]  ;;  %v10275_v20 = vcombine.high %v422_v8, %v426_v12  ;;  %6398 = vmatprep.subr.bf16.mxu0 %v10147_v16  ;;  %v10274_v24 = vcombine.low %v422_v8, %v426_v12 }
  0x5f   :  { %v290_v18 = vld [vmem:[%s15984_s1 + $0x820] sm:$0xff]  ;;  %6399 = vmatpush1.bf16.msra.mxu0 %v10146_v23 }
  0x60   :  { %v414_v19 = vld [vmem:[%s15984_s1 + $0xc00] sm:$0xff]  ;;  %v10139_v25 = vcombine.high %v286_v17, %v290_v18  ;;  %6439 = vmatprep.subr.bf16.mxu1 %v10275_v20  ;;  %v10138_v32 = vcombine.low %v286_v17, %v290_v18 }
  0x61   :  { %v418_v21 = vld [vmem:[%s15984_s1 + $0xc20] sm:$0xff]  ;;  %6440 = vmatpush1.bf16.msra.mxu1 %v10274_v24  ;;  %v12150_v24 = vld [vmem:[%s15983_s0 + $0x8] sm:$0xff] }
  0x62   :  { %v406_v26 = vld [vmem:[%s15984_s1 + $0xbc0] sm:$0xff]  ;;  %v10267_v63 = vcombine.high %v414_v19, %v418_v21  ;;  %6400 = vmatprep.subr.bf16.mxu0 %v10139_v25  ;;  %v10266_v33 = vcombine.low %v414_v19, %v418_v21 }
  0x63   :  { %v410_v27 = vld [vmem:[%s15984_s1 + $0xbe0] sm:$0xff]  ;;  %6401 = vmatpush1.bf16.msra.mxu0 %v10138_v32 }
  0x64   :  { %v534_v28 = vld [vmem:[%s15984_s1 + $0xfc0] sm:$0xff]  ;;  %v10259_v34 = vcombine.high %v406_v26, %v410_v27  ;;  %6441 = vmatprep.subr.bf16.mxu1 %v10267_v63  ;;  %v10258_v41 = vcombine.low %v406_v26, %v410_v27 }
  0x65   :  { %v538_v31 = vld [vmem:[%s15984_s1 + $0xfe0] sm:$0xff]  ;;  %6442 = vmatpush1.bf16.msra.mxu1 %v10266_v33 }
  0x66   :  { %v398_v35 = vld [vmem:[%s15984_s1 + $0xb80] sm:$0xff]  ;;  %v10387_v38 = vcombine.high %v534_v28, %v538_v31  ;;  %6402 = vmatprep.subr.bf16.mxu0 %v10259_v34  ;;  %v10386_v42 = vcombine.low %v534_v28, %v538_v31  ;;  %v12166_v34 = vrot.slane %v12150_v24, %v11805_v53 }
  0x67   :  { %v402_v36 = vld [vmem:[%s15984_s1 + $0xba0] sm:$0xff]  ;;  %6403 = vmatpush2.bf16.msra.mxu0 %v10258_v41 }
  0x68   :  { %v526_v37 = vld [vmem:[%s15984_s1 + $0xf80] sm:$0xff]  ;;  %v10251_v44 = vcombine.high %v398_v35, %v402_v36  ;;  %6443 = vmatprep.subr.bf16.mxu1 %v10387_v38  ;;  %v10250_v50 = vcombine.low %v398_v35, %v402_v36 }
  0x69   :  { %v530_v40 = vld [vmem:[%s15984_s1 + $0xfa0] sm:$0xff]  ;;  %6444 = vmatpush2.bf16.msra.mxu1 %v10386_v42 }
  0x6a   :  { %v390_v45 = vld [vmem:[%s15984_s1 + $0xb40] sm:$0xff]  ;;  %v10379_v48 = vcombine.high %v526_v37, %v530_v40  ;;  %6404 = vmatprep.subr.bf16.mxu0 %v10251_v44  ;;  %v10378_v51 = vcombine.low %v526_v37, %v530_v40 }
  0x6b   :  { %v394_v46 = vld [vmem:[%s15984_s1 + $0xb60] sm:$0xff]  ;;  %6405 = vmatpush2.bf16.msra.mxu0 %v10250_v50 }
  0x6c   :  { %v518_v47 = vld [vmem:[%s15984_s1 + $0xf40] sm:$0xff]  ;;  %v10243_v52 = vcombine.high %v390_v45, %v394_v46  ;;  %6445 = vmatprep.subr.bf16.mxu1 %v10379_v48  ;;  %v10242_v60 = vcombine.low %v390_v45, %v394_v46  ;;  %v1154_v45 = vcombine.high %v12166_v34, %v12166_v34 }
  0x6d   :  { %v522_v49 = vld [vmem:[%s15984_s1 + $0xf60] sm:$0xff]  ;;  %6446 = vmatpush2.bf16.msra.mxu1 %v10378_v51 }
  0x6e   :  { %v382_v54 = vld [vmem:[%s15984_s1 + $0xb00] sm:$0xff]  ;;  %v10371_v57 = vcombine.high %v518_v47, %v522_v49  ;;  %6406 = vmatprep.subr.bf16.mxu0 %v10243_v52  ;;  %v10370_v61 = vcombine.low %v518_v47, %v522_v49  ;;  %v12184_v47 = vrot.slane %v11944_v10, %v11805_v53 }
  0x6f   :  { %v386_v55 = vld [vmem:[%s15984_s1 + $0xb20] sm:$0xff]  ;;  %6407 = vmatpush2.bf16.msra.mxu0 %v10242_v60 }
  0x70   :  { %v510_v56 = vld [vmem:[%s15984_s1 + $0xf00] sm:$0xff]  ;;  %v10235_v62 = vcombine.high %v382_v54, %v386_v55  ;;  %6447 = vmatprep.subr.bf16.mxu1 %v10371_v57  ;;  %v10234_v5 = vcombine.low %v382_v54, %v386_v55  ;;  %v12199_v55 = vrot.slane %v1154_v45, %v11805_v53 }
  0x71   :  { %v514_v58 = vld [vmem:[%s15984_s1 + $0xf20] sm:$0xff]  ;;  %6448 = vmatpush2.bf16.msra.mxu1 %v10370_v61 }
  0x72   :  { %v374_v0 = vld [vmem:[%s15984_s1 + $0xac0] sm:$0xff]  ;;  %v10363_v3 = vcombine.high %v510_v56, %v514_v58  ;;  %6408 = vmatprep.subr.bf16.mxu0 %v10235_v62  ;;  %v10362_v6 = vcombine.low %v510_v56, %v514_v58  ;;  %v12203_v56 = vcombine.high %v12184_v47, %v12184_v47 }
  0x73   :  { %v378_v1 = vld [vmem:[%s15984_s1 + $0xae0] sm:$0xff]  ;;  %6409 = vmatpush2.bf16.msra.mxu0 %v10234_v5 }
  0x74   :  { %v502_v2 = vld [vmem:[%s15984_s1 + $0xec0] sm:$0xff]  ;;  %v10227_v7 = vcombine.high %v374_v0, %v378_v1  ;;  %6449 = vmatprep.subr.bf16.mxu1 %v10363_v3  ;;  %v10226_v15 = vcombine.low %v374_v0, %v378_v1  ;;  %v12220_v3 = vcombine.high %v12199_v55, %v12199_v55 }
  0x75   :  { %v506_v4 = vld [vmem:[%s15984_s1 + $0xee0] sm:$0xff]  ;;  %6450 = vmatpush2.bf16.msra.mxu1 %v10362_v6 }
  0x76   :  { %v366_v59 = vld [vmem:[%s15984_s1 + $0xa80] sm:$0xff]  ;;  %v10355_v12 = vcombine.high %v502_v2, %v506_v4  ;;  %6410 = vmatprep.subr.bf16.mxu0 %v10227_v7  ;;  %v10354_v17 = vcombine.low %v502_v2, %v506_v4 }
  0x77   :  { %v370_v8 = vld [vmem:[%s15984_s1 + $0xaa0] sm:$0xff]  ;;  %6411 = vmatpush2.bf16.msra.mxu0 %v10226_v15 }
  0x78   :  { %v494_v11 = vld [vmem:[%s15984_s1 + $0xe80] sm:$0xff]  ;;  %v10219_v18 = vcombine.high %v366_v59, %v370_v8  ;;  %6451 = vmatprep.subr.bf16.mxu1 %v10355_v12  ;;  %v10218_v25 = vcombine.low %v366_v59, %v370_v8 }
  0x79   :  { %v498_v14 = vld [vmem:[%s15984_s1 + $0xea0] sm:$0xff]  ;;  %6452 = vmatpush2.bf16.msra.mxu1 %v10354_v17 }
  0x7a   :  { %v358_v16 = vld [vmem:[%s15984_s1 + $0xa40] sm:$0xff]  ;;  %v10347_v23 = vcombine.high %v494_v11, %v498_v14  ;;  %6412 = vmatprep.subr.bf16.mxu0 %v10219_v18  ;;  %v10346_v26 = vcombine.low %v494_v11, %v498_v14 }
  0x7b   :  { %v362_v19 = vld [vmem:[%s15984_s1 + $0xa60] sm:$0xff]  ;;  %6413 = vmatpush2.bf16.msra.mxu0 %v10218_v25 }
  0x7c   :  { %v486_v20 = vld [vmem:[%s15984_s1 + $0xe40] sm:$0xff]  ;;  %v10211_v27 = vcombine.high %v358_v16, %v362_v19  ;;  %6453 = vmatprep.subr.bf16.mxu1 %v10347_v23  ;;  %v10210_v35 = vcombine.low %v358_v16, %v362_v19 }
  0x7d   :  { %v490_v21 = vld [vmem:[%s15984_s1 + $0xe60] sm:$0xff]  ;;  %6454 = vmatpush2.bf16.msra.mxu1 %v10346_v26 }
  0x7e   :  { %v350_v28 = vld [vmem:[%s15984_s1 + $0xa00] sm:$0xff]  ;;  %v10339_v32 = vcombine.high %v486_v20, %v490_v21  ;;  %6414 = vmatprep.subr.bf16.mxu0 %v10211_v27  ;;  %v10338_v36 = vcombine.low %v486_v20, %v490_v21 }
  0x7f   :  { %v354_v63 = vld [vmem:[%s15984_s1 + $0xa20] sm:$0xff]  ;;  %6415 = vmatpush2.bf16.msra.mxu0 %v10210_v35 }
  0x80   :  { %v478_v31 = vld [vmem:[%s15984_s1 + $0xe00] sm:$0xff]  ;;  %v10203_v37 = vcombine.high %v350_v28, %v354_v63  ;;  %6455 = vmatprep.subr.bf16.mxu1 %v10339_v32  ;;  %v10202_v46 = vcombine.low %v350_v28, %v354_v63 }
  0x81   :  { %v482_v33 = vld [vmem:[%s15984_s1 + $0xe20] sm:$0xff]  ;;  %6456 = vmatpush2.bf16.msra.mxu1 %v10338_v36 }
  0x82   :  { %v598_v38 = vld [vmem:[%s15984_s1 + $0x11c0] sm:$0xff]  ;;  %v10331_v42 = vcombine.high %v478_v31, %v482_v33  ;;  %6416 = vmatprep.subr.bf16.mxu0 %v10203_v37  ;;  %v10330_v48 = vcombine.low %v478_v31, %v482_v33 }
  0x83   :  { %v602_v40 = vld [vmem:[%s15984_s1 + $0x11e0] sm:$0xff]  ;;  %6417 = vmatpush2.bf16.msra.mxu0 %v10202_v46 }
  0x84   :  { %v726_v41 = vld [vmem:[%s15984_s1 + $0x15c0] sm:$0xff]  ;;  %v10451_v49 = vcombine.high %v598_v38, %v602_v40  ;;  %6457 = vmatprep.subr.bf16.mxu1 %v10331_v42  ;;  %v10450_v57 = vcombine.low %v598_v38, %v602_v40 }
  0x85   :  { %v730_v44 = vld [vmem:[%s15984_s1 + $0x15e0] sm:$0xff]  ;;  %6458 = vmatpush2.bf16.msra.mxu1 %v10330_v48 }
  0x86   :  { %v590_v50 = vld [vmem:[%s15984_s1 + $0x1180] sm:$0xff]  ;;  %v10579_v54 = vcombine.high %v726_v41, %v730_v44  ;;  %6468 = vmatprep.subr.bf16.mxu0 %v10451_v49  ;;  %v10578_v58 = vcombine.low %v726_v41, %v730_v44  ;;  %6419 = vmatmul.mubr.bf16.vlgmr.msra.gmra.mxu0 %v12184_v47 }
  0x87   :  { %v594_v51 = vld [vmem:[%s15984_s1 + $0x11a0] sm:$0xff]  ;;  %6469 = vmatpush1.bf16.msra.mxu0 %v10450_v57  ;;  %6500 = vmatprep.mubr.bf16.mxu0 %v12199_v55 }
  0x88   :  { %v718_v52 = vld [vmem:[%s15984_s1 + $0x1580] sm:$0xff]  ;;  %v10443_v60 = vcombine.high %v590_v50, %v594_v51  ;;  %6509 = vmatprep.subr.bf16.mxu1 %v10579_v54  ;;  %6460 = vmatmul.mubr.bf16.vlgmr.msra.gmra.mxu1 %v12203_v56  ;;  %v10442_v4 = vcombine.low %v590_v50, %v594_v51 }
  0x89   :  { %v722_v10 = vld [vmem:[%s15984_s1 + $0x15a0] sm:$0xff]  ;;  %6510 = vmatpush1.bf16.msra.mxu1 %v10578_v58  ;;  %6541 = vmatprep.mubr.bf16.mxu1 %v12220_v3 }
  0x8a   :  { %v582_v61 = vld [vmem:[%s15984_s1 + $0x1140] sm:$0xff]  ;;  %v10571_v0 = vcombine.high %v718_v52, %v722_v10  ;;  %6470 = vmatprep.subr.bf16.mxu0 %v10443_v60  ;;  %v10570_v5 = vcombine.low %v718_v52, %v722_v10 }
  0x8b   :  { %v586_v62 = vld [vmem:[%s15984_s1 + $0x1160] sm:$0xff]  ;;  %6471 = vmatpush1.bf16.msra.mxu0 %v10442_v4 }
  0x8c   :  { %v710_v1 = vld [vmem:[%s15984_s1 + $0x1540] sm:$0xff]  ;;  %v10435_v6 = vcombine.high %v582_v61, %v586_v62  ;;  %6511 = vmatprep.subr.bf16.mxu1 %v10571_v0  ;;  %v10434_v14 = vcombine.low %v582_v61, %v586_v62 }
  0x8d   :  { %v714_v2 = vld [vmem:[%s15984_s1 + $0x1560] sm:$0xff]  ;;  %6512 = vmatpush1.bf16.msra.mxu1 %v10570_v5 }
  0x8e   :  { %v574_v7 = vld [vmem:[%s15984_s1 + $0x1100] sm:$0xff]  ;;  %v10563_v11 = vcombine.high %v710_v1, %v714_v2  ;;  %6472 = vmatprep.subr.bf16.mxu0 %v10435_v6  ;;  %v10562_v15 = vcombine.low %v710_v1, %v714_v2 }
  0x8f   :  { %v578_v59 = vld [vmem:[%s15984_s1 + $0x1120] sm:$0xff]  ;;  %6473 = vmatpush1.bf16.msra.mxu0 %v10434_v14 }
  0x90   :  { %v702_v8 = vld [vmem:[%s15984_s1 + $0x1500] sm:$0xff]  ;;  %v10427_v16 = vcombine.high %v574_v7, %v578_v59  ;;  %6513 = vmatprep.subr.bf16.mxu1 %v10563_v11  ;;  %v10426_v23 = vcombine.low %v574_v7, %v578_v59 }
  0x91   :  { %v706_v12 = vld [vmem:[%s15984_s1 + $0x1520] sm:$0xff]  ;;  %6514 = vmatpush1.bf16.msra.mxu1 %v10562_v15 }
  0x92   :  { %v566_v17 = vld [vmem:[%s15984_s1 + $0x10c0] sm:$0xff]  ;;  %v10555_v20 = vcombine.high %v702_v8, %v706_v12  ;;  %6474 = vmatprep.subr.bf16.mxu0 %v10427_v16  ;;  %v10554_v25 = vcombine.low %v702_v8, %v706_v12 }
  0x93   :  { %v570_v18 = vld [vmem:[%s15984_s1 + $0x10e0] sm:$0xff]  ;;  %6475 = vmatpush1.bf16.msra.mxu0 %v10426_v23 }
  0x94   :  { %v694_v19 = vld [vmem:[%s15984_s1 + $0x14c0] sm:$0xff]  ;;  %v10419_v26 = vcombine.high %v566_v17, %v570_v18  ;;  %6515 = vmatprep.subr.bf16.mxu1 %v10555_v20  ;;  %v10418_v33 = vcombine.low %v566_v17, %v570_v18 }
  0x95   :  { %v698_v21 = vld [vmem:[%s15984_s1 + $0x14e0] sm:$0xff]  ;;  %6516 = vmatpush1.bf16.msra.mxu1 %v10554_v25 }
  0x96   :  { %v558_v27 = vld [vmem:[%s15984_s1 + $0x1080] sm:$0xff]  ;;  %v10547_v31 = vcombine.high %v694_v19, %v698_v21  ;;  %6476 = vmatprep.subr.bf16.mxu0 %v10419_v26  ;;  %v10546_v35 = vcombine.low %v694_v19, %v698_v21 }
  0x97   :  { %v562_v28 = vld [vmem:[%s15984_s1 + $0x10a0] sm:$0xff]  ;;  %6477 = vmatpush1.bf16.msra.mxu0 %v10418_v33 }
  0x98   :  { %v686_v63 = vld [vmem:[%s15984_s1 + $0x1480] sm:$0xff]  ;;  %v10411_v36 = vcombine.high %v558_v27, %v562_v28  ;;  %6517 = vmatprep.subr.bf16.mxu1 %v10547_v31  ;;  %v10410_v44 = vcombine.low %v558_v27, %v562_v28 }
  0x99   :  { %v690_v32 = vld [vmem:[%s15984_s1 + $0x14a0] sm:$0xff]  ;;  %6518 = vmatpush1.bf16.msra.mxu1 %v10546_v35 }
  0x9a   :  { %v550_v37 = vld [vmem:[%s15984_s1 + $0x1040] sm:$0xff]  ;;  %v10539_v41 = vcombine.high %v686_v63, %v690_v32  ;;  %6478 = vmatprep.subr.bf16.mxu0 %v10411_v36  ;;  %v10538_v45 = vcombine.low %v686_v63, %v690_v32 }
  0x9b   :  { %v554_v38 = vld [vmem:[%s15984_s1 + $0x1060] sm:$0xff]  ;;  %6479 = vmatpush1.bf16.msra.mxu0 %v10410_v44 }
  0x9c   :  { %v678_v40 = vld [vmem:[%s15984_s1 + $0x1440] sm:$0xff]  ;;  %v10403_v46 = vcombine.high %v550_v37, %v554_v38  ;;  %6519 = vmatprep.subr.bf16.mxu1 %v10539_v41  ;;  %v10402_v54 = vcombine.low %v550_v37, %v554_v38 }
  0x9d   :  { %v682_v42 = vld [vmem:[%s15984_s1 + $0x1460] sm:$0xff]  ;;  %6520 = vmatpush1.bf16.msra.mxu1 %v10538_v45 }
  0x9e   :  { %v542_v48 = vld [vmem:[%s15984_s1 + $0x1000] sm:$0xff]  ;;  %v10531_v51 = vcombine.high %v678_v40, %v682_v42  ;;  %6480 = vmatprep.subr.bf16.mxu0 %v10403_v46  ;;  %v10530_v10 = vcombine.low %v678_v40, %v682_v42 }
  0x9f   :  { %v546_v49 = vld [vmem:[%s15984_s1 + $0x1020] sm:$0xff]  ;;  %6481 = vmatpush1.bf16.msra.mxu0 %v10402_v54 }
  0xa0   :  { %v670_v50 = vld [vmem:[%s15984_s1 + $0x1400] sm:$0xff]  ;;  %v10395_v57 = vcombine.high %v542_v48, %v546_v49  ;;  %6521 = vmatprep.subr.bf16.mxu1 %v10531_v51  ;;  %v10394_v1 = vcombine.low %v542_v48, %v546_v49 }
  0xa1   :  { %v674_v52 = vld [vmem:[%s15984_s1 + $0x1420] sm:$0xff]  ;;  %6522 = vmatpush1.bf16.msra.mxu1 %v10530_v10 }
  0xa2   :  { %v662_v58 = vld [vmem:[%s15984_s1 + $0x13c0] sm:$0xff]  ;;  %v10523_v62 = vcombine.high %v670_v50, %v674_v52  ;;  %6482 = vmatprep.subr.bf16.mxu0 %v10395_v57  ;;  %v10522_v2 = vcombine.low %v670_v50, %v674_v52 }
  0xa3   :  { %v666_v60 = vld [vmem:[%s15984_s1 + $0x13e0] sm:$0xff]  ;;  %6483 = vmatpush1.bf16.msra.mxu0 %v10394_v1 }
  0xa4   :  { %v790_v61 = vld [vmem:[%s15984_s1 + $0x17c0] sm:$0xff]  ;;  %v10515_v4 = vcombine.high %v662_v58, %v666_v60  ;;  %6523 = vmatprep.subr.bf16.mxu1 %v10523_v62  ;;  %v10514_v11 = vcombine.low %v662_v58, %v666_v60  ;;  %v1139_v62 = vcombine.high %v12150_v24, %v12150_v24 }
  0xa5   :  { %v794_v0 = vld [vmem:[%s15984_s1 + $0x17e0] sm:$0xff]  ;;  %6524 = vmatpush1.bf16.msra.mxu1 %v10522_v2 }
  0xa6   :  { %v654_v5 = vld [vmem:[%s15984_s1 + $0x1380] sm:$0xff]  ;;  %v10643_v59 = vcombine.high %v790_v61, %v794_v0  ;;  %6484 = vmatprep.subr.bf16.mxu0 %v10515_v4  ;;  %v10642_v12 = vcombine.low %v790_v61, %v794_v0 }
  0xa7   :  { %v658_v6 = vld [vmem:[%s15984_s1 + $0x13a0] sm:$0xff]  ;;  %6485 = vmatpush2.bf16.msra.mxu0 %v10514_v11 }
  0xa8   :  { %v782_v7 = vld [vmem:[%s15984_s1 + $0x1780] sm:$0xff]  ;;  %v10507_v14 = vcombine.high %v654_v5, %v658_v6  ;;  %6525 = vmatprep.subr.bf16.mxu1 %v10643_v59  ;;  %v10506_v20 = vcombine.low %v654_v5, %v658_v6  ;;  %v12384_v59 = vrot.slane %v1139_v62, %v11805_v53 }
  0xa9   :  { %v786_v8 = vld [vmem:[%s15984_s1 + $0x17a0] sm:$0xff]  ;;  %6526 = vmatpush2.bf16.msra.mxu1 %v10642_v12 }
  0xaa   :  { %v646_v15 = vld [vmem:[%s15984_s1 + $0x1340] sm:$0xff]  ;;  %v10635_v18 = vcombine.high %v782_v7, %v786_v8  ;;  %6486 = vmatprep.subr.bf16.mxu0 %v10507_v14  ;;  %v10634_v21 = vcombine.low %v782_v7, %v786_v8 }
  0xab   :  { %v650_v16 = vld [vmem:[%s15984_s1 + $0x1360] sm:$0xff]  ;;  %6487 = vmatpush2.bf16.msra.mxu0 %v10506_v20 }
  0xac   :  { %v774_v17 = vld [vmem:[%s15984_s1 + $0x1740] sm:$0xff]  ;;  %v10499_v23 = vcombine.high %v646_v15, %v650_v16  ;;  %6527 = vmatprep.subr.bf16.mxu1 %v10635_v18  ;;  %v10498_v31 = vcombine.low %v646_v15, %v650_v16 }
  0xad   :  { %v778_v19 = vld [vmem:[%s15984_s1 + $0x1760] sm:$0xff]  ;;  %6528 = vmatpush2.bf16.msra.mxu1 %v10634_v21  ;;  %v12402_v21 = vrot.slane %v12166_v34, %v11805_v53 }
  0xae   :  { %v638_v25 = vld [vmem:[%s15984_s1 + $0x1300] sm:$0xff]  ;;  %v10627_v28 = vcombine.high %v774_v17, %v778_v19  ;;  %6488 = vmatprep.subr.bf16.mxu0 %v10499_v23  ;;  %v10626_v32 = vcombine.low %v774_v17, %v778_v19  ;;  %v1155_v19 = vcombine.high %v12384_v59, %v12384_v59 }
  0xaf   :  { %v642_v26 = vld [vmem:[%s15984_s1 + $0x1320] sm:$0xff]  ;;  %6489 = vmatpush2.bf16.msra.mxu0 %v10498_v31 }
  0xb0   :  { %v766_v27 = vld [vmem:[%s15984_s1 + $0x1700] sm:$0xff]  ;;  %v10491_v33 = vcombine.high %v638_v25, %v642_v26  ;;  %6529 = vmatprep.subr.bf16.mxu1 %v10627_v28  ;;  %v10490_v41 = vcombine.low %v638_v25, %v642_v26  ;;  %v12417_v31 = vrot.slane %v1155_v19, %v11805_v53 }
  0xb1   :  { %v770_v63 = vld [vmem:[%s15984_s1 + $0x1720] sm:$0xff]  ;;  %6530 = vmatpush2.bf16.msra.mxu1 %v10626_v32  ;;  %v12421_v32 = vcombine.high %v12402_v21, %v12402_v21 }
  0xb2   :  { %v630_v35 = vld [vmem:[%s15984_s1 + $0x12c0] sm:$0xff]  ;;  %v10619_v38 = vcombine.high %v766_v27, %v770_v63  ;;  %6490 = vmatprep.subr.bf16.mxu0 %v10491_v33  ;;  %v10618_v42 = vcombine.low %v766_v27, %v770_v63 }
  0xb3   :  { %v634_v36 = vld [vmem:[%s15984_s1 + $0x12e0] sm:$0xff]  ;;  %6491 = vmatpush2.bf16.msra.mxu0 %v10490_v41 }
  0xb4   :  { %v758_v37 = vld [vmem:[%s15984_s1 + $0x16c0] sm:$0xff]  ;;  %v10483_v44 = vcombine.high %v630_v35, %v634_v36  ;;  %6531 = vmatprep.subr.bf16.mxu1 %v10619_v38  ;;  %v10482_v51 = vcombine.low %v630_v35, %v634_v36 }
  0xb5   :  { %v762_v40 = vld [vmem:[%s15984_s1 + $0x16e0] sm:$0xff]  ;;  %6532 = vmatpush2.bf16.msra.mxu1 %v10618_v42 }
  0xb6   :  { %v622_v45 = vld [vmem:[%s15984_s1 + $0x1280] sm:$0xff]  ;;  %v10611_v49 = vcombine.high %v758_v37, %v762_v40  ;;  %6492 = vmatprep.subr.bf16.mxu0 %v10483_v44  ;;  %v10610_v52 = vcombine.low %v758_v37, %v762_v40  ;;  %v12437_v44 = vcombine.high %v12417_v31, %v12417_v31 }
  0xb7   :  { %v626_v46 = vld [vmem:[%s15984_s1 + $0x12a0] sm:$0xff]  ;;  %6493 = vmatpush2.bf16.msra.mxu0 %v10482_v51 }
  0xb8   :  { %v750_v48 = vld [vmem:[%s15984_s1 + $0x1680] sm:$0xff]  ;;  %v10475_v54 = vcombine.high %v622_v45, %v626_v46  ;;  %6533 = vmatprep.subr.bf16.mxu1 %v10611_v49  ;;  %v10474_v0 = vcombine.low %v622_v45, %v626_v46 }
  0xb9   :  { %v754_v50 = vld [vmem:[%s15984_s1 + $0x16a0] sm:$0xff]  ;;  %6534 = vmatpush2.bf16.msra.mxu1 %v10610_v52 }
  0xba   :  { %v614_v10 = vld [vmem:[%s15984_s1 + $0x1240] sm:$0xff]  ;;  %v10603_v60 = vcombine.high %v750_v48, %v754_v50  ;;  %6494 = vmatprep.subr.bf16.mxu0 %v10475_v54  ;;  %v10602_v1 = vcombine.low %v750_v48, %v754_v50 }
  0xbb   :  { %v618_v57 = vld [vmem:[%s15984_s1 + $0x1260] sm:$0xff]  ;;  %6495 = vmatpush2.bf16.msra.mxu0 %v10474_v0 }
  0xbc   :  { %v742_v58 = vld [vmem:[%s15984_s1 + $0x1640] sm:$0xff]  ;;  %v10467_v2 = vcombine.high %v614_v10, %v618_v57  ;;  %6535 = vmatprep.subr.bf16.mxu1 %v10603_v60  ;;  %v10466_v8 = vcombine.low %v614_v10, %v618_v57 }
  0xbd   :  { %v746_v61 = vld [vmem:[%s15984_s1 + $0x1660] sm:$0xff]  ;;  %6536 = vmatpush2.bf16.msra.mxu1 %v10602_v1 }
  0xbe   :  { %v606_v4 = vld [vmem:[%s15984_s1 + $0x1200] sm:$0xff]  ;;  %v10595_v24 = vcombine.high %v742_v58, %v746_v61  ;;  %6496 = vmatprep.subr.bf16.mxu0 %v10467_v2  ;;  %v10594_v11 = vcombine.low %v742_v58, %v746_v61 }
  0xbf   :  { %v610_v5 = vld [vmem:[%s15984_s1 + $0x1220] sm:$0xff]  ;;  %6497 = vmatpush2.bf16.msra.mxu0 %v10466_v8 }
  0xc0   :  { %v734_v6 = vld [vmem:[%s15984_s1 + $0x1600] sm:$0xff]  ;;  %v10459_v12 = vcombine.high %v606_v4, %v610_v5  ;;  %6537 = vmatprep.subr.bf16.mxu1 %v10595_v24  ;;  %v10458_v20 = vcombine.low %v606_v4, %v610_v5 }
  0xc1   :  { %v738_v7 = vld [vmem:[%s15984_s1 + $0x1620] sm:$0xff]  ;;  %6538 = vmatpush2.bf16.msra.mxu1 %v10594_v11 }
  0xc2   :  { %v854_v14 = vld [vmem:[%s15984_s1 + $0x19c0] sm:$0xff]  ;;  %v10587_v17 = vcombine.high %v734_v6, %v738_v7  ;;  %6498 = vmatprep.subr.bf16.mxu0 %v10459_v12  ;;  %v10586_v23 = vcombine.low %v734_v6, %v738_v7 }
  0xc3   :  { %v858_v15 = vld [vmem:[%s15984_s1 + $0x19e0] sm:$0xff]  ;;  %6499 = vmatpush2.bf16.msra.mxu0 %v10458_v20 }
  0xc4   :  { %v982_v16 = vld [vmem:[%s15984_s1 + $0x1dc0] sm:$0xff]  ;;  %v10707_v25 = vcombine.high %v854_v14, %v858_v15  ;;  %6539 = vmatprep.subr.bf16.mxu1 %v10587_v17  ;;  %v10706_v33 = vcombine.low %v854_v14, %v858_v15 }
  0xc5   :  { %v986_v18 = vld [vmem:[%s15984_s1 + $0x1de0] sm:$0xff]  ;;  %6540 = vmatpush2.bf16.msra.mxu1 %v10586_v23 }
  0xc6   :  { %v846_v26 = vld [vmem:[%s15984_s1 + $0x1980] sm:$0xff]  ;;  %v10835_v63 = vcombine.high %v982_v16, %v986_v18  ;;  %6550 = vmatprep.subr.bf16.mxu0 %v10707_v25  ;;  %v10834_v35 = vcombine.low %v982_v16, %v986_v18  ;;  %6501 = vmatmul.mubr.bf16.vlgmr.msra.gmra.mxu0 %v12402_v21 }
  0xc7   :  { %v850_v27 = vld [vmem:[%s15984_s1 + $0x19a0] sm:$0xff]  ;;  %6551 = vmatpush1.bf16.msra.mxu0 %v10706_v33  ;;  %6582 = vmatprep.mubr.bf16.mxu0 %v12417_v31 }
  0xc8   :  { %v974_v28 = vld [vmem:[%s15984_s1 + $0x1d80] sm:$0xff]  ;;  %v10699_v36 = vcombine.high %v846_v26, %v850_v27  ;;  %6591 = vmatprep.subr.bf16.mxu1 %v10835_v63  ;;  %6542 = vmatmul.mubr.bf16.vlgmr.msra.gmra.mxu1 %v12421_v32  ;;  %v10698_v45 = vcombine.low %v846_v26, %v850_v27 }
  0xc9   :  { %v978_v34 = vld [vmem:[%s15984_s1 + $0x1da0] sm:$0xff]  ;;  %6592 = vmatpush1.bf16.msra.mxu1 %v10834_v35  ;;  %10899 = vmatprep.mubr.msk.bf16.mxu1 %vm6275_vm0, %v12437_v44 }
  0xca   :  { %v838_v37 = vld [vmem:[%s15984_s1 + $0x1940] sm:$0xff]  ;;  %v10827_v41 = vcombine.high %v974_v28, %v978_v34  ;;  %6552 = vmatprep.subr.bf16.mxu0 %v10699_v36  ;;  %v10826_v46 = vcombine.low %v974_v28, %v978_v34 }
  0xcb   :  { %v842_v38 = vld [vmem:[%s15984_s1 + $0x1960] sm:$0xff]  ;;  %6553 = vmatpush1.bf16.msra.mxu0 %v10698_v45 }
  0xcc   :  { %v966_v40 = vld [vmem:[%s15984_s1 + $0x1d40] sm:$0xff]  ;;  %v10691_v48 = vcombine.high %v838_v37, %v842_v38  ;;  %6593 = vmatprep.subr.bf16.mxu1 %v10827_v41  ;;  %v10690_v10 = vcombine.low %v838_v37, %v842_v38 }
  0xcd   :  { %v970_v42 = vld [vmem:[%s15984_s1 + $0x1d60] sm:$0xff]  ;;  %6594 = vmatpush1.bf16.msra.mxu1 %v10826_v46 }
  0xce   :  { %v830_v49 = vld [vmem:[%s15984_s1 + $0x1900] sm:$0xff]  ;;  %v10819_v52 = vcombine.high %v966_v40, %v970_v42  ;;  %6554 = vmatprep.subr.bf16.mxu0 %v10691_v48  ;;  %v10818_v57 = vcombine.low %v966_v40, %v970_v42 }
  0xcf   :  { %v834_v50 = vld [vmem:[%s15984_s1 + $0x1920] sm:$0xff]  ;;  %6555 = vmatpush1.bf16.msra.mxu0 %v10690_v10 }
  0xd0   :  { %v958_v51 = vld [vmem:[%s15984_s1 + $0x1d00] sm:$0xff]  ;;  %v10683_v58 = vcombine.high %v830_v49, %v834_v50  ;;  %6595 = vmatprep.subr.bf16.mxu1 %v10819_v52  ;;  %v10682_v2 = vcombine.low %v830_v49, %v834_v50 }
  0xd1   :  { %v962_v54 = vld [vmem:[%s15984_s1 + $0x1d20] sm:$0xff]  ;;  %6596 = vmatpush1.bf16.msra.mxu1 %v10818_v57 }
  0xd2   :  { %v822_v60 = vld [vmem:[%s15984_s1 + $0x18c0] sm:$0xff]  ;;  %v10811_v0 = vcombine.high %v958_v51, %v962_v54  ;;  %6556 = vmatprep.subr.bf16.mxu0 %v10683_v58  ;;  %v10810_v4 = vcombine.low %v958_v51, %v962_v54 }
  0xd3   :  { %v826_v61 = vld [vmem:[%s15984_s1 + $0x18e0] sm:$0xff]  ;;  %6557 = vmatpush1.bf16.msra.mxu0 %v10682_v2 }
  0xd4   :  { %v950_v62 = vld [vmem:[%s15984_s1 + $0x1cc0] sm:$0xff]  ;;  %v10675_v5 = vcombine.high %v822_v60, %v826_v61  ;;  %6597 = vmatprep.subr.bf16.mxu1 %v10811_v0  ;;  %v10674_v12 = vcombine.low %v822_v60, %v826_v61 }
  0xd5   :  { %v954_v1 = vld [vmem:[%s15984_s1 + $0x1ce0] sm:$0xff]  ;;  %6598 = vmatpush1.bf16.msra.mxu1 %v10810_v4 }
  0xd6   :  { %v814_v6 = vld [vmem:[%s15984_s1 + $0x1880] sm:$0xff]  ;;  %v10803_v8 = vcombine.high %v950_v62, %v954_v1  ;;  %6558 = vmatprep.subr.bf16.mxu0 %v10675_v5  ;;  %v10802_v14 = vcombine.low %v950_v62, %v954_v1 }
  0xd7   :  { %v818_v24 = vld [vmem:[%s15984_s1 + $0x18a0] sm:$0xff]  ;;  %6559 = vmatpush1.bf16.msra.mxu0 %v10674_v12 }
  0xd8   :  { %v942_v7 = vld [vmem:[%s15984_s1 + $0x1c80] sm:$0xff]  ;;  %v10667_v15 = vcombine.high %v814_v6, %v818_v24  ;;  %6599 = vmatprep.subr.bf16.mxu1 %v10803_v8  ;;  %v10666_v23 = vcombine.low %v814_v6, %v818_v24 }
  0xd9   :  { %v946_v11 = vld [vmem:[%s15984_s1 + $0x1ca0] sm:$0xff]  ;;  %6600 = vmatpush1.bf16.msra.mxu1 %v10802_v14 }
  0xda   :  { %v806_v16 = vld [vmem:[%s15984_s1 + $0x1840] sm:$0xff]  ;;  %v10795_v19 = vcombine.high %v942_v7, %v946_v11  ;;  %6560 = vmatprep.subr.bf16.mxu0 %v10667_v15  ;;  %v10794_v25 = vcombine.low %v942_v7, %v946_v11 }
  0xdb   :  { %v810_v17 = vld [vmem:[%s15984_s1 + $0x1860] sm:$0xff]  ;;  %6561 = vmatpush1.bf16.msra.mxu0 %v10666_v23 }
  0xdc   :  { %v934_v18 = vld [vmem:[%s15984_s1 + $0x1c40] sm:$0xff]  ;;  %v10659_v26 = vcombine.high %v806_v16, %v810_v17  ;;  %6601 = vmatprep.subr.bf16.mxu1 %v10795_v19  ;;  %v10658_v35 = vcombine.low %v806_v16, %v810_v17 }
  0xdd   :  { %v938_v20 = vld [vmem:[%s15984_s1 + $0x1c60] sm:$0xff]  ;;  %6602 = vmatpush1.bf16.msra.mxu1 %v10794_v25 }
  0xde   :  { %v798_v27 = vld [vmem:[%s15984_s1 + $0x1800] sm:$0xff]  ;;  %v10787_v34 = vcombine.high %v934_v18, %v938_v20  ;;  %6562 = vmatprep.subr.bf16.mxu0 %v10659_v26  ;;  %v10786_v36 = vcombine.low %v934_v18, %v938_v20 }
  0xdf   :  { %v802_v28 = vld [vmem:[%s15984_s1 + $0x1820] sm:$0xff]  ;;  %6563 = vmatpush1.bf16.msra.mxu0 %v10658_v35 }
  0xe0   :  { %v926_v63 = vld [vmem:[%s15984_s1 + $0x1c00] sm:$0xff]  ;;  %v10651_v37 = vcombine.high %v798_v27, %v802_v28  ;;  %6603 = vmatprep.subr.bf16.mxu1 %v10787_v34  ;;  %v10650_v46 = vcombine.low %v798_v27, %v802_v28 }
  0xe1   :  { %v930_v33 = vld [vmem:[%s15984_s1 + $0x1c20] sm:$0xff] }
  0xe2   :  { %v918_v38 = vld [vmem:[%s15984_s1 + $0x1bc0] sm:$0xff]  ;;  %v10779_v42 = vcombine.high %v926_v63, %v930_v33 }
  0xe3   :  { %v922_v40 = vld [vmem:[%s15984_s1 + $0x1be0] sm:$0xff] }
  0xe4   :  { %v1038_v41 = vld [vmem:[%s15984_s1 + $0x1f80] sm:$0xff] }
  0xe5   :  { %v1042_v45 = vld [vmem:[%s15984_s1 + $0x1fa0] sm:$0x33] }
  0xe6   :  { %12 = vsyncpa [#allocation3], 0  ;;  %6604 = vmatpush1.bf16.msra.mxu1 %v10786_v36  ;;  %6564 = vmatprep.subr.bf16.mxu0 %v10651_v37  ;;  %v10778_v48 = vcombine.low %v926_v63, %v930_v33  ;;  %v10771_v49 = vcombine.high %v918_v38, %v922_v40  ;;  %v10891_v50 = vcombine.high %v1038_v41, %v1042_v45  ;;  %v910_v52 = vld [vmem:[%s15984_s1 + $0x1b80] sm:$0xff]  ;;  %vm6279_vm1 = vcmask 1045504  }
  0xe7   :  { %6605 = vmatprep.subr.bf16.mxu1 %v10779_v42  ;;  %v10890_v51 = vcombine.low %v1038_v41, %v1042_v45  ;;  %v914_v54 = vld [vmem:[%s15984_s1 + $0x1ba0] sm:$0xff]  ;;  %6565 = vmatpush1.bf16.msra.mxu0 %v10650_v46  ;;  %v10770_v58 = vcombine.low %v918_v38, %v922_v40  ;;  %vm9158_vm2 = vcmask 1043456   ;;  %vm9154_vm3 = vcmask 850944  }
  0xe8   :  { %v1030_v10 = vld [vmem:[%s15984_s1 + $0x1f40] sm:$0xff]  ;;  %6566 = vmatprep.subr.bf16.mxu0 %v10771_v49  ;;  %v10763_v60 = vcombine.high %v910_v52, %v914_v54  ;;  %v10762_v5 = vcombine.low %v910_v52, %v914_v54  ;;  %vm9770_vm4 = vcmask 1041408   ;;  %vm9766_vm5 = vcmask 949248  }
  0xe9   :  { %v1034_v57 = vld [vmem:[%s15984_s1 + $0x1f60] sm:$0xff]  ;;  %v6281_v61 = vsel %vm6279_vm1, %v10890_v51, 0  ;;  %vm9854_vm6 = vcmask 58368  }
  0xea   :  { %6606 = vmatpush1.bf16.msra.mxu1 %v10778_v48  ;;  %v10883_v62 = vcombine.high %v1030_v10, %v1034_v57  ;;  %v902_v0 = vld [vmem:[%s15984_s1 + $0x1b40] sm:$0xff]  ;;  %v10882_v6 = vcombine.low %v1030_v10, %v1034_v57  ;;  %v87_v57 = vld [vmem:[%s15984_s1 + $0x1c8] sm:$0xff] }
  0xeb   :  { %10898 = vmatprep.subr.msk.bf16.mxu1 %vm6279_vm1, %v10891_v50  ;;  %v906_v1 = vld [vmem:[%s15984_s1 + $0x1b60] sm:$0xff]  ;;  %6567 = vmatpush2.bf16.msra.mxu0 %v10770_v58  ;;  %v91_v58 = vld [vmem:[%s15984_s1 + $0x1e8] sm:$0xff] }
  0xec   :  { %v1022_v2 = vld [vmem:[%s15984_s1 + $0x1f00] sm:$0xff]  ;;  %6568 = vmatprep.subr.bf16.mxu0 %v10763_v60  ;;  %v10755_v24 = vcombine.high %v902_v0, %v906_v1  ;;  %v10754_v15 = vcombine.low %v902_v0, %v906_v1  ;;  %v9941_v1 = vcombine.high %v87_v57, %v91_v58 }
  0xed   :  { %v1026_v4 = vld [vmem:[%s15984_s1 + $0x1f20] sm:$0xff] }
  0xee   :  { %6610 = vmatpush2.bf16.msra.mxu1 %v6281_v61  ;;  %v10875_v7 = vcombine.high %v1022_v2, %v1026_v4  ;;  %v894_v8 = vld [vmem:[%s15984_s1 + $0x1b00] sm:$0xff]  ;;  %v10874_v16 = vcombine.low %v1022_v2, %v1026_v4  ;;  %v12604_v61 = vrot.slane %v12384_v59, %v11805_v53  ;;  %v215_v2 = vld [vmem:[%s15984_s1 + $0x5c8] sm:$0xff] }
  0xef   :  { %6611 = vmatprep.subr.bf16.mxu1 %v10883_v62  ;;  %v898_v11 = vld [vmem:[%s15984_s1 + $0x1b20] sm:$0xff]  ;;  %6569 = vmatpush2.bf16.msra.mxu0 %v10762_v5  ;;  %v219_v4 = vld [vmem:[%s15984_s1 + $0x5e8] sm:$0xff] }
  0xf0   :  { %v1014_v12 = vld [vmem:[%s15984_s1 + $0x1ec0] sm:$0xff]  ;;  %6570 = vmatprep.subr.bf16.mxu0 %v10755_v24  ;;  %v10747_v17 = vcombine.high %v894_v8, %v898_v11  ;;  %v10746_v26 = vcombine.low %v894_v8, %v898_v11  ;;  %v79_v5 = vld [vmem:[%s15984_s1 + $0x188] sm:$0xff]  ;;  %v1050_v24 = vsub.s32 0, %v11790_v43  ;;  %v10069_v11 = vcombine.high %v215_v2, %v219_v4 }
  0xf1   :  { %v1018_v14 = vld [vmem:[%s15984_s1 + $0x1ee0] sm:$0xff]  ;;  %v83_v53 = vld [vmem:[%s15984_s1 + $0x1a8] sm:$0xff] }
  0xf2   :  { %6612 = vmatpush2.bf16.msra.mxu1 %v10882_v6  ;;  %v10867_v18 = vcombine.high %v1014_v12, %v1018_v14  ;;  %v886_v19 = vld [vmem:[%s15984_s1 + $0x1ac0] sm:$0xff]  ;;  %v10866_v27 = vcombine.low %v1014_v12, %v1018_v14  ;;  %v12620_v6 = vcombine.high %v12604_v61, %v12604_v61  ;;  %v9933_v12 = vcombine.high %v79_v5, %v83_v53 }
  0xf3   :  { %6613 = vmatprep.subr.bf16.mxu1 %v10875_v7  ;;  %v890_v20 = vld [vmem:[%s15984_s1 + $0x1ae0] sm:$0xff]  ;;  %6571 = vmatpush2.bf16.msra.mxu0 %v10754_v15  ;;  %v9940_v7 = vcombine.low %v87_v57, %v91_v58  ;;  %v1054_v14 = vsub.s32 1, %v11790_v43  ;;  %v207_v15 = vld [vmem:[%s15984_s1 + $0x588] sm:$0xff] }
  0xf4   :  { %v1006_v23 = vld [vmem:[%s15984_s1 + $0x1e80] sm:$0xff]  ;;  %6572 = vmatprep.subr.bf16.mxu0 %v10747_v17  ;;  %v10739_v28 = vcombine.high %v886_v19, %v890_v20  ;;  %v10738_v37 = vcombine.low %v886_v19, %v890_v20  ;;  %v71_v17 = vld [vmem:[%s15984_s1 + $0x148] sm:$0xff]  ;;  %v10068_v20 = vcombine.low %v215_v2, %v219_v4 }
  0xf5   :  { %v1010_v25 = vld [vmem:[%s15984_s1 + $0x1ea0] sm:$0xff] }
  0xf6   :  { %6614 = vmatpush2.bf16.msra.mxu1 %v10874_v16  ;;  %v10859_v63 = vcombine.high %v1006_v23, %v1010_v25  ;;  %v878_v34 = vld [vmem:[%s15984_s1 + $0x1a80] sm:$0xff]  ;;  %v10858_v38 = vcombine.low %v1006_v23, %v1010_v25  ;;  %v211_v16 = vld [vmem:[%s15984_s1 + $0x5a8] sm:$0xff]  ;;  %v9932_v23 = vcombine.low %v79_v5, %v83_v53 }
  0xf7   :  { %6615 = vmatprep.subr.bf16.mxu1 %v10867_v18  ;;  %v882_v33 = vld [vmem:[%s15984_s1 + $0x1aa0] sm:$0xff]  ;;  %6573 = vmatpush2.bf16.msra.mxu0 %v10746_v26  ;;  %v75_v18 = vld [vmem:[%s15984_s1 + $0x168] sm:$0xff]  ;;  %v10061_v25 = vcombine.high %v207_v15, %v211_v16 }
  0xf8   :  { %v998_v35 = vld [vmem:[%s15984_s1 + $0x1e40] sm:$0xff]  ;;  %6574 = vmatprep.subr.bf16.mxu0 %v10739_v28  ;;  %v10731_v40 = vcombine.high %v878_v34, %v882_v33  ;;  %v10730_v49 = vcombine.low %v878_v34, %v882_v33  ;;  %v199_v28 = vld [vmem:[%s15984_s1 + $0x548] sm:$0xff] }
  0xf9   :  { %v1002_v36 = vld [vmem:[%s15984_s1 + $0x1e60] sm:$0xff]  ;;  %v63_v33 = vld [vmem:[%s15984_s1 + $0x108] sm:$0xff] }
  0xfa   :  { %6616 = vmatpush2.bf16.msra.mxu1 %v10866_v27  ;;  %v10851_v41 = vcombine.high %v998_v35, %v1002_v36  ;;  %v870_v42 = vld [vmem:[%s15984_s1 + $0x1a40] sm:$0xff]  ;;  %v10850_v50 = vcombine.low %v998_v35, %v1002_v36  ;;  %v9925_v27 = vcombine.high %v71_v17, %v75_v18  ;;  %v67_v35 = vld [vmem:[%s15984_s1 + $0x128] sm:$0xff] }
  0xfb   :  { %6617 = vmatprep.subr.bf16.mxu1 %v10859_v63  ;;  %v874_v45 = vld [vmem:[%s15984_s1 + $0x1a60] sm:$0xff]  ;;  %6575 = vmatpush2.bf16.msra.mxu0 %v10738_v37  ;;  %v203_v63 = vld [vmem:[%s15984_s1 + $0x568] sm:$0xff] }
  0xfc   :  { %v990_v46 = vld [vmem:[%s15984_s1 + $0x1e00] sm:$0xff]  ;;  %6576 = vmatprep.subr.bf16.mxu0 %v10731_v40  ;;  %v10723_v51 = vcombine.high %v870_v42, %v874_v45  ;;  %v10722_v60 = vcombine.low %v870_v42, %v874_v45  ;;  %v10053_v42 = vcombine.high %v199_v28, %v203_v63  ;;  %v183_v5 = vld [vmem:[%s15984_s1 + $0x4c8] sm:$0xff] }
  0xfd   :  { %v994_v48 = vld [vmem:[%s15984_s1 + $0x1e20] sm:$0xff]  ;;  %v187_v53 = vld [vmem:[%s15984_s1 + $0x4e8] sm:$0xff] }
  0xfe   :  { %6618 = vmatpush2.bf16.msra.mxu1 %v10858_v38  ;;  %v10843_v52 = vcombine.high %v990_v46, %v994_v48  ;;  %v862_v54 = vld [vmem:[%s15984_s1 + $0x1a00] sm:$0xff]  ;;  %v10842_v62 = vcombine.low %v990_v46, %v994_v48  ;;  %v10060_v38 = vcombine.low %v207_v15, %v211_v16  ;;  %v175_v16 = vld [vmem:[%s15984_s1 + $0x488] sm:$0xff] }
  0xff   :  { %6619 = vmatprep.subr.bf16.mxu1 %v10851_v41  ;;  %v866_v10 = vld [vmem:[%s15984_s1 + $0x1a20] sm:$0xff]  ;;  %6577 = vmatpush2.bf16.msra.mxu0 %v10730_v49  ;;  %v9924_v41 = vcombine.low %v71_v17, %v75_v18  ;;  %v9917_v49 = vcombine.high %v63_v33, %v67_v35  ;;  %v179_v17 = vld [vmem:[%s15984_s1 + $0x4a8] sm:$0xff] }
 0x100   :  { %6578 = vmatprep.subr.bf16.mxu0 %v10723_v51  ;;  %v10715_v0 = vcombine.high %v862_v54, %v866_v10  ;;  %v10714_v59 = vcombine.low %v862_v54, %v866_v10  ;;  %v1046_v8 = vld [vmem:[%s15985_s2] sm:$0xff]  ;;  %v195_v51 = vld [vmem:[%s15984_s1 + $0x528] sm:$0xff] }
 0x101   :  { %v1051_v19 = vrot.slane %v1046_v8, %v1050_v24  ;;  %v1055_v26 = vrot.slane %v1046_v8, %v1054_v14  ;;  %v55_v54 = vld [vmem:[%s15984_s1 + $0xc8] sm:$0xff] }
 0x102   :  { %6620 = vmatpush2.bf16.msra.mxu1 %v10850_v50  ;;  %v191_v50 = vld [vmem:[%s15984_s1 + $0x508] sm:$0xff] }
 0x103   :  { %6621 = vmatprep.subr.bf16.mxu1 %v10843_v52  ;;  %6579 = vmatpush2.bf16.msra.mxu0 %v10722_v60  ;;  %v59_v10 = vld [vmem:[%s15984_s1 + $0xe8] sm:$0xff]  ;;  %v10052_v60 = vcombine.low %v199_v28, %v203_v63  ;;  %v10044_v8 = vcombine.low %v191_v50, %v195_v51 }
 0x104   :  { %6580 = vmatprep.subr.bf16.mxu0 %v10715_v0  ;;  %v9916_v0 = vcombine.low %v63_v33, %v67_v35  ;;  %v9909_v4 = vcombine.high %v55_v54, %v59_v10  ;;  %v39_v18 = vld [vmem:[%s15984_s1 + $0x48] sm:$0xff]  ;;  %v10028_v33 = vcombine.low %v175_v16, %v179_v17 }
 0x105   :  { %v171_v28 = vld [vmem:[%s15984_s1 + $0x468] sm:$0xff] }
 0x106   :  { %6622 = vmatpush2.bf16.msra.mxu1 %v10842_v62  ;;  %v6338_v34 = vpop.f32.mrf.mxu0  ;;  %v31_v63 = vld [vmem:[%s15984_s1 + $0x8] sm:$0xff] }
 0x107   :  { %6632 = vmatprep.subr.bf16.mxu1 %v9941_v1  ;;  %6581 = vmatpush2.bf16.msra.mxu0 %v10714_v59  ;;  %v6339_v36 = vadd.f32 %v6338_v34, %v1051_v19  ;;  %v10045_v1 = vcombine.high %v191_v50, %v195_v51  ;;  %v47_v59 = vld [vmem:[%s15984_s1 + $0x88] sm:$0xff] }
 0x108   :  { %6673 = vmatprep.subr.bf16.mxu0 %v10069_v11  ;;  %v6379_v37 = vpop.f32.mrf.mxu1  ;;  %v6340_v40 = vpop.f32.mrf.mxu0  ;;  %v9908_v11 = vcombine.low %v55_v54, %v59_v10  ;;  %v43_v19 = vld [vmem:[%s15984_s1 + $0x68] sm:$0xff] }
 0x109   :  { %6624 = vmatmul.mubr.bf16.vlgmr.msra.gmra.mxu1 %v12620_v6  ;;  %v12659_v45 = vadd.f32 %v6379_v37, %v6339_v36  ;;  %v6341_v46 = vadd.f32 %v6340_v40, %v1055_v26  ;;  %v9893_v26 = vcombine.high %v39_v18, %v43_v19  ;;  %v35_v34 = vld [vmem:[%s15984_s1 + $0x28] sm:$0xff]  ;;  %v9892_v35 = vcombine.low %v39_v18, %v43_v19 }
 0x10a   :  { %6633 = vmatpush1.bf16.msra.mxu1 %v9940_v7  ;;  %6664 = vmatprep.mubr.bf16.mxu1 %v11843_v9  ;;  %v6381_v48 = vpop.f32.mrf.mxu1  ;;  %v6342_v52 = vpop.f32.mrf.mxu0  ;;  %v51_v7 = vld [vmem:[%s15984_s1 + $0xa8] sm:$0xff]  ;;  %v9885_v37 = vcombine.high %v31_v63, %v35_v34 }
 0x10b   :  { %6634 = vmatprep.subr.bf16.mxu1 %v9933_v12  ;;  %6583 = vmatmul.mubr.bf16.vlgmr.msra.gmra.mxu0 %v12604_v61  ;;  %v12673_v57 = vadd.f32 %v6381_v48, %v6341_v46  ;;  %v10037_v12 = vcombine.high %v183_v5, %v187_v53  ;;  %v9901_v15 = vcombine.high %v47_v59, %v51_v7  ;;  %v163_v40 = vld [vmem:[%s15984_s1 + $0x428] sm:$0xff] }
 0x10c   :  { %6674 = vmatpush1.bf16.msra.mxu0 %v10068_v20  ;;  %6705 = vmatprep.mubr.bf16.mxu0 %v11854_v13  ;;  %v6383_v58 = vpop.f32.mrf.mxu1  ;;  %v6343_v62 = vpop.f32.mrf.mxu0  ;;  %v10036_v20 = vcombine.low %v183_v5, %v187_v53  ;;  %v9884_v48 = vcombine.low %v31_v63, %v35_v34  ;;  %v279_v51 = vld [vmem:[%s15984_s1 + $0x7c8] sm:$0xff] }
 0x10d   :  { %6675 = vmatprep.subr.bf16.mxu0 %v10061_v25  ;;  %v10029_v25 = vcombine.high %v175_v16, %v179_v17  ;;  %v283_v52 = vld [vmem:[%s15984_s1 + $0x7e8] sm:$0xff] }
 0x10e   :  { %6635 = vmatpush1.bf16.msra.mxu1 %v9932_v23  ;;  %v6384_v2 = vpop.f32.mrf.mxu1  ;;  %v9900_v23 = vcombine.low %v47_v59, %v51_v7  ;;  %v143_v54 = vld [vmem:[%s15984_s1 + $0x388] sm:$0xff]  ;;  %v10133_v62 = vcombine.high %v279_v51, %v283_v52  ;;  %v10132_v53 = vcombine.low %v279_v51, %v283_v52 }
 0x10f   :  { %6636 = vmatprep.subr.bf16.mxu1 %v9925_v27  ;;  %v167_v27 = vld [vmem:[%s15984_s1 + $0x448] sm:$0xff] }
 0x110   :  { %6676 = vmatpush1.bf16.msra.mxu0 %v10060_v38  ;;  %v10021_v36 = vcombine.high %v167_v27, %v171_v28  ;;  %v159_v38 = vld [vmem:[%s15984_s1 + $0x408] sm:$0xff]  ;;  %v10020_v46 = vcombine.low %v167_v27, %v171_v28 }
 0x111   :  { %6677 = vmatprep.subr.bf16.mxu0 %v10053_v42  ;;  %v155_v42 = vld [vmem:[%s15984_s1 + $0x3e8] sm:$0xff]  ;;  %v10012_v58 = vcombine.low %v159_v38, %v163_v40 }
 0x112   :  { %6637 = vmatpush1.bf16.msra.mxu1 %v9924_v41  ;;  %v151_v41 = vld [vmem:[%s15984_s1 + $0x3c8] sm:$0xff] }
 0x113   :  { %6638 = vmatprep.subr.bf16.mxu1 %v9917_v49  ;;  %v10013_v49 = vcombine.high %v159_v38, %v163_v40  ;;  %v10005_v50 = vcombine.high %v151_v41, %v155_v42  ;;  %v147_v10 = vld [vmem:[%s15984_s1 + $0x3a8] sm:$0xff] }
 0x114   :  { %6678 = vmatpush1.bf16.msra.mxu0 %v10052_v60  ;;  %v10004_v60 = vcombine.low %v151_v41, %v155_v42  ;;  %v275_v2 = vld [vmem:[%s15984_s1 + $0x7a8] sm:$0xff]  ;;  %v9996_v59 = vcombine.low %v143_v54, %v147_v10 }
 0x115   :  { %6679 = vmatprep.subr.bf16.mxu0 %v10045_v1  ;;  %v271_v1 = vld [vmem:[%s15984_s1 + $0x788] sm:$0xff] }
 0x116   :  { %6639 = vmatpush1.bf16.msra.mxu1 %v9916_v0  ;;  %v9997_v0 = vcombine.high %v143_v54, %v147_v10  ;;  %v139_v5 = vld [vmem:[%s15984_s1 + $0x368] sm:$0xff]  ;;  %v10125_v7 = vcombine.high %v271_v1, %v275_v2  ;;  %v10124_v17 = vcombine.low %v271_v1, %v275_v2 }
 0x117   :  { %6640 = vmatprep.subr.bf16.mxu1 %v9909_v4  ;;  %v135_v4 = vld [vmem:[%s15984_s1 + $0x348] sm:$0xff] }
 0x118   :  { %6680 = vmatpush1.bf16.msra.mxu0 %v10044_v8  ;;  %v9989_v8 = vcombine.high %v135_v4, %v139_v5  ;;  %v131_v16 = vld [vmem:[%s15984_s1 + $0x328] sm:$0xff]  ;;  %v9988_v18 = vcombine.low %v135_v4, %v139_v5 }
 0x119   :  { %6681 = vmatprep.subr.bf16.mxu0 %v10037_v12  ;;  %v267_v12 = vld [vmem:[%s15984_s1 + $0x768] sm:$0xff] }
 0x11a   :  { %6641 = vmatpush1.bf16.msra.mxu1 %v9908_v11  ;;  %v263_v11 = vld [vmem:[%s15984_s1 + $0x748] sm:$0xff] }
 0x11b   :  { %6642 = vmatprep.subr.bf16.mxu1 %v9901_v15  ;;  %v127_v15 = vld [vmem:[%s15984_s1 + $0x308] sm:$0xff]  ;;  %v10117_v19 = vcombine.high %v263_v11, %v267_v12  ;;  %v10116_v28 = vcombine.low %v263_v11, %v267_v12 }
 0x11c   :  { %6682 = vmatpush1.bf16.msra.mxu0 %v10036_v20  ;;  %v9981_v20 = vcombine.high %v127_v15, %v131_v16  ;;  %v123_v27 = vld [vmem:[%s15984_s1 + $0x2e8] sm:$0xff]  ;;  %v9980_v63 = vcombine.low %v127_v15, %v131_v16 }
 0x11d   :  { %6683 = vmatprep.subr.bf16.mxu0 %v10029_v25  ;;  %v259_v25 = vld [vmem:[%s15984_s1 + $0x728] sm:$0xff] }
 0x11e   :  { %6643 = vmatpush1.bf16.msra.mxu1 %v9900_v23  ;;  %v255_v23 = vld [vmem:[%s15984_s1 + $0x708] sm:$0xff] }
 0x11f   :  { %6644 = vmatprep.subr.bf16.mxu1 %v9893_v26  ;;  %v119_v26 = vld [vmem:[%s15984_s1 + $0x2c8] sm:$0xff]  ;;  %v10109_v34 = vcombine.high %v255_v23, %v259_v25  ;;  %v10108_v40 = vcombine.low %v255_v23, %v259_v25 }
 0x120   :  { %6684 = vmatpush1.bf16.msra.mxu0 %v10028_v33  ;;  %v9973_v33 = vcombine.high %v119_v26, %v123_v27  ;;  %v115_v38 = vld [vmem:[%s15984_s1 + $0x2a8] sm:$0xff]  ;;  %v9972_v41 = vcombine.low %v119_v26, %v123_v27 }
 0x121   :  { %6685 = vmatprep.subr.bf16.mxu0 %v10021_v36  ;;  %v251_v36 = vld [vmem:[%s15984_s1 + $0x6e8] sm:$0xff] }
 0x122   :  { %6645 = vmatpush1.bf16.msra.mxu1 %v9892_v35  ;;  %v247_v35 = vld [vmem:[%s15984_s1 + $0x6c8] sm:$0xff] }
 0x123   :  { %6646 = vmatprep.subr.bf16.mxu1 %v9885_v37  ;;  %v111_v37 = vld [vmem:[%s15984_s1 + $0x288] sm:$0xff]  ;;  %v10101_v42 = vcombine.high %v247_v35, %v251_v36  ;;  %v10100_v52 = vcombine.low %v247_v35, %v251_v36 }
 0x124   :  { %6686 = vmatpush1.bf16.msra.mxu0 %v10020_v46  ;;  %v9965_v46 = vcombine.high %v111_v37, %v115_v38  ;;  %v107_v51 = vld [vmem:[%s15984_s1 + $0x268] sm:$0xff]  ;;  %v9964_v54 = vcombine.low %v111_v37, %v115_v38 }
 0x125   :  { %6687 = vmatprep.subr.bf16.mxu0 %v10013_v49  ;;  %v243_v49 = vld [vmem:[%s15984_s1 + $0x6a8] sm:$0xff] }
 0x126   :  { %6647 = vmatpush1.bf16.msra.mxu1 %v9884_v48  ;;  %v239_v48 = vld [vmem:[%s15984_s1 + $0x688] sm:$0xff] }
 0x127   :  { %6648 = vmatprep.subr.bf16.mxu1 %v10005_v50  ;;  %v103_v50 = vld [vmem:[%s15984_s1 + $0x248] sm:$0xff]  ;;  %v10093_v10 = vcombine.high %v239_v48, %v243_v49  ;;  %v10092_v2 = vcombine.low %v239_v48, %v243_v49 }
 0x128   :  { %6688 = vmatpush1.bf16.msra.mxu0 %v10012_v58  ;;  %v9957_v58 = vcombine.high %v103_v50, %v107_v51  ;;  %v99_v1 = vld [vmem:[%s15984_s1 + $0x228] sm:$0xff]  ;;  %v9956_v4 = vcombine.low %v103_v50, %v107_v51 }
 0x129   :  { %6689 = vmatprep.subr.bf16.mxu0 %v10133_v62  ;;  %v235_v62 = vld [vmem:[%s15984_s1 + $0x668] sm:$0xff] }
 0x12a   :  { %6649 = vmatpush2.bf16.msra.mxu1 %v10004_v60  ;;  %v231_v60 = vld [vmem:[%s15984_s1 + $0x648] sm:$0xff] }
 0x12b   :  { %6650 = vmatprep.subr.bf16.mxu1 %v9997_v0  ;;  %v95_v0 = vld [vmem:[%s15984_s1 + $0x208] sm:$0xff]  ;;  %v10085_v5 = vcombine.high %v231_v60, %v235_v62  ;;  %v10084_v12 = vcombine.low %v231_v60, %v235_v62 }
 0x12c   :  { %6690 = vmatpush2.bf16.msra.mxu0 %v10132_v53  ;;  %v9949_v53 = vcombine.high %v95_v0, %v99_v1  ;;  %v347_v11 = vld [vmem:[%s15984_s1 + $0x9e8] sm:$0xff]  ;;  %v9948_v15 = vcombine.low %v95_v0, %v99_v1 }
 0x12d   :  { %6691 = vmatprep.subr.bf16.mxu0 %v10125_v7  ;;  %v227_v7 = vld [vmem:[%s15984_s1 + $0x628] sm:$0xff] }
 0x12e   :  { %6651 = vmatpush2.bf16.msra.mxu1 %v9996_v59  ;;  %v223_v59 = vld [vmem:[%s15984_s1 + $0x608] sm:$0xff] }
 0x12f   :  { %6652 = vmatprep.subr.bf16.mxu1 %v9989_v8  ;;  %v343_v8 = vld [vmem:[%s15984_s1 + $0x9c8] sm:$0xff]  ;;  %v10077_v16 = vcombine.high %v223_v59, %v227_v7  ;;  %v10076_v25 = vcombine.low %v223_v59, %v227_v7 }
 0x130   :  { %6692 = vmatpush2.bf16.msra.mxu0 %v10124_v17  ;;  %v10197_v17 = vcombine.high %v343_v8, %v347_v11  ;;  %v339_v23 = vld [vmem:[%s15984_s1 + $0x9a8] sm:$0xff]  ;;  %v10196_v26 = vcombine.low %v343_v8, %v347_v11 }
 0x131   :  { %6693 = vmatprep.subr.bf16.mxu0 %v10117_v19  ;;  %v475_v19 = vld [vmem:[%s15984_s1 + $0xde8] sm:$0xff] }
 0x132   :  { %6653 = vmatpush2.bf16.msra.mxu1 %v9988_v18  ;;  %v471_v18 = vld [vmem:[%s15984_s1 + $0xdc8] sm:$0xff] }
 0x133   :  { %6654 = vmatprep.subr.bf16.mxu1 %v9981_v20  ;;  %v335_v20 = vld [vmem:[%s15984_s1 + $0x988] sm:$0xff]  ;;  %v10325_v27 = vcombine.high %v471_v18, %v475_v19  ;;  %v10324_v36 = vcombine.low %v471_v18, %v475_v19 }
 0x134   :  { %6694 = vmatpush2.bf16.msra.mxu0 %v10116_v28  ;;  %v10189_v28 = vcombine.high %v335_v20, %v339_v23  ;;  %v331_v35 = vld [vmem:[%s15984_s1 + $0x968] sm:$0xff]  ;;  %v10188_v37 = vcombine.low %v335_v20, %v339_v23 }
 0x135   :  { %6695 = vmatprep.subr.bf16.mxu0 %v10109_v34  ;;  %v467_v34 = vld [vmem:[%s15984_s1 + $0xda8] sm:$0xff] }
 0x136   :  { %6655 = vmatpush2.bf16.msra.mxu1 %v9980_v63  ;;  %v463_v63 = vld [vmem:[%s15984_s1 + $0xd88] sm:$0xff] }
 0x137   :  { %6656 = vmatprep.subr.bf16.mxu1 %v9973_v33  ;;  %v327_v33 = vld [vmem:[%s15984_s1 + $0x948] sm:$0xff]  ;;  %v10317_v38 = vcombine.high %v463_v63, %v467_v34 }
 0x138   :  { %6696 = vmatpush2.bf16.msra.mxu0 %v10108_v40  ;;  %v10181_v40 = vcombine.high %v327_v33, %v331_v35  ;;  %v319_v48 = vld [vmem:[%s15984_s1 + $0x908] sm:$0xff] }
 0x139   :  { %6697 = vmatprep.subr.bf16.mxu0 %v10101_v42  ;;  %v459_v42 = vld [vmem:[%s15984_s1 + $0xd68] sm:$0xff] }
 0x13a   :  { %6657 = vmatpush2.bf16.msra.mxu1 %v9972_v41  ;;  %v455_v41 = vld [vmem:[%s15984_s1 + $0xd48] sm:$0xff] }
 0x13b   :  { %6658 = vmatprep.subr.bf16.mxu1 %v9965_v46  ;;  %v323_v49 = vld [vmem:[%s15984_s1 + $0x928] sm:$0xff]  ;;  %v10308_v7 = vcombine.low %v455_v41, %v459_v42 }
 0x13c   :  { %6698 = vmatpush2.bf16.msra.mxu0 %v10100_v52  ;;  %v10316_v52 = vcombine.low %v463_v63, %v467_v34  ;;  %v10173_v1 = vcombine.high %v319_v48, %v323_v49  ;;  %v10172_v11 = vcombine.low %v319_v48, %v323_v49  ;;  %v443_v18 = vld [vmem:[%s15984_s1 + $0xce8] sm:$0xff] }
 0x13d   :  { %6699 = vmatprep.subr.bf16.mxu0 %v10093_v10  ;;  %v10180_v10 = vcombine.low %v327_v33, %v331_v35  ;;  %v303_v19 = vld [vmem:[%s15984_s1 + $0x888] sm:$0xff] }
 0x13e   :  { %6659 = vmatpush2.bf16.msra.mxu1 %v9964_v54  ;;  %v307_v20 = vld [vmem:[%s15984_s1 + $0x8a8] sm:$0xff] }
 0x13f   :  { %6660 = vmatprep.subr.bf16.mxu1 %v9957_v58  ;;  %v10309_v58 = vcombine.high %v455_v41, %v459_v42  ;;  %v435_v63 = vld [vmem:[%s15984_s1 + $0xca8] sm:$0xff] }
 0x140   :  { %6700 = vmatpush2.bf16.msra.mxu0 %v10092_v2  ;;  %v451_v2 = vld [vmem:[%s15984_s1 + $0xd28] sm:$0xff] }
 0x141   :  { %6701 = vmatprep.subr.bf16.mxu0 %v10085_v5  ;;  %v311_v5 = vld [vmem:[%s15984_s1 + $0x8c8] sm:$0xff] }
 0x142   :  { %6661 = vmatpush2.bf16.msra.mxu1 %v9956_v4  ;;  %v295_v34 = vld [vmem:[%s15984_s1 + $0x848] sm:$0xff] }
 0x143   :  { %6662 = vmatprep.subr.bf16.mxu1 %v9949_v53  ;;  %v299_v33 = vld [vmem:[%s15984_s1 + $0x868] sm:$0xff] }
 0x144   :  { %6702 = vmatpush2.bf16.msra.mxu0 %v10084_v12  ;;  %v427_v41 = vld [vmem:[%s15984_s1 + $0xc68] sm:$0xff]  ;;  %v10148_v49 = vcombine.low %v295_v34, %v299_v33 }
 0x145   :  { %6703 = vmatprep.subr.bf16.mxu0 %v10077_v16  ;;  %v287_v42 = vld [vmem:[%s15984_s1 + $0x808] sm:$0xff] }
 0x146   :  { %6663 = vmatpush2.bf16.msra.mxu1 %v9948_v15  ;;  %v6420_v46 = vpop.f32.mrf.mxu0 }
 0x147   :  { %6714 = vmatprep.subr.bf16.mxu1 %v10197_v17  ;;  %v6421_v50 = vadd.f32 %v6420_v46, %v12659_v45  ;;  %v447_v45 = vld [vmem:[%s15984_s1 + $0xd08] sm:$0xff] }
 0x148   :  { %6704 = vmatpush2.bf16.msra.mxu0 %v10076_v25  ;;  %v6461_v51 = vpop.f32.mrf.mxu1  ;;  %v6422_v54 = vpop.f32.mrf.mxu0  ;;  %v10301_v12 = vcombine.high %v447_v45, %v451_v2  ;;  %v439_v17 = vld [vmem:[%s15984_s1 + $0xcc8] sm:$0xff]  ;;  %v10300_v23 = vcombine.low %v447_v45, %v451_v2 }
 0x149   :  { %6665 = vmatmul.mubr.bf16.vlgmr.msra.gmra.mxu1 %v11962_v22  ;;  %6755 = vmatprep.subr.bf16.mxu0 %v10325_v27  ;;  %v12860_v60 = vadd.f32 %v6461_v51, %v6421_v50  ;;  %v6423_v62 = vadd.f32 %v6422_v54, %v12673_v57  ;;  %v315_v57 = vld [vmem:[%s15984_s1 + $0x8e8] sm:$0xff]  ;;  %v10157_v27 = vcombine.high %v303_v19, %v307_v20 }
 0x14a   :  { %6715 = vmatpush1.bf16.msra.mxu1 %v10196_v26  ;;  %6746 = vmatprep.mubr.bf16.mxu1 %v11977_v29  ;;  %v6463_v0 = vpop.f32.mrf.mxu1  ;;  %v6424_v4 = vpop.f32.mrf.mxu0  ;;  %v10165_v16 = vcombine.high %v311_v5, %v315_v57  ;;  %v10164_v25 = vcombine.low %v311_v5, %v315_v57  ;;  %v10293_v26 = vcombine.high %v439_v17, %v443_v18  ;;  %v291_v46 = vld [vmem:[%s15984_s1 + $0x828] sm:$0xff] }
 0x14b   :  { %6716 = vmatprep.subr.bf16.mxu1 %v10189_v28  ;;  %6706 = vmatmul.mubr.bf16.vlgmr.msra.gmra.mxu0 %v11981_v30  ;;  %v12875_v53 = vadd.f32 %v6463_v0, %v6423_v62  ;;  %v431_v28 = vld [vmem:[%s15984_s1 + $0xc88] sm:$0xff]  ;;  %v10292_v35 = vcombine.low %v439_v17, %v443_v18  ;;  %v10141_v51 = vcombine.high %v287_v42, %v291_v46 }
 0x14c   :  { %6756 = vmatpush1.bf16.msra.mxu0 %v10324_v36  ;;  %6787 = vmatprep.mubr.bf16.mxu0 %v11998_v39  ;;  %v6465_v59 = vpop.f32.mrf.mxu1  ;;  %v6425_v8 = vpop.f32.mrf.mxu0  ;;  %v10156_v36 = vcombine.low %v303_v19, %v307_v20  ;;  %v10284_v48 = vcombine.low %v431_v28, %v435_v63  ;;  %v419_v54 = vld [vmem:[%s15984_s1 + $0xc28] sm:$0xff]  ;;  %v10140_v0 = vcombine.low %v287_v42, %v291_v46 }
 0x14d   :  { %6757 = vmatprep.subr.bf16.mxu0 %v10317_v38  ;;  %v10149_v38 = vcombine.high %v295_v34, %v299_v33  ;;  %v535_v2 = vld [vmem:[%s15984_s1 + $0xfc8] sm:$0xff] }
 0x14e   :  { %6717 = vmatpush1.bf16.msra.mxu1 %v10188_v37  ;;  %v6466_v15 = vpop.f32.mrf.mxu1  ;;  %v10285_v37 = vcombine.high %v431_v28, %v435_v63  ;;  %v539_v4 = vld [vmem:[%s15984_s1 + $0xfe8] sm:$0xff] }
 0x14f   :  { %6718 = vmatprep.subr.bf16.mxu1 %v10181_v40  ;;  %v423_v40 = vld [vmem:[%s15984_s1 + $0xc48] sm:$0xff]  ;;  %v10389_v8 = vcombine.high %v535_v2, %v539_v4  ;;  %v10388_v18 = vcombine.low %v535_v2, %v539_v4 }
 0x150   :  { %6758 = vmatpush1.bf16.msra.mxu0 %v10316_v52  ;;  %v10277_v50 = vcombine.high %v423_v40, %v427_v41  ;;  %v415_v52 = vld [vmem:[%s15984_s1 + $0xc08] sm:$0xff]  ;;  %v10276_v62 = vcombine.low %v423_v40, %v427_v41 }
 0x151   :  { %6759 = vmatprep.subr.bf16.mxu0 %v10309_v58  ;;  %v411_v58 = vld [vmem:[%s15984_s1 + $0xbe8] sm:$0xff]  ;;  %v10268_v59 = vcombine.low %v415_v52, %v419_v54 }
 0x152   :  { %6719 = vmatpush1.bf16.msra.mxu1 %v10180_v10  ;;  %v407_v10 = vld [vmem:[%s15984_s1 + $0xbc8] sm:$0xff] }
 0x153   :  { %6720 = vmatprep.subr.bf16.mxu1 %v10173_v1  ;;  %v10269_v1 = vcombine.high %v415_v52, %v419_v54  ;;  %v10261_v45 = vcombine.high %v407_v10, %v411_v58  ;;  %v399_v5 = vld [vmem:[%s15984_s1 + $0xb88] sm:$0xff] }
 0x154   :  { %6760 = vmatpush1.bf16.msra.mxu0 %v10308_v7  ;;  %v403_v57 = vld [vmem:[%s15984_s1 + $0xba8] sm:$0xff]  ;;  %v10260_v7 = vcombine.low %v407_v10, %v411_v58 }
 0x155   :  { %6761 = vmatprep.subr.bf16.mxu0 %v10301_v12  ;;  %v527_v12 = vld [vmem:[%s15984_s1 + $0xf88] sm:$0xff]  ;;  %v10252_v19 = vcombine.low %v399_v5, %v403_v57 }
 0x156   :  { %6721 = vmatpush1.bf16.msra.mxu1 %v10172_v11  ;;  %v10253_v11 = vcombine.high %v399_v5, %v403_v57  ;;  %v531_v15 = vld [vmem:[%s15984_s1 + $0xfa8] sm:$0xff] }
 0x157   :  { %6722 = vmatprep.subr.bf16.mxu1 %v10165_v16  ;;  %v391_v16 = vld [vmem:[%s15984_s1 + $0xb48] sm:$0xff]  ;;  %v10381_v20 = vcombine.high %v527_v12, %v531_v15  ;;  %v10380_v63 = vcombine.low %v527_v12, %v531_v15 }
 0x158   :  { %6762 = vmatpush1.bf16.msra.mxu0 %v10300_v23  ;;  %v395_v17 = vld [vmem:[%s15984_s1 + $0xb68] sm:$0xff] }
 0x159   :  { %6763 = vmatprep.subr.bf16.mxu0 %v10293_v26  ;;  %v10245_v23 = vcombine.high %v391_v16, %v395_v17  ;;  %v523_v26 = vld [vmem:[%s15984_s1 + $0xf68] sm:$0xff]  ;;  %v10244_v34 = vcombine.low %v391_v16, %v395_v17 }
 0x15a   :  { %6723 = vmatpush1.bf16.msra.mxu1 %v10164_v25  ;;  %v519_v25 = vld [vmem:[%s15984_s1 + $0xf48] sm:$0xff] }
 0x15b   :  { %6724 = vmatprep.subr.bf16.mxu1 %v10157_v27  ;;  %v383_v27 = vld [vmem:[%s15984_s1 + $0xb08] sm:$0xff]  ;;  %v10373_v33 = vcombine.high %v519_v25, %v523_v26  ;;  %v10372_v41 = vcombine.low %v519_v25, %v523_v26 }
 0x15c   :  { %6764 = vmatpush1.bf16.msra.mxu0 %v10292_v35  ;;  %v387_v28 = vld [vmem:[%s15984_s1 + $0xb28] sm:$0xff] }
 0x15d   :  { %6765 = vmatprep.subr.bf16.mxu0 %v10285_v37  ;;  %v10237_v35 = vcombine.high %v383_v27, %v387_v28  ;;  %v515_v37 = vld [vmem:[%s15984_s1 + $0xf28] sm:$0xff]  ;;  %v10236_v42 = vcombine.low %v383_v27, %v387_v28 }
 0x15e   :  { %6725 = vmatpush1.bf16.msra.mxu1 %v10156_v36  ;;  %v511_v36 = vld [vmem:[%s15984_s1 + $0xf08] sm:$0xff] }
 0x15f   :  { %6726 = vmatprep.subr.bf16.mxu1 %v10149_v38  ;;  %v375_v38 = vld [vmem:[%s15984_s1 + $0xac8] sm:$0xff]  ;;  %v10365_v46 = vcombine.high %v511_v36, %v515_v37  ;;  %v10364_v54 = vcombine.low %v511_v36, %v515_v37 }
 0x160   :  { %6766 = vmatpush1.bf16.msra.mxu0 %v10284_v48  ;;  %v379_v40 = vld [vmem:[%s15984_s1 + $0xae8] sm:$0xff] }
 0x161   :  { %6767 = vmatprep.subr.bf16.mxu0 %v10277_v50  ;;  %v10229_v48 = vcombine.high %v375_v38, %v379_v40  ;;  %v507_v50 = vld [vmem:[%s15984_s1 + $0xee8] sm:$0xff]  ;;  %v10228_v10 = vcombine.low %v375_v38, %v379_v40 }
 0x162   :  { %6727 = vmatpush1.bf16.msra.mxu1 %v10148_v49  ;;  %v503_v49 = vld [vmem:[%s15984_s1 + $0xec8] sm:$0xff] }
 0x163   :  { %6728 = vmatprep.subr.bf16.mxu1 %v10141_v51  ;;  %v367_v51 = vld [vmem:[%s15984_s1 + $0xa88] sm:$0xff]  ;;  %v10357_v58 = vcombine.high %v503_v49, %v507_v50  ;;  %v10356_v4 = vcombine.low %v503_v49, %v507_v50 }
 0x164   :  { %6768 = vmatpush1.bf16.msra.mxu0 %v10276_v62  ;;  %v371_v52 = vld [vmem:[%s15984_s1 + $0xaa8] sm:$0xff] }
 0x165   :  { %6769 = vmatprep.subr.bf16.mxu0 %v10269_v1  ;;  %v10221_v62 = vcombine.high %v367_v51, %v371_v52  ;;  %v499_v1 = vld [vmem:[%s15984_s1 + $0xea8] sm:$0xff]  ;;  %v10220_v5 = vcombine.low %v367_v51, %v371_v52 }
 0x166   :  { %6729 = vmatpush1.bf16.msra.mxu1 %v10140_v0  ;;  %v495_v0 = vld [vmem:[%s15984_s1 + $0xe88] sm:$0xff] }
 0x167   :  { %6730 = vmatprep.subr.bf16.mxu1 %v10261_v45  ;;  %v359_v45 = vld [vmem:[%s15984_s1 + $0xa48] sm:$0xff]  ;;  %v10349_v57 = vcombine.high %v495_v0, %v499_v1  ;;  %v10348_v15 = vcombine.low %v495_v0, %v499_v1 }
 0x168   :  { %6770 = vmatpush1.bf16.msra.mxu0 %v10268_v59  ;;  %v363_v2 = vld [vmem:[%s15984_s1 + $0xa68] sm:$0xff] }
 0x169   :  { %6771 = vmatprep.subr.bf16.mxu0 %v10389_v8  ;;  %v10213_v59 = vcombine.high %v359_v45, %v363_v2  ;;  %v491_v8 = vld [vmem:[%s15984_s1 + $0xe68] sm:$0xff]  ;;  %v10212_v16 = vcombine.low %v359_v45, %v363_v2 }
 0x16a   :  { %6731 = vmatpush2.bf16.msra.mxu1 %v10260_v7  ;;  %v487_v7 = vld [vmem:[%s15984_s1 + $0xe48] sm:$0xff] }
 0x16b   :  { %6732 = vmatprep.subr.bf16.mxu1 %v10253_v11  ;;  %v351_v11 = vld [vmem:[%s15984_s1 + $0xa08] sm:$0xff]  ;;  %v10341_v17 = vcombine.high %v487_v7, %v491_v8  ;;  %v10340_v26 = vcombine.low %v487_v7, %v491_v8 }
 0x16c   :  { %6772 = vmatpush2.bf16.msra.mxu0 %v10388_v18  ;;  %v355_v12 = vld [vmem:[%s15984_s1 + $0xa28] sm:$0xff] }
 0x16d   :  { %6773 = vmatprep.subr.bf16.mxu0 %v10381_v20  ;;  %v10205_v18 = vcombine.high %v351_v11, %v355_v12  ;;  %v483_v20 = vld [vmem:[%s15984_s1 + $0xe28] sm:$0xff]  ;;  %v10204_v27 = vcombine.low %v351_v11, %v355_v12 }
 0x16e   :  { %6733 = vmatpush2.bf16.msra.mxu1 %v10252_v19  ;;  %v479_v19 = vld [vmem:[%s15984_s1 + $0xe08] sm:$0xff] }
 0x16f   :  { %6734 = vmatprep.subr.bf16.mxu1 %v10245_v23  ;;  %v599_v23 = vld [vmem:[%s15984_s1 + $0x11c8] sm:$0xff]  ;;  %v10333_v28 = vcombine.high %v479_v19, %v483_v20  ;;  %v10332_v37 = vcombine.low %v479_v19, %v483_v20 }
 0x170   :  { %6774 = vmatpush2.bf16.msra.mxu0 %v10380_v63  ;;  %v603_v25 = vld [vmem:[%s15984_s1 + $0x11e8] sm:$0xff] }
 0x171   :  { %6775 = vmatprep.subr.bf16.mxu0 %v10373_v33  ;;  %v10453_v63 = vcombine.high %v599_v23, %v603_v25  ;;  %v731_v33 = vld [vmem:[%s15984_s1 + $0x15e8] sm:$0xff]  ;;  %v10452_v38 = vcombine.low %v599_v23, %v603_v25 }
 0x172   :  { %6735 = vmatpush2.bf16.msra.mxu1 %v10244_v34  ;;  %v727_v34 = vld [vmem:[%s15984_s1 + $0x15c8] sm:$0xff] }
 0x173   :  { %6736 = vmatprep.subr.bf16.mxu1 %v10237_v35  ;;  %v591_v35 = vld [vmem:[%s15984_s1 + $0x1188] sm:$0xff]  ;;  %v10581_v40 = vcombine.high %v727_v34, %v731_v33  ;;  %v10580_v50 = vcombine.low %v727_v34, %v731_v33 }
 0x174   :  { %6776 = vmatpush2.bf16.msra.mxu0 %v10372_v41  ;;  %v595_v36 = vld [vmem:[%s15984_s1 + $0x11a8] sm:$0xff] }
 0x175   :  { %6777 = vmatprep.subr.bf16.mxu0 %v10365_v46  ;;  %v10445_v41 = vcombine.high %v591_v35, %v595_v36  ;;  %v723_v46 = vld [vmem:[%s15984_s1 + $0x15a8] sm:$0xff]  ;;  %v10444_v51 = vcombine.low %v591_v35, %v595_v36 }
 0x176   :  { %6737 = vmatpush2.bf16.msra.mxu1 %v10236_v42  ;;  %v719_v42 = vld [vmem:[%s15984_s1 + $0x1588] sm:$0xff] }
 0x177   :  { %6738 = vmatprep.subr.bf16.mxu1 %v10229_v48  ;;  %v583_v48 = vld [vmem:[%s15984_s1 + $0x1148] sm:$0xff]  ;;  %v10573_v52 = vcombine.high %v719_v42, %v723_v46 }
 0x178   :  { %6778 = vmatpush2.bf16.msra.mxu0 %v10364_v54  ;;  %v587_v49 = vld [vmem:[%s15984_s1 + $0x1168] sm:$0xff] }
 0x179   :  { %6779 = vmatprep.subr.bf16.mxu0 %v10357_v58  ;;  %v10437_v54 = vcombine.high %v583_v48, %v587_v49  ;;  %v715_v58 = vld [vmem:[%s15984_s1 + $0x1568] sm:$0xff] }
 0x17a   :  { %6739 = vmatpush2.bf16.msra.mxu1 %v10228_v10  ;;  %v711_v10 = vld [vmem:[%s15984_s1 + $0x1548] sm:$0xff] }
 0x17b   :  { %6740 = vmatprep.subr.bf16.mxu1 %v10221_v62  ;;  %v575_v0 = vld [vmem:[%s15984_s1 + $0x1108] sm:$0xff]  ;;  %v10564_v20 = vcombine.low %v711_v10, %v715_v58 }
 0x17c   :  { %6780 = vmatpush2.bf16.msra.mxu0 %v10356_v4  ;;  %v579_v1 = vld [vmem:[%s15984_s1 + $0x1128] sm:$0xff]  ;;  %v10572_v4 = vcombine.low %v719_v42, %v723_v46 }
 0x17d   :  { %6781 = vmatprep.subr.bf16.mxu0 %v10349_v57  ;;  %v10436_v57 = vcombine.low %v583_v48, %v587_v49  ;;  %v10429_v12 = vcombine.high %v575_v0, %v579_v1  ;;  %v10428_v25 = vcombine.low %v575_v0, %v579_v1  ;;  %v699_v34 = vld [vmem:[%s15984_s1 + $0x14e8] sm:$0xff] }
 0x17e   :  { %6741 = vmatpush2.bf16.msra.mxu1 %v10220_v5  ;;  %v559_v33 = vld [vmem:[%s15984_s1 + $0x1088] sm:$0xff] }
 0x17f   :  { %6742 = vmatprep.subr.bf16.mxu1 %v10213_v59  ;;  %v10565_v59 = vcombine.high %v711_v10, %v715_v58  ;;  %v563_v35 = vld [vmem:[%s15984_s1 + $0x10a8] sm:$0xff] }
 0x180   :  { %6782 = vmatpush2.bf16.msra.mxu0 %v10348_v15  ;;  %v707_v15 = vld [vmem:[%s15984_s1 + $0x1528] sm:$0xff] }
 0x181   :  { %6783 = vmatprep.subr.bf16.mxu0 %v10341_v17  ;;  %v567_v17 = vld [vmem:[%s15984_s1 + $0x10c8] sm:$0xff] }
 0x182   :  { %6743 = vmatpush2.bf16.msra.mxu1 %v10212_v16  ;;  %v691_v42 = vld [vmem:[%s15984_s1 + $0x14a8] sm:$0xff] }
 0x183   :  { %6744 = vmatprep.subr.bf16.mxu1 %v10205_v18  ;;  %v551_v46 = vld [vmem:[%s15984_s1 + $0x1048] sm:$0xff] }
 0x184   :  { %6784 = vmatpush2.bf16.msra.mxu0 %v10340_v26  ;;  %v555_v48 = vld [vmem:[%s15984_s1 + $0x1068] sm:$0xff] }
 0x185   :  { %6785 = vmatprep.subr.bf16.mxu0 %v10333_v28  ;;  %v683_v10 = vld [vmem:[%s15984_s1 + $0x1468] sm:$0xff]  ;;  %v10404_v1 = vcombine.low %v551_v46, %v555_v48 }
 0x186   :  { %6745 = vmatpush2.bf16.msra.mxu1 %v10204_v27  ;;  %v6502_v62 = vpop.f32.mrf.mxu0  ;;  %v543_v58 = vld [vmem:[%s15984_s1 + $0x1008] sm:$0xff] }
 0x187   :  { %6796 = vmatprep.subr.bf16.mxu1 %v10453_v63  ;;  %v6503_v45 = vadd.f32 %v6502_v62, %v12860_v60  ;;  %v703_v60 = vld [vmem:[%s15984_s1 + $0x1508] sm:$0xff] }
 0x188   :  { %6786 = vmatpush2.bf16.msra.mxu0 %v10332_v37  ;;  %v6543_v2 = vpop.f32.mrf.mxu1  ;;  %v6504_v5 = vpop.f32.mrf.mxu0  ;;  %v10557_v26 = vcombine.high %v703_v60, %v707_v15  ;;  %v695_v63 = vld [vmem:[%s15984_s1 + $0x14c8] sm:$0xff]  ;;  %v10556_v36 = vcombine.low %v703_v60, %v707_v15 }
 0x189   :  { %6747 = vmatmul.mubr.bf16.vlgmr.msra.gmra.mxu1 %v12184_v47  ;;  %6837 = vmatprep.subr.bf16.mxu0 %v10581_v40  ;;  %v13062_v7 = vadd.f32 %v6543_v2, %v6503_v45  ;;  %v6505_v8 = vadd.f32 %v6504_v5, %v12875_v53  ;;  %v571_v53 = vld [vmem:[%s15984_s1 + $0x10e8] sm:$0xff]  ;;  %v10413_v40 = vcombine.high %v559_v33, %v563_v35 }
 0x18a   :  { %6797 = vmatpush1.bf16.msra.mxu1 %v10452_v38  ;;  %6828 = vmatprep.mubr.bf16.mxu1 %v12199_v55  ;;  %v6545_v11 = vpop.f32.mrf.mxu1  ;;  %v6506_v16 = vpop.f32.mrf.mxu0  ;;  %v10421_v28 = vcombine.high %v567_v17, %v571_v53  ;;  %v10420_v37 = vcombine.low %v567_v17, %v571_v53  ;;  %v10549_v38 = vcombine.high %v695_v63, %v699_v34  ;;  %v547_v62 = vld [vmem:[%s15984_s1 + $0x1028] sm:$0xff] }
 0x18b   :  { %6798 = vmatprep.subr.bf16.mxu1 %v10445_v41  ;;  %6788 = vmatmul.mubr.bf16.vlgmr.msra.gmra.mxu0 %v12203_v56  ;;  %v13077_v18 = vadd.f32 %v6545_v11, %v6505_v8  ;;  %v687_v41 = vld [vmem:[%s15984_s1 + $0x1488] sm:$0xff]  ;;  %v10548_v49 = vcombine.low %v695_v63, %v699_v34  ;;  %v10397_v2 = vcombine.high %v543_v58, %v547_v62 }
 0x18c   :  { %6838 = vmatpush1.bf16.msra.mxu0 %v10580_v50  ;;  %6869 = vmatprep.mubr.bf16.mxu0 %v12220_v3  ;;  %v6547_v19 = vpop.f32.mrf.mxu1  ;;  %v6507_v23 = vpop.f32.mrf.mxu0  ;;  %v10412_v50 = vcombine.low %v559_v33, %v563_v35  ;;  %v10540_v0 = vcombine.low %v687_v41, %v691_v42  ;;  %v675_v5 = vld [vmem:[%s15984_s1 + $0x1428] sm:$0xff]  ;;  %v10396_v11 = vcombine.low %v543_v58, %v547_v62 }
 0x18d   :  { %6839 = vmatprep.subr.bf16.mxu0 %v10573_v52  ;;  %v10405_v52 = vcombine.high %v551_v46, %v555_v48  ;;  %v791_v15 = vld [vmem:[%s15984_s1 + $0x17c8] sm:$0xff] }
 0x18e   :  { %6799 = vmatpush1.bf16.msra.mxu1 %v10444_v51  ;;  %v6548_v27 = vpop.f32.mrf.mxu1  ;;  %v10541_v51 = vcombine.high %v687_v41, %v691_v42  ;;  %v795_v16 = vld [vmem:[%s15984_s1 + $0x17e8] sm:$0xff] }
 0x18f   :  { %6800 = vmatprep.subr.bf16.mxu1 %v10437_v54  ;;  %v679_v54 = vld [vmem:[%s15984_s1 + $0x1448] sm:$0xff]  ;;  %v10645_v23 = vcombine.high %v791_v15, %v795_v16  ;;  %v10644_v34 = vcombine.low %v791_v15, %v795_v16 }
 0x190   :  { %6840 = vmatpush1.bf16.msra.mxu0 %v10572_v4  ;;  %v10533_v45 = vcombine.high %v679_v54, %v683_v10  ;;  %v671_v4 = vld [vmem:[%s15984_s1 + $0x1408] sm:$0xff]  ;;  %v10532_v8 = vcombine.low %v679_v54, %v683_v10 }
 0x191   :  { %6841 = vmatprep.subr.bf16.mxu0 %v10565_v59  ;;  %v667_v59 = vld [vmem:[%s15984_s1 + $0x13e8] sm:$0xff]  ;;  %v10524_v19 = vcombine.low %v671_v4, %v675_v5 }
 0x192   :  { %6801 = vmatpush1.bf16.msra.mxu1 %v10436_v57  ;;  %v663_v57 = vld [vmem:[%s15984_s1 + $0x13c8] sm:$0xff] }
 0x193   :  { %6802 = vmatprep.subr.bf16.mxu1 %v10429_v12  ;;  %v10525_v12 = vcombine.high %v671_v4, %v675_v5  ;;  %v10517_v60 = vcombine.high %v663_v57, %v667_v59  ;;  %v655_v17 = vld [vmem:[%s15984_s1 + $0x1388] sm:$0xff] }
 0x194   :  { %6842 = vmatpush1.bf16.msra.mxu0 %v10564_v20  ;;  %v659_v53 = vld [vmem:[%s15984_s1 + $0x13a8] sm:$0xff]  ;;  %v10516_v20 = vcombine.low %v663_v57, %v667_v59 }
 0x195   :  { %6843 = vmatprep.subr.bf16.mxu0 %v10557_v26  ;;  %v783_v26 = vld [vmem:[%s15984_s1 + $0x1788] sm:$0xff]  ;;  %v10508_v33 = vcombine.low %v655_v17, %v659_v53 }
 0x196   :  { %6803 = vmatpush1.bf16.msra.mxu1 %v10428_v25  ;;  %v10509_v25 = vcombine.high %v655_v17, %v659_v53  ;;  %v787_v27 = vld [vmem:[%s15984_s1 + $0x17a8] sm:$0xff] }
 0x197   :  { %6804 = vmatprep.subr.bf16.mxu1 %v10421_v28  ;;  %v647_v28 = vld [vmem:[%s15984_s1 + $0x1348] sm:$0xff]  ;;  %v10637_v35 = vcombine.high %v783_v26, %v787_v27  ;;  %v10636_v42 = vcombine.low %v783_v26, %v787_v27 }
 0x198   :  { %6844 = vmatpush1.bf16.msra.mxu0 %v10556_v36  ;;  %v651_v63 = vld [vmem:[%s15984_s1 + $0x1368] sm:$0xff] }
 0x199   :  { %6845 = vmatprep.subr.bf16.mxu0 %v10549_v38  ;;  %v10501_v36 = vcombine.high %v647_v28, %v651_v63  ;;  %v779_v38 = vld [vmem:[%s15984_s1 + $0x1768] sm:$0xff]  ;;  %v10500_v46 = vcombine.low %v647_v28, %v651_v63 }
 0x19a   :  { %6805 = vmatpush1.bf16.msra.mxu1 %v10420_v37  ;;  %v775_v37 = vld [vmem:[%s15984_s1 + $0x1748] sm:$0xff] }
 0x19b   :  { %6806 = vmatprep.subr.bf16.mxu1 %v10413_v40  ;;  %v639_v40 = vld [vmem:[%s15984_s1 + $0x1308] sm:$0xff]  ;;  %v10629_v48 = vcombine.high %v775_v37, %v779_v38  ;;  %v10628_v10 = vcombine.low %v775_v37, %v779_v38 }
 0x19c   :  { %6846 = vmatpush1.bf16.msra.mxu0 %v10548_v49  ;;  %v643_v41 = vld [vmem:[%s15984_s1 + $0x1328] sm:$0xff] }
 0x19d   :  { %6847 = vmatprep.subr.bf16.mxu0 %v10541_v51  ;;  %v10493_v49 = vcombine.high %v639_v40, %v643_v41  ;;  %v771_v51 = vld [vmem:[%s15984_s1 + $0x1728] sm:$0xff]  ;;  %v10492_v58 = vcombine.low %v639_v40, %v643_v41 }
 0x19e   :  { %6807 = vmatpush1.bf16.msra.mxu1 %v10412_v50  ;;  %v767_v50 = vld [vmem:[%s15984_s1 + $0x1708] sm:$0xff] }
 0x19f   :  { %6808 = vmatprep.subr.bf16.mxu1 %v10405_v52  ;;  %v631_v52 = vld [vmem:[%s15984_s1 + $0x12c8] sm:$0xff]  ;;  %v10621_v62 = vcombine.high %v767_v50, %v771_v51  ;;  %v10620_v5 = vcombine.low %v767_v50, %v771_v51 }
 0x1a0   :  { %6848 = vmatpush1.bf16.msra.mxu0 %v10540_v0  ;;  %v635_v54 = vld [vmem:[%s15984_s1 + $0x12e8] sm:$0xff] }
 0x1a1   :  { %6849 = vmatprep.subr.bf16.mxu0 %v10533_v45  ;;  %v10485_v0 = vcombine.high %v631_v52, %v635_v54  ;;  %v763_v45 = vld [vmem:[%s15984_s1 + $0x16e8] sm:$0xff]  ;;  %v10484_v57 = vcombine.low %v631_v52, %v635_v54 }
 0x1a2   :  { %6809 = vmatpush1.bf16.msra.mxu1 %v10404_v1  ;;  %v759_v1 = vld [vmem:[%s15984_s1 + $0x16c8] sm:$0xff] }
 0x1a3   :  { %6810 = vmatprep.subr.bf16.mxu1 %v10397_v2  ;;  %v623_v2 = vld [vmem:[%s15984_s1 + $0x1288] sm:$0xff]  ;;  %v10613_v59 = vcombine.high %v759_v1, %v763_v45  ;;  %v10612_v16 = vcombine.low %v759_v1, %v763_v45 }
 0x1a4   :  { %6850 = vmatpush1.bf16.msra.mxu0 %v10532_v8  ;;  %v627_v4 = vld [vmem:[%s15984_s1 + $0x12a8] sm:$0xff] }
 0x1a5   :  { %6851 = vmatprep.subr.bf16.mxu0 %v10525_v12  ;;  %v10477_v8 = vcombine.high %v623_v2, %v627_v4  ;;  %v755_v12 = vld [vmem:[%s15984_s1 + $0x16a8] sm:$0xff]  ;;  %v10476_v17 = vcombine.low %v623_v2, %v627_v4 }
 0x1a6   :  { %6811 = vmatpush1.bf16.msra.mxu1 %v10396_v11  ;;  %v751_v11 = vld [vmem:[%s15984_s1 + $0x1688] sm:$0xff] }
 0x1a7   :  { %6812 = vmatprep.subr.bf16.mxu1 %v10517_v60  ;;  %v615_v60 = vld [vmem:[%s15984_s1 + $0x1248] sm:$0xff]  ;;  %v10605_v53 = vcombine.high %v751_v11, %v755_v12  ;;  %v10604_v27 = vcombine.low %v751_v11, %v755_v12 }
 0x1a8   :  { %6852 = vmatpush1.bf16.msra.mxu0 %v10524_v19  ;;  %v619_v15 = vld [vmem:[%s15984_s1 + $0x1268] sm:$0xff] }
 0x1a9   :  { %6853 = vmatprep.subr.bf16.mxu0 %v10645_v23  ;;  %v10469_v19 = vcombine.high %v615_v60, %v619_v15  ;;  %v747_v23 = vld [vmem:[%s15984_s1 + $0x1668] sm:$0xff]  ;;  %v10468_v28 = vcombine.low %v615_v60, %v619_v15 }
 0x1aa   :  { %6813 = vmatpush2.bf16.msra.mxu1 %v10516_v20  ;;  %v743_v20 = vld [vmem:[%s15984_s1 + $0x1648] sm:$0xff] }
 0x1ab   :  { %6814 = vmatprep.subr.bf16.mxu1 %v10509_v25  ;;  %v607_v25 = vld [vmem:[%s15984_s1 + $0x1208] sm:$0xff]  ;;  %v10597_v63 = vcombine.high %v743_v20, %v747_v23  ;;  %v10596_v38 = vcombine.low %v743_v20, %v747_v23 }
 0x1ac   :  { %6854 = vmatpush2.bf16.msra.mxu0 %v10644_v34  ;;  %v611_v26 = vld [vmem:[%s15984_s1 + $0x1228] sm:$0xff] }
 0x1ad   :  { %6855 = vmatprep.subr.bf16.mxu0 %v10637_v35  ;;  %v10461_v34 = vcombine.high %v607_v25, %v611_v26  ;;  %v739_v35 = vld [vmem:[%s15984_s1 + $0x1628] sm:$0xff]  ;;  %v10460_v40 = vcombine.low %v607_v25, %v611_v26 }
 0x1ae   :  { %6815 = vmatpush2.bf16.msra.mxu1 %v10508_v33  ;;  %v735_v33 = vld [vmem:[%s15984_s1 + $0x1608] sm:$0xff] }
 0x1af   :  { %6816 = vmatprep.subr.bf16.mxu1 %v10501_v36  ;;  %v855_v36 = vld [vmem:[%s15984_s1 + $0x19c8] sm:$0xff]  ;;  %v10589_v41 = vcombine.high %v735_v33, %v739_v35  ;;  %v10588_v51 = vcombine.low %v735_v33, %v739_v35 }
 0x1b0   :  { %6856 = vmatpush2.bf16.msra.mxu0 %v10636_v42  ;;  %v859_v37 = vld [vmem:[%s15984_s1 + $0x19e8] sm:$0xff] }
 0x1b1   :  { %6857 = vmatprep.subr.bf16.mxu0 %v10629_v48  ;;  %v10709_v42 = vcombine.high %v855_v36, %v859_v37  ;;  %v987_v48 = vld [vmem:[%s15984_s1 + $0x1de8] sm:$0xff]  ;;  %v10708_v52 = vcombine.low %v855_v36, %v859_v37 }
 0x1b2   :  { %6817 = vmatpush2.bf16.msra.mxu1 %v10500_v46  ;;  %v983_v46 = vld [vmem:[%s15984_s1 + $0x1dc8] sm:$0xff] }
 0x1b3   :  { %6818 = vmatprep.subr.bf16.mxu1 %v10493_v49  ;;  %v847_v49 = vld [vmem:[%s15984_s1 + $0x1988] sm:$0xff]  ;;  %v10837_v54 = vcombine.high %v983_v46, %v987_v48  ;;  %v10836_v2 = vcombine.low %v983_v46, %v987_v48 }
 0x1b4   :  { %6858 = vmatpush2.bf16.msra.mxu0 %v10628_v10  ;;  %v851_v50 = vld [vmem:[%s15984_s1 + $0x19a8] sm:$0xff] }
 0x1b5   :  { %6859 = vmatprep.subr.bf16.mxu0 %v10621_v62  ;;  %v10701_v10 = vcombine.high %v847_v49, %v851_v50  ;;  %v979_v62 = vld [vmem:[%s15984_s1 + $0x1da8] sm:$0xff]  ;;  %v10700_v4 = vcombine.low %v847_v49, %v851_v50 }
 0x1b6   :  { %6819 = vmatpush2.bf16.msra.mxu1 %v10492_v58  ;;  %v975_v58 = vld [vmem:[%s15984_s1 + $0x1d88] sm:$0xff] }
 0x1b7   :  { %6820 = vmatprep.subr.bf16.mxu1 %v10485_v0  ;;  %v839_v0 = vld [vmem:[%s15984_s1 + $0x1948] sm:$0xff] }
 0x1b8   :  { %6860 = vmatpush2.bf16.msra.mxu0 %v10620_v5  ;;  %v843_v1 = vld [vmem:[%s15984_s1 + $0x1968] sm:$0xff]  ;;  %v10829_v5 = vcombine.high %v975_v58, %v979_v62 }
 0x1b9   :  { %6861 = vmatprep.subr.bf16.mxu0 %v10613_v59  ;;  %v10693_v59 = vcombine.high %v839_v0, %v843_v1  ;;  %v971_v11 = vld [vmem:[%s15984_s1 + $0x1d68] sm:$0xff]  ;;  %v10692_v20 = vcombine.low %v839_v0, %v843_v1 }
 0x1ba   :  { %6821 = vmatpush2.bf16.msra.mxu1 %v10484_v57  ;;  %v831_v60 = vld [vmem:[%s15984_s1 + $0x1908] sm:$0xff] }
 0x1bb   :  { %6822 = vmatprep.subr.bf16.mxu1 %v10477_v8  ;;  %v967_v8 = vld [vmem:[%s15984_s1 + $0x1d48] sm:$0xff] }
 0x1bc   :  { %6862 = vmatpush2.bf16.msra.mxu0 %v10612_v16  ;;  %v835_v15 = vld [vmem:[%s15984_s1 + $0x1928] sm:$0xff]  ;;  %v10821_v23 = vcombine.high %v967_v8, %v971_v11  ;;  %v10820_v36 = vcombine.low %v967_v8, %v971_v11 }
 0x1bd   :  { %6863 = vmatprep.subr.bf16.mxu0 %v10605_v53  ;;  %v10828_v53 = vcombine.low %v975_v58, %v979_v62  ;;  %v823_v33 = vld [vmem:[%s15984_s1 + $0x18c8] sm:$0xff] }
 0x1be   :  { %6823 = vmatpush2.bf16.msra.mxu1 %v10476_v17  ;;  %v955_v46 = vld [vmem:[%s15984_s1 + $0x1ce8] sm:$0xff] }
 0x1bf   :  { %6824 = vmatprep.subr.bf16.mxu1 %v10469_v19  ;;  %v815_v48 = vld [vmem:[%s15984_s1 + $0x1888] sm:$0xff] }
 0x1c0   :  { %6864 = vmatpush2.bf16.msra.mxu0 %v10604_v27  ;;  %v819_v49 = vld [vmem:[%s15984_s1 + $0x18a8] sm:$0xff] }
 0x1c1   :  { %6865 = vmatprep.subr.bf16.mxu0 %v10597_v63  ;;  %v963_v63 = vld [vmem:[%s15984_s1 + $0x1d28] sm:$0xff] }
 0x1c2   :  { %6825 = vmatpush2.bf16.msra.mxu1 %v10468_v28  ;;  %v10685_v28 = vcombine.high %v831_v60, %v835_v15  ;;  %v947_v58 = vld [vmem:[%s15984_s1 + $0x1ca8] sm:$0xff] }
 0x1c3   :  { %6826 = vmatprep.subr.bf16.mxu1 %v10461_v34  ;;  %v807_v62 = vld [vmem:[%s15984_s1 + $0x1848] sm:$0xff] }
 0x1c4   :  { %6866 = vmatpush2.bf16.msra.mxu0 %v10596_v38  ;;  %v10684_v38 = vcombine.low %v831_v60, %v835_v15  ;;  %v811_v0 = vld [vmem:[%s15984_s1 + $0x1868] sm:$0xff] }
 0x1c5   :  { %6867 = vmatprep.subr.bf16.mxu0 %v10589_v41  ;;  %v803_v8 = vld [vmem:[%s15984_s1 + $0x1828] sm:$0xff] }
 0x1c6   :  { %6827 = vmatpush2.bf16.msra.mxu1 %v10460_v40 }
 0x1c7   :  { %6878 = vmatprep.subr.bf16.mxu1 %v10709_v42  ;;  %v951_v42 = vld [vmem:[%s15984_s1 + $0x1cc8] sm:$0xff] }
 0x1c8   :  { %6868 = vmatpush2.bf16.msra.mxu0 %v10588_v51  ;;  %v10804_v1 = vcombine.low %v951_v42, %v955_v46 }
 0x1c9   :  { %v6625_v45 = vpop.f32.mrf.mxu1  ;;  %6829 = vmatmul.mubr.bf16.vlgmr.msra.gmra.mxu1 %v12402_v21  ;;  %6919 = vmatprep.subr.bf16.mxu0 %v10837_v54  ;;  %v10669_v54 = vcombine.high %v815_v48, %v819_v49 }
 0x1ca   :  { %6879 = vmatpush1.bf16.msra.mxu1 %v10708_v52  ;;  %6910 = vmatprep.mubr.bf16.mxu1 %v12417_v31  ;;  %v10805_v52 = vcombine.high %v951_v42, %v955_v46  ;;  %v903_v42 = vld [vmem:[%s15984_s1 + $0x1b48] sm:$0xff] }
 0x1cb   :  { %v6627_v57 = vpop.f32.mrf.mxu1  ;;  %6880 = vmatprep.subr.bf16.mxu1 %v10701_v10  ;;  %v6584_v12 = vpop.f32.mrf.mxu0  ;;  %6870 = vmatmul.mubr.bf16.vlgmr.msra.gmra.mxu0 %v12421_v32  ;;  %v943_v10 = vld [vmem:[%s15984_s1 + $0x1c88] sm:$0xff] }
 0x1cc   :  { %v6585_v16 = vadd.f32 %v6584_v12, %v13062_v7  ;;  %6920 = vmatpush1.bf16.msra.mxu0 %v10836_v2  ;;  %10901 = vmatprep.mubr.msk.bf16.mxu0 %vm6275_vm0, %v12437_v44  ;;  %v959_v7 = vld [vmem:[%s15984_s1 + $0x1d08] sm:$0xff]  ;;  %v10797_v2 = vcombine.high %v943_v10, %v947_v58  ;;  %v10796_v11 = vcombine.low %v943_v10, %v947_v58 }
 0x1cd   :  { %v6629_v17 = vpop.f32.mrf.mxu1  ;;  %v6586_v19 = vpop.f32.mrf.mxu0  ;;  %6921 = vmatprep.subr.bf16.mxu0 %v10829_v5  ;;  %v10813_v40 = vcombine.high %v959_v7, %v963_v63  ;;  %v10812_v50 = vcombine.low %v959_v7, %v963_v63  ;;  %v935_v5 = vld [vmem:[%s15984_s1 + $0x1c48] sm:$0xff]  ;;  %v10660_v12 = vcombine.low %v807_v62, %v811_v0 }
 0x1ce   :  { %6881 = vmatpush1.bf16.msra.mxu1 %v10700_v4  ;;  %v13265_v25 = vadd.f32 %v6625_v45, %v6585_v16  ;;  %v6587_v26 = vadd.f32 %v6586_v19, %v13077_v18  ;;  %v827_v18 = vld [vmem:[%s15984_s1 + $0x18e8] sm:$0xff]  ;;  %v10668_v45 = vcombine.low %v815_v48, %v819_v49  ;;  %v10661_v4 = vcombine.high %v807_v62, %v811_v0 }
 0x1cf   :  { %v6630_v27 = vpop.f32.mrf.mxu1  ;;  %6882 = vmatprep.subr.bf16.mxu1 %v10693_v59  ;;  %v6588_v34 = vpop.f32.mrf.mxu0  ;;  %v10677_v41 = vcombine.high %v823_v33, %v827_v18  ;;  %v10676_v51 = vcombine.low %v823_v33, %v827_v18  ;;  %v799_v59 = vld [vmem:[%s15984_s1 + $0x1808] sm:$0xff] }
 0x1d0   :  { %v13280_v35 = vadd.f32 %v6627_v57, %v6587_v26  ;;  %6922 = vmatpush1.bf16.msra.mxu0 %v10828_v53  ;;  %v939_v57 = vld [vmem:[%s15984_s1 + $0x1c68] sm:$0xff]  ;;  %v10653_v15 = vcombine.high %v799_v59, %v803_v8 }
 0x1d1   :  { %v6589_v37 = vpop.f32.mrf.mxu0  ;;  %6923 = vmatprep.subr.bf16.mxu0 %v10821_v23  ;;  %v10789_v60 = vcombine.high %v935_v5, %v939_v57  ;;  %v927_v16 = vld [vmem:[%s15984_s1 + $0x1c08] sm:$0xff]  ;;  %v10652_v23 = vcombine.low %v799_v59, %v803_v8 }
 0x1d2   :  { %6883 = vmatpush1.bf16.msra.mxu1 %v10692_v20  ;;  %v931_v17 = vld [vmem:[%s15984_s1 + $0x1c28] sm:$0xff]  ;;  %v10788_v20 = vcombine.low %v935_v5, %v939_v57 }
 0x1d3   :  { %6884 = vmatprep.subr.bf16.mxu1 %v10685_v28  ;;  %v919_v53 = vld [vmem:[%s15984_s1 + $0x1bc8] sm:$0xff]  ;;  %v10781_v26 = vcombine.high %v927_v16, %v931_v17  ;;  %v10780_v33 = vcombine.low %v927_v16, %v931_v17 }
 0x1d4   :  { %6924 = vmatpush1.bf16.msra.mxu0 %v10820_v36  ;;  %v923_v19 = vld [vmem:[%s15984_s1 + $0x1be8] sm:$0xff] }
 0x1d5   :  { %6925 = vmatprep.subr.bf16.mxu0 %v10813_v40  ;;  %v10773_v27 = vcombine.high %v919_v53, %v923_v19  ;;  %v1039_v28 = vld [vmem:[%s15984_s1 + $0x1f88] sm:$0xff]  ;;  %v10772_v18 = vcombine.low %v919_v53, %v923_v19 }
 0x1d6   :  { %6885 = vmatpush1.bf16.msra.mxu1 %v10684_v38  ;;  %v1043_v7 = vld [vmem:[%s15984_s1 + $0x1fa8] sm:$0x33] }
 0x1d7   :  { %6886 = vmatprep.subr.bf16.mxu1 %v10677_v41  ;;  %v911_v63 = vld [vmem:[%s15984_s1 + $0x1b88] sm:$0xff]  ;;  %v10893_v36 = vcombine.high %v1039_v28, %v1043_v7  ;;  %v10892_v37 = vcombine.low %v1039_v28, %v1043_v7 }
 0x1d8   :  { %6926 = vmatpush1.bf16.msra.mxu0 %v10812_v50  ;;  %v915_v34 = vld [vmem:[%s15984_s1 + $0x1ba8] sm:$0xff] }
 0x1d9   :  { %6927 = vmatprep.subr.bf16.mxu0 %v10805_v52  ;;  %v10765_v38 = vcombine.high %v911_v63, %v915_v34  ;;  %v1031_v40 = vld [vmem:[%s15984_s1 + $0x1f48] sm:$0xff]  ;;  %v10764_v48 = vcombine.low %v911_v63, %v915_v34  ;;  %v6287_v49 = vsel %vm6279_vm1, %v10892_v37, 0 }
 0x1da   :  { %6887 = vmatpush1.bf16.msra.mxu1 %v10676_v51  ;;  %v1035_v41 = vld [vmem:[%s15984_s1 + $0x1f68] sm:$0xff] }
 0x1db   :  { %6888 = vmatprep.subr.bf16.mxu1 %v10669_v54  ;;  %v907_v46 = vld [vmem:[%s15984_s1 + $0x1b68] sm:$0xff]  ;;  %v10885_v50 = vcombine.high %v1031_v40, %v1035_v41  ;;  %v10884_v62 = vcombine.low %v1031_v40, %v1035_v41 }
 0x1dc   :  { %6928 = vmatpush1.bf16.msra.mxu0 %v10804_v1  ;;  %v10757_v51 = vcombine.high %v903_v42, %v907_v46  ;;  %v1023_v52 = vld [vmem:[%s15984_s1 + $0x1f08] sm:$0xff]  ;;  %v10756_v0 = vcombine.low %v903_v42, %v907_v46 }
 0x1dd   :  { %6929 = vmatprep.subr.bf16.mxu0 %v10797_v2  ;;  %v1027_v54 = vld [vmem:[%s15984_s1 + $0x1f28] sm:$0xff] }
 0x1de   :  { %6889 = vmatpush1.bf16.msra.mxu1 %v10668_v45  ;;  %v895_v10 = vld [vmem:[%s15984_s1 + $0x1b08] sm:$0xff]  ;;  %v10877_v1 = vcombine.high %v1023_v52, %v1027_v54  ;;  %v10876_v59 = vcombine.low %v1023_v52, %v1027_v54  ;;  %v220_v52 = vld [vmem:[%s15984_s1 + $0x5f0] sm:$0xff] }
 0x1df   :  { %6890 = vmatprep.subr.bf16.mxu1 %v10661_v4  ;;  %v899_v58 = vld [vmem:[%s15984_s1 + $0x1b28] sm:$0xff] }
 0x1e0   :  { %6930 = vmatpush1.bf16.msra.mxu0 %v10796_v11  ;;  %v10749_v45 = vcombine.high %v895_v10, %v899_v58  ;;  %v1015_v2 = vld [vmem:[%s15984_s1 + $0x1ec8] sm:$0xff]  ;;  %v10748_v8 = vcombine.low %v895_v10, %v899_v58  ;;  %v1058_v58 = vsub.s32 2, %v11790_v43 }
 0x1e1   :  { %6931 = vmatprep.subr.bf16.mxu0 %v10789_v60  ;;  %v1019_v4 = vld [vmem:[%s15984_s1 + $0x1ee8] sm:$0xff] }
 0x1e2   :  { %6891 = vmatpush1.bf16.msra.mxu1 %v10660_v12  ;;  %v887_v5 = vld [vmem:[%s15984_s1 + $0x1ac8] sm:$0xff]  ;;  %v10869_v11 = vcombine.high %v1015_v2, %v1019_v4  ;;  %v10868_v53 = vcombine.low %v1015_v2, %v1019_v4  ;;  %v208_v2 = vld [vmem:[%s15984_s1 + $0x590] sm:$0xff] }
 0x1e3   :  { %6892 = vmatprep.subr.bf16.mxu1 %v10653_v15  ;;  %v891_v57 = vld [vmem:[%s15984_s1 + $0x1ae8] sm:$0xff]  ;;  %v212_v4 = vld [vmem:[%s15984_s1 + $0x5b0] sm:$0xff] }
 0x1e4   :  { %6932 = vmatpush1.bf16.msra.mxu0 %v10788_v20  ;;  %v10741_v12 = vcombine.high %v887_v5, %v891_v57  ;;  %v1007_v60 = vld [vmem:[%s15984_s1 + $0x1e88] sm:$0xff]  ;;  %v10740_v19 = vcombine.low %v887_v5, %v891_v57  ;;  %v1062_v57 = vsub.s32 3, %v11790_v43 }
 0x1e5   :  { %6933 = vmatprep.subr.bf16.mxu0 %v10781_v26  ;;  %v1011_v15 = vld [vmem:[%s15984_s1 + $0x1ea8] sm:$0xff] }
 0x1e6   :  { %6893 = vmatpush1.bf16.msra.mxu1 %v10652_v23  ;;  %v879_v16 = vld [vmem:[%s15984_s1 + $0x1a88] sm:$0xff]  ;;  %v10861_v20 = vcombine.high %v1007_v60, %v1011_v15  ;;  %v10860_v63 = vcombine.low %v1007_v60, %v1011_v15  ;;  %v10063_v60 = vcombine.high %v208_v2, %v212_v4  ;;  %v72_v15 = vld [vmem:[%s15984_s1 + $0x150] sm:$0xff] }
 0x1e7   :  { %6894 = vmatprep.subr.bf16.mxu1 %v10773_v27  ;;  %v883_v17 = vld [vmem:[%s15984_s1 + $0x1aa8] sm:$0xff] }
 0x1e8   :  { %6934 = vmatpush1.bf16.msra.mxu0 %v10780_v33  ;;  %v10733_v23 = vcombine.high %v879_v16, %v883_v17  ;;  %v999_v26 = vld [vmem:[%s15984_s1 + $0x1e48] sm:$0xff]  ;;  %v10732_v34 = vcombine.low %v879_v16, %v883_v17  ;;  %v76_v16 = vld [vmem:[%s15984_s1 + $0x170] sm:$0xff] }
 0x1e9   :  { %10900 = vmatprep.subr.msk.bf16.mxu0 %vm6279_vm1, %v10893_v36  ;;  %v1003_v27 = vld [vmem:[%s15984_s1 + $0x1e68] sm:$0xff]  ;;  %v200_v17 = vld [vmem:[%s15984_s1 + $0x550] sm:$0xff] }
 0x1ea   :  { %6895 = vmatpush2.bf16.msra.mxu1 %v10772_v18  ;;  %v871_v28 = vld [vmem:[%s15984_s1 + $0x1a48] sm:$0xff]  ;;  %v10853_v33 = vcombine.high %v999_v26, %v1003_v27  ;;  %v10852_v41 = vcombine.low %v999_v26, %v1003_v27  ;;  %v10062_v27 = vcombine.low %v208_v2, %v212_v4 }
 0x1eb   :  { %6896 = vmatprep.subr.bf16.mxu1 %v10765_v38  ;;  %v875_v7 = vld [vmem:[%s15984_s1 + $0x1a68] sm:$0xff] }
 0x1ec   :  { %6938 = vmatpush2.bf16.msra.mxu0 %v6287_v49  ;;  %v10725_v18 = vcombine.high %v871_v28, %v875_v7  ;;  %v991_v36 = vld [vmem:[%s15984_s1 + $0x1e08] sm:$0xff]  ;;  %v10724_v42 = vcombine.low %v871_v28, %v875_v7  ;;  %v88_v49 = vld [vmem:[%s15984_s1 + $0x1d0] sm:$0xff]  ;;  %v9927_v28 = vcombine.high %v72_v15, %v76_v16 }
 0x1ed   :  { %6939 = vmatprep.subr.bf16.mxu0 %v10885_v50  ;;  %v995_v37 = vld [vmem:[%s15984_s1 + $0x1e28] sm:$0xff]  ;;  %v92_v50 = vld [vmem:[%s15984_s1 + $0x1f0] sm:$0xff] }
 0x1ee   :  { %6897 = vmatpush2.bf16.msra.mxu1 %v10764_v48  ;;  %v863_v38 = vld [vmem:[%s15984_s1 + $0x1a08] sm:$0xff]  ;;  %v10845_v46 = vcombine.high %v991_v36, %v995_v37  ;;  %v10844_v54 = vcombine.low %v991_v36, %v995_v37  ;;  %v9942_v5 = vcombine.low %v88_v49, %v92_v50  ;;  %v192_v36 = vld [vmem:[%s15984_s1 + $0x510] sm:$0xff] }
 0x1ef   :  { %6898 = vmatprep.subr.bf16.mxu1 %v10757_v51  ;;  %v867_v40 = vld [vmem:[%s15984_s1 + $0x1a28] sm:$0xff]  ;;  %v216_v51 = vld [vmem:[%s15984_s1 + $0x5d0] sm:$0xff] }
 0x1f0   :  { %6940 = vmatpush2.bf16.msra.mxu0 %v10884_v62  ;;  %v10717_v48 = vcombine.high %v863_v38, %v867_v40  ;;  %v10716_v10 = vcombine.low %v863_v38, %v867_v40  ;;  %v9943_v62 = vcombine.high %v88_v49, %v92_v50  ;;  %v196_v37 = vld [vmem:[%s15984_s1 + $0x530] sm:$0xff] }
 0x1f1   :  { %6941 = vmatprep.subr.bf16.mxu0 %v10877_v1  ;;  %v80_v1 = vld [vmem:[%s15984_s1 + $0x190] sm:$0xff]  ;;  %v10046_v4 = vcombine.low %v192_v36, %v196_v37 }
 0x1f2   :  { %6899 = vmatpush2.bf16.msra.mxu1 %v10756_v0  ;;  %v10071_v0 = vcombine.high %v216_v51, %v220_v52 }
 0x1f3   :  { %6900 = vmatprep.subr.bf16.mxu1 %v10749_v45  ;;  %v84_v45 = vld [vmem:[%s15984_s1 + $0x1b0] sm:$0xff] }
 0x1f4   :  { %6942 = vmatpush2.bf16.msra.mxu0 %v10876_v59  ;;  %v11657_v59 = vld [vmem:[%s15985_s2] sm:$0xff] }
 0x1f5   :  { %6943 = vmatprep.subr.bf16.mxu0 %v10869_v11  ;;  %v10070_v11 = vcombine.low %v216_v51, %v220_v52  ;;  %v10047_v52 = vcombine.high %v192_v36, %v196_v37  ;;  %v164_v36 = vld [vmem:[%s15984_s1 + $0x430] sm:$0xff] }
 0x1f6   :  { %6901 = vmatpush2.bf16.msra.mxu1 %v10748_v8  ;;  %v1059_v8 = vrot.slane %v11657_v59, %v1058_v58 }
 0x1f7   :  { %6902 = vmatprep.subr.bf16.mxu1 %v10741_v12  ;;  %v9935_v12 = vcombine.high %v80_v1, %v84_v45 }
 0x1f8   :  { %6944 = vmatpush2.bf16.msra.mxu0 %v10868_v53  ;;  %v204_v53 = vld [vmem:[%s15984_s1 + $0x570] sm:$0xff] }
 0x1f9   :  { %6945 = vmatprep.subr.bf16.mxu0 %v10861_v20  ;;  %v1063_v20 = vrot.slane %v11657_v59, %v1062_v57 }
 0x1fa   :  { %6903 = vmatpush2.bf16.msra.mxu1 %v10740_v19 }
 0x1fb   :  { %6904 = vmatprep.subr.bf16.mxu1 %v10733_v23  ;;  %v9934_v23 = vcombine.low %v80_v1, %v84_v45  ;;  %v188_v1 = vld [vmem:[%s15984_s1 + $0x4f0] sm:$0xff] }
 0x1fc   :  { %6946 = vmatpush2.bf16.msra.mxu0 %v10860_v63  ;;  %v10055_v63 = vcombine.high %v200_v17, %v204_v53 }
 0x1fd   :  { %6947 = vmatprep.subr.bf16.mxu0 %v10853_v33  ;;  %v68_v33 = vld [vmem:[%s15984_s1 + $0x130] sm:$0xff] }
 0x1fe   :  { %6905 = vmatpush2.bf16.msra.mxu1 %v10732_v34  ;;  %v64_v34 = vld [vmem:[%s15984_s1 + $0x110] sm:$0xff] }
 0x1ff   :  { %6906 = vmatprep.subr.bf16.mxu1 %v10725_v18  ;;  %v9919_v49 = vcombine.high %v64_v34, %v68_v33  ;;  %v9918_v45 = vcombine.low %v64_v34, %v68_v33  ;;  %v32_v34 = vld [vmem:[%s15984_s1 + $0x10] sm:$0xff] }
 0x200   :  { %6948 = vmatpush2.bf16.msra.mxu0 %v10852_v41  ;;  %v36_v33 = vld [vmem:[%s15984_s1 + $0x30] sm:$0xff] }
 0x201   :  { %6949 = vmatprep.subr.bf16.mxu0 %v10845_v46 }
 0x202   :  { %6907 = vmatpush2.bf16.msra.mxu1 %v10724_v42  ;;  %v9926_v42 = vcombine.low %v72_v15, %v76_v16 }
 0x203   :  { %6908 = vmatprep.subr.bf16.mxu1 %v10717_v48  ;;  %v10054_v48 = vcombine.low %v200_v17, %v204_v53 }
 0x204   :  { %6950 = vmatpush2.bf16.msra.mxu0 %v10844_v54  ;;  %v56_v54 = vld [vmem:[%s15984_s1 + $0xd0] sm:$0xff] }
 0x205   :  { %6960 = vmatprep.subr.bf16.mxu0 %v9943_v62 }
 0x206   :  { %6909 = vmatpush2.bf16.msra.mxu1 %v10716_v10  ;;  %v60_v10 = vld [vmem:[%s15984_s1 + $0xf0] sm:$0xff] }
 0x207   :  { %7001 = vmatprep.subr.bf16.mxu1 %v10071_v0  ;;  %6952 = vmatmul.mubr.bf16.vlgmr.msra.gmra.mxu0 %v12620_v6  ;;  %v184_v0 = vld [vmem:[%s15984_s1 + $0x4d0] sm:$0xff]  ;;  %v9910_v15 = vcombine.low %v56_v54, %v60_v10 }
 0x208   :  { %6961 = vmatpush1.bf16.msra.mxu0 %v9942_v5  ;;  %6992 = vmatprep.mubr.bf16.mxu0 %v11843_v9  ;;  %v9911_v5 = vcombine.high %v56_v54, %v60_v10  ;;  %v10039_v59 = vcombine.high %v184_v0, %v188_v1  ;;  %v10038_v16 = vcombine.low %v184_v0, %v188_v1  ;;  %v144_v0 = vld [vmem:[%s15984_s1 + $0x390] sm:$0xff] }
 0x209   :  { %v6666_v19 = vpop.f32.mrf.mxu1  ;;  %6911 = vmatmul.mubr.bf16.vlgmr.msra.gmra.mxu1 %v12604_v61  ;;  %6962 = vmatprep.subr.bf16.mxu0 %v9935_v12  ;;  %v176_v12 = vld [vmem:[%s15984_s1 + $0x490] sm:$0xff] }
 0x20a   :  { %v6667_v26 = vadd.f32 %v6666_v19, %v1059_v8  ;;  %7002 = vmatpush1.bf16.msra.mxu1 %v10070_v11  ;;  %7033 = vmatprep.mubr.bf16.mxu1 %v11854_v13  ;;  %v48_v8 = vld [vmem:[%s15984_s1 + $0x90] sm:$0xff] }
 0x20b   :  { %v6668_v7 = vpop.f32.mrf.mxu1  ;;  %7003 = vmatprep.subr.bf16.mxu1 %v10063_v60  ;;  %v6707_v18 = vpop.f32.mrf.mxu0  ;;  %v52_v11 = vld [vmem:[%s15984_s1 + $0xb0] sm:$0xff] }
 0x20c   :  { %v6669_v38 = vadd.f32 %v6668_v7, %v1063_v20  ;;  %v13477_v41 = vadd.f32 %v6707_v18, %v6667_v26  ;;  %6963 = vmatpush1.bf16.msra.mxu0 %v9934_v23  ;;  %v180_v60 = vld [vmem:[%s15984_s1 + $0x4b0] sm:$0xff]  ;;  %v9903_v17 = vcombine.high %v48_v8, %v52_v11 }
 0x20d   :  { %v6670_v40 = vpop.f32.mrf.mxu1  ;;  %v6709_v46 = vpop.f32.mrf.mxu0  ;;  %6964 = vmatprep.subr.bf16.mxu0 %v9927_v28  ;;  %v10031_v53 = vcombine.high %v176_v12, %v180_v60  ;;  %v40_v19 = vld [vmem:[%s15984_s1 + $0x50] sm:$0xff]  ;;  %v10030_v28 = vcombine.low %v176_v12, %v180_v60 }
 0x20e   :  { %7004 = vmatpush1.bf16.msra.mxu1 %v10062_v27  ;;  %v13479_v51 = vadd.f32 %v6709_v46, %v6669_v38  ;;  %v44_v20 = vld [vmem:[%s15984_s1 + $0x70] sm:$0xff]  ;;  %v9902_v27 = vcombine.low %v48_v8, %v52_v11  ;;  %v9887_v40 = vcombine.high %v32_v34, %v36_v33 }
 0x20f   :  { %v6671_v50 = vpop.f32.mrf.mxu1  ;;  %7005 = vmatprep.subr.bf16.mxu1 %v10055_v63  ;;  %v6711_v62 = vpop.f32.mrf.mxu0  ;;  %v168_v23 = vld [vmem:[%s15984_s1 + $0x450] sm:$0xff]  ;;  %v9895_v7 = vcombine.high %v40_v19, %v44_v20  ;;  %v9894_v37 = vcombine.low %v40_v19, %v44_v20 }
 0x210   :  { %6965 = vmatpush1.bf16.msra.mxu0 %v9926_v42  ;;  %v172_v26 = vld [vmem:[%s15984_s1 + $0x470] sm:$0xff] }
 0x211   :  { %v6712_v2 = vpop.f32.mrf.mxu0  ;;  %6966 = vmatprep.subr.bf16.mxu0 %v9919_v49  ;;  %v10023_v63 = vcombine.high %v168_v23, %v172_v26  ;;  %v160_v18 = vld [vmem:[%s15984_s1 + $0x410] sm:$0xff]  ;;  %v10022_v38 = vcombine.low %v168_v23, %v172_v26 }
 0x212   :  { %7006 = vmatpush1.bf16.msra.mxu1 %v10054_v48  ;;  %v10015_v42 = vcombine.high %v160_v18, %v164_v36  ;;  %v152_v46 = vld [vmem:[%s15984_s1 + $0x3d0] sm:$0xff]  ;;  %v10014_v54 = vcombine.low %v160_v18, %v164_v36 }
 0x213   :  { %7007 = vmatprep.subr.bf16.mxu1 %v10047_v52  ;;  %v156_v48 = vld [vmem:[%s15984_s1 + $0x3f0] sm:$0xff]  ;;  %v9886_v52 = vcombine.low %v32_v34, %v36_v33 }
 0x214   :  { %6967 = vmatpush1.bf16.msra.mxu0 %v9918_v45  ;;  %v280_v49 = vld [vmem:[%s15984_s1 + $0x7d0] sm:$0xff]  ;;  %v10007_v10 = vcombine.high %v152_v46, %v156_v48 }
 0x215   :  { %6968 = vmatprep.subr.bf16.mxu0 %v9911_v5  ;;  %v284_v50 = vld [vmem:[%s15984_s1 + $0x7f0] sm:$0xff] }
 0x216   :  { %7008 = vmatpush1.bf16.msra.mxu1 %v10046_v4  ;;  %v10135_v62 = vcombine.high %v280_v49, %v284_v50  ;;  %v148_v1 = vld [vmem:[%s15984_s1 + $0x3b0] sm:$0xff]  ;;  %v10006_v4 = vcombine.low %v152_v46, %v156_v48  ;;  %v10134_v5 = vcombine.low %v280_v49, %v284_v50 }
 0x217   :  { %7009 = vmatprep.subr.bf16.mxu1 %v10039_v59  ;;  %v272_v45 = vld [vmem:[%s15984_s1 + $0x790] sm:$0xff]  ;;  %v9999_v59 = vcombine.high %v144_v0, %v148_v1 }
 0x218   :  { %6969 = vmatpush1.bf16.msra.mxu0 %v9910_v15  ;;  %v276_v2 = vld [vmem:[%s15984_s1 + $0x7b0] sm:$0xff] }
 0x219   :  { %6970 = vmatprep.subr.bf16.mxu0 %v9903_v17  ;;  %v10127_v8 = vcombine.high %v272_v45, %v276_v2  ;;  %v136_v11 = vld [vmem:[%s15984_s1 + $0x350] sm:$0xff]  ;;  %v10126_v17 = vcombine.low %v272_v45, %v276_v2 }
 0x21a   :  { %7010 = vmatpush1.bf16.msra.mxu1 %v10038_v16  ;;  %v140_v12 = vld [vmem:[%s15984_s1 + $0x370] sm:$0xff]  ;;  %v9998_v16 = vcombine.low %v144_v0, %v148_v1 }
 0x21b   :  { %7011 = vmatprep.subr.bf16.mxu1 %v10031_v53  ;;  %v264_v60 = vld [vmem:[%s15984_s1 + $0x750] sm:$0xff]  ;;  %v9991_v53 = vcombine.high %v136_v11, %v140_v12 }
 0x21c   :  { %6971 = vmatpush1.bf16.msra.mxu0 %v9902_v27  ;;  %v268_v15 = vld [vmem:[%s15984_s1 + $0x770] sm:$0xff] }
 0x21d   :  { %6972 = vmatprep.subr.bf16.mxu0 %v9895_v7  ;;  %v10119_v19 = vcombine.high %v264_v60, %v268_v15  ;;  %v128_v20 = vld [vmem:[%s15984_s1 + $0x310] sm:$0xff]  ;;  %v10118_v7 = vcombine.low %v264_v60, %v268_v15 }
 0x21e   :  { %7012 = vmatpush1.bf16.msra.mxu1 %v10030_v28  ;;  %v132_v23 = vld [vmem:[%s15984_s1 + $0x330] sm:$0xff]  ;;  %v9990_v28 = vcombine.low %v136_v11, %v140_v12 }
 0x21f   :  { %7013 = vmatprep.subr.bf16.mxu1 %v10023_v63  ;;  %v256_v26 = vld [vmem:[%s15984_s1 + $0x710] sm:$0xff]  ;;  %v9983_v63 = vcombine.high %v128_v20, %v132_v23 }
 0x220   :  { %6973 = vmatpush1.bf16.msra.mxu0 %v9894_v37  ;;  %v260_v27 = vld [vmem:[%s15984_s1 + $0x730] sm:$0xff] }
 0x221   :  { %6974 = vmatprep.subr.bf16.mxu0 %v9887_v40  ;;  %v10111_v34 = vcombine.high %v256_v26, %v260_v27  ;;  %v120_v33 = vld [vmem:[%s15984_s1 + $0x2d0] sm:$0xff]  ;;  %v10110_v40 = vcombine.low %v256_v26, %v260_v27 }
 0x222   :  { %7014 = vmatpush1.bf16.msra.mxu1 %v10022_v38  ;;  %v124_v18 = vld [vmem:[%s15984_s1 + $0x2f0] sm:$0xff]  ;;  %v9982_v38 = vcombine.low %v128_v20, %v132_v23 }
 0x223   :  { %7015 = vmatprep.subr.bf16.mxu1 %v10015_v42  ;;  %v248_v36 = vld [vmem:[%s15984_s1 + $0x6d0] sm:$0xff]  ;;  %v9975_v42 = vcombine.high %v120_v33, %v124_v18 }
 0x224   :  { %6975 = vmatpush1.bf16.msra.mxu0 %v9886_v52  ;;  %v252_v37 = vld [vmem:[%s15984_s1 + $0x6f0] sm:$0xff] }
 0x225   :  { %6976 = vmatprep.subr.bf16.mxu0 %v10007_v10  ;;  %v10103_v46 = vcombine.high %v248_v36, %v252_v37  ;;  %v112_v48 = vld [vmem:[%s15984_s1 + $0x290] sm:$0xff]  ;;  %v10102_v10 = vcombine.low %v248_v36, %v252_v37 }
 0x226   :  { %7016 = vmatpush1.bf16.msra.mxu1 %v10014_v54  ;;  %v116_v49 = vld [vmem:[%s15984_s1 + $0x2b0] sm:$0xff]  ;;  %v9974_v54 = vcombine.low %v120_v33, %v124_v18 }
 0x227   :  { %7017 = vmatprep.subr.bf16.mxu1 %v10135_v62  ;;  %v240_v50 = vld [vmem:[%s15984_s1 + $0x690] sm:$0xff]  ;;  %v9967_v62 = vcombine.high %v112_v48, %v116_v49 }
 0x228   :  { %6977 = vmatpush2.bf16.msra.mxu0 %v10006_v4  ;;  %v244_v52 = vld [vmem:[%s15984_s1 + $0x6b0] sm:$0xff] }
 0x229   :  { %6978 = vmatprep.subr.bf16.mxu0 %v9999_v59  ;;  %v10095_v0 = vcombine.high %v240_v50, %v244_v52  ;;  %v104_v1 = vld [vmem:[%s15984_s1 + $0x250] sm:$0xff]  ;;  %v10094_v59 = vcombine.low %v240_v50, %v244_v52 }
 0x22a   :  { %7018 = vmatpush2.bf16.msra.mxu1 %v10134_v5  ;;  %v108_v45 = vld [vmem:[%s15984_s1 + $0x270] sm:$0xff]  ;;  %v9966_v5 = vcombine.low %v112_v48, %v116_v49 }
 0x22b   :  { %7019 = vmatprep.subr.bf16.mxu1 %v10127_v8  ;;  %v232_v2 = vld [vmem:[%s15984_s1 + $0x650] sm:$0xff]  ;;  %v9959_v8 = vcombine.high %v104_v1, %v108_v45 }
 0x22c   :  { %6979 = vmatpush2.bf16.msra.mxu0 %v9998_v16  ;;  %v236_v4 = vld [vmem:[%s15984_s1 + $0x670] sm:$0xff] }
 0x22d   :  { %6980 = vmatprep.subr.bf16.mxu0 %v9991_v53  ;;  %v10087_v11 = vcombine.high %v232_v2, %v236_v4  ;;  %v96_v12 = vld [vmem:[%s15984_s1 + $0x210] sm:$0xff]  ;;  %v10086_v53 = vcombine.low %v232_v2, %v236_v4 }
 0x22e   :  { %7020 = vmatpush2.bf16.msra.mxu1 %v10126_v17  ;;  %v100_v60 = vld [vmem:[%s15984_s1 + $0x230] sm:$0xff]  ;;  %v9958_v17 = vcombine.low %v104_v1, %v108_v45 }
 0x22f   :  { %7021 = vmatprep.subr.bf16.mxu1 %v10119_v19  ;;  %v224_v15 = vld [vmem:[%s15984_s1 + $0x610] sm:$0xff]  ;;  %v9951_v19 = vcombine.high %v96_v12, %v100_v60 }
 0x230   :  { %6981 = vmatpush2.bf16.msra.mxu0 %v9990_v28  ;;  %v228_v16 = vld [vmem:[%s15984_s1 + $0x630] sm:$0xff] }
 0x231   :  { %6982 = vmatprep.subr.bf16.mxu0 %v9983_v63  ;;  %v10079_v20 = vcombine.high %v224_v15, %v228_v16  ;;  %v344_v23 = vld [vmem:[%s15984_s1 + $0x9d0] sm:$0xff]  ;;  %v10078_v63 = vcombine.low %v224_v15, %v228_v16 }
 0x232   :  { %7022 = vmatpush2.bf16.msra.mxu1 %v10118_v7  ;;  %v348_v26 = vld [vmem:[%s15984_s1 + $0x9f0] sm:$0xff]  ;;  %v9950_v7 = vcombine.low %v96_v12, %v100_v60 }
 0x233   :  { %7023 = vmatprep.subr.bf16.mxu1 %v10111_v34  ;;  %v472_v27 = vld [vmem:[%s15984_s1 + $0xdd0] sm:$0xff]  ;;  %v10199_v34 = vcombine.high %v344_v23, %v348_v26 }
 0x234   :  { %6983 = vmatpush2.bf16.msra.mxu0 %v9982_v38  ;;  %v476_v28 = vld [vmem:[%s15984_s1 + $0xdf0] sm:$0xff] }
 0x235   :  { %6984 = vmatprep.subr.bf16.mxu0 %v9975_v42  ;;  %v10327_v33 = vcombine.high %v472_v27, %v476_v28  ;;  %v336_v18 = vld [vmem:[%s15984_s1 + $0x990] sm:$0xff]  ;;  %v10326_v42 = vcombine.low %v472_v27, %v476_v28 }
 0x236   :  { %7024 = vmatpush2.bf16.msra.mxu1 %v10110_v40  ;;  %v340_v36 = vld [vmem:[%s15984_s1 + $0x9b0] sm:$0xff]  ;;  %v10198_v40 = vcombine.low %v344_v23, %v348_v26 }
 0x237   :  { %7025 = vmatprep.subr.bf16.mxu1 %v10103_v46  ;;  %v464_v37 = vld [vmem:[%s15984_s1 + $0xd90] sm:$0xff]  ;;  %v10191_v46 = vcombine.high %v336_v18, %v340_v36 }
 0x238   :  { %6985 = vmatpush2.bf16.msra.mxu0 %v9974_v54  ;;  %v468_v38 = vld [vmem:[%s15984_s1 + $0xdb0] sm:$0xff] }
 0x239   :  { %6986 = vmatprep.subr.bf16.mxu0 %v9967_v62  ;;  %v10319_v48 = vcombine.high %v464_v37, %v468_v38  ;;  %v328_v49 = vld [vmem:[%s15984_s1 + $0x950] sm:$0xff]  ;;  %v10190_v62 = vcombine.low %v336_v18, %v340_v36  ;;  %v10318_v1 = vcombine.low %v464_v37, %v468_v38 }
 0x23a   :  { %7026 = vmatpush2.bf16.msra.mxu1 %v10102_v10  ;;  %v332_v50 = vld [vmem:[%s15984_s1 + $0x970] sm:$0xff] }
 0x23b   :  { %7027 = vmatprep.subr.bf16.mxu1 %v10095_v0  ;;  %v456_v52 = vld [vmem:[%s15984_s1 + $0xd50] sm:$0xff]  ;;  %v10183_v45 = vcombine.high %v328_v49, %v332_v50  ;;  %v10182_v16 = vcombine.low %v328_v49, %v332_v50 }
 0x23c   :  { %6987 = vmatpush2.bf16.msra.mxu0 %v9966_v5  ;;  %v460_v54 = vld [vmem:[%s15984_s1 + $0xd70] sm:$0xff] }
 0x23d   :  { %6988 = vmatprep.subr.bf16.mxu0 %v9959_v8  ;;  %v10311_v4 = vcombine.high %v456_v52, %v460_v54  ;;  %v320_v5 = vld [vmem:[%s15984_s1 + $0x910] sm:$0xff] }
 0x23e   :  { %7028 = vmatpush2.bf16.msra.mxu1 %v10094_v59  ;;  %v324_v59 = vld [vmem:[%s15984_s1 + $0x930] sm:$0xff] }
 0x23f   :  { %7029 = vmatprep.subr.bf16.mxu1 %v10087_v11  ;;  %v448_v11 = vld [vmem:[%s15984_s1 + $0xd10] sm:$0xff] }
 0x240   :  { %6989 = vmatpush2.bf16.msra.mxu0 %v9958_v17  ;;  %v452_v12 = vld [vmem:[%s15984_s1 + $0xd30] sm:$0xff] }
 0x241   :  { %6990 = vmatprep.subr.bf16.mxu0 %v9951_v19  ;;  %v10303_v23 = vcombine.high %v448_v11, %v452_v12  ;;  %v312_v26 = vld [vmem:[%s15984_s1 + $0x8d0] sm:$0xff]  ;;  %v10302_v18 = vcombine.low %v448_v11, %v452_v12 }
 0x242   :  { %7030 = vmatpush2.bf16.msra.mxu1 %v10086_v53  ;;  %v10175_v53 = vcombine.high %v320_v5, %v324_v59  ;;  %v316_v27 = vld [vmem:[%s15984_s1 + $0x8f0] sm:$0xff] }
 0x243   :  { %7031 = vmatprep.subr.bf16.mxu1 %v10079_v20  ;;  %v10167_v36 = vcombine.high %v312_v26, %v316_v27  ;;  %v304_v38 = vld [vmem:[%s15984_s1 + $0x890] sm:$0xff] }
 0x244   :  { %6991 = vmatpush2.bf16.msra.mxu0 %v9950_v7  ;;  %v440_v7 = vld [vmem:[%s15984_s1 + $0xcd0] sm:$0xff] }
 0x245   :  { %7042 = vmatprep.subr.bf16.mxu0 %v10199_v34  ;;  %v10174_v34 = vcombine.low %v320_v5, %v324_v59  ;;  %v288_v5 = vld [vmem:[%s15984_s1 + $0x810] sm:$0xff] }
 0x246   :  { %7032 = vmatpush2.bf16.msra.mxu1 %v10078_v63  ;;  %v444_v63 = vld [vmem:[%s15984_s1 + $0xcf0] sm:$0xff] }
 0x247   :  { %7083 = vmatprep.subr.bf16.mxu1 %v10327_v33  ;;  %6993 = vmatmul.mubr.bf16.vlgmr.msra.gmra.mxu0 %v11962_v22  ;;  %v10295_v37 = vcombine.high %v440_v7, %v444_v63  ;;  %v10294_v49 = vcombine.low %v440_v7, %v444_v63  ;;  %v292_v59 = vld [vmem:[%s15984_s1 + $0x830] sm:$0xff] }
 0x248   :  { %7043 = vmatpush1.bf16.msra.mxu0 %v10198_v40  ;;  %7074 = vmatprep.mubr.bf16.mxu0 %v11977_v29  ;;  %v308_v40 = vld [vmem:[%s15984_s1 + $0x8b0] sm:$0xff] }
 0x249   :  { %v6748_v10 = vpop.f32.mrf.mxu1  ;;  %7034 = vmatmul.mubr.bf16.vlgmr.msra.gmra.mxu1 %v11981_v30  ;;  %7044 = vmatprep.subr.bf16.mxu0 %v10191_v46  ;;  %v436_v46 = vld [vmem:[%s15984_s1 + $0xcb0] sm:$0xff]  ;;  %v10159_v50 = vcombine.high %v304_v38, %v308_v40 }
 0x24a   :  { %v6749_v0 = vadd.f32 %v6748_v10, %v13477_v41  ;;  %7084 = vmatpush1.bf16.msra.mxu1 %v10326_v42  ;;  %7115 = vmatprep.mubr.bf16.mxu1 %v11998_v39  ;;  %v432_v42 = vld [vmem:[%s15984_s1 + $0xc90] sm:$0xff] }
 0x24b   :  { %v6750_v2 = vpop.f32.mrf.mxu1  ;;  %7085 = vmatprep.subr.bf16.mxu1 %v10319_v48  ;;  %v6789_v41 = vpop.f32.mrf.mxu0  ;;  %v10166_v48 = vcombine.low %v312_v26, %v316_v27  ;;  %v300_v10 = vld [vmem:[%s15984_s1 + $0x870] sm:$0xff] }
 0x24c   :  { %v6751_v8 = vadd.f32 %v6750_v2, %v13479_v51  ;;  %v13679_v15 = vadd.f32 %v6789_v41, %v6749_v0  ;;  %7045 = vmatpush1.bf16.msra.mxu0 %v10190_v62  ;;  %v10310_v51 = vcombine.low %v456_v52, %v460_v54  ;;  %v10287_v52 = vcombine.high %v432_v42, %v436_v46  ;;  %v296_v54 = vld [vmem:[%s15984_s1 + $0x850] sm:$0xff] }
 0x24d   :  { %v6752_v60 = vpop.f32.mrf.mxu1  ;;  %v6791_v17 = vpop.f32.mrf.mxu0  ;;  %7046 = vmatprep.subr.bf16.mxu0 %v10183_v45  ;;  %v424_v62 = vld [vmem:[%s15984_s1 + $0xc50] sm:$0xff]  ;;  %v10286_v45 = vcombine.low %v432_v42, %v436_v46  ;;  %v10151_v2 = vcombine.high %v296_v54, %v300_v10  ;;  %v10150_v11 = vcombine.low %v296_v54, %v300_v10 }
 0x24e   :  { %7086 = vmatpush1.bf16.msra.mxu1 %v10318_v1  ;;  %v13681_v20 = vadd.f32 %v6791_v17, %v6751_v8  ;;  %v428_v0 = vld [vmem:[%s15984_s1 + $0xc70] sm:$0xff]  ;;  %v10158_v1 = vcombine.low %v304_v38, %v308_v40  ;;  %v10143_v60 = vcombine.high %v288_v5, %v292_v59 }
 0x24f   :  { %v6753_v19 = vpop.f32.mrf.mxu1  ;;  %7087 = vmatprep.subr.bf16.mxu1 %v10311_v4  ;;  %v6793_v28 = vpop.f32.mrf.mxu0  ;;  %v10279_v4 = vcombine.high %v424_v62, %v428_v0  ;;  %v416_v8 = vld [vmem:[%s15984_s1 + $0xc10] sm:$0xff]  ;;  %v10278_v12 = vcombine.low %v424_v62, %v428_v0 }
 0x250   :  { %7047 = vmatpush1.bf16.msra.mxu0 %v10182_v16  ;;  %v420_v41 = vld [vmem:[%s15984_s1 + $0xc30] sm:$0xff] }
 0x251   :  { %v6794_v33 = vpop.f32.mrf.mxu0  ;;  %7048 = vmatprep.subr.bf16.mxu0 %v10175_v53  ;;  %v10271_v16 = vcombine.high %v416_v8, %v420_v41  ;;  %v408_v17 = vld [vmem:[%s15984_s1 + $0xbd0] sm:$0xff]  ;;  %v10270_v26 = vcombine.low %v416_v8, %v420_v41 }
 0x252   :  { %7088 = vmatpush1.bf16.msra.mxu1 %v10310_v51  ;;  %v412_v51 = vld [vmem:[%s15984_s1 + $0xbf0] sm:$0xff] }
 0x253   :  { %7089 = vmatprep.subr.bf16.mxu1 %v10303_v23  ;;  %v536_v53 = vld [vmem:[%s15984_s1 + $0xfd0] sm:$0xff]  ;;  %v10142_v23 = vcombine.low %v288_v5, %v292_v59  ;;  %v10263_v27 = vcombine.high %v408_v17, %v412_v51 }
 0x254   :  { %7049 = vmatpush1.bf16.msra.mxu0 %v10174_v34  ;;  %v540_v19 = vld [vmem:[%s15984_s1 + $0xff0] sm:$0xff] }
 0x255   :  { %7050 = vmatprep.subr.bf16.mxu0 %v10167_v36  ;;  %v10391_v28 = vcombine.high %v536_v53, %v540_v19  ;;  %v400_v7 = vld [vmem:[%s15984_s1 + $0xb90] sm:$0xff]  ;;  %v10390_v36 = vcombine.low %v536_v53, %v540_v19 }
 0x256   :  { %7090 = vmatpush1.bf16.msra.mxu1 %v10302_v18  ;;  %v404_v63 = vld [vmem:[%s15984_s1 + $0xbb0] sm:$0xff]  ;;  %v10262_v18 = vcombine.low %v408_v17, %v412_v51 }
 0x257   :  { %7091 = vmatprep.subr.bf16.mxu1 %v10295_v37  ;;  %v528_v34 = vld [vmem:[%s15984_s1 + $0xf90] sm:$0xff]  ;;  %v10255_v37 = vcombine.high %v400_v7, %v404_v63 }
 0x258   :  { %7051 = vmatpush1.bf16.msra.mxu0 %v10166_v48  ;;  %v532_v33 = vld [vmem:[%s15984_s1 + $0xfb0] sm:$0xff] }
 0x259   :  { %7052 = vmatprep.subr.bf16.mxu0 %v10159_v50  ;;  %v10383_v38 = vcombine.high %v528_v34, %v532_v33  ;;  %v392_v40 = vld [vmem:[%s15984_s1 + $0xb50] sm:$0xff]  ;;  %v10382_v50 = vcombine.low %v528_v34, %v532_v33 }
 0x25a   :  { %7092 = vmatpush1.bf16.msra.mxu1 %v10294_v49  ;;  %v396_v42 = vld [vmem:[%s15984_s1 + $0xb70] sm:$0xff]  ;;  %v10254_v49 = vcombine.low %v400_v7, %v404_v63 }
 0x25b   :  { %7093 = vmatprep.subr.bf16.mxu1 %v10287_v52  ;;  %v520_v46 = vld [vmem:[%s15984_s1 + $0xf50] sm:$0xff]  ;;  %v10247_v52 = vcombine.high %v392_v40, %v396_v42 }
 0x25c   :  { %7053 = vmatpush1.bf16.msra.mxu0 %v10158_v1  ;;  %v524_v48 = vld [vmem:[%s15984_s1 + $0xf70] sm:$0xff] }
 0x25d   :  { %7054 = vmatprep.subr.bf16.mxu0 %v10151_v2  ;;  %v10375_v54 = vcombine.high %v520_v46, %v524_v48  ;;  %v384_v10 = vld [vmem:[%s15984_s1 + $0xb10] sm:$0xff]  ;;  %v10374_v2 = vcombine.low %v520_v46, %v524_v48 }
 0x25e   :  { %7094 = vmatpush1.bf16.msra.mxu1 %v10286_v45  ;;  %v388_v62 = vld [vmem:[%s15984_s1 + $0xb30] sm:$0xff]  ;;  %v10246_v45 = vcombine.low %v392_v40, %v396_v42 }
 0x25f   :  { %7095 = vmatprep.subr.bf16.mxu1 %v10279_v4  ;;  %v512_v0 = vld [vmem:[%s15984_s1 + $0xf10] sm:$0xff]  ;;  %v10239_v4 = vcombine.high %v384_v10, %v388_v62 }
 0x260   :  { %7055 = vmatpush1.bf16.msra.mxu0 %v10150_v11  ;;  %v516_v1 = vld [vmem:[%s15984_s1 + $0xf30] sm:$0xff] }
 0x261   :  { %7056 = vmatprep.subr.bf16.mxu0 %v10143_v60  ;;  %v10367_v5 = vcombine.high %v512_v0, %v516_v1  ;;  %v376_v59 = vld [vmem:[%s15984_s1 + $0xad0] sm:$0xff]  ;;  %v10366_v60 = vcombine.low %v512_v0, %v516_v1 }
 0x262   :  { %7096 = vmatpush1.bf16.msra.mxu1 %v10278_v12  ;;  %v380_v8 = vld [vmem:[%s15984_s1 + $0xaf0] sm:$0xff]  ;;  %v10238_v12 = vcombine.low %v384_v10, %v388_v62 }
 0x263   :  { %7097 = vmatprep.subr.bf16.mxu1 %v10271_v16  ;;  %v504_v41 = vld [vmem:[%s15984_s1 + $0xed0] sm:$0xff]  ;;  %v10231_v16 = vcombine.high %v376_v59, %v380_v8 }
 0x264   :  { %7057 = vmatpush1.bf16.msra.mxu0 %v10142_v23  ;;  %v508_v11 = vld [vmem:[%s15984_s1 + $0xef0] sm:$0xff] }
 0x265   :  { %7058 = vmatprep.subr.bf16.mxu0 %v10263_v27  ;;  %v10359_v17 = vcombine.high %v504_v41, %v508_v11  ;;  %v368_v51 = vld [vmem:[%s15984_s1 + $0xa90] sm:$0xff]  ;;  %v10358_v27 = vcombine.low %v504_v41, %v508_v11 }
 0x266   :  { %7098 = vmatpush1.bf16.msra.mxu1 %v10270_v26  ;;  %v372_v53 = vld [vmem:[%s15984_s1 + $0xab0] sm:$0xff]  ;;  %v10230_v26 = vcombine.low %v376_v59, %v380_v8 }
 0x267   :  { %7099 = vmatprep.subr.bf16.mxu1 %v10391_v28  ;;  %v496_v19 = vld [vmem:[%s15984_s1 + $0xe90] sm:$0xff]  ;;  %v10223_v28 = vcombine.high %v368_v51, %v372_v53 }
 0x268   :  { %7059 = vmatpush2.bf16.msra.mxu0 %v10262_v18  ;;  %v500_v23 = vld [vmem:[%s15984_s1 + $0xeb0] sm:$0xff] }
 0x269   :  { %7060 = vmatprep.subr.bf16.mxu0 %v10255_v37  ;;  %v10351_v7 = vcombine.high %v496_v19, %v500_v23  ;;  %v360_v63 = vld [vmem:[%s15984_s1 + $0xa50] sm:$0xff]  ;;  %v10350_v37 = vcombine.low %v496_v19, %v500_v23 }
 0x26a   :  { %7100 = vmatpush2.bf16.msra.mxu1 %v10390_v36  ;;  %v364_v34 = vld [vmem:[%s15984_s1 + $0xa70] sm:$0xff]  ;;  %v10222_v36 = vcombine.low %v368_v51, %v372_v53 }
 0x26b   :  { %7101 = vmatprep.subr.bf16.mxu1 %v10383_v38  ;;  %v488_v33 = vld [vmem:[%s15984_s1 + $0xe50] sm:$0xff]  ;;  %v10215_v38 = vcombine.high %v360_v63, %v364_v34 }
 0x26c   :  { %7061 = vmatpush2.bf16.msra.mxu0 %v10254_v49  ;;  %v492_v18 = vld [vmem:[%s15984_s1 + $0xe70] sm:$0xff] }
 0x26d   :  { %7062 = vmatprep.subr.bf16.mxu0 %v10247_v52  ;;  %v10343_v40 = vcombine.high %v488_v33, %v492_v18  ;;  %v352_v42 = vld [vmem:[%s15984_s1 + $0xa10] sm:$0xff]  ;;  %v10342_v52 = vcombine.low %v488_v33, %v492_v18 }
 0x26e   :  { %7102 = vmatpush2.bf16.msra.mxu1 %v10382_v50  ;;  %v356_v46 = vld [vmem:[%s15984_s1 + $0xa30] sm:$0xff]  ;;  %v10214_v50 = vcombine.low %v360_v63, %v364_v34 }
 0x26f   :  { %7103 = vmatprep.subr.bf16.mxu1 %v10375_v54  ;;  %v480_v48 = vld [vmem:[%s15984_s1 + $0xe10] sm:$0xff]  ;;  %v10207_v54 = vcombine.high %v352_v42, %v356_v46 }
 0x270   :  { %7063 = vmatpush2.bf16.msra.mxu0 %v10246_v45  ;;  %v484_v49 = vld [vmem:[%s15984_s1 + $0xe30] sm:$0xff] }
 0x271   :  { %7064 = vmatprep.subr.bf16.mxu0 %v10239_v4  ;;  %v10335_v10 = vcombine.high %v480_v48, %v484_v49  ;;  %v600_v62 = vld [vmem:[%s15984_s1 + $0x11d0] sm:$0xff]  ;;  %v10334_v4 = vcombine.low %v480_v48, %v484_v49 }
 0x272   :  { %7104 = vmatpush2.bf16.msra.mxu1 %v10374_v2  ;;  %v604_v0 = vld [vmem:[%s15984_s1 + $0x11f0] sm:$0xff]  ;;  %v10206_v2 = vcombine.low %v352_v42, %v356_v46 }
 0x273   :  { %7105 = vmatprep.subr.bf16.mxu1 %v10367_v5  ;;  %v728_v1 = vld [vmem:[%s15984_s1 + $0x15d0] sm:$0xff]  ;;  %v10455_v5 = vcombine.high %v600_v62, %v604_v0 }
 0x274   :  { %7065 = vmatpush2.bf16.msra.mxu0 %v10238_v12  ;;  %v732_v45 = vld [vmem:[%s15984_s1 + $0x15f0] sm:$0xff] }
 0x275   :  { %7066 = vmatprep.subr.bf16.mxu0 %v10231_v16  ;;  %v10583_v59 = vcombine.high %v728_v1, %v732_v45  ;;  %v592_v8 = vld [vmem:[%s15984_s1 + $0x1190] sm:$0xff]  ;;  %v10582_v16 = vcombine.low %v728_v1, %v732_v45 }
 0x276   :  { %7106 = vmatpush2.bf16.msra.mxu1 %v10366_v60  ;;  %v596_v41 = vld [vmem:[%s15984_s1 + $0x11b0] sm:$0xff]  ;;  %v10454_v60 = vcombine.low %v600_v62, %v604_v0 }
 0x277   :  { %7107 = vmatprep.subr.bf16.mxu1 %v10359_v17  ;;  %v720_v11 = vld [vmem:[%s15984_s1 + $0x1590] sm:$0xff]  ;;  %v10447_v17 = vcombine.high %v592_v8, %v596_v41 }
 0x278   :  { %7067 = vmatpush2.bf16.msra.mxu0 %v10230_v26  ;;  %v724_v12 = vld [vmem:[%s15984_s1 + $0x15b0] sm:$0xff] }
 0x279   :  { %7068 = vmatprep.subr.bf16.mxu0 %v10223_v28  ;;  %v10575_v51 = vcombine.high %v720_v11, %v724_v12  ;;  %v584_v53 = vld [vmem:[%s15984_s1 + $0x1150] sm:$0xff]  ;;  %v10446_v28 = vcombine.low %v592_v8, %v596_v41  ;;  %v10574_v63 = vcombine.low %v720_v11, %v724_v12 }
 0x27a   :  { %7108 = vmatpush2.bf16.msra.mxu1 %v10358_v27  ;;  %v588_v19 = vld [vmem:[%s15984_s1 + $0x1170] sm:$0xff] }
 0x27b   :  { %7109 = vmatprep.subr.bf16.mxu1 %v10351_v7  ;;  %v712_v23 = vld [vmem:[%s15984_s1 + $0x1550] sm:$0xff]  ;;  %v10439_v34 = vcombine.high %v584_v53, %v588_v19  ;;  %v10438_v49 = vcombine.low %v584_v53, %v588_v19 }
 0x27c   :  { %7069 = vmatpush2.bf16.msra.mxu0 %v10222_v36  ;;  %v716_v26 = vld [vmem:[%s15984_s1 + $0x1570] sm:$0xff] }
 0x27d   :  { %7070 = vmatprep.subr.bf16.mxu0 %v10215_v38  ;;  %v10567_v18 = vcombine.high %v712_v23, %v716_v26  ;;  %v576_v36 = vld [vmem:[%s15984_s1 + $0x1110] sm:$0xff] }
 0x27e   :  { %7110 = vmatpush2.bf16.msra.mxu1 %v10350_v37  ;;  %v580_v37 = vld [vmem:[%s15984_s1 + $0x1130] sm:$0xff] }
 0x27f   :  { %7111 = vmatprep.subr.bf16.mxu1 %v10343_v40  ;;  %v704_v40 = vld [vmem:[%s15984_s1 + $0x1510] sm:$0xff] }
 0x280   :  { %7071 = vmatpush2.bf16.msra.mxu0 %v10214_v50  ;;  %v708_v42 = vld [vmem:[%s15984_s1 + $0x1530] sm:$0xff] }
 0x281   :  { %7072 = vmatprep.subr.bf16.mxu0 %v10207_v54  ;;  %v10559_v62 = vcombine.high %v704_v40, %v708_v42  ;;  %v568_v0 = vld [vmem:[%s15984_s1 + $0x10d0] sm:$0xff]  ;;  %v10558_v8 = vcombine.low %v704_v40, %v708_v42 }
 0x282   :  { %7112 = vmatpush2.bf16.msra.mxu1 %v10342_v52  ;;  %v10431_v52 = vcombine.high %v576_v36, %v580_v37  ;;  %v572_v1 = vld [vmem:[%s15984_s1 + $0x10f0] sm:$0xff] }
 0x283   :  { %7113 = vmatprep.subr.bf16.mxu1 %v10335_v10  ;;  %v10423_v41 = vcombine.high %v568_v0, %v572_v1  ;;  %v560_v12 = vld [vmem:[%s15984_s1 + $0x1090] sm:$0xff] }
 0x284   :  { %7073 = vmatpush2.bf16.msra.mxu0 %v10206_v2  ;;  %v696_v2 = vld [vmem:[%s15984_s1 + $0x14d0] sm:$0xff] }
 0x285   :  { %7124 = vmatprep.subr.bf16.mxu0 %v10455_v5  ;;  %v10430_v5 = vcombine.low %v576_v36, %v580_v37  ;;  %v544_v36 = vld [vmem:[%s15984_s1 + $0x1010] sm:$0xff] }
 0x286   :  { %7114 = vmatpush2.bf16.msra.mxu1 %v10334_v4  ;;  %v700_v4 = vld [vmem:[%s15984_s1 + $0x14f0] sm:$0xff] }
 0x287   :  { %7165 = vmatprep.subr.bf16.mxu1 %v10583_v59  ;;  %7075 = vmatmul.mubr.bf16.vlgmr.msra.gmra.mxu0 %v12184_v47  ;;  %v10551_v11 = vcombine.high %v696_v2, %v700_v4  ;;  %v10550_v53 = vcombine.low %v696_v2, %v700_v4  ;;  %v548_v37 = vld [vmem:[%s15984_s1 + $0x1030] sm:$0xff] }
 0x288   :  { %7125 = vmatpush1.bf16.msra.mxu0 %v10454_v60  ;;  %7156 = vmatprep.mubr.bf16.mxu0 %v12199_v55  ;;  %v564_v60 = vld [vmem:[%s15984_s1 + $0x10b0] sm:$0xff] }
 0x289   :  { %v6830_v27 = vpop.f32.mrf.mxu1  ;;  %7116 = vmatmul.mubr.bf16.vlgmr.msra.gmra.mxu1 %v12203_v56  ;;  %7126 = vmatprep.subr.bf16.mxu0 %v10447_v17  ;;  %v692_v17 = vld [vmem:[%s15984_s1 + $0x14b0] sm:$0xff]  ;;  %v10415_v19 = vcombine.high %v560_v12, %v564_v60 }
 0x28a   :  { %v6831_v7 = vadd.f32 %v6830_v27, %v13679_v15  ;;  %7166 = vmatpush1.bf16.msra.mxu1 %v10582_v16  ;;  %7197 = vmatprep.mubr.bf16.mxu1 %v12220_v3  ;;  %v688_v16 = vld [vmem:[%s15984_s1 + $0x1490] sm:$0xff] }
 0x28b   :  { %v6832_v33 = vpop.f32.mrf.mxu1  ;;  %7167 = vmatprep.subr.bf16.mxu1 %v10575_v51  ;;  %v6871_v15 = vpop.f32.mrf.mxu0  ;;  %v10422_v51 = vcombine.low %v568_v0, %v572_v1  ;;  %v556_v27 = vld [vmem:[%s15984_s1 + $0x1070] sm:$0xff] }
 0x28c   :  { %v6833_v38 = vadd.f32 %v6832_v33, %v13681_v20  ;;  %v13881_v48 = vadd.f32 %v6871_v15, %v6831_v7  ;;  %7127 = vmatpush1.bf16.msra.mxu0 %v10446_v28  ;;  %v10566_v20 = vcombine.low %v712_v23, %v716_v26  ;;  %v10543_v23 = vcombine.high %v688_v16, %v692_v17  ;;  %v552_v26 = vld [vmem:[%s15984_s1 + $0x1050] sm:$0xff] }
 0x28d   :  { %v6834_v46 = vpop.f32.mrf.mxu1  ;;  %v6873_v50 = vpop.f32.mrf.mxu0  ;;  %7128 = vmatprep.subr.bf16.mxu0 %v10439_v34  ;;  %v680_v28 = vld [vmem:[%s15984_s1 + $0x1450] sm:$0xff]  ;;  %v10542_v34 = vcombine.low %v688_v16, %v692_v17  ;;  %v10407_v33 = vcombine.high %v552_v26, %v556_v27  ;;  %v10406_v40 = vcombine.low %v552_v26, %v556_v27 }
 0x28e   :  { %7168 = vmatpush1.bf16.msra.mxu1 %v10574_v63  ;;  %v13883_v10 = vadd.f32 %v6873_v50, %v6833_v38  ;;  %v684_v7 = vld [vmem:[%s15984_s1 + $0x1470] sm:$0xff]  ;;  %v10414_v63 = vcombine.low %v560_v12, %v564_v60  ;;  %v10399_v46 = vcombine.high %v544_v36, %v548_v37 }
 0x28f   :  { %v6835_v54 = vpop.f32.mrf.mxu1  ;;  %7169 = vmatprep.subr.bf16.mxu1 %v10567_v18  ;;  %v6875_v45 = vpop.f32.mrf.mxu0  ;;  %v10535_v18 = vcombine.high %v680_v28, %v684_v7  ;;  %v672_v38 = vld [vmem:[%s15984_s1 + $0x1410] sm:$0xff]  ;;  %v10534_v42 = vcombine.low %v680_v28, %v684_v7 }
 0x290   :  { %7129 = vmatpush1.bf16.msra.mxu0 %v10438_v49  ;;  %v676_v15 = vld [vmem:[%s15984_s1 + $0x1430] sm:$0xff] }
 0x291   :  { %v6876_v59 = vpop.f32.mrf.mxu0  ;;  %7130 = vmatprep.subr.bf16.mxu0 %v10431_v52  ;;  %v10527_v49 = vcombine.high %v672_v38, %v676_v15  ;;  %v664_v50 = vld [vmem:[%s15984_s1 + $0x13d0] sm:$0xff]  ;;  %v10526_v0 = vcombine.low %v672_v38, %v676_v15 }
 0x292   :  { %7170 = vmatpush1.bf16.msra.mxu1 %v10566_v20  ;;  %v668_v20 = vld [vmem:[%s15984_s1 + $0x13f0] sm:$0xff] }
 0x293   :  { %7171 = vmatprep.subr.bf16.mxu1 %v10559_v62  ;;  %v792_v52 = vld [vmem:[%s15984_s1 + $0x17d0] sm:$0xff]  ;;  %v10398_v62 = vcombine.low %v544_v36, %v548_v37  ;;  %v10519_v1 = vcombine.high %v664_v50, %v668_v20 }
 0x294   :  { %7131 = vmatpush1.bf16.msra.mxu0 %v10430_v5  ;;  %v796_v54 = vld [vmem:[%s15984_s1 + $0x17f0] sm:$0xff] }
 0x295   :  { %7132 = vmatprep.subr.bf16.mxu0 %v10423_v41  ;;  %v10647_v45 = vcombine.high %v792_v52, %v796_v54  ;;  %v656_v2 = vld [vmem:[%s15984_s1 + $0x1390] sm:$0xff]  ;;  %v10646_v41 = vcombine.low %v792_v52, %v796_v54 }
 0x296   :  { %7172 = vmatpush1.bf16.msra.mxu1 %v10558_v8  ;;  %v660_v4 = vld [vmem:[%s15984_s1 + $0x13b0] sm:$0xff]  ;;  %v10518_v8 = vcombine.low %v664_v50, %v668_v20 }
 0x297   :  { %7173 = vmatprep.subr.bf16.mxu1 %v10551_v11  ;;  %v784_v5 = vld [vmem:[%s15984_s1 + $0x1790] sm:$0xff]  ;;  %v10511_v11 = vcombine.high %v656_v2, %v660_v4 }
 0x298   :  { %7133 = vmatpush1.bf16.msra.mxu0 %v10422_v51  ;;  %v788_v59 = vld [vmem:[%s15984_s1 + $0x17b0] sm:$0xff] }
 0x299   :  { %7134 = vmatprep.subr.bf16.mxu0 %v10415_v19  ;;  %v10639_v12 = vcombine.high %v784_v5, %v788_v59  ;;  %v648_v60 = vld [vmem:[%s15984_s1 + $0x1350] sm:$0xff]  ;;  %v10638_v19 = vcombine.low %v784_v5, %v788_v59 }
 0x29a   :  { %7174 = vmatpush1.bf16.msra.mxu1 %v10550_v53  ;;  %v652_v16 = vld [vmem:[%s15984_s1 + $0x1370] sm:$0xff]  ;;  %v10510_v53 = vcombine.low %v656_v2, %v660_v4 }
 0x29b   :  { %7175 = vmatprep.subr.bf16.mxu1 %v10543_v23  ;;  %v776_v17 = vld [vmem:[%s15984_s1 + $0x1750] sm:$0xff]  ;;  %v10503_v23 = vcombine.high %v648_v60, %v652_v16 }
 0x29c   :  { %7135 = vmatpush1.bf16.msra.mxu0 %v10414_v63  ;;  %v780_v51 = vld [vmem:[%s15984_s1 + $0x1770] sm:$0xff] }
 0x29d   :  { %7136 = vmatprep.subr.bf16.mxu0 %v10407_v33  ;;  %v10631_v26 = vcombine.high %v776_v17, %v780_v51  ;;  %v640_v27 = vld [vmem:[%s15984_s1 + $0x1310] sm:$0xff]  ;;  %v10630_v33 = vcombine.low %v776_v17, %v780_v51 }
 0x29e   :  { %7176 = vmatpush1.bf16.msra.mxu1 %v10542_v34  ;;  %v644_v28 = vld [vmem:[%s15984_s1 + $0x1330] sm:$0xff]  ;;  %v10502_v34 = vcombine.low %v648_v60, %v652_v16 }
 0x29f   :  { %7177 = vmatprep.subr.bf16.mxu1 %v10535_v18  ;;  %v768_v7 = vld [vmem:[%s15984_s1 + $0x1710] sm:$0xff]  ;;  %v10495_v18 = vcombine.high %v640_v27, %v644_v28 }
 0x2a0   :  { %7137 = vmatpush1.bf16.msra.mxu0 %v10406_v40  ;;  %v772_v63 = vld [vmem:[%s15984_s1 + $0x1730] sm:$0xff] }
 0x2a1   :  { %7138 = vmatprep.subr.bf16.mxu0 %v10399_v46  ;;  %v10623_v36 = vcombine.high %v768_v7, %v772_v63  ;;  %v632_v37 = vld [vmem:[%s15984_s1 + $0x12d0] sm:$0xff]  ;;  %v10622_v46 = vcombine.low %v768_v7, %v772_v63 }
 0x2a2   :  { %7178 = vmatpush1.bf16.msra.mxu1 %v10534_v42  ;;  %v636_v38 = vld [vmem:[%s15984_s1 + $0x12f0] sm:$0xff]  ;;  %v10494_v42 = vcombine.low %v640_v27, %v644_v28 }
 0x2a3   :  { %7179 = vmatprep.subr.bf16.mxu1 %v10527_v49  ;;  %v760_v15 = vld [vmem:[%s15984_s1 + $0x16d0] sm:$0xff]  ;;  %v10487_v49 = vcombine.high %v632_v37, %v636_v38 }
 0x2a4   :  { %7139 = vmatpush1.bf16.msra.mxu0 %v10398_v62  ;;  %v764_v40 = vld [vmem:[%s15984_s1 + $0x16f0] sm:$0xff] }
 0x2a5   :  { %7140 = vmatprep.subr.bf16.mxu0 %v10519_v1  ;;  %v10615_v50 = vcombine.high %v760_v15, %v764_v40  ;;  %v624_v20 = vld [vmem:[%s15984_s1 + $0x1290] sm:$0xff]  ;;  %v10614_v1 = vcombine.low %v760_v15, %v764_v40 }
 0x2a6   :  { %7180 = vmatpush1.bf16.msra.mxu1 %v10526_v0  ;;  %v628_v52 = vld [vmem:[%s15984_s1 + $0x12b0] sm:$0xff]  ;;  %v10486_v0 = vcombine.low %v632_v37, %v636_v38 }
 0x2a7   :  { %7181 = vmatprep.subr.bf16.mxu1 %v10647_v45  ;;  %v752_v54 = vld [vmem:[%s15984_s1 + $0x1690] sm:$0xff]  ;;  %v10479_v45 = vcombine.high %v624_v20, %v628_v52 }
 0x2a8   :  { %7141 = vmatpush2.bf16.msra.mxu0 %v10518_v8  ;;  %v756_v62 = vld [vmem:[%s15984_s1 + $0x16b0] sm:$0xff] }
 0x2a9   :  { %7142 = vmatprep.subr.bf16.mxu0 %v10511_v11  ;;  %v10607_v2 = vcombine.high %v752_v54, %v756_v62  ;;  %v616_v4 = vld [vmem:[%s15984_s1 + $0x1250] sm:$0xff]  ;;  %v10606_v11 = vcombine.low %v752_v54, %v756_v62 }
 0x2aa   :  { %7182 = vmatpush2.bf16.msra.mxu1 %v10646_v41  ;;  %v620_v5 = vld [vmem:[%s15984_s1 + $0x1270] sm:$0xff]  ;;  %v10478_v41 = vcombine.low %v624_v20, %v628_v52 }
 0x2ab   :  { %7183 = vmatprep.subr.bf16.mxu1 %v10639_v12  ;;  %v744_v59 = vld [vmem:[%s15984_s1 + $0x1650] sm:$0xff]  ;;  %v10471_v12 = vcombine.high %v616_v4, %v620_v5 }
 0x2ac   :  { %7143 = vmatpush2.bf16.msra.mxu0 %v10510_v53  ;;  %v748_v8 = vld [vmem:[%s15984_s1 + $0x1670] sm:$0xff] }
 0x2ad   :  { %7144 = vmatprep.subr.bf16.mxu0 %v10503_v23  ;;  %v10599_v60 = vcombine.high %v744_v59, %v748_v8  ;;  %v608_v16 = vld [vmem:[%s15984_s1 + $0x1210] sm:$0xff]  ;;  %v10598_v23 = vcombine.low %v744_v59, %v748_v8 }
 0x2ae   :  { %7184 = vmatpush2.bf16.msra.mxu1 %v10638_v19  ;;  %v612_v17 = vld [vmem:[%s15984_s1 + $0x1230] sm:$0xff]  ;;  %v10470_v19 = vcombine.low %v616_v4, %v620_v5 }
 0x2af   :  { %7185 = vmatprep.subr.bf16.mxu1 %v10631_v26  ;;  %v736_v51 = vld [vmem:[%s15984_s1 + $0x1610] sm:$0xff]  ;;  %v10463_v26 = vcombine.high %v608_v16, %v612_v17 }
 0x2b0   :  { %7145 = vmatpush2.bf16.msra.mxu0 %v10502_v34  ;;  %v740_v53 = vld [vmem:[%s15984_s1 + $0x1630] sm:$0xff] }
 0x2b1   :  { %7146 = vmatprep.subr.bf16.mxu0 %v10495_v18  ;;  %v10591_v27 = vcombine.high %v736_v51, %v740_v53  ;;  %v856_v28 = vld [vmem:[%s15984_s1 + $0x19d0] sm:$0xff]  ;;  %v10590_v18 = vcombine.low %v736_v51, %v740_v53 }
 0x2b2   :  { %7186 = vmatpush2.bf16.msra.mxu1 %v10630_v33  ;;  %v860_v7 = vld [vmem:[%s15984_s1 + $0x19f0] sm:$0xff]  ;;  %v10462_v33 = vcombine.low %v608_v16, %v612_v17 }
 0x2b3   :  { %7187 = vmatprep.subr.bf16.mxu1 %v10623_v36  ;;  %v984_v63 = vld [vmem:[%s15984_s1 + $0x1dd0] sm:$0xff]  ;;  %v10711_v36 = vcombine.high %v856_v28, %v860_v7 }
 0x2b4   :  { %7147 = vmatpush2.bf16.msra.mxu0 %v10494_v42  ;;  %v988_v34 = vld [vmem:[%s15984_s1 + $0x1df0] sm:$0xff] }
 0x2b5   :  { %7148 = vmatprep.subr.bf16.mxu0 %v10487_v49  ;;  %v10839_v37 = vcombine.high %v984_v63, %v988_v34  ;;  %v848_v38 = vld [vmem:[%s15984_s1 + $0x1990] sm:$0xff]  ;;  %v10838_v49 = vcombine.low %v984_v63, %v988_v34 }
 0x2b6   :  { %7188 = vmatpush2.bf16.msra.mxu1 %v10622_v46  ;;  %v852_v15 = vld [vmem:[%s15984_s1 + $0x19b0] sm:$0xff]  ;;  %v10710_v46 = vcombine.low %v856_v28, %v860_v7 }
 0x2b7   :  { %7189 = vmatprep.subr.bf16.mxu1 %v10615_v50  ;;  %v976_v40 = vld [vmem:[%s15984_s1 + $0x1d90] sm:$0xff]  ;;  %v10703_v50 = vcombine.high %v848_v38, %v852_v15 }
 0x2b8   :  { %7149 = vmatpush2.bf16.msra.mxu0 %v10486_v0  ;;  %v980_v42 = vld [vmem:[%s15984_s1 + $0x1db0] sm:$0xff] }
 0x2b9   :  { %7150 = vmatprep.subr.bf16.mxu0 %v10479_v45  ;;  %v10831_v20 = vcombine.high %v976_v40, %v980_v42  ;;  %v840_v52 = vld [vmem:[%s15984_s1 + $0x1950] sm:$0xff]  ;;  %v10830_v59 = vcombine.low %v976_v40, %v980_v42 }
 0x2ba   :  { %7190 = vmatpush2.bf16.msra.mxu1 %v10614_v1  ;;  %v844_v54 = vld [vmem:[%s15984_s1 + $0x1970] sm:$0xff] }
 0x2bb   :  { %7191 = vmatprep.subr.bf16.mxu1 %v10607_v2  ;;  %v968_v0 = vld [vmem:[%s15984_s1 + $0x1d50] sm:$0xff]  ;;  %v10702_v2 = vcombine.low %v848_v38, %v852_v15  ;;  %v10695_v8 = vcombine.high %v840_v52, %v844_v54 }
 0x2bc   :  { %7151 = vmatpush2.bf16.msra.mxu0 %v10478_v41  ;;  %v972_v1 = vld [vmem:[%s15984_s1 + $0x1d70] sm:$0xff] }
 0x2bd   :  { %7152 = vmatprep.subr.bf16.mxu0 %v10471_v12  ;;  %v832_v12 = vld [vmem:[%s15984_s1 + $0x1910] sm:$0xff] }
 0x2be   :  { %7192 = vmatpush2.bf16.msra.mxu1 %v10606_v11  ;;  %v10823_v11 = vcombine.high %v968_v0, %v972_v1  ;;  %v960_v51 = vld [vmem:[%s15984_s1 + $0x1d10] sm:$0xff] }
 0x2bf   :  { %7193 = vmatprep.subr.bf16.mxu1 %v10599_v60  ;;  %v836_v60 = vld [vmem:[%s15984_s1 + $0x1930] sm:$0xff] }
 0x2c0   :  { %7153 = vmatpush2.bf16.msra.mxu0 %v10470_v19  ;;  %v964_v53 = vld [vmem:[%s15984_s1 + $0x1d30] sm:$0xff]  ;;  %v10687_v28 = vcombine.high %v832_v12, %v836_v60 }
 0x2c1   :  { %7154 = vmatprep.subr.bf16.mxu0 %v10463_v26  ;;  %v10815_v63 = vcombine.high %v960_v51, %v964_v53  ;;  %v824_v34 = vld [vmem:[%s15984_s1 + $0x18d0] sm:$0xff]  ;;  %v10814_v38 = vcombine.low %v960_v51, %v964_v53 }
 0x2c2   :  { %7194 = vmatpush2.bf16.msra.mxu1 %v10598_v23  ;;  %v10694_v23 = vcombine.low %v840_v52, %v844_v54  ;;  %v816_v42 = vld [vmem:[%s15984_s1 + $0x1890] sm:$0xff] }
 0x2c3   :  { %7195 = vmatprep.subr.bf16.mxu1 %v10591_v27 }
 0x2c4   :  { %7155 = vmatpush2.bf16.msra.mxu0 %v10462_v33  ;;  %v828_v33 = vld [vmem:[%s15984_s1 + $0x18f0] sm:$0xff] }
 0x2c5   :  { %7206 = vmatprep.subr.bf16.mxu0 %v10711_v36  ;;  %v956_v36 = vld [vmem:[%s15984_s1 + $0x1cf0] sm:$0xff]  ;;  %v10679_v15 = vcombine.high %v824_v34, %v828_v33 }
 0x2c6   :  { %7196 = vmatpush2.bf16.msra.mxu1 %v10590_v18  ;;  %v952_v18 = vld [vmem:[%s15984_s1 + $0x1cd0] sm:$0xff] }
 0x2c7   :  { %7247 = vmatprep.subr.bf16.mxu1 %v10839_v37  ;;  %v6953_v62 = vpop.f32.mrf.mxu0  ;;  %7157 = vmatmul.mubr.bf16.vlgmr.msra.gmra.mxu0 %v12402_v21  ;;  %v10686_v37 = vcombine.low %v832_v12, %v836_v60  ;;  %v10807_v40 = vcombine.high %v952_v18, %v956_v36  ;;  %v10806_v52 = vcombine.low %v952_v18, %v956_v36  ;;  %v928_v12 = vld [vmem:[%s15984_s1 + $0x1c10] sm:$0xff] }
 0x2c8   :  { %7207 = vmatpush1.bf16.msra.mxu0 %v10710_v46  ;;  %7238 = vmatprep.mubr.bf16.mxu0 %v12417_v31  ;;  %v820_v46 = vld [vmem:[%s15984_s1 + $0x18b0] sm:$0xff] }
 0x2c9   :  { %v6912_v45 = vpop.f32.mrf.mxu1  ;;  %7198 = vmatmul.mubr.bf16.vlgmr.msra.gmra.mxu1 %v12421_v32  ;;  %v6955_v5 = vpop.f32.mrf.mxu0  ;;  %7208 = vmatprep.subr.bf16.mxu0 %v10703_v50  ;;  %v948_v50 = vld [vmem:[%s15984_s1 + $0x1cb0] sm:$0xff]  ;;  %v10671_v54 = vcombine.high %v816_v42, %v820_v46 }
 0x2ca   :  { %v6913_v4 = vadd.f32 %v6912_v45, %v13881_v48  ;;  %7248 = vmatpush1.bf16.msra.mxu1 %v10838_v49  ;;  %10903 = vmatprep.mubr.msk.bf16.mxu1 %vm6275_vm0, %v12437_v44  ;;  %v944_v49 = vld [vmem:[%s15984_s1 + $0x1c90] sm:$0xff] }
 0x2cb   :  { %v6914_v41 = vpop.f32.mrf.mxu1  ;;  %7249 = vmatprep.subr.bf16.mxu1 %v10831_v20  ;;  %v6957_v17 = vpop.f32.mrf.mxu0  ;;  %v10678_v20 = vcombine.low %v824_v34, %v828_v33  ;;  %v936_v45 = vld [vmem:[%s15984_s1 + $0x1c50] sm:$0xff] }
 0x2cc   :  { %v14076_v48 = vadd.f32 %v6953_v62, %v6913_v4  ;;  %v6915_v16 = vadd.f32 %v6914_v41, %v13883_v10  ;;  %7209 = vmatpush1.bf16.msra.mxu0 %v10702_v2  ;;  %v10822_v10 = vcombine.low %v968_v0, %v972_v1  ;;  %v10799_v62 = vcombine.high %v944_v49, %v948_v50  ;;  %v808_v0 = vld [vmem:[%s15984_s1 + $0x1850] sm:$0xff] }
 0x2cd   :  { %v6916_v19 = vpop.f32.mrf.mxu1  ;;  %v6958_v27 = vpop.f32.mrf.mxu0  ;;  %7210 = vmatprep.subr.bf16.mxu0 %v10695_v8  ;;  %v812_v1 = vld [vmem:[%s15984_s1 + $0x1870] sm:$0xff]  ;;  %v10670_v4 = vcombine.low %v816_v42, %v820_v46 }
 0x2ce   :  { %v14086_v26 = vadd.f32 %v6955_v5, %v6915_v16  ;;  %7250 = vmatpush1.bf16.msra.mxu1 %v10830_v59  ;;  %v940_v2 = vld [vmem:[%s15984_s1 + $0x1c70] sm:$0xff]  ;;  %v10798_v5 = vcombine.low %v944_v49, %v948_v50  ;;  %v10663_v59 = vcombine.high %v808_v0, %v812_v1  ;;  %v10662_v16 = vcombine.low %v808_v0, %v812_v1 }
 0x2cf   :  { %v6917_v7 = vpop.f32.mrf.mxu1  ;;  %7251 = vmatprep.subr.bf16.mxu1 %v10823_v11  ;;  %v10791_v8 = vcombine.high %v936_v45, %v940_v2  ;;  %v800_v41 = vld [vmem:[%s15984_s1 + $0x1810] sm:$0xff]  ;;  %v10790_v17 = vcombine.low %v936_v45, %v940_v2 }
 0x2d0   :  { %7211 = vmatpush1.bf16.msra.mxu0 %v10694_v23  ;;  %v804_v11 = vld [vmem:[%s15984_s1 + $0x1830] sm:$0xff] }
 0x2d1   :  { %7212 = vmatprep.subr.bf16.mxu0 %v10687_v28  ;;  %v932_v60 = vld [vmem:[%s15984_s1 + $0x1c30] sm:$0xff]  ;;  %v10655_v51 = vcombine.high %v800_v41, %v804_v11  ;;  %v10654_v28 = vcombine.low %v800_v41, %v804_v11 }
 0x2d2   :  { %7252 = vmatpush1.bf16.msra.mxu1 %v10822_v10  ;;  %v10783_v53 = vcombine.high %v928_v12, %v932_v60  ;;  %v920_v19 = vld [vmem:[%s15984_s1 + $0x1bd0] sm:$0xff]  ;;  %v10782_v7 = vcombine.low %v928_v12, %v932_v60 }
 0x2d3   :  { %7253 = vmatprep.subr.bf16.mxu1 %v10815_v63  ;;  %v924_v23 = vld [vmem:[%s15984_s1 + $0x1bf0] sm:$0xff] }
 0x2d4   :  { %7213 = vmatpush1.bf16.msra.mxu0 %v10686_v37  ;;  %v1040_v27 = vld [vmem:[%s15984_s1 + $0x1f90] sm:$0xff]  ;;  %v10775_v63 = vcombine.high %v920_v19, %v924_v23 }
 0x2d5   :  { %7214 = vmatprep.subr.bf16.mxu0 %v10679_v15  ;;  %v1044_v10 = vld [vmem:[%s15984_s1 + $0x1fb0] sm:$0x33]  ;;  %v10774_v15 = vcombine.low %v920_v19, %v924_v23 }
 0x2d6   :  { %7254 = vmatpush1.bf16.msra.mxu1 %v10814_v38  ;;  %v10895_v34 = vcombine.high %v1040_v27, %v1044_v10  ;;  %v10894_v33 = vcombine.low %v1040_v27, %v1044_v10  ;;  %v912_v18 = vld [vmem:[%s15984_s1 + $0x1b90] sm:$0xff] }
 0x2d7   :  { %7255 = vmatprep.subr.bf16.mxu1 %v10807_v40  ;;  %v916_v36 = vld [vmem:[%s15984_s1 + $0x1bb0] sm:$0xff] }
 0x2d8   :  { %7215 = vmatpush1.bf16.msra.mxu0 %v10678_v20  ;;  %v1032_v37 = vld [vmem:[%s15984_s1 + $0x1f50] sm:$0xff]  ;;  %v10767_v40 = vcombine.high %v912_v18, %v916_v36  ;;  %v6293_v42 = vsel %vm6279_vm1, %v10894_v33, 0 }
 0x2d9   :  { %7216 = vmatprep.subr.bf16.mxu0 %v10671_v54  ;;  %v1036_v38 = vld [vmem:[%s15984_s1 + $0x1f70] sm:$0xff]  ;;  %v10766_v54 = vcombine.low %v912_v18, %v916_v36 }
 0x2da   :  { %7256 = vmatpush1.bf16.msra.mxu1 %v10806_v52  ;;  %v10887_v46 = vcombine.high %v1032_v37, %v1036_v38  ;;  %v904_v49 = vld [vmem:[%s15984_s1 + $0x1b50] sm:$0xff] }
 0x2db   :  { %7257 = vmatprep.subr.bf16.mxu1 %v10799_v62  ;;  %v908_v50 = vld [vmem:[%s15984_s1 + $0x1b70] sm:$0xff]  ;;  %v10886_v62 = vcombine.low %v1032_v37, %v1036_v38 }
 0x2dc   :  { %7217 = vmatpush1.bf16.msra.mxu0 %v10670_v4  ;;  %v1024_v20 = vld [vmem:[%s15984_s1 + $0x1f10] sm:$0xff]  ;;  %v10759_v0 = vcombine.high %v904_v49, %v908_v50 }
 0x2dd   :  { %7218 = vmatprep.subr.bf16.mxu0 %v10663_v59  ;;  %v1028_v52 = vld [vmem:[%s15984_s1 + $0x1f30] sm:$0xff]  ;;  %v10758_v59 = vcombine.low %v904_v49, %v908_v50 }
 0x2de   :  { %7258 = vmatpush1.bf16.msra.mxu1 %v10798_v5  ;;  %v10879_v1 = vcombine.high %v1024_v20, %v1028_v52  ;;  %v896_v45 = vld [vmem:[%s15984_s1 + $0x1b10] sm:$0xff] }
 0x2df   :  { %7259 = vmatprep.subr.bf16.mxu1 %v10791_v8  ;;  %v900_v2 = vld [vmem:[%s15984_s1 + $0x1b30] sm:$0xff]  ;;  %v10878_v8 = vcombine.low %v1024_v20, %v1028_v52  ;;  %v89_v52 = vld [vmem:[%s15984_s1 + $0x1d8] sm:$0xff] }
 0x2e0   :  { %7219 = vmatpush1.bf16.msra.mxu0 %v10662_v16  ;;  %v1016_v4 = vld [vmem:[%s15984_s1 + $0x1ed0] sm:$0xff]  ;;  %v10751_v41 = vcombine.high %v896_v45, %v900_v2 }
 0x2e1   :  { %7220 = vmatprep.subr.bf16.mxu0 %v10655_v51  ;;  %v1020_v5 = vld [vmem:[%s15984_s1 + $0x1ef0] sm:$0xff]  ;;  %v10750_v51 = vcombine.low %v896_v45, %v900_v2  ;;  %v217_v2 = vld [vmem:[%s15984_s1 + $0x5d8] sm:$0xff] }
 0x2e2   :  { %7260 = vmatpush1.bf16.msra.mxu1 %v10790_v17  ;;  %v10871_v11 = vcombine.high %v1016_v4, %v1020_v5  ;;  %v888_v12 = vld [vmem:[%s15984_s1 + $0x1ad0] sm:$0xff] }
 0x2e3   :  { %7261 = vmatprep.subr.bf16.mxu1 %v10783_v53  ;;  %v892_v60 = vld [vmem:[%s15984_s1 + $0x1af0] sm:$0xff]  ;;  %v10870_v53 = vcombine.low %v1016_v4, %v1020_v5  ;;  %v221_v4 = vld [vmem:[%s15984_s1 + $0x5f8] sm:$0xff] }
 0x2e4   :  { %7221 = vmatpush1.bf16.msra.mxu0 %v10654_v28  ;;  %v1008_v16 = vld [vmem:[%s15984_s1 + $0x1e90] sm:$0xff]  ;;  %v10743_v19 = vcombine.high %v888_v12, %v892_v60  ;;  %v81_v5 = vld [vmem:[%s15984_s1 + $0x198] sm:$0xff] }
 0x2e5   :  { %7222 = vmatprep.subr.bf16.mxu0 %v10775_v63  ;;  %v1012_v17 = vld [vmem:[%s15984_s1 + $0x1eb0] sm:$0xff]  ;;  %v10742_v63 = vcombine.low %v888_v12, %v892_v60  ;;  %v10073_v12 = vcombine.high %v217_v2, %v221_v4 }
 0x2e6   :  { %7262 = vmatpush1.bf16.msra.mxu1 %v10782_v7  ;;  %v10863_v23 = vcombine.high %v1008_v16, %v1012_v17  ;;  %v880_v27 = vld [vmem:[%s15984_s1 + $0x1a90] sm:$0xff] }
 0x2e7   :  { %10902 = vmatprep.subr.msk.bf16.mxu1 %vm6279_vm1, %v10895_v34  ;;  %v884_v10 = vld [vmem:[%s15984_s1 + $0x1ab0] sm:$0xff]  ;;  %v10862_v34 = vcombine.low %v1008_v16, %v1012_v17  ;;  %v1070_v16 = vsub.s32 5, %v11790_v43  ;;  %v209_v17 = vld [vmem:[%s15984_s1 + $0x598] sm:$0xff] }
 0x2e8   :  { %7223 = vmatpush2.bf16.msra.mxu0 %v10774_v15  ;;  %v1000_v28 = vld [vmem:[%s15984_s1 + $0x1e50] sm:$0xff]  ;;  %v10735_v33 = vcombine.high %v880_v27, %v884_v10 }
 0x2e9   :  { %7224 = vmatprep.subr.bf16.mxu0 %v10767_v40  ;;  %v1004_v7 = vld [vmem:[%s15984_s1 + $0x1e70] sm:$0xff]  ;;  %v10734_v40 = vcombine.low %v880_v27, %v884_v10  ;;  %v10072_v10 = vcombine.low %v217_v2, %v221_v4 }
 0x2ea   :  { %7266 = vmatpush2.bf16.msra.mxu1 %v6293_v42  ;;  %v10855_v18 = vcombine.high %v1000_v28, %v1004_v7  ;;  %v872_v36 = vld [vmem:[%s15984_s1 + $0x1a50] sm:$0xff]  ;;  %v10854_v42 = vcombine.low %v1000_v28, %v1004_v7 }
 0x2eb   :  { %7267 = vmatprep.subr.bf16.mxu1 %v10887_v46  ;;  %v876_v37 = vld [vmem:[%s15984_s1 + $0x1a70] sm:$0xff] }
 0x2ec   :  { %7225 = vmatpush2.bf16.msra.mxu0 %v10766_v54  ;;  %v992_v38 = vld [vmem:[%s15984_s1 + $0x1e10] sm:$0xff]  ;;  %v10727_v46 = vcombine.high %v872_v36, %v876_v37  ;;  %v93_v54 = vld [vmem:[%s15984_s1 + $0x1f8] sm:$0xff] }
 0x2ed   :  { %7226 = vmatprep.subr.bf16.mxu0 %v10759_v0  ;;  %v996_v15 = vld [vmem:[%s15984_s1 + $0x1e30] sm:$0xff]  ;;  %v9945_v45 = vcombine.high %v89_v52, %v93_v54 }
 0x2ee   :  { %7268 = vmatpush2.bf16.msra.mxu1 %v10886_v62  ;;  %v10847_v49 = vcombine.high %v992_v38, %v996_v15  ;;  %v864_v50 = vld [vmem:[%s15984_s1 + $0x1a10] sm:$0xff]  ;;  %v10726_v62 = vcombine.low %v872_v36, %v876_v37  ;;  %v10846_v0 = vcombine.low %v992_v38, %v996_v15  ;;  %v65_v37 = vld [vmem:[%s15984_s1 + $0x118] sm:$0xff] }
 0x2ef   :  { %7269 = vmatprep.subr.bf16.mxu1 %v10879_v1  ;;  %v868_v20 = vld [vmem:[%s15984_s1 + $0x1a30] sm:$0xff]  ;;  %v69_v38 = vld [vmem:[%s15984_s1 + $0x138] sm:$0xff] }
 0x2f0   :  { %7227 = vmatpush2.bf16.msra.mxu0 %v10758_v59  ;;  %v10719_v1 = vcombine.high %v864_v50, %v868_v20  ;;  %v85_v59 = vld [vmem:[%s15984_s1 + $0x1b8] sm:$0xff] }
 0x2f1   :  { %7228 = vmatprep.subr.bf16.mxu0 %v10751_v41  ;;  %v1066_v41 = vsub.s32 4, %v11790_v43  ;;  %v9937_v60 = vcombine.high %v81_v5, %v85_v59  ;;  %v9936_v28 = vcombine.low %v81_v5, %v85_v59 }
 0x2f2   :  { %7270 = vmatpush2.bf16.msra.mxu1 %v10878_v8  ;;  %v10718_v8 = vcombine.low %v864_v50, %v868_v20 }
 0x2f3   :  { %7271 = vmatprep.subr.bf16.mxu1 %v10871_v11  ;;  %v9944_v11 = vcombine.low %v89_v52, %v93_v54  ;;  %v9921_v54 = vcombine.high %v65_v37, %v69_v38 }
 0x2f4   :  { %7229 = vmatpush2.bf16.msra.mxu0 %v10750_v51  ;;  %v213_v51 = vld [vmem:[%s15984_s1 + $0x5b8] sm:$0xff] }
 0x2f5   :  { %7230 = vmatprep.subr.bf16.mxu0 %v10743_v19  ;;  %v77_v19 = vld [vmem:[%s15984_s1 + $0x178] sm:$0xff]  ;;  %v10065_v7 = vcombine.high %v209_v17, %v213_v51 }
 0x2f6   :  { %7272 = vmatpush2.bf16.msra.mxu1 %v10870_v53  ;;  %v73_v53 = vld [vmem:[%s15984_s1 + $0x158] sm:$0xff] }
 0x2f7   :  { %7273 = vmatprep.subr.bf16.mxu1 %v10863_v23  ;;  %v11658_v23 = vld [vmem:[%s15985_s2] sm:$0xff] }
 0x2f8   :  { %7231 = vmatpush2.bf16.msra.mxu0 %v10742_v63  ;;  %v1067_v27 = vrot.slane %v11658_v23, %v1066_v41  ;;  %v1071_v63 = vrot.slane %v11658_v23, %v1070_v16  ;;  %v189_v16 = vld [vmem:[%s15984_s1 + $0x4f8] sm:$0xff] }
 0x2f9   :  { %7232 = vmatprep.subr.bf16.mxu0 %v10735_v33  ;;  %v201_v33 = vld [vmem:[%s15984_s1 + $0x558] sm:$0xff] }
 0x2fa   :  { %7274 = vmatpush2.bf16.msra.mxu1 %v10862_v34  ;;  %v9929_v34 = vcombine.high %v73_v53, %v77_v19 }
 0x2fb   :  { %7275 = vmatprep.subr.bf16.mxu1 %v10855_v18  ;;  %v205_v18 = vld [vmem:[%s15984_s1 + $0x578] sm:$0xff] }
 0x2fc   :  { %7233 = vmatpush2.bf16.msra.mxu0 %v10734_v40  ;;  %v10056_v5 = vcombine.low %v201_v33, %v205_v18 }
 0x2fd   :  { %7234 = vmatprep.subr.bf16.mxu0 %v10727_v46 }
 0x2fe   :  { %7276 = vmatpush2.bf16.msra.mxu1 %v10854_v42  ;;  %v10064_v42 = vcombine.low %v209_v17, %v213_v51  ;;  %v49_v17 = vld [vmem:[%s15984_s1 + $0x98] sm:$0xff] }
 0x2ff   :  { %7277 = vmatprep.subr.bf16.mxu1 %v10847_v49  ;;  %v10057_v49 = vcombine.high %v201_v33, %v205_v18  ;;  %v53_v51 = vld [vmem:[%s15984_s1 + $0xb8] sm:$0xff] }
 0x300   :  { %7235 = vmatpush2.bf16.msra.mxu0 %v10726_v62  ;;  %v193_v62 = vld [vmem:[%s15984_s1 + $0x518] sm:$0xff]  ;;  %v9904_v33 = vcombine.low %v49_v17, %v53_v51 }
 0x301   :  { %7236 = vmatprep.subr.bf16.mxu0 %v10719_v1  ;;  %v57_v1 = vld [vmem:[%s15984_s1 + $0xd8] sm:$0xff] }
 0x302   :  { %7278 = vmatpush2.bf16.msra.mxu1 %v10846_v0  ;;  %v197_v0 = vld [vmem:[%s15984_s1 + $0x538] sm:$0xff] }
 0x303   :  { %7288 = vmatprep.subr.bf16.mxu1 %v9945_v45  ;;  %v61_v45 = vld [vmem:[%s15984_s1 + $0xf8] sm:$0xff]  ;;  %v10049_v41 = vcombine.high %v193_v62, %v197_v0 }
 0x304   :  { %7237 = vmatpush2.bf16.msra.mxu0 %v10718_v8  ;;  %v9920_v8 = vcombine.low %v65_v37, %v69_v38  ;;  %v169_v37 = vld [vmem:[%s15984_s1 + $0x458] sm:$0xff] }
 0x305   :  { %7280 = vmatmul.mubr.bf16.vlgmr.msra.gmra.mxu1 %v12620_v6  ;;  %7329 = vmatprep.subr.bf16.mxu0 %v10073_v12  ;;  %v9913_v12 = vcombine.high %v57_v1, %v61_v45  ;;  %v173_v38 = vld [vmem:[%s15984_s1 + $0x478] sm:$0xff] }
 0x306   :  { %7289 = vmatpush1.bf16.msra.mxu1 %v9944_v11  ;;  %7320 = vmatprep.mubr.bf16.mxu1 %v11843_v9  ;;  %v9928_v9 = vcombine.low %v73_v53, %v77_v19  ;;  %v10048_v53 = vcombine.low %v193_v62, %v197_v0  ;;  %v9912_v19 = vcombine.low %v57_v1, %v61_v45  ;;  %v157_v62 = vld [vmem:[%s15984_s1 + $0x3f8] sm:$0xff] }
 0x307   :  { %7290 = vmatprep.subr.bf16.mxu1 %v9937_v60  ;;  %v6994_v36 = vpop.f32.mrf.mxu0  ;;  %7239 = vmatmul.mubr.bf16.vlgmr.msra.gmra.mxu0 %v12604_v61  ;;  %v185_v60 = vld [vmem:[%s15984_s1 + $0x4d8] sm:$0xff]  ;;  %v10024_v0 = vcombine.low %v169_v37, %v173_v38 }
 0x308   :  { %v6995_v15 = vadd.f32 %v6994_v36, %v1067_v27  ;;  %7330 = vmatpush1.bf16.msra.mxu0 %v10072_v10  ;;  %7361 = vmatprep.mubr.bf16.mxu0 %v11854_v13  ;;  %v10041_v23 = vcombine.high %v185_v60, %v189_v16  ;;  %v9905_v27 = vcombine.high %v49_v17, %v53_v51  ;;  %v177_v10 = vld [vmem:[%s15984_s1 + $0x498] sm:$0xff] }
 0x309   :  { %v7035_v40 = vpop.f32.mrf.mxu1  ;;  %v6996_v46 = vpop.f32.mrf.mxu0  ;;  %7331 = vmatprep.subr.bf16.mxu0 %v10065_v7  ;;  %v41_v7 = vld [vmem:[%s15984_s1 + $0x58] sm:$0xff] }
 0x30a   :  { %7291 = vmatpush1.bf16.msra.mxu1 %v9936_v28  ;;  %v14279_v50 = vadd.f32 %v7035_v40, %v6995_v15  ;;  %v6997_v20 = vadd.f32 %v6996_v46, %v1071_v63  ;;  %v181_v28 = vld [vmem:[%s15984_s1 + $0x4b8] sm:$0xff] }
 0x30b   :  { %v7037_v52 = vpop.f32.mrf.mxu1  ;;  %7292 = vmatprep.subr.bf16.mxu1 %v9929_v34  ;;  %v6998_v13 = vpop.f32.mrf.mxu0  ;;  %v45_v63 = vld [vmem:[%s15984_s1 + $0x78] sm:$0xff]  ;;  %v10040_v34 = vcombine.low %v185_v60, %v189_v16  ;;  %v10033_v18 = vcombine.high %v177_v10, %v181_v28 }
 0x30c   :  { %v14293_v2 = vadd.f32 %v7037_v52, %v6997_v20  ;;  %7332 = vmatpush1.bf16.msra.mxu0 %v10064_v42  ;;  %v9897_v36 = vcombine.high %v41_v7, %v45_v63  ;;  %v33_v15 = vld [vmem:[%s15984_s1 + $0x18] sm:$0xff]  ;;  %v10032_v42 = vcombine.low %v177_v10, %v181_v28  ;;  %v9896_v46 = vcombine.low %v41_v7, %v45_v63 }
 0x30d   :  { %v7039_v4 = vpop.f32.mrf.mxu1  ;;  %v6999_v59 = vpop.f32.mrf.mxu0  ;;  %7333 = vmatprep.subr.bf16.mxu0 %v10057_v49  ;;  %v37_v40 = vld [vmem:[%s15984_s1 + $0x38] sm:$0xff] }
 0x30e   :  { %7293 = vmatpush1.bf16.msra.mxu1 %v9928_v9  ;;  %v10025_v9 = vcombine.high %v169_v37, %v173_v38  ;;  %v9889_v49 = vcombine.high %v33_v15, %v37_v40  ;;  %v161_v20 = vld [vmem:[%s15984_s1 + $0x418] sm:$0xff]  ;;  %v9888_v13 = vcombine.low %v33_v15, %v37_v40 }
 0x30f   :  { %v7040_v11 = vpop.f32.mrf.mxu1  ;;  %7294 = vmatprep.subr.bf16.mxu1 %v9921_v54  ;;  %v165_v52 = vld [vmem:[%s15984_s1 + $0x438] sm:$0xff] }
 0x310   :  { %7334 = vmatpush1.bf16.msra.mxu0 %v10056_v5  ;;  %v153_v54 = vld [vmem:[%s15984_s1 + $0x3d8] sm:$0xff]  ;;  %v10017_v1 = vcombine.high %v161_v20, %v165_v52 }
 0x311   :  { %7335 = vmatprep.subr.bf16.mxu0 %v10049_v41  ;;  %v10009_v45 = vcombine.high %v153_v54, %v157_v62  ;;  %v281_v4 = vld [vmem:[%s15984_s1 + $0x7d8] sm:$0xff]  ;;  %v10016_v41 = vcombine.low %v161_v20, %v165_v52  ;;  %v10008_v11 = vcombine.low %v153_v54, %v157_v62 }
 0x312   :  { %7295 = vmatpush1.bf16.msra.mxu1 %v9920_v8  ;;  %v285_v5 = vld [vmem:[%s15984_s1 + $0x7f8] sm:$0xff] }
 0x313   :  { %7296 = vmatprep.subr.bf16.mxu1 %v9913_v12  ;;  %v145_v59 = vld [vmem:[%s15984_s1 + $0x398] sm:$0xff]  ;;  %v10137_v12 = vcombine.high %v281_v4, %v285_v5 }
 0x314   :  { %7336 = vmatpush1.bf16.msra.mxu0 %v10048_v53  ;;  %v149_v8 = vld [vmem:[%s15984_s1 + $0x3b8] sm:$0xff] }
 0x315   :  { %7337 = vmatprep.subr.bf16.mxu0 %v10041_v23  ;;  %v10001_v60 = vcombine.high %v145_v59, %v149_v8  ;;  %v273_v16 = vld [vmem:[%s15984_s1 + $0x798] sm:$0xff]  ;;  %v10000_v23 = vcombine.low %v145_v59, %v149_v8 }
 0x316   :  { %7297 = vmatpush1.bf16.msra.mxu1 %v9912_v19  ;;  %v277_v17 = vld [vmem:[%s15984_s1 + $0x7b8] sm:$0xff]  ;;  %v10136_v19 = vcombine.low %v281_v4, %v285_v5 }
 0x317   :  { %7298 = vmatprep.subr.bf16.mxu1 %v9905_v27  ;;  %v137_v51 = vld [vmem:[%s15984_s1 + $0x358] sm:$0xff]  ;;  %v10129_v27 = vcombine.high %v273_v16, %v277_v17 }
 0x318   :  { %7338 = vmatpush1.bf16.msra.mxu0 %v10040_v34  ;;  %v141_v53 = vld [vmem:[%s15984_s1 + $0x378] sm:$0xff] }
 0x319   :  { %7339 = vmatprep.subr.bf16.mxu0 %v10033_v18  ;;  %v9993_v10 = vcombine.high %v137_v51, %v141_v53  ;;  %v265_v28 = vld [vmem:[%s15984_s1 + $0x758] sm:$0xff]  ;;  %v9992_v18 = vcombine.low %v137_v51, %v141_v53 }
 0x31a   :  { %7299 = vmatpush1.bf16.msra.mxu1 %v9904_v33  ;;  %v269_v7 = vld [vmem:[%s15984_s1 + $0x778] sm:$0xff]  ;;  %v10128_v33 = vcombine.low %v273_v16, %v277_v17 }
 0x31b   :  { %7300 = vmatprep.subr.bf16.mxu1 %v9897_v36  ;;  %v129_v63 = vld [vmem:[%s15984_s1 + $0x318] sm:$0xff]  ;;  %v10121_v36 = vcombine.high %v265_v28, %v269_v7 }
 0x31c   :  { %7340 = vmatpush1.bf16.msra.mxu0 %v10032_v42  ;;  %v133_v34 = vld [vmem:[%s15984_s1 + $0x338] sm:$0xff] }
 0x31d   :  { %7341 = vmatprep.subr.bf16.mxu0 %v10025_v9  ;;  %v9985_v37 = vcombine.high %v129_v63, %v133_v34  ;;  %v257_v38 = vld [vmem:[%s15984_s1 + $0x718] sm:$0xff]  ;;  %v9984_v9 = vcombine.low %v129_v63, %v133_v34 }
 0x31e   :  { %7301 = vmatpush1.bf16.msra.mxu1 %v9896_v46  ;;  %v261_v15 = vld [vmem:[%s15984_s1 + $0x738] sm:$0xff]  ;;  %v10120_v46 = vcombine.low %v265_v28, %v269_v7 }
 0x31f   :  { %7302 = vmatprep.subr.bf16.mxu1 %v9889_v49  ;;  %v121_v40 = vld [vmem:[%s15984_s1 + $0x2d8] sm:$0xff]  ;;  %v10113_v49 = vcombine.high %v257_v38, %v261_v15 }
 0x320   :  { %7342 = vmatpush1.bf16.msra.mxu0 %v10024_v0  ;;  %v125_v42 = vld [vmem:[%s15984_s1 + $0x2f8] sm:$0xff] }
 0x321   :  { %7343 = vmatprep.subr.bf16.mxu0 %v10017_v1  ;;  %v9977_v20 = vcombine.high %v121_v40, %v125_v42  ;;  %v249_v52 = vld [vmem:[%s15984_s1 + $0x6d8] sm:$0xff]  ;;  %v9976_v1 = vcombine.low %v121_v40, %v125_v42 }
 0x322   :  { %7303 = vmatpush1.bf16.msra.mxu1 %v9888_v13  ;;  %v253_v54 = vld [vmem:[%s15984_s1 + $0x6f8] sm:$0xff]  ;;  %v10112_v13 = vcombine.low %v257_v38, %v261_v15 }
 0x323   :  { %7304 = vmatprep.subr.bf16.mxu1 %v10009_v45  ;;  %v113_v62 = vld [vmem:[%s15984_s1 + $0x298] sm:$0xff]  ;;  %v10105_v45 = vcombine.high %v249_v52, %v253_v54 }
 0x324   :  { %7344 = vmatpush1.bf16.msra.mxu0 %v10016_v41  ;;  %v117_v0 = vld [vmem:[%s15984_s1 + $0x2b8] sm:$0xff] }
 0x325   :  { %7345 = vmatprep.subr.bf16.mxu0 %v10137_v12  ;;  %v9969_v4 = vcombine.high %v113_v62, %v117_v0  ;;  %v241_v5 = vld [vmem:[%s15984_s1 + $0x698] sm:$0xff]  ;;  %v9968_v12 = vcombine.low %v113_v62, %v117_v0 }
 0x326   :  { %7305 = vmatpush2.bf16.msra.mxu1 %v10008_v11  ;;  %v245_v59 = vld [vmem:[%s15984_s1 + $0x6b8] sm:$0xff]  ;;  %v10104_v11 = vcombine.low %v249_v52, %v253_v54 }
 0x327   :  { %7306 = vmatprep.subr.bf16.mxu1 %v10001_v60  ;;  %v105_v8 = vld [vmem:[%s15984_s1 + $0x258] sm:$0xff]  ;;  %v10097_v60 = vcombine.high %v241_v5, %v245_v59 }
 0x328   :  { %7346 = vmatpush2.bf16.msra.mxu0 %v10136_v19  ;;  %v109_v41 = vld [vmem:[%s15984_s1 + $0x278] sm:$0xff] }
 0x329   :  { %7347 = vmatprep.subr.bf16.mxu0 %v10129_v27  ;;  %v9961_v16 = vcombine.high %v105_v8, %v109_v41  ;;  %v233_v17 = vld [vmem:[%s15984_s1 + $0x658] sm:$0xff]  ;;  %v9960_v27 = vcombine.low %v105_v8, %v109_v41 }
 0x32a   :  { %7307 = vmatpush2.bf16.msra.mxu1 %v10000_v23  ;;  %v237_v51 = vld [vmem:[%s15984_s1 + $0x678] sm:$0xff]  ;;  %v10096_v23 = vcombine.low %v241_v5, %v245_v59 }
 0x32b   :  { %7308 = vmatprep.subr.bf16.mxu1 %v9993_v10  ;;  %v97_v53 = vld [vmem:[%s15984_s1 + $0x218] sm:$0xff]  ;;  %v10089_v10 = vcombine.high %v233_v17, %v237_v51 }
 0x32c   :  { %7348 = vmatpush2.bf16.msra.mxu0 %v10128_v33  ;;  %v101_v19 = vld [vmem:[%s15984_s1 + $0x238] sm:$0xff] }
 0x32d   :  { %7349 = vmatprep.subr.bf16.mxu0 %v10121_v36  ;;  %v9953_v28 = vcombine.high %v97_v53, %v101_v19  ;;  %v225_v7 = vld [vmem:[%s15984_s1 + $0x618] sm:$0xff]  ;;  %v9952_v36 = vcombine.low %v97_v53, %v101_v19 }
 0x32e   :  { %7309 = vmatpush2.bf16.msra.mxu1 %v9992_v18  ;;  %v229_v63 = vld [vmem:[%s15984_s1 + $0x638] sm:$0xff]  ;;  %v10088_v18 = vcombine.low %v233_v17, %v237_v51 }
 0x32f   :  { %7310 = vmatprep.subr.bf16.mxu1 %v9985_v37  ;;  %v345_v34 = vld [vmem:[%s15984_s1 + $0x9d8] sm:$0xff]  ;;  %v10081_v37 = vcombine.high %v225_v7, %v229_v63 }
 0x330   :  { %7350 = vmatpush2.bf16.msra.mxu0 %v10120_v46  ;;  %v349_v33 = vld [vmem:[%s15984_s1 + $0x9f8] sm:$0xff] }
 0x331   :  { %7351 = vmatprep.subr.bf16.mxu0 %v10113_v49  ;;  %v10201_v38 = vcombine.high %v345_v34, %v349_v33  ;;  %v473_v15 = vld [vmem:[%s15984_s1 + $0xdd8] sm:$0xff]  ;;  %v10200_v49 = vcombine.low %v345_v34, %v349_v33 }
 0x332   :  { %7311 = vmatpush2.bf16.msra.mxu1 %v9984_v9  ;;  %v477_v40 = vld [vmem:[%s15984_s1 + $0xdf8] sm:$0xff]  ;;  %v10080_v9 = vcombine.low %v225_v7, %v229_v63 }
 0x333   :  { %7312 = vmatprep.subr.bf16.mxu1 %v9977_v20  ;;  %v337_v42 = vld [vmem:[%s15984_s1 + $0x998] sm:$0xff]  ;;  %v10329_v20 = vcombine.high %v473_v15, %v477_v40 }
 0x334   :  { %7352 = vmatpush2.bf16.msra.mxu0 %v10112_v13  ;;  %v341_v46 = vld [vmem:[%s15984_s1 + $0x9b8] sm:$0xff] }
 0x335   :  { %7353 = vmatprep.subr.bf16.mxu0 %v10105_v45  ;;  %v10193_v52 = vcombine.high %v337_v42, %v341_v46  ;;  %v465_v54 = vld [vmem:[%s15984_s1 + $0xd98] sm:$0xff]  ;;  %v10192_v45 = vcombine.low %v337_v42, %v341_v46 }
 0x336   :  { %7313 = vmatpush2.bf16.msra.mxu1 %v9976_v1  ;;  %v469_v62 = vld [vmem:[%s15984_s1 + $0xdb8] sm:$0xff]  ;;  %v10328_v1 = vcombine.low %v473_v15, %v477_v40 }
 0x337   :  { %7314 = vmatprep.subr.bf16.mxu1 %v9969_v4  ;;  %v329_v0 = vld [vmem:[%s15984_s1 + $0x958] sm:$0xff]  ;;  %v10321_v4 = vcombine.high %v465_v54, %v469_v62 }
 0x338   :  { %7354 = vmatpush2.bf16.msra.mxu0 %v10104_v11  ;;  %v333_v13 = vld [vmem:[%s15984_s1 + $0x978] sm:$0xff] }
 0x339   :  { %7355 = vmatprep.subr.bf16.mxu0 %v10097_v60  ;;  %v10185_v5 = vcombine.high %v329_v0, %v333_v13  ;;  %v457_v59 = vld [vmem:[%s15984_s1 + $0xd58] sm:$0xff]  ;;  %v10184_v17 = vcombine.low %v329_v0, %v333_v13 }
 0x33a   :  { %7315 = vmatpush2.bf16.msra.mxu1 %v9968_v12  ;;  %v461_v8 = vld [vmem:[%s15984_s1 + $0xd78] sm:$0xff] }
 0x33b   :  { %7316 = vmatprep.subr.bf16.mxu1 %v9961_v16  ;;  %v325_v11 = vld [vmem:[%s15984_s1 + $0x938] sm:$0xff]  ;;  %v10320_v16 = vcombine.low %v465_v54, %v469_v62  ;;  %v10312_v63 = vcombine.low %v457_v59, %v461_v8 }
 0x33c   :  { %7356 = vmatpush2.bf16.msra.mxu0 %v10096_v23  ;;  %v445_v15 = vld [vmem:[%s15984_s1 + $0xcf8] sm:$0xff] }
 0x33d   :  { %7357 = vmatprep.subr.bf16.mxu0 %v10089_v10  ;;  %v313_v10 = vld [vmem:[%s15984_s1 + $0x8d8] sm:$0xff] }
 0x33e   :  { %7317 = vmatpush2.bf16.msra.mxu1 %v9960_v27  ;;  %v305_v40 = vld [vmem:[%s15984_s1 + $0x898] sm:$0xff] }
 0x33f   :  { %7318 = vmatprep.subr.bf16.mxu1 %v9953_v28  ;;  %v309_v42 = vld [vmem:[%s15984_s1 + $0x8b8] sm:$0xff] }
 0x340   :  { %7358 = vmatpush2.bf16.msra.mxu0 %v10088_v18  ;;  %v437_v54 = vld [vmem:[%s15984_s1 + $0xcb8] sm:$0xff] }
 0x341   :  { %7359 = vmatprep.subr.bf16.mxu0 %v10081_v37  ;;  %v297_v62 = vld [vmem:[%s15984_s1 + $0x858] sm:$0xff] }
 0x342   :  { %7319 = vmatpush2.bf16.msra.mxu1 %v9952_v36  ;;  %v301_v0 = vld [vmem:[%s15984_s1 + $0x878] sm:$0xff] }
 0x343   :  { %7370 = vmatprep.subr.bf16.mxu1 %v10201_v38  ;;  %v441_v38 = vld [vmem:[%s15984_s1 + $0xcd8] sm:$0xff] }
 0x344   :  { %7360 = vmatpush2.bf16.msra.mxu0 %v10080_v9  ;;  %v10296_v13 = vcombine.low %v441_v38, %v445_v15 }
 0x345   :  { %7321 = vmatmul.mubr.bf16.vlgmr.msra.gmra.mxu1 %v11962_v22  ;;  %7411 = vmatprep.subr.bf16.mxu0 %v10329_v20  ;;  %v321_v22 = vld [vmem:[%s15984_s1 + $0x918] sm:$0xff]  ;;  %v10161_v20 = vcombine.high %v305_v40, %v309_v42 }
 0x346   :  { %7371 = vmatpush1.bf16.msra.mxu1 %v10200_v49  ;;  %7402 = vmatprep.mubr.bf16.mxu1 %v11977_v29  ;;  %v10177_v23 = vcombine.high %v321_v22, %v325_v11  ;;  %v10176_v33 = vcombine.low %v321_v22, %v325_v11  ;;  %v10297_v49 = vcombine.high %v441_v38, %v445_v15  ;;  %v397_v38 = vld [vmem:[%s15984_s1 + $0xb78] sm:$0xff] }
 0x347   :  { %7372 = vmatprep.subr.bf16.mxu1 %v10193_v52  ;;  %v7076_v41 = vpop.f32.mrf.mxu0  ;;  %7362 = vmatmul.mubr.bf16.vlgmr.msra.gmra.mxu0 %v11981_v30  ;;  %v10313_v30 = vcombine.high %v457_v59, %v461_v8  ;;  %v433_v52 = vld [vmem:[%s15984_s1 + $0xc98] sm:$0xff]  ;;  %v10152_v11 = vcombine.low %v297_v62, %v301_v0 }
 0x348   :  { %v7077_v12 = vadd.f32 %v7076_v41, %v14279_v50  ;;  %7412 = vmatpush1.bf16.msra.mxu0 %v10328_v1  ;;  %7443 = vmatprep.mubr.bf16.mxu0 %v11998_v39  ;;  %v449_v50 = vld [vmem:[%s15984_s1 + $0xd18] sm:$0xff]  ;;  %v10160_v1 = vcombine.low %v305_v40, %v309_v42  ;;  %v10288_v22 = vcombine.low %v433_v52, %v437_v54 }
 0x349   :  { %v7117_v60 = vpop.f32.mrf.mxu1  ;;  %v7078_v29 = vpop.f32.mrf.mxu0  ;;  %7413 = vmatprep.subr.bf16.mxu0 %v10321_v4  ;;  %v453_v39 = vld [vmem:[%s15984_s1 + $0xd38] sm:$0xff]  ;;  %v10153_v4 = vcombine.high %v297_v62, %v301_v0 }
 0x34a   :  { %7373 = vmatpush1.bf16.msra.mxu1 %v10192_v45  ;;  %v14480_v51 = vadd.f32 %v7117_v60, %v7077_v12  ;;  %v7079_v53 = vadd.f32 %v7078_v29, %v14293_v2  ;;  %v317_v2 = vld [vmem:[%s15984_s1 + $0x8f8] sm:$0xff]  ;;  %v10305_v18 = vcombine.high %v449_v50, %v453_v39  ;;  %v10304_v46 = vcombine.low %v449_v50, %v453_v39 }
 0x34b   :  { %v7119_v19 = vpop.f32.mrf.mxu1  ;;  %7374 = vmatprep.subr.bf16.mxu1 %v10185_v5  ;;  %v7080_v27 = vpop.f32.mrf.mxu0  ;;  %v10169_v37 = vcombine.high %v313_v10, %v317_v2  ;;  %v10168_v9 = vcombine.low %v313_v10, %v317_v2  ;;  %v10289_v45 = vcombine.high %v433_v52, %v437_v54  ;;  %v425_v5 = vld [vmem:[%s15984_s1 + $0xc58] sm:$0xff] }
 0x34c   :  { %v14495_v28 = vadd.f32 %v7119_v19, %v7079_v53  ;;  %7414 = vmatpush1.bf16.msra.mxu0 %v10320_v16  ;;  %v429_v59 = vld [vmem:[%s15984_s1 + $0xc78] sm:$0xff] }
 0x34d   :  { %v7121_v7 = vpop.f32.mrf.mxu1  ;;  %v7081_v34 = vpop.f32.mrf.mxu0  ;;  %7415 = vmatprep.subr.bf16.mxu0 %v10313_v30  ;;  %v289_v8 = vld [vmem:[%s15984_s1 + $0x818] sm:$0xff]  ;;  %v10281_v12 = vcombine.high %v425_v5, %v429_v59  ;;  %v10280_v53 = vcombine.low %v425_v5, %v429_v59 }
 0x34e   :  { %7375 = vmatpush1.bf16.msra.mxu1 %v10184_v17  ;;  %v293_v41 = vld [vmem:[%s15984_s1 + $0x838] sm:$0xff] }
 0x34f   :  { %v7122_v36 = vpop.f32.mrf.mxu1  ;;  %7376 = vmatprep.subr.bf16.mxu1 %v10177_v23  ;;  %v10145_v60 = vcombine.high %v289_v8, %v293_v41  ;;  %v417_v16 = vld [vmem:[%s15984_s1 + $0xc18] sm:$0xff]  ;;  %v10144_v19 = vcombine.low %v289_v8, %v293_v41 }
 0x350   :  { %7416 = vmatpush1.bf16.msra.mxu0 %v10312_v63  ;;  %v421_v29 = vld [vmem:[%s15984_s1 + $0xc38] sm:$0xff] }
 0x351   :  { %7417 = vmatprep.subr.bf16.mxu0 %v10305_v18  ;;  %v409_v17 = vld [vmem:[%s15984_s1 + $0xbd8] sm:$0xff]  ;;  %v10273_v23 = vcombine.high %v417_v16, %v421_v29  ;;  %v10272_v7 = vcombine.low %v417_v16, %v421_v29 }
 0x352   :  { %7377 = vmatpush1.bf16.msra.mxu1 %v10176_v33  ;;  %v413_v30 = vld [vmem:[%s15984_s1 + $0xbf8] sm:$0xff] }
 0x353   :  { %7378 = vmatprep.subr.bf16.mxu1 %v10169_v37  ;;  %v10265_v50 = vcombine.high %v409_v17, %v413_v30  ;;  %v537_v39 = vld [vmem:[%s15984_s1 + $0xfd8] sm:$0xff]  ;;  %v10264_v63 = vcombine.low %v409_v17, %v413_v30 }
 0x354   :  { %7418 = vmatpush1.bf16.msra.mxu0 %v10304_v46  ;;  %v541_v27 = vld [vmem:[%s15984_s1 + $0xff8] sm:$0xff] }
 0x355   :  { %7419 = vmatprep.subr.bf16.mxu0 %v10297_v49  ;;  %v401_v10 = vld [vmem:[%s15984_s1 + $0xb98] sm:$0xff]  ;;  %v10393_v34 = vcombine.high %v537_v39, %v541_v27  ;;  %v10392_v15 = vcombine.low %v537_v39, %v541_v27 }
 0x356   :  { %7379 = vmatpush1.bf16.msra.mxu1 %v10168_v9  ;;  %v405_v2 = vld [vmem:[%s15984_s1 + $0xbb8] sm:$0xff] }
 0x357   :  { %7380 = vmatprep.subr.bf16.mxu1 %v10161_v20  ;;  %v10257_v33 = vcombine.high %v401_v10, %v405_v2  ;;  %v529_v18 = vld [vmem:[%s15984_s1 + $0xf98] sm:$0xff]  ;;  %v10256_v40 = vcombine.low %v401_v10, %v405_v2 }
 0x358   :  { %7420 = vmatpush1.bf16.msra.mxu0 %v10296_v13  ;;  %v533_v36 = vld [vmem:[%s15984_s1 + $0xfb8] sm:$0xff] }
 0x359   :  { %7421 = vmatprep.subr.bf16.mxu0 %v10289_v45  ;;  %v393_v37 = vld [vmem:[%s15984_s1 + $0xb58] sm:$0xff]  ;;  %v10385_v42 = vcombine.high %v529_v18, %v533_v36  ;;  %v10384_v54 = vcombine.low %v529_v18, %v533_v36 }
 0x35a   :  { %7381 = vmatpush1.bf16.msra.mxu1 %v10160_v1  ;;  %v10249_v46 = vcombine.high %v393_v37, %v397_v38  ;;  %v521_v9 = vld [vmem:[%s15984_s1 + $0xf58] sm:$0xff]  ;;  %v10248_v62 = vcombine.low %v393_v37, %v397_v38 }
 0x35b   :  { %7382 = vmatprep.subr.bf16.mxu1 %v10153_v4  ;;  %v525_v49 = vld [vmem:[%s15984_s1 + $0xf78] sm:$0xff] }
 0x35c   :  { %7422 = vmatpush1.bf16.msra.mxu0 %v10288_v22  ;;  %v385_v20 = vld [vmem:[%s15984_s1 + $0xb18] sm:$0xff]  ;;  %v10377_v0 = vcombine.high %v521_v9, %v525_v49  ;;  %v10376_v59 = vcombine.low %v521_v9, %v525_v49 }
 0x35d   :  { %7423 = vmatprep.subr.bf16.mxu0 %v10281_v12  ;;  %v389_v52 = vld [vmem:[%s15984_s1 + $0xb38] sm:$0xff] }
 0x35e   :  { %7383 = vmatpush1.bf16.msra.mxu1 %v10152_v11  ;;  %v10241_v13 = vcombine.high %v385_v20, %v389_v52  ;;  %v513_v1 = vld [vmem:[%s15984_s1 + $0xf18] sm:$0xff]  ;;  %v10240_v8 = vcombine.low %v385_v20, %v389_v52 }
 0x35f   :  { %7384 = vmatprep.subr.bf16.mxu1 %v10145_v60  ;;  %v517_v45 = vld [vmem:[%s15984_s1 + $0xf38] sm:$0xff] }
 0x360   :  { %7424 = vmatpush1.bf16.msra.mxu0 %v10280_v53  ;;  %v377_v4 = vld [vmem:[%s15984_s1 + $0xad8] sm:$0xff]  ;;  %v10369_v41 = vcombine.high %v513_v1, %v517_v45  ;;  %v10368_v29 = vcombine.low %v513_v1, %v517_v45 }
 0x361   :  { %7425 = vmatprep.subr.bf16.mxu0 %v10273_v23  ;;  %v381_v5 = vld [vmem:[%s15984_s1 + $0xaf8] sm:$0xff] }
 0x362   :  { %7385 = vmatpush1.bf16.msra.mxu1 %v10144_v19  ;;  %v10233_v22 = vcombine.high %v377_v4, %v381_v5  ;;  %v505_v11 = vld [vmem:[%s15984_s1 + $0xed8] sm:$0xff]  ;;  %v10232_v17 = vcombine.low %v377_v4, %v381_v5 }
 0x363   :  { %7386 = vmatprep.subr.bf16.mxu1 %v10265_v50  ;;  %v509_v12 = vld [vmem:[%s15984_s1 + $0xef8] sm:$0xff] }
 0x364   :  { %7426 = vmatpush1.bf16.msra.mxu0 %v10272_v7  ;;  %v369_v60 = vld [vmem:[%s15984_s1 + $0xa98] sm:$0xff]  ;;  %v10361_v30 = vcombine.high %v505_v11, %v509_v12  ;;  %v10360_v27 = vcombine.low %v505_v11, %v509_v12 }
 0x365   :  { %7427 = vmatprep.subr.bf16.mxu0 %v10393_v34  ;;  %v373_v16 = vld [vmem:[%s15984_s1 + $0xab8] sm:$0xff] }
 0x366   :  { %7387 = vmatpush2.bf16.msra.mxu1 %v10264_v63  ;;  %v10225_v53 = vcombine.high %v369_v60, %v373_v16  ;;  %v497_v19 = vld [vmem:[%s15984_s1 + $0xe98] sm:$0xff]  ;;  %v10224_v10 = vcombine.low %v369_v60, %v373_v16 }
 0x367   :  { %7388 = vmatprep.subr.bf16.mxu1 %v10257_v33  ;;  %v501_v23 = vld [vmem:[%s15984_s1 + $0xeb8] sm:$0xff] }
 0x368   :  { %7428 = vmatpush2.bf16.msra.mxu0 %v10392_v15  ;;  %v361_v50 = vld [vmem:[%s15984_s1 + $0xa58] sm:$0xff]  ;;  %v10353_v2 = vcombine.high %v497_v19, %v501_v23  ;;  %v10352_v36 = vcombine.low %v497_v19, %v501_v23 }
 0x369   :  { %7429 = vmatprep.subr.bf16.mxu0 %v10385_v42  ;;  %v365_v39 = vld [vmem:[%s15984_s1 + $0xa78] sm:$0xff] }
 0x36a   :  { %7389 = vmatpush2.bf16.msra.mxu1 %v10256_v40  ;;  %v10217_v7 = vcombine.high %v361_v50, %v365_v39  ;;  %v489_v63 = vld [vmem:[%s15984_s1 + $0xe58] sm:$0xff]  ;;  %v10216_v37 = vcombine.low %v361_v50, %v365_v39 }
 0x36b   :  { %7390 = vmatprep.subr.bf16.mxu1 %v10249_v46  ;;  %v493_v34 = vld [vmem:[%s15984_s1 + $0xe78] sm:$0xff] }
 0x36c   :  { %7430 = vmatpush2.bf16.msra.mxu0 %v10384_v54  ;;  %v353_v33 = vld [vmem:[%s15984_s1 + $0xa18] sm:$0xff]  ;;  %v10345_v38 = vcombine.high %v489_v63, %v493_v34  ;;  %v10344_v49 = vcombine.low %v489_v63, %v493_v34 }
 0x36d   :  { %7431 = vmatprep.subr.bf16.mxu0 %v10377_v0  ;;  %v357_v18 = vld [vmem:[%s15984_s1 + $0xa38] sm:$0xff] }
 0x36e   :  { %7391 = vmatpush2.bf16.msra.mxu1 %v10248_v62  ;;  %v10209_v15 = vcombine.high %v353_v33, %v357_v18  ;;  %v481_v40 = vld [vmem:[%s15984_s1 + $0xe18] sm:$0xff]  ;;  %v10208_v20 = vcombine.low %v353_v33, %v357_v18 }
 0x36f   :  { %7392 = vmatprep.subr.bf16.mxu1 %v10241_v13  ;;  %v485_v42 = vld [vmem:[%s15984_s1 + $0xe38] sm:$0xff] }
 0x370   :  { %7432 = vmatpush2.bf16.msra.mxu0 %v10376_v59  ;;  %v601_v46 = vld [vmem:[%s15984_s1 + $0x11d8] sm:$0xff]  ;;  %v10337_v52 = vcombine.high %v481_v40, %v485_v42  ;;  %v10336_v45 = vcombine.low %v481_v40, %v485_v42 }
 0x371   :  { %7433 = vmatprep.subr.bf16.mxu0 %v10369_v41  ;;  %v605_v9 = vld [vmem:[%s15984_s1 + $0x11f8] sm:$0xff] }
 0x372   :  { %7393 = vmatpush2.bf16.msra.mxu1 %v10240_v8  ;;  %v10457_v54 = vcombine.high %v601_v46, %v605_v9  ;;  %v729_v62 = vld [vmem:[%s15984_s1 + $0x15d8] sm:$0xff]  ;;  %v10456_v4 = vcombine.low %v601_v46, %v605_v9 }
 0x373   :  { %7394 = vmatprep.subr.bf16.mxu1 %v10233_v22  ;;  %v733_v0 = vld [vmem:[%s15984_s1 + $0x15f8] sm:$0xff] }
 0x374   :  { %7434 = vmatpush2.bf16.msra.mxu0 %v10368_v29  ;;  %v593_v13 = vld [vmem:[%s15984_s1 + $0x1198] sm:$0xff]  ;;  %v10585_v5 = vcombine.high %v729_v62, %v733_v0  ;;  %v10584_v12 = vcombine.low %v729_v62, %v733_v0 }
 0x375   :  { %7435 = vmatprep.subr.bf16.mxu0 %v10361_v30  ;;  %v597_v1 = vld [vmem:[%s15984_s1 + $0x11b8] sm:$0xff] }
 0x376   :  { %7395 = vmatpush2.bf16.msra.mxu1 %v10232_v17  ;;  %v10449_v59 = vcombine.high %v593_v13, %v597_v1  ;;  %v721_v8 = vld [vmem:[%s15984_s1 + $0x1598] sm:$0xff]  ;;  %v10448_v60 = vcombine.low %v593_v13, %v597_v1 }
 0x377   :  { %7396 = vmatprep.subr.bf16.mxu1 %v10225_v53  ;;  %v725_v41 = vld [vmem:[%s15984_s1 + $0x15b8] sm:$0xff] }
 0x378   :  { %7436 = vmatpush2.bf16.msra.mxu0 %v10360_v27  ;;  %v585_v22 = vld [vmem:[%s15984_s1 + $0x1158] sm:$0xff]  ;;  %v10577_v16 = vcombine.high %v721_v8, %v725_v41  ;;  %v10576_v39 = vcombine.low %v721_v8, %v725_v41 }
 0x379   :  { %7437 = vmatprep.subr.bf16.mxu0 %v10353_v2  ;;  %v589_v11 = vld [vmem:[%s15984_s1 + $0x1178] sm:$0xff] }
 0x37a   :  { %7397 = vmatpush2.bf16.msra.mxu1 %v10224_v10  ;;  %v10441_v29 = vcombine.high %v585_v22, %v589_v11  ;;  %v713_v17 = vld [vmem:[%s15984_s1 + $0x1558] sm:$0xff]  ;;  %v10440_v27 = vcombine.low %v585_v22, %v589_v11 }
 0x37b   :  { %7398 = vmatprep.subr.bf16.mxu1 %v10217_v7  ;;  %v717_v30 = vld [vmem:[%s15984_s1 + $0x1578] sm:$0xff] }
 0x37c   :  { %7438 = vmatpush2.bf16.msra.mxu0 %v10352_v36  ;;  %v581_v19 = vld [vmem:[%s15984_s1 + $0x1138] sm:$0xff] }
 0x37d   :  { %7439 = vmatprep.subr.bf16.mxu0 %v10345_v38  ;;  %v569_v33 = vld [vmem:[%s15984_s1 + $0x10d8] sm:$0xff] }
 0x37e   :  { %7399 = vmatpush2.bf16.msra.mxu1 %v10216_v37  ;;  %v10568_v37 = vcombine.low %v713_v17, %v717_v30  ;;  %v697_v9 = vld [vmem:[%s15984_s1 + $0x14d8] sm:$0xff] }
 0x37f   :  { %7400 = vmatprep.subr.bf16.mxu1 %v10209_v15  ;;  %v689_v1 = vld [vmem:[%s15984_s1 + $0x1498] sm:$0xff] }
 0x380   :  { %7440 = vmatpush2.bf16.msra.mxu0 %v10344_v49  ;;  %v701_v49 = vld [vmem:[%s15984_s1 + $0x14f8] sm:$0xff] }
 0x381   :  { %7441 = vmatprep.subr.bf16.mxu0 %v10337_v52  ;;  %v565_v52 = vld [vmem:[%s15984_s1 + $0x10b8] sm:$0xff]  ;;  %v10553_v0 = vcombine.high %v697_v9, %v701_v49 }
 0x382   :  { %7401 = vmatpush2.bf16.msra.mxu1 %v10208_v20  ;;  %v561_v20 = vld [vmem:[%s15984_s1 + $0x1098] sm:$0xff] }
 0x383   :  { %7452 = vmatprep.subr.bf16.mxu1 %v10457_v54  ;;  %v10417_v13 = vcombine.high %v561_v20, %v565_v52  ;;  %v10416_v8 = vcombine.low %v561_v20, %v565_v52  ;;  %v681_v11 = vld [vmem:[%s15984_s1 + $0x1458] sm:$0xff] }
 0x384   :  { %7442 = vmatpush2.bf16.msra.mxu0 %v10336_v45  ;;  %v693_v45 = vld [vmem:[%s15984_s1 + $0x14b8] sm:$0xff] }
 0x385   :  { %7403 = vmatmul.mubr.bf16.vlgmr.msra.gmra.mxu1 %v12184_v47  ;;  %7493 = vmatprep.subr.bf16.mxu0 %v10585_v5  ;;  %v577_v47 = vld [vmem:[%s15984_s1 + $0x1118] sm:$0xff]  ;;  %v10545_v41 = vcombine.high %v689_v1, %v693_v45 }
 0x386   :  { %7453 = vmatpush1.bf16.msra.mxu1 %v10456_v4  ;;  %7484 = vmatprep.mubr.bf16.mxu1 %v12199_v55  ;;  %v10433_v63 = vcombine.high %v577_v47, %v581_v19  ;;  %v10432_v15 = vcombine.low %v577_v47, %v581_v19  ;;  %v553_v4 = vld [vmem:[%s15984_s1 + $0x1058] sm:$0xff] }
 0x387   :  { %7454 = vmatprep.subr.bf16.mxu1 %v10449_v59  ;;  %v7158_v53 = vpop.f32.mrf.mxu0  ;;  %7444 = vmatmul.mubr.bf16.vlgmr.msra.gmra.mxu0 %v12203_v56  ;;  %v10569_v56 = vcombine.high %v713_v17, %v717_v30  ;;  %v557_v5 = vld [vmem:[%s15984_s1 + $0x1078] sm:$0xff]  ;;  %v10552_v59 = vcombine.low %v697_v9, %v701_v49 }
 0x388   :  { %v7159_v23 = vadd.f32 %v7158_v53, %v14480_v51  ;;  %7494 = vmatpush1.bf16.msra.mxu0 %v10584_v12  ;;  %7525 = vmatprep.mubr.bf16.mxu0 %v12220_v3  ;;  %v705_v51 = vld [vmem:[%s15984_s1 + $0x1518] sm:$0xff]  ;;  %v10409_v22 = vcombine.high %v553_v4, %v557_v5  ;;  %v10408_v17 = vcombine.low %v553_v4, %v557_v5 }
 0x389   :  { %v7199_v50 = vpop.f32.mrf.mxu1  ;;  %v7160_v55 = vpop.f32.mrf.mxu0  ;;  %7495 = vmatprep.subr.bf16.mxu0 %v10577_v16  ;;  %v709_v3 = vld [vmem:[%s15984_s1 + $0x1538] sm:$0xff] }
 0x38a   :  { %7455 = vmatpush1.bf16.msra.mxu1 %v10448_v60  ;;  %v14682_v10 = vadd.f32 %v7199_v50, %v7159_v23  ;;  %v7161_v2 = vadd.f32 %v7160_v55, %v14495_v28  ;;  %v573_v28 = vld [vmem:[%s15984_s1 + $0x10f8] sm:$0xff]  ;;  %v10561_v40 = vcombine.high %v705_v51, %v709_v3  ;;  %v10560_v54 = vcombine.low %v705_v51, %v709_v3 }
 0x38b   :  { %v7201_v7 = vpop.f32.mrf.mxu1  ;;  %7456 = vmatprep.subr.bf16.mxu1 %v10441_v29  ;;  %v7162_v34 = vpop.f32.mrf.mxu0  ;;  %v10425_v46 = vcombine.high %v569_v33, %v573_v28  ;;  %v10424_v62 = vcombine.low %v569_v33, %v573_v28  ;;  %v685_v12 = vld [vmem:[%s15984_s1 + $0x1478] sm:$0xff]  ;;  %v10544_v29 = vcombine.low %v689_v1, %v693_v45 }
 0x38c   :  { %v14697_v18 = vadd.f32 %v7201_v7, %v7161_v2  ;;  %7496 = vmatpush1.bf16.msra.mxu0 %v10576_v39  ;;  %v545_v60 = vld [vmem:[%s15984_s1 + $0x1018] sm:$0xff]  ;;  %v10537_v30 = vcombine.high %v681_v11, %v685_v12  ;;  %v10536_v39 = vcombine.low %v681_v11, %v685_v12 }
 0x38d   :  { %v7203_v36 = vpop.f32.mrf.mxu1  ;;  %v7163_v38 = vpop.f32.mrf.mxu0  ;;  %7497 = vmatprep.subr.bf16.mxu0 %v10569_v56  ;;  %v549_v16 = vld [vmem:[%s15984_s1 + $0x1038] sm:$0xff] }
 0x38e   :  { %7457 = vmatpush1.bf16.msra.mxu1 %v10440_v27  ;;  %v10401_v53 = vcombine.high %v545_v60, %v549_v16  ;;  %v673_v47 = vld [vmem:[%s15984_s1 + $0x1418] sm:$0xff]  ;;  %v10400_v55 = vcombine.low %v545_v60, %v549_v16 }
 0x38f   :  { %v7204_v42 = vpop.f32.mrf.mxu1  ;;  %7458 = vmatprep.subr.bf16.mxu1 %v10433_v63  ;;  %v677_v19 = vld [vmem:[%s15984_s1 + $0x1438] sm:$0xff] }
 0x390   :  { %7498 = vmatpush1.bf16.msra.mxu0 %v10568_v37  ;;  %v665_v23 = vld [vmem:[%s15984_s1 + $0x13d8] sm:$0xff]  ;;  %v10529_v27 = vcombine.high %v673_v47, %v677_v19  ;;  %v10528_v3 = vcombine.low %v673_v47, %v677_v19 }
 0x391   :  { %7499 = vmatprep.subr.bf16.mxu0 %v10561_v40  ;;  %v669_v50 = vld [vmem:[%s15984_s1 + $0x13f8] sm:$0xff] }
 0x392   :  { %7459 = vmatpush1.bf16.msra.mxu1 %v10432_v15  ;;  %v10521_v56 = vcombine.high %v665_v23, %v669_v50  ;;  %v793_v2 = vld [vmem:[%s15984_s1 + $0x17d8] sm:$0xff]  ;;  %v10520_v34 = vcombine.low %v665_v23, %v669_v50 }
 0x393   :  { %7460 = vmatprep.subr.bf16.mxu1 %v10425_v46  ;;  %v797_v7 = vld [vmem:[%s15984_s1 + $0x17f8] sm:$0xff] }
 0x394   :  { %7500 = vmatpush1.bf16.msra.mxu0 %v10560_v54  ;;  %v657_v63 = vld [vmem:[%s15984_s1 + $0x1398] sm:$0xff]  ;;  %v10649_v33 = vcombine.high %v793_v2, %v797_v7  ;;  %v10648_v40 = vcombine.low %v793_v2, %v797_v7 }
 0x395   :  { %7501 = vmatprep.subr.bf16.mxu0 %v10553_v0  ;;  %v661_v51 = vld [vmem:[%s15984_s1 + $0x13b8] sm:$0xff] }
 0x396   :  { %7461 = vmatpush1.bf16.msra.mxu1 %v10424_v62  ;;  %v10513_v28 = vcombine.high %v657_v63, %v661_v51  ;;  %v785_v36 = vld [vmem:[%s15984_s1 + $0x1798] sm:$0xff]  ;;  %v10512_v42 = vcombine.low %v657_v63, %v661_v51 }
 0x397   :  { %7462 = vmatprep.subr.bf16.mxu1 %v10417_v13  ;;  %v789_v37 = vld [vmem:[%s15984_s1 + $0x17b8] sm:$0xff] }
 0x398   :  { %7502 = vmatpush1.bf16.msra.mxu0 %v10552_v59  ;;  %v649_v38 = vld [vmem:[%s15984_s1 + $0x1358] sm:$0xff]  ;;  %v10641_v46 = vcombine.high %v785_v36, %v789_v37  ;;  %v10640_v62 = vcombine.low %v785_v36, %v789_v37 }
 0x399   :  { %7503 = vmatprep.subr.bf16.mxu0 %v10545_v41  ;;  %v653_v15 = vld [vmem:[%s15984_s1 + $0x1378] sm:$0xff] }
 0x39a   :  { %7463 = vmatpush1.bf16.msra.mxu1 %v10416_v8  ;;  %v10505_v9 = vcombine.high %v649_v38, %v653_v15  ;;  %v777_v49 = vld [vmem:[%s15984_s1 + $0x1758] sm:$0xff]  ;;  %v10504_v0 = vcombine.low %v649_v38, %v653_v15 }
 0x39b   :  { %7464 = vmatprep.subr.bf16.mxu1 %v10409_v22  ;;  %v781_v20 = vld [vmem:[%s15984_s1 + $0x1778] sm:$0xff] }
 0x39c   :  { %7504 = vmatpush1.bf16.msra.mxu0 %v10544_v29  ;;  %v641_v52 = vld [vmem:[%s15984_s1 + $0x1318] sm:$0xff]  ;;  %v10633_v13 = vcombine.high %v777_v49, %v781_v20  ;;  %v10632_v8 = vcombine.low %v777_v49, %v781_v20 }
 0x39d   :  { %7505 = vmatprep.subr.bf16.mxu0 %v10537_v30  ;;  %v645_v54 = vld [vmem:[%s15984_s1 + $0x1338] sm:$0xff] }
 0x39e   :  { %7465 = vmatpush1.bf16.msra.mxu1 %v10408_v17  ;;  %v10497_v1 = vcombine.high %v641_v52, %v645_v54  ;;  %v769_v45 = vld [vmem:[%s15984_s1 + $0x1718] sm:$0xff]  ;;  %v10496_v41 = vcombine.low %v641_v52, %v645_v54 }
 0x39f   :  { %7466 = vmatprep.subr.bf16.mxu1 %v10401_v53  ;;  %v773_v4 = vld [vmem:[%s15984_s1 + $0x1738] sm:$0xff] }
 0x3a0   :  { %7506 = vmatpush1.bf16.msra.mxu0 %v10536_v39  ;;  %v633_v5 = vld [vmem:[%s15984_s1 + $0x12d8] sm:$0xff]  ;;  %v10625_v22 = vcombine.high %v769_v45, %v773_v4  ;;  %v10624_v17 = vcombine.low %v769_v45, %v773_v4 }
 0x3a1   :  { %7507 = vmatprep.subr.bf16.mxu0 %v10529_v27  ;;  %v637_v59 = vld [vmem:[%s15984_s1 + $0x12f8] sm:$0xff] }
 0x3a2   :  { %7467 = vmatpush1.bf16.msra.mxu1 %v10400_v55  ;;  %v10489_v11 = vcombine.high %v633_v5, %v637_v59  ;;  %v761_v12 = vld [vmem:[%s15984_s1 + $0x16d8] sm:$0xff]  ;;  %v10488_v30 = vcombine.low %v633_v5, %v637_v59 }
 0x3a3   :  { %7468 = vmatprep.subr.bf16.mxu1 %v10521_v56  ;;  %v765_v60 = vld [vmem:[%s15984_s1 + $0x16f8] sm:$0xff] }
 0x3a4   :  { %7508 = vmatpush1.bf16.msra.mxu0 %v10528_v3  ;;  %v625_v16 = vld [vmem:[%s15984_s1 + $0x1298] sm:$0xff]  ;;  %v10617_v53 = vcombine.high %v761_v12, %v765_v60  ;;  %v10616_v55 = vcombine.low %v761_v12, %v765_v60 }
 0x3a5   :  { %7509 = vmatprep.subr.bf16.mxu0 %v10649_v33  ;;  %v629_v29 = vld [vmem:[%s15984_s1 + $0x12b8] sm:$0xff] }
 0x3a6   :  { %7469 = vmatpush2.bf16.msra.mxu1 %v10520_v34  ;;  %v10481_v47 = vcombine.high %v625_v16, %v629_v29  ;;  %v753_v19 = vld [vmem:[%s15984_s1 + $0x1698] sm:$0xff]  ;;  %v10480_v27 = vcombine.low %v625_v16, %v629_v29 }
 0x3a7   :  { %7470 = vmatprep.subr.bf16.mxu1 %v10513_v28  ;;  %v757_v23 = vld [vmem:[%s15984_s1 + $0x16b8] sm:$0xff] }
 0x3a8   :  { %7510 = vmatpush2.bf16.msra.mxu0 %v10648_v40  ;;  %v617_v50 = vld [vmem:[%s15984_s1 + $0x1258] sm:$0xff]  ;;  %v10609_v56 = vcombine.high %v753_v19, %v757_v23  ;;  %v10608_v34 = vcombine.low %v753_v19, %v757_v23 }
 0x3a9   :  { %7511 = vmatprep.subr.bf16.mxu0 %v10641_v46  ;;  %v621_v39 = vld [vmem:[%s15984_s1 + $0x1278] sm:$0xff] }
 0x3aa   :  { %7471 = vmatpush2.bf16.msra.mxu1 %v10512_v42  ;;  %v10473_v2 = vcombine.high %v617_v50, %v621_v39  ;;  %v745_v7 = vld [vmem:[%s15984_s1 + $0x1658] sm:$0xff]  ;;  %v10472_v33 = vcombine.low %v617_v50, %v621_v39 }
 0x3ab   :  { %7472 = vmatprep.subr.bf16.mxu1 %v10505_v9  ;;  %v749_v63 = vld [vmem:[%s15984_s1 + $0x1678] sm:$0xff] }
 0x3ac   :  { %7512 = vmatpush2.bf16.msra.mxu0 %v10640_v62  ;;  %v609_v51 = vld [vmem:[%s15984_s1 + $0x1218] sm:$0xff]  ;;  %v10601_v28 = vcombine.high %v745_v7, %v749_v63  ;;  %v10600_v42 = vcombine.low %v745_v7, %v749_v63 }
 0x3ad   :  { %7513 = vmatprep.subr.bf16.mxu0 %v10633_v13  ;;  %v613_v3 = vld [vmem:[%s15984_s1 + $0x1238] sm:$0xff] }
 0x3ae   :  { %7473 = vmatpush2.bf16.msra.mxu1 %v10504_v0  ;;  %v10465_v36 = vcombine.high %v609_v51, %v613_v3  ;;  %v737_v37 = vld [vmem:[%s15984_s1 + $0x1618] sm:$0xff]  ;;  %v10464_v46 = vcombine.low %v609_v51, %v613_v3 }
 0x3af   :  { %7474 = vmatprep.subr.bf16.mxu1 %v10497_v1  ;;  %v741_v38 = vld [vmem:[%s15984_s1 + $0x1638] sm:$0xff] }
 0x3b0   :  { %7514 = vmatpush2.bf16.msra.mxu0 %v10632_v8  ;;  %v857_v15 = vld [vmem:[%s15984_s1 + $0x19d8] sm:$0xff]  ;;  %v10593_v9 = vcombine.high %v737_v37, %v741_v38  ;;  %v10592_v0 = vcombine.low %v737_v37, %v741_v38 }
 0x3b1   :  { %7515 = vmatprep.subr.bf16.mxu0 %v10625_v22  ;;  %v861_v40 = vld [vmem:[%s15984_s1 + $0x19f8] sm:$0xff] }
 0x3b2   :  { %7475 = vmatpush2.bf16.msra.mxu1 %v10496_v41  ;;  %v10713_v49 = vcombine.high %v857_v15, %v861_v40  ;;  %v985_v20 = vld [vmem:[%s15984_s1 + $0x1dd8] sm:$0xff]  ;;  %v10712_v13 = vcombine.low %v857_v15, %v861_v40 }
 0x3b3   :  { %7476 = vmatprep.subr.bf16.mxu1 %v10489_v11  ;;  %v989_v52 = vld [vmem:[%s15984_s1 + $0x1df8] sm:$0xff] }
 0x3b4   :  { %7516 = vmatpush2.bf16.msra.mxu0 %v10624_v17  ;;  %v849_v54 = vld [vmem:[%s15984_s1 + $0x1998] sm:$0xff]  ;;  %v10841_v1 = vcombine.high %v985_v20, %v989_v52  ;;  %v10840_v22 = vcombine.low %v985_v20, %v989_v52 }
 0x3b5   :  { %7517 = vmatprep.subr.bf16.mxu0 %v10617_v53  ;;  %v853_v62 = vld [vmem:[%s15984_s1 + $0x19b8] sm:$0xff] }
 0x3b6   :  { %7477 = vmatpush2.bf16.msra.mxu1 %v10488_v30  ;;  %v10705_v45 = vcombine.high %v849_v54, %v853_v62  ;;  %v977_v4 = vld [vmem:[%s15984_s1 + $0x1d98] sm:$0xff]  ;;  %v10704_v11 = vcombine.low %v849_v54, %v853_v62 }
 0x3b7   :  { %7478 = vmatprep.subr.bf16.mxu1 %v10481_v47  ;;  %v981_v5 = vld [vmem:[%s15984_s1 + $0x1db8] sm:$0xff] }
 0x3b8   :  { %7518 = vmatpush2.bf16.msra.mxu0 %v10616_v55  ;;  %v841_v59 = vld [vmem:[%s15984_s1 + $0x1958] sm:$0xff]  ;;  %v10833_v12 = vcombine.high %v977_v4, %v981_v5  ;;  %v10832_v23 = vcombine.low %v977_v4, %v981_v5 }
 0x3b9   :  { %7519 = vmatprep.subr.bf16.mxu0 %v10609_v56  ;;  %v845_v8 = vld [vmem:[%s15984_s1 + $0x1978] sm:$0xff] }
 0x3ba   :  { %7479 = vmatpush2.bf16.msra.mxu1 %v10480_v27  ;;  %v10697_v16 = vcombine.high %v841_v59, %v845_v8  ;;  %v969_v29 = vld [vmem:[%s15984_s1 + $0x1d58] sm:$0xff]  ;;  %v10696_v50 = vcombine.low %v841_v59, %v845_v8 }
 0x3bb   :  { %7480 = vmatprep.subr.bf16.mxu1 %v10473_v2  ;;  %v973_v17 = vld [vmem:[%s15984_s1 + $0x1d78] sm:$0xff] }
 0x3bc   :  { %7520 = vmatpush2.bf16.msra.mxu0 %v10608_v34  ;;  %v833_v30 = vld [vmem:[%s15984_s1 + $0x1918] sm:$0xff]  ;;  %v10824_v51 = vcombine.low %v969_v29, %v973_v17 }
 0x3bd   :  { %7521 = vmatprep.subr.bf16.mxu0 %v10601_v28  ;;  %v837_v53 = vld [vmem:[%s15984_s1 + $0x1938] sm:$0xff] }
 0x3be   :  { %7481 = vmatpush2.bf16.msra.mxu1 %v10472_v33  ;;  %v10689_v56 = vcombine.high %v833_v30, %v837_v53  ;;  %v825_v7 = vld [vmem:[%s15984_s1 + $0x18d8] sm:$0xff]  ;;  %v10688_v34 = vcombine.low %v833_v30, %v837_v53 }
 0x3bf   :  { %7482 = vmatprep.subr.bf16.mxu1 %v10465_v36  ;;  %v953_v36 = vld [vmem:[%s15984_s1 + $0x1cd8] sm:$0xff] }
 0x3c0   :  { %7522 = vmatpush2.bf16.msra.mxu0 %v10600_v42  ;;  %v957_v37 = vld [vmem:[%s15984_s1 + $0x1cf8] sm:$0xff] }
 0x3c1   :  { %7523 = vmatprep.subr.bf16.mxu0 %v10593_v9  ;;  %v817_v38 = vld [vmem:[%s15984_s1 + $0x1898] sm:$0xff]  ;;  %v10808_v62 = vcombine.low %v953_v36, %v957_v37 }
 0x3c2   :  { %7483 = vmatpush2.bf16.msra.mxu1 %v10464_v46  ;;  %v821_v15 = vld [vmem:[%s15984_s1 + $0x18b8] sm:$0xff]  ;;  %v10809_v46 = vcombine.high %v953_v36, %v957_v37 }
 0x3c3   :  { %7534 = vmatprep.subr.bf16.mxu1 %v10713_v49  ;;  %v10673_v9 = vcombine.high %v817_v38, %v821_v15  ;;  %v945_v49 = vld [vmem:[%s15984_s1 + $0x1c98] sm:$0xff] }
 0x3c4   :  { %7524 = vmatpush2.bf16.msra.mxu0 %v10592_v0  ;;  %v949_v20 = vld [vmem:[%s15984_s1 + $0x1cb8] sm:$0xff]  ;;  %v10672_v0 = vcombine.low %v817_v38, %v821_v15 }
 0x3c5   :  { %v7281_v41 = vpop.f32.mrf.mxu1  ;;  %7485 = vmatmul.mubr.bf16.vlgmr.msra.gmra.mxu1 %v12402_v21  ;;  %7575 = vmatprep.subr.bf16.mxu0 %v10841_v1  ;;  %v809_v52 = vld [vmem:[%s15984_s1 + $0x1858] sm:$0xff]  ;;  %v10800_v8 = vcombine.low %v945_v49, %v949_v20 }
 0x3c6   :  { %7535 = vmatpush1.bf16.msra.mxu1 %v10712_v13  ;;  %7566 = vmatprep.mubr.bf16.mxu1 %v12417_v31  ;;  %v813_v54 = vld [vmem:[%s15984_s1 + $0x1878] sm:$0xff]  ;;  %v10801_v13 = vcombine.high %v945_v49, %v949_v20 }
 0x3c7   :  { %v7283_v60 = vpop.f32.mrf.mxu1  ;;  %7536 = vmatprep.subr.bf16.mxu1 %v10705_v45  ;;  %v7240_v21 = vpop.f32.mrf.mxu0  ;;  %7526 = vmatmul.mubr.bf16.vlgmr.msra.gmra.mxu0 %v12421_v32  ;;  %v10825_v32 = vcombine.high %v969_v29, %v973_v17  ;;  %v10665_v1 = vcombine.high %v809_v52, %v813_v54  ;;  %v937_v45 = vld [vmem:[%s15984_s1 + $0x1c58] sm:$0xff] }
 0x3c8   :  { %v7241_v47 = vadd.f32 %v7240_v21, %v14682_v10  ;;  %7576 = vmatpush1.bf16.msra.mxu0 %v10840_v22  ;;  %10905 = vmatprep.mubr.msk.bf16.mxu0 %vm6275_vm0, %v12437_v44  ;;  %v961_v10 = vld [vmem:[%s15984_s1 + $0x1d18] sm:$0xff] }
 0x3c9   :  { %v7285_v19 = vpop.f32.mrf.mxu1  ;;  %v7242_v31 = vpop.f32.mrf.mxu0  ;;  %7577 = vmatprep.subr.bf16.mxu0 %v10833_v12  ;;  %v965_v44 = vld [vmem:[%s15984_s1 + $0x1d38] sm:$0xff] }
 0x3ca   :  { %7537 = vmatpush1.bf16.msra.mxu1 %v10704_v11  ;;  %v14885_v39 = vadd.f32 %v7281_v41, %v7241_v47  ;;  %v7243_v55 = vadd.f32 %v7242_v31, %v14697_v18  ;;  %v829_v18 = vld [vmem:[%s15984_s1 + $0x18f8] sm:$0xff]  ;;  %v10817_v33 = vcombine.high %v961_v10, %v965_v44  ;;  %v10816_v40 = vcombine.low %v961_v10, %v965_v44 }
 0x3cb   :  { %v7286_v27 = vpop.f32.mrf.mxu1  ;;  %7538 = vmatprep.subr.bf16.mxu1 %v10697_v16  ;;  %v7244_v2 = vpop.f32.mrf.mxu0  ;;  %v10681_v28 = vcombine.high %v825_v7, %v829_v18  ;;  %v10680_v42 = vcombine.low %v825_v7, %v829_v18  ;;  %v941_v4 = vld [vmem:[%s15984_s1 + $0x1c78] sm:$0xff]  ;;  %v10664_v41 = vcombine.low %v809_v52, %v813_v54 }
 0x3cc   :  { %v14900_v63 = vadd.f32 %v7283_v60, %v7243_v55  ;;  %7578 = vmatpush1.bf16.msra.mxu0 %v10832_v23  ;;  %v801_v5 = vld [vmem:[%s15984_s1 + $0x1818] sm:$0xff]  ;;  %v10793_v22 = vcombine.high %v937_v45, %v941_v4  ;;  %v10792_v17 = vcombine.low %v937_v45, %v941_v4 }
 0x3cd   :  { %v7245_v3 = vpop.f32.mrf.mxu0  ;;  %7579 = vmatprep.subr.bf16.mxu0 %v10825_v32  ;;  %v805_v59 = vld [vmem:[%s15984_s1 + $0x1838] sm:$0xff] }
 0x3ce   :  { %7539 = vmatpush1.bf16.msra.mxu1 %v10696_v50  ;;  %v10657_v11 = vcombine.high %v801_v5, %v805_v59  ;;  %v929_v12 = vld [vmem:[%s15984_s1 + $0x1c18] sm:$0xff]  ;;  %v10656_v21 = vcombine.low %v801_v5, %v805_v59 }
 0x3cf   :  { %7540 = vmatprep.subr.bf16.mxu1 %v10689_v56  ;;  %v933_v60 = vld [vmem:[%s15984_s1 + $0x1c38] sm:$0xff] }
 0x3d0   :  { %7580 = vmatpush1.bf16.msra.mxu0 %v10824_v51  ;;  %v921_v16 = vld [vmem:[%s15984_s1 + $0x1bd8] sm:$0xff]  ;;  %v10785_v30 = vcombine.high %v929_v12, %v933_v60  ;;  %v10784_v50 = vcombine.low %v929_v12, %v933_v60 }
 0x3d1   :  { %7581 = vmatprep.subr.bf16.mxu0 %v10817_v33  ;;  %v925_v29 = vld [vmem:[%s15984_s1 + $0x1bf8] sm:$0xff] }
 0x3d2   :  { %7541 = vmatpush1.bf16.msra.mxu1 %v10688_v34  ;;  %v10777_v53 = vcombine.high %v921_v16, %v925_v29  ;;  %v1041_v47 = vld [vmem:[%s15984_s1 + $0x1f98] sm:$0xff]  ;;  %v10776_v32 = vcombine.low %v921_v16, %v925_v29 }
 0x3d3   :  { %7542 = vmatprep.subr.bf16.mxu1 %v10681_v28  ;;  %v1045_v19 = vld [vmem:[%s15984_s1 + $0x1fb8] sm:$0x33] }
 0x3d4   :  { %7582 = vmatpush1.bf16.msra.mxu0 %v10816_v40  ;;  %v913_v23 = vld [vmem:[%s15984_s1 + $0x1b98] sm:$0xff]  ;;  %v10897_v55 = vcombine.high %v1041_v47, %v1045_v19  ;;  %v10896_v27 = vcombine.low %v1041_v47, %v1045_v19 }
 0x3d5   :  { %7583 = vmatprep.subr.bf16.mxu0 %v10809_v46  ;;  %v917_v31 = vld [vmem:[%s15984_s1 + $0x1bb8] sm:$0xff] }
 0x3d6   :  { %7543 = vmatpush1.bf16.msra.mxu1 %v10680_v42  ;;  %v10769_v56 = vcombine.high %v913_v23, %v917_v31  ;;  %v1033_v10 = vld [vmem:[%s15984_s1 + $0x1f58] sm:$0xff]  ;;  %v10768_v18 = vcombine.low %v913_v23, %v917_v31  ;;  %v6299_v51 = vsel %vm6279_vm1, %v10896_v27, 0 }
 0x3d7   :  { %7544 = vmatprep.subr.bf16.mxu1 %v10673_v9  ;;  %v1037_v44 = vld [vmem:[%s15984_s1 + $0x1f78] sm:$0xff] }
 0x3d8   :  { %7584 = vmatpush1.bf16.msra.mxu0 %v10808_v62  ;;  %v905_v2 = vld [vmem:[%s15984_s1 + $0x1b58] sm:$0xff]  ;;  %v10889_v3 = vcombine.high %v1033_v10, %v1037_v44  ;;  %v10888_v38 = vcombine.low %v1033_v10, %v1037_v44  ;;  %v11247_v10 = vld [vmem:[%s15986_s3 + $0xe4] ss:$16 sps:$4 sm:$0xff]  }
 0x3d9   :  { %7585 = vmatprep.subr.bf16.mxu0 %v10801_v13  ;;  %v909_v7 = vld [vmem:[%s15984_s1 + $0x1b78] sm:$0xff]  ;;  %v11250_v44 = vld [vmem:[%s15986_s3 + $0x2e4] ss:$16 sps:$4 sm:$0xff]  }
 0x3da   :  { %7545 = vmatpush1.bf16.msra.mxu1 %v10672_v0  ;;  %v10761_v34 = vcombine.high %v905_v2, %v909_v7  ;;  %v1025_v33 = vld [vmem:[%s15984_s1 + $0x1f18] sm:$0xff]  ;;  %v10760_v15 = vcombine.low %v905_v2, %v909_v7  ;;  %v7617_v2 = vmax.f32 %v13280_v35, 0.0  ;;  %v7619_v7 = vmax.f32 %v14086_v26, 0.0  ;;  %v11248_v35 = vld [vmem:[%s15986_s3 + $0x2e0] ss:$16 sps:$4 sm:$0xff]  }
 0x3db   :  { %7546 = vmatprep.subr.bf16.mxu1 %v10665_v1  ;;  %v1029_v28 = vld [vmem:[%s15984_s1 + $0x1f38] sm:$0xff]  ;;  %v11253_v26 = vld [vmem:[%s15986_s3 + $0xc4] ss:$16 sps:$4 sm:$0xff]  }
 0x3dc   :  { %7586 = vmatpush1.bf16.msra.mxu0 %v10800_v8  ;;  %v897_v36 = vld [vmem:[%s15984_s1 + $0x1b18] sm:$0xff]  ;;  %v10881_v40 = vcombine.high %v1025_v33, %v1029_v28  ;;  %v10880_v52 = vcombine.low %v1025_v33, %v1029_v28  ;;  %v15058_v33 = vpack.c.bf16 %v7617_v2, %v7617_v2  ;;  %v11256_v28 = vld [vmem:[%s15986_s3 + $0x2c4] ss:$16 sps:$4 sm:$0xff]  }
 0x3dd   :  { %7587 = vmatprep.subr.bf16.mxu0 %v10793_v22  ;;  %v901_v37 = vld [vmem:[%s15984_s1 + $0x1b38] sm:$0xff]  ;;  %v11304_v2 = vld [vmem:[%s15986_s3 + $0x3c4] ss:$16 sps:$4 sm:$0xff]  }
 0x3de   :  { %7547 = vmatpush1.bf16.msra.mxu1 %v10664_v41  ;;  %v10753_v42 = vcombine.high %v897_v36, %v901_v37  ;;  %v1017_v46 = vld [vmem:[%s15984_s1 + $0x1ed8] sm:$0xff]  ;;  %v10752_v54 = vcombine.low %v897_v36, %v901_v37  ;;  %v15064_v36 = vpack.c.bf16 %v7619_v7, %v7619_v7  ;;  %v11299_v7 = vld [vmem:[%s15986_s3 + $0x1c0] ss:$16 sps:$4 sm:$0xff]  }
 0x3df   :  { %7548 = vmatprep.subr.bf16.mxu1 %v10657_v11  ;;  %v1021_v9 = vld [vmem:[%s15984_s1 + $0x1ef8] sm:$0xff] }
 0x3e0   :  { %7588 = vmatpush1.bf16.msra.mxu0 %v10792_v17  ;;  %v889_v49 = vld [vmem:[%s15984_s1 + $0x1ad8] sm:$0xff]  ;;  %v10873_v62 = vcombine.high %v1017_v46, %v1021_v9  ;;  %v10872_v5 = vcombine.low %v1017_v46, %v1021_v9  ;;  %v11262_v46 = vld [vmem:[%s15986_s3 + $0x2a4] ss:$16 sps:$4 sm:$0xff]  }
 0x3e1   :  { %7589 = vmatprep.subr.bf16.mxu0 %v10785_v30  ;;  %v893_v20 = vld [vmem:[%s15984_s1 + $0x1af8] sm:$0xff] }
 0x3e2   :  { %7549 = vmatpush1.bf16.msra.mxu1 %v10656_v21  ;;  %v10745_v0 = vcombine.high %v889_v49, %v893_v20  ;;  %v1009_v13 = vld [vmem:[%s15984_s1 + $0x1e98] sm:$0xff]  ;;  %v10744_v59 = vcombine.low %v889_v49, %v893_v20 }
 0x3e3   :  { %7550 = vmatprep.subr.bf16.mxu1 %v10777_v53  ;;  %v1013_v1 = vld [vmem:[%s15984_s1 + $0x1eb8] sm:$0xff] }
 0x3e4   :  { %7590 = vmatpush1.bf16.msra.mxu0 %v10784_v50  ;;  %v881_v45 = vld [vmem:[%s15984_s1 + $0x1a98] sm:$0xff]  ;;  %v10865_v8 = vcombine.high %v1009_v13, %v1013_v1  ;;  %v10864_v16 = vcombine.low %v1009_v13, %v1013_v1  ;;  %v11265_v13 = vld [vmem:[%s15986_s3 + $0x84] ss:$16 sps:$4 sm:$0xff]  }
 0x3e5   :  { %10904 = vmatprep.subr.msk.bf16.mxu0 %vm6279_vm1, %v10897_v55  ;;  %v885_v4 = vld [vmem:[%s15984_s1 + $0x1ab8] sm:$0xff] }
 0x3e6   :  { %7551 = vmatpush2.bf16.msra.mxu1 %v10776_v32  ;;  %v10737_v41 = vcombine.high %v881_v45, %v885_v4  ;;  %v1001_v22 = vld [vmem:[%s15984_s1 + $0x1e58] sm:$0xff]  ;;  %v10736_v29 = vcombine.low %v881_v45, %v885_v4  ;;  %v11268_v4 = vld [vmem:[%s15986_s3 + $0x284] ss:$16 sps:$4 sm:$0xff]  }
 0x3e7   :  { %7552 = vmatprep.subr.bf16.mxu1 %v10769_v56  ;;  %v1005_v11 = vld [vmem:[%s15984_s1 + $0x1e78] sm:$0xff]  ;;  %v1074_v56 = vsub.s32 6, %v11790_v43 }
 0x3e8   :  { %7594 = vmatpush2.bf16.msra.mxu0 %v6299_v51  ;;  %v873_v12 = vld [vmem:[%s15984_s1 + $0x1a58] sm:$0xff]  ;;  %v10857_v17 = vcombine.high %v1001_v22, %v1005_v11  ;;  %v10856_v23 = vcombine.low %v1001_v22, %v1005_v11  ;;  %v1078_v51 = vsub.s32 7, %v11790_v43  ;;  %v11271_v22 = vld [vmem:[%s15986_s3 + $0x64] ss:$16 sps:$4 sm:$0xff]  }
 0x3e9   :  { %7595 = vmatprep.subr.bf16.mxu0 %v10889_v3  ;;  %v877_v60 = vld [vmem:[%s15984_s1 + $0x1a78] sm:$0xff]  ;;  %v11659_v3 = vld [vmem:[%s15985_s2] sm:$0xff] }
 0x3ea   :  { %7553 = vmatpush2.bf16.msra.mxu1 %v10768_v18  ;;  %v10729_v21 = vcombine.high %v873_v12, %v877_v60  ;;  %v993_v30 = vld [vmem:[%s15984_s1 + $0x1e18] sm:$0xff]  ;;  %v10728_v31 = vcombine.low %v873_v12, %v877_v60  ;;  %v11245_v18 = vld [vmem:[%s15986_s3 + $0xe0] ss:$16 sps:$4 sm:$0xff]   ;;  %v11274_v11 = vld [vmem:[%s15986_s3 + $0x264] ss:$16 sps:$4 sm:$0xff]  }
 0x3eb   :  { %7554 = vmatprep.subr.bf16.mxu1 %v10761_v34  ;;  %v997_v53 = vld [vmem:[%s15984_s1 + $0x1e38] sm:$0xff]  ;;  %v1075_v34 = vrot.slane %v11659_v3, %v1074_v56  ;;  %v11269_v12 = vld [vmem:[%s15986_s3 + $0x60] ss:$16 sps:$4 sm:$0xff]  }
 0x3ec   :  { %7596 = vmatpush2.bf16.msra.mxu0 %v10888_v38  ;;  %v865_v47 = vld [vmem:[%s15984_s1 + $0x1a18] sm:$0xff]  ;;  %v10849_v50 = vcombine.high %v993_v30, %v997_v53  ;;  %v10848_v55 = vcombine.low %v993_v30, %v997_v53  ;;  %v1079_v38 = vrot.slane %v11659_v3, %v1078_v51  ;;  %v11272_v60 = vld [vmem:[%s15986_s3 + $0x260] ss:$16 sps:$4 sm:$0xff]   ;;  %v11283_v30 = vld [vmem:[%s15986_s3 + $0x24] ss:$16 sps:$4 sm:$0xff]  }
 0x3ed   :  { %7597 = vmatprep.subr.bf16.mxu0 %v10881_v40  ;;  %v869_v19 = vld [vmem:[%s15984_s1 + $0x1a38] sm:$0xff]  ;;  %v11286_v53 = vld [vmem:[%s15986_s3 + $0x224] ss:$16 sps:$4 sm:$0xff]   ;;  %v11293_v56 = vld [vmem:[%s15986_s3 + $0x1e0] ss:$16 sps:$4 sm:$0xff]  }
 0x3ee   :  { %7555 = vmatpush2.bf16.msra.mxu1 %v10760_v15  ;;  %v10721_v32 = vcombine.high %v865_v47, %v869_v19  ;;  %v10720_v27 = vcombine.low %v865_v47, %v869_v19  ;;  %v11251_v15 = vld [vmem:[%s15986_s3 + $0xc0] ss:$16 sps:$4 sm:$0xff]   ;;  %v11307_v51 = vld [vmem:[%s15986_s3 + $0x1a4] ss:$16 sps:$4 sm:$0xff]  }
 0x3ef   :  { %7556 = vmatprep.subr.bf16.mxu1 %v10753_v42  ;;  %v11259_v42 = vld [vmem:[%s15986_s3 + $0xa4] ss:$16 sps:$4 sm:$0xff]   ;;  %v11281_v47 = vld [vmem:[%s15986_s3 + $0x20] ss:$16 sps:$4 sm:$0xff]  }
 0x3f0   :  { %7598 = vmatpush2.bf16.msra.mxu0 %v10880_v52  ;;  %v11284_v19 = vld [vmem:[%s15986_s3 + $0x220] ss:$16 sps:$4 sm:$0xff]   ;;  %v11310_v3 = vld [vmem:[%s15986_s3 + $0x3a4] ss:$16 sps:$4 sm:$0xff]  }
 0x3f1   :  { %7599 = vmatprep.subr.bf16.mxu0 %v10873_v62 }
 0x3f2   :  { %7557 = vmatpush2.bf16.msra.mxu1 %v10752_v54  ;;  %v11257_v54 = vld [vmem:[%s15986_s3 + $0xa0] ss:$16 sps:$4 sm:$0xff]  }
 0x3f3   :  { %7558 = vmatprep.subr.bf16.mxu1 %v10745_v0  ;;  %v11260_v0 = vld [vmem:[%s15986_s3 + $0x2a0] ss:$16 sps:$4 sm:$0xff]  }
 0x3f4   :  { %7600 = vmatpush2.bf16.msra.mxu0 %v10872_v5 }
 0x3f5   :  { %7601 = vmatprep.subr.bf16.mxu0 %v10865_v8 }
 0x3f6   :  { %7559 = vmatpush2.bf16.msra.mxu1 %v10744_v59  ;;  %v11263_v59 = vld [vmem:[%s15986_s3 + $0x80] ss:$16 sps:$4 sm:$0xff]  }
 0x3f7   :  { %7560 = vmatprep.subr.bf16.mxu1 %v10737_v41  ;;  %v11266_v41 = vld [vmem:[%s15986_s3 + $0x280] ss:$16 sps:$4 sm:$0xff]  }
 0x3f8   :  { %7602 = vmatpush2.bf16.msra.mxu0 %v10864_v16  ;;  %v11277_v16 = vld [vmem:[%s15986_s3 + $0x44] ss:$16 sps:$4 sm:$0xff]  }
 0x3f9   :  { %7603 = vmatprep.subr.bf16.mxu0 %v10857_v17  ;;  %v11275_v17 = vld [vmem:[%s15986_s3 + $0x40] ss:$16 sps:$4 sm:$0xff]  }
 0x3fa   :  { %7561 = vmatpush2.bf16.msra.mxu1 %v10736_v29  ;;  %v11280_v29 = vld [vmem:[%s15986_s3 + $0x244] ss:$16 sps:$4 sm:$0xff]  }
 0x3fb   :  { %7562 = vmatprep.subr.bf16.mxu1 %v10729_v21  ;;  %v11278_v21 = vld [vmem:[%s15986_s3 + $0x240] ss:$16 sps:$4 sm:$0xff]  }
 0x3fc   :  { %7604 = vmatpush2.bf16.msra.mxu0 %v10856_v23  ;;  %v11289_v23 = vld [vmem:[%s15986_s3 + $0x4] ss:$16 sps:$4 sm:$0xff]  }
 0x3fd   :  { %7605 = vmatprep.subr.bf16.mxu0 %v10849_v50  ;;  %v11287_v50 = vld [vmem:[%s15986_s3] ss:$16 sps:$4 sm:$0xff]  }
 0x3fe   :  { %7563 = vmatpush2.bf16.msra.mxu1 %v10728_v31  ;;  %v11292_v31 = vld [vmem:[%s15986_s3 + $0x204] ss:$16 sps:$4 sm:$0xff]  }
 0x3ff   :  { %7564 = vmatprep.subr.bf16.mxu1 %v10721_v32  ;;  %v11290_v32 = vld [vmem:[%s15986_s3 + $0x200] ss:$16 sps:$4 sm:$0xff]  }
 0x400   :  { %7606 = vmatpush2.bf16.msra.mxu0 %v10848_v55  ;;  %v11295_v55 = vld [vmem:[%s15986_s3 + $0x1e4] ss:$16 sps:$4 sm:$0xff]  }
 0x401   :  { %9171 = vmatprep.subr.bf16.mxu0 %v11247_v10  ;;  %v11296_v10 = vld [vmem:[%s15986_s3 + $0x3e0] ss:$16 sps:$4 sm:$0xff]  }
 0x402   :  { %7565 = vmatpush2.bf16.msra.mxu1 %v10720_v27  ;;  %v11298_v27 = vld [vmem:[%s15986_s3 + $0x3e4] ss:$16 sps:$4 sm:$0xff]  }
 0x403   :  { %9212 = vmatprep.subr.bf16.mxu1 %v11250_v44  ;;  %7608 = vmatmul.mubr.bf16.vlgmr.msra.gmra.mxu0 %v12620_v6  ;;  %v11254_v6 = vld [vmem:[%s15986_s3 + $0x2c0] ss:$16 sps:$4 sm:$0xff]   ;;  %v11301_v44 = vld [vmem:[%s15986_s3 + $0x1c4] ss:$16 sps:$4 sm:$0xff]  }
 0x404   :  { %9172 = vmatpush1.bf16.msra.mxu0 %v11245_v18  ;;  %9203 = vmatprep.mubr.bf16.mxu0 %v15058_v33  ;;  %v11302_v18 = vld [vmem:[%s15986_s3 + $0x3c0] ss:$16 sps:$4 sm:$0xff]  }
 0x405   :  { %v7322_v37 = vpop.f32.mrf.mxu1  ;;  %7567 = vmatmul.mubr.bf16.vlgmr.msra.gmra.mxu1 %v12604_v61  ;;  %9173 = vmatprep.subr.bf16.mxu0 %v11253_v26  ;;  %v11313_v26 = vld [vmem:[%s15986_s3 + $0x184] ss:$16 sps:$4 sm:$0xff]  }
 0x406   :  { %v7323_v40 = vadd.f32 %v7322_v37, %v1075_v34  ;;  %9213 = vmatpush1.bf16.msra.mxu1 %v11248_v35  ;;  %9244 = vmatprep.mubr.bf16.mxu1 %v15064_v36  ;;  %v11305_v34 = vld [vmem:[%s15986_s3 + $0x1a0] ss:$16 sps:$4 sm:$0xff]  }
 0x407   :  { %v7324_v61 = vpop.f32.mrf.mxu1  ;;  %v7363_v9 = vpop.f32.mrf.mxu0  ;;  %9214 = vmatprep.subr.bf16.mxu1 %v11256_v28  ;;  %v11308_v35 = vld [vmem:[%s15986_s3 + $0x3a0] ss:$16 sps:$4 sm:$0xff]   ;;  %v11316_v28 = vld [vmem:[%s15986_s3 + $0x384] ss:$16 sps:$4 sm:$0xff]  }
 0x408   :  { %v7325_v49 = vadd.f32 %v7324_v61, %v1079_v38  ;;  %v15081_v52 = vadd.f32 %v7363_v9, %v7323_v40  ;;  %9174 = vmatpush1.bf16.msra.mxu0 %v11251_v15  ;;  %v11311_v37 = vld [vmem:[%s15986_s3 + $0x180] ss:$16 sps:$4 sm:$0xff]   ;;  %v11319_v15 = vld [vmem:[%s15986_s3 + $0x164] ss:$16 sps:$4 sm:$0xff]  }
 0x409   :  { %v7326_v20 = vpop.f32.mrf.mxu1  ;;  %v7365_v62 = vpop.f32.mrf.mxu0  ;;  %9175 = vmatprep.subr.bf16.mxu0 %v11259_v42  ;;  %v11314_v38 = vld [vmem:[%s15986_s3 + $0x380] ss:$16 sps:$4 sm:$0xff]   ;;  %v11322_v40 = vld [vmem:[%s15986_s3 + $0x364] ss:$16 sps:$4 sm:$0xff]  }
 0x40a   :  { %9215 = vmatpush1.bf16.msra.mxu1 %v11254_v6  ;;  %v15092_v45 = vadd.f32 %v7365_v62, %v7325_v49  ;;  %v11317_v6 = vld [vmem:[%s15986_s3 + $0x160] ss:$16 sps:$4 sm:$0xff]   ;;  %v11325_v61 = vld [vmem:[%s15986_s3 + $0x144] ss:$16 sps:$4 sm:$0xff]  }
 0x40b   :  { %v7327_v1 = vpop.f32.mrf.mxu1  ;;  %9216 = vmatprep.subr.bf16.mxu1 %v11262_v46  ;;  %v7367_v5 = vpop.f32.mrf.mxu0  ;;  %v11320_v42 = vld [vmem:[%s15986_s3 + $0x360] ss:$16 sps:$4 sm:$0xff]   ;;  %v11328_v46 = vld [vmem:[%s15986_s3 + $0x344] ss:$16 sps:$4 sm:$0xff]  }
 0x40c   :  { %9176 = vmatpush1.bf16.msra.mxu0 %v11257_v54  ;;  %v11323_v9 = vld [vmem:[%s15986_s3 + $0x140] ss:$16 sps:$4 sm:$0xff]   ;;  %v11331_v20 = vld [vmem:[%s15986_s3 + $0x124] ss:$16 sps:$4 sm:$0xff]   ;;  %v7616_v5 = vmax.f32 %v13265_v25, 0.0 }
 0x40d   :  { %v7368_v8 = vpop.f32.mrf.mxu0  ;;  %9177 = vmatprep.subr.bf16.mxu0 %v11265_v13  ;;  %v11326_v49 = vld [vmem:[%s15986_s3 + $0x340] ss:$16 sps:$4 sm:$0xff]   ;;  %v11334_v54 = vld [vmem:[%s15986_s3 + $0x324] ss:$16 sps:$4 sm:$0xff]  }
 0x40e   :  { %9217 = vmatpush1.bf16.msra.mxu1 %v11260_v0  ;;  %v11329_v62 = vld [vmem:[%s15986_s3 + $0x120] ss:$16 sps:$4 sm:$0xff]   ;;  %v11337_v13 = vld [vmem:[%s15986_s3 + $0x104] ss:$16 sps:$4 sm:$0xff]  }
 0x40f   :  { %9218 = vmatprep.subr.bf16.mxu1 %v11268_v4  ;;  %v11332_v0 = vld [vmem:[%s15986_s3 + $0x320] ss:$16 sps:$4 sm:$0xff]   ;;  %v11340_v1 = vld [vmem:[%s15986_s3 + $0x304] ss:$16 sps:$4 sm:$0xff]  }
 0x410   :  { %9178 = vmatpush1.bf16.msra.mxu0 %v11263_v59  ;;  %v11335_v4 = vld [vmem:[%s15986_s3 + $0x100] ss:$16 sps:$4 sm:$0xff]   ;;  %v11343_v8 = vld [vmem:[%s15986_s3 + $0x4e4] ss:$16 sps:$4 sm:$0xff]  }
 0x411   :  { %9179 = vmatprep.subr.bf16.mxu0 %v11271_v22  ;;  %v11338_v59 = vld [vmem:[%s15986_s3 + $0x300] ss:$16 sps:$4 sm:$0xff]   ;;  %v11403_v22 = vld [vmem:[%s15986_s3 + $0x6e4] ss:$16 sps:$4 sm:$0xff]  }
 0x412   :  { %9219 = vmatpush1.bf16.msra.mxu1 %v11266_v41  ;;  %v7618_v41 = vmax.f32 %v14076_v48, 0.0  ;;  %v11341_v25 = vld [vmem:[%s15986_s3 + $0x4e0] ss:$16 sps:$4 sm:$0xff]   ;;  %v11346_v48 = vld [vmem:[%s15986_s3 + $0x4c4] ss:$16 sps:$4 sm:$0xff]  }
 0x413   :  { %9220 = vmatprep.subr.bf16.mxu1 %v11274_v11  ;;  %v7621_v11 = vmax.f32 %v14900_v63, 0.0 }
 0x414   :  { %9180 = vmatpush1.bf16.msra.mxu0 %v11269_v12  ;;  %v15259_v12 = vpack.c.bf16 %v7616_v5, %v7616_v5  ;;  %v11370_v5 = vld [vmem:[%s15986_s3 + $0x5c4] ss:$16 sps:$4 sm:$0xff]  }
 0x415   :  { %9181 = vmatprep.subr.bf16.mxu0 %v11277_v16  ;;  %v11401_v16 = vld [vmem:[%s15986_s3 + $0x6e0] ss:$16 sps:$4 sm:$0xff]   ;;  %v15269_v63 = vpack.c.bf16 %v7621_v11, %v7621_v11 }
 0x416   :  { %9221 = vmatpush1.bf16.msra.mxu1 %v11272_v60  ;;  %v15264_v60 = vpack.c.bf16 %v7618_v41, %v7618_v41  ;;  %v11368_v41 = vld [vmem:[%s15986_s3 + $0x5c0] ss:$16 sps:$4 sm:$0xff]  }
 0x417   :  { %9222 = vmatprep.subr.bf16.mxu1 %v11280_v29  ;;  %v11409_v29 = vld [vmem:[%s15986_s3 + $0x6c4] ss:$16 sps:$4 sm:$0xff]   ;;  %v11454_v11 = vld [vmem:[%s15986_s3 + $0x7a0] ss:$16 sps:$4 sm:$0xff]  }
 0x418   :  { %9182 = vmatpush1.bf16.msra.mxu0 %v11275_v17 }
 0x419   :  { %9183 = vmatprep.subr.bf16.mxu0 %v11283_v30 }
 0x41a   :  { %9223 = vmatpush1.bf16.msra.mxu1 %v11278_v21  ;;  %v11344_v21 = vld [vmem:[%s15986_s3 + $0x4c0] ss:$16 sps:$4 sm:$0xff]  }
 0x41b   :  { %9224 = vmatprep.subr.bf16.mxu1 %v11286_v53  ;;  %v11349_v53 = vld [vmem:[%s15986_s3 + $0x4a4] ss:$16 sps:$4 sm:$0xff]  }
 0x41c   :  { %9184 = vmatpush1.bf16.msra.mxu0 %v11281_v47 }
 0x41d   :  { %9185 = vmatprep.subr.bf16.mxu0 %v11289_v23 }
 0x41e   :  { %9225 = vmatpush1.bf16.msra.mxu1 %v11284_v19  ;;  %v11407_v19 = vld [vmem:[%s15986_s3 + $0x6c0] ss:$16 sps:$4 sm:$0xff]  }
 0x41f   :  { %9226 = vmatprep.subr.bf16.mxu1 %v11292_v31 }
 0x420   :  { %9186 = vmatpush1.bf16.msra.mxu0 %v11287_v50 }
 0x421   :  { %9187 = vmatprep.subr.bf16.mxu0 %v11295_v55  ;;  %v11347_v55 = vld [vmem:[%s15986_s3 + $0x4a0] ss:$16 sps:$4 sm:$0xff]  }
 0x422   :  { %9227 = vmatpush1.bf16.msra.mxu1 %v11290_v32 }
 0x423   :  { %9228 = vmatprep.subr.bf16.mxu1 %v11298_v27 }
 0x424   :  { %9188 = vmatpush2.bf16.msra.mxu0 %v11293_v56 }
 0x425   :  { %9189 = vmatprep.subr.bf16.mxu0 %v11301_v44  ;;  %v11413_v44 = vld [vmem:[%s15986_s3 + $0x6a0] ss:$16 sps:$4 sm:$0xff]  }
 0x426   :  { %9229 = vmatpush2.bf16.msra.mxu1 %v11296_v10 }
 0x427   :  { %9230 = vmatprep.subr.bf16.mxu1 %v11304_v2 }
 0x428   :  { %9190 = vmatpush2.bf16.msra.mxu0 %v11299_v7  ;;  %v11421_v7 = vld [vmem:[%s15986_s3 + $0x684] ss:$16 sps:$4 sm:$0xff]  }
 0x429   :  { %9191 = vmatprep.subr.bf16.mxu0 %v11307_v51 }
 0x42a   :  { %9231 = vmatpush2.bf16.msra.mxu1 %v11302_v18  ;;  %v11350_v18 = vld [vmem:[%s15986_s3 + $0x480] ss:$16 sps:$4 sm:$0xff]  }
 0x42b   :  { %9232 = vmatprep.subr.bf16.mxu1 %v11310_v3  ;;  %v11355_v3 = vld [vmem:[%s15986_s3 + $0x464] ss:$16 sps:$4 sm:$0xff]  }
 0x42c   :  { %9192 = vmatpush2.bf16.msra.mxu0 %v11305_v34  ;;  %v11419_v34 = vld [vmem:[%s15986_s3 + $0x680] ss:$16 sps:$4 sm:$0xff]  }
 0x42d   :  { %9193 = vmatprep.subr.bf16.mxu0 %v11313_v26  ;;  %v11353_v26 = vld [vmem:[%s15986_s3 + $0x460] ss:$16 sps:$4 sm:$0xff]  }
 0x42e   :  { %9233 = vmatpush2.bf16.msra.mxu1 %v11308_v35  ;;  %v11427_v35 = vld [vmem:[%s15986_s3 + $0x664] ss:$16 sps:$4 sm:$0xff]  }
 0x42f   :  { %9234 = vmatprep.subr.bf16.mxu1 %v11316_v28  ;;  %v11358_v28 = vld [vmem:[%s15986_s3 + $0x444] ss:$16 sps:$4 sm:$0xff]  }
 0x430   :  { %9194 = vmatpush2.bf16.msra.mxu0 %v11311_v37  ;;  %v11425_v37 = vld [vmem:[%s15986_s3 + $0x660] ss:$16 sps:$4 sm:$0xff]  }
 0x431   :  { %9195 = vmatprep.subr.bf16.mxu0 %v11319_v15  ;;  %v11356_v15 = vld [vmem:[%s15986_s3 + $0x440] ss:$16 sps:$4 sm:$0xff]  }
 0x432   :  { %9235 = vmatpush2.bf16.msra.mxu1 %v11314_v38  ;;  %v11433_v38 = vld [vmem:[%s15986_s3 + $0x644] ss:$16 sps:$4 sm:$0xff]  }
 0x433   :  { %9236 = vmatprep.subr.bf16.mxu1 %v11322_v40  ;;  %v11361_v40 = vld [vmem:[%s15986_s3 + $0x424] ss:$16 sps:$4 sm:$0xff]  }
 0x434   :  { %9196 = vmatpush2.bf16.msra.mxu0 %v11317_v6  ;;  %v11431_v6 = vld [vmem:[%s15986_s3 + $0x640] ss:$16 sps:$4 sm:$0xff]  }
 0x435   :  { %9197 = vmatprep.subr.bf16.mxu0 %v11325_v61  ;;  %v11359_v61 = vld [vmem:[%s15986_s3 + $0x420] ss:$16 sps:$4 sm:$0xff]  }
 0x436   :  { %9237 = vmatpush2.bf16.msra.mxu1 %v11320_v42  ;;  %v11439_v42 = vld [vmem:[%s15986_s3 + $0x624] ss:$16 sps:$4 sm:$0xff]  }
 0x437   :  { %9238 = vmatprep.subr.bf16.mxu1 %v11328_v46  ;;  %v11364_v46 = vld [vmem:[%s15986_s3 + $0x404] ss:$16 sps:$4 sm:$0xff]  }
 0x438   :  { %9198 = vmatpush2.bf16.msra.mxu0 %v11323_v9  ;;  %v11437_v9 = vld [vmem:[%s15986_s3 + $0x620] ss:$16 sps:$4 sm:$0xff]  }
 0x439   :  { %9199 = vmatprep.subr.bf16.mxu0 %v11331_v20  ;;  %v11362_v20 = vld [vmem:[%s15986_s3 + $0x400] ss:$16 sps:$4 sm:$0xff]  }
 0x43a   :  { %9239 = vmatpush2.bf16.msra.mxu1 %v11326_v49  ;;  %v11445_v49 = vld [vmem:[%s15986_s3 + $0x604] ss:$16 sps:$4 sm:$0xff]  }
 0x43b   :  { %9240 = vmatprep.subr.bf16.mxu1 %v11334_v54  ;;  %v7880_v54 = vld [vmem:[%s15986_s3 + $0x7c0] sm:$0xff] }
 0x43c   :  { %9200 = vmatpush2.bf16.msra.mxu0 %v11329_v62  ;;  %v11367_v62 = vld [vmem:[%s15986_s3 + $0x5e4] ss:$16 sps:$4 sm:$0xff]  }
 0x43d   :  { %9201 = vmatprep.subr.bf16.mxu0 %v11337_v13  ;;  %v11155_v13 = vcombine.high %v7880_v54, %v7880_v54 }
 0x43e   :  { %9241 = vmatpush2.bf16.msra.mxu1 %v11332_v0  ;;  %v11443_v0 = vld [vmem:[%s15986_s3 + $0x600] ss:$16 sps:$4 sm:$0xff]  }
 0x43f   :  { %9242 = vmatprep.subr.bf16.mxu1 %v11340_v1  ;;  %v11154_v1 = vcombine.low %v7880_v54, %v7880_v54  ;;  %v11404_v54 = vld [vmem:[%s15986_s3 + $0x268] ss:$16 sps:$4 sm:$0xff]  }
 0x440   :  { %9202 = vmatpush2.bf16.msra.mxu0 %v11335_v4  ;;  %v11365_v4 = vld [vmem:[%s15986_s3 + $0x5e0] ss:$16 sps:$4 sm:$0xff]  }
 0x441   :  { %9253 = vmatprep.subr.bf16.mxu0 %v11343_v8  ;;  %v11456_v8 = vld [vmem:[%s15986_s3 + $0x7a4] ss:$16 sps:$4 sm:$0xff]  }
 0x442   :  { %9243 = vmatpush2.bf16.msra.mxu1 %v11338_v59  ;;  %v9160_v59 = vsel %vm9158_vm2, %v11154_v1, 0  ;;  %v11416_v1 = vld [vmem:[%s15986_s3 + $0x228] ss:$16 sps:$4 sm:$0xff]  }
 0x443   :  { %9294 = vmatprep.subr.bf16.mxu1 %v11403_v22  ;;  %9204 = vmatmul.mubr.bf16.vlgmr.msra.gmra.mxu0 %v15259_v12  ;;  %v11373_v22 = vld [vmem:[%s15986_s3 + $0x5a4] ss:$16 sps:$4 sm:$0xff]  }
 0x444   :  { %9254 = vmatpush1.bf16.msra.mxu0 %v11341_v25  ;;  %9285 = vmatprep.mubr.bf16.mxu0 %v15269_v63  ;;  %v11462_v25 = vld [vmem:[%s15986_s3 + $0x784] ss:$16 sps:$4 sm:$0xff]  }
 0x445   :  { %v7404_v17 = vpop.f32.mrf.mxu1  ;;  %9245 = vmatmul.mubr.bf16.vlgmr.msra.gmra.mxu1 %v15264_v60  ;;  %9255 = vmatprep.subr.bf16.mxu0 %v11346_v48  ;;  %v11371_v48 = vld [vmem:[%s15986_s3 + $0x5a0] ss:$16 sps:$4 sm:$0xff]  }
 0x446   :  { %v7405_v30 = vadd.f32 %v7404_v17, %v15081_v52  ;;  %9295 = vmatpush1.bf16.msra.mxu1 %v11401_v16  ;;  %v11415_v52 = vld [vmem:[%s15986_s3 + $0x6a4] ss:$16 sps:$4 sm:$0xff]  }
 0x447   :  { %v7406_v47 = vpop.f32.mrf.mxu1  ;;  %v7445_v31 = vpop.f32.mrf.mxu0  ;;  %9296 = vmatprep.subr.bf16.mxu1 %v11409_v29  ;;  %v11376_v16 = vld [vmem:[%s15986_s3 + $0x584] ss:$16 sps:$4 sm:$0xff]   ;;  %v11460_v29 = vld [vmem:[%s15986_s3 + $0x780] ss:$16 sps:$4 sm:$0xff]  }
 0x448   :  { %v7407_v23 = vadd.f32 %v7406_v47, %v15092_v45  ;;  %v15291_v32 = vadd.f32 %v7445_v31, %v7405_v30  ;;  %9256 = vmatpush1.bf16.msra.mxu0 %v11344_v21  ;;  %v11352_v45 = vld [vmem:[%s15986_s3 + $0x484] ss:$16 sps:$4 sm:$0xff]   ;;  %v11374_v21 = vld [vmem:[%s15986_s3 + $0x580] ss:$16 sps:$4 sm:$0xff]  }
 0x449   :  { %v7408_v50 = vpop.f32.mrf.mxu1  ;;  %v7447_v27 = vpop.f32.mrf.mxu0  ;;  %9257 = vmatprep.subr.bf16.mxu0 %v11349_v53  ;;  %v11468_v17 = vld [vmem:[%s15986_s3 + $0x764] ss:$16 sps:$4 sm:$0xff]   ;;  %v11466_v53 = vld [vmem:[%s15986_s3 + $0x760] ss:$16 sps:$4 sm:$0xff]  }
 0x44a   :  { %v15299_v10 = vadd.f32 %v7447_v27, %v7407_v23  ;;  %9297 = vmatpush1.bf16.msra.mxu1 %v11407_v19  ;;  %v11379_v30 = vld [vmem:[%s15986_s3 + $0x564] ss:$16 sps:$4 sm:$0xff]   ;;  %v11377_v19 = vld [vmem:[%s15986_s3 + $0x560] ss:$16 sps:$4 sm:$0xff]  }
 0x44b   :  { %v7409_v56 = vpop.f32.mrf.mxu1  ;;  %v7449_v2 = vpop.f32.mrf.mxu0  ;;  %9298 = vmatprep.subr.bf16.mxu1 %v11415_v52  ;;  %v11474_v47 = vld [vmem:[%s15986_s3 + $0x744] ss:$16 sps:$4 sm:$0xff]   ;;  %v11472_v31 = vld [vmem:[%s15986_s3 + $0x740] ss:$16 sps:$4 sm:$0xff]  }
 0x44c   :  { %9258 = vmatpush1.bf16.msra.mxu0 %v11347_v55  ;;  %v11382_v23 = vld [vmem:[%s15986_s3 + $0x544] ss:$16 sps:$4 sm:$0xff]   ;;  %v11380_v50 = vld [vmem:[%s15986_s3 + $0x540] ss:$16 sps:$4 sm:$0xff]  }
 0x44d   :  { %v7450_v51 = vpop.f32.mrf.mxu0  ;;  %9259 = vmatprep.subr.bf16.mxu0 %v11352_v45  ;;  %v11480_v52 = vld [vmem:[%s15986_s3 + $0x724] ss:$16 sps:$4 sm:$0xff]   ;;  %v11478_v27 = vld [vmem:[%s15986_s3 + $0x720] ss:$16 sps:$4 sm:$0xff]  }
 0x44e   :  { %9299 = vmatpush1.bf16.msra.mxu1 %v11413_v44  ;;  %v11385_v55 = vld [vmem:[%s15986_s3 + $0x524] ss:$16 sps:$4 sm:$0xff]   ;;  %v11383_v56 = vld [vmem:[%s15986_s3 + $0x520] ss:$16 sps:$4 sm:$0xff]   ;;  %v7620_v51 = vmax.f32 %v14885_v39, 0.0 }
 0x44f   :  { %9300 = vmatprep.subr.bf16.mxu1 %v11421_v7  ;;  %v11486_v45 = vld [vmem:[%s15986_s3 + $0x704] ss:$16 sps:$4 sm:$0xff]   ;;  %v11484_v2 = vld [vmem:[%s15986_s3 + $0x700] ss:$16 sps:$4 sm:$0xff]   ;;  %v11492_v7 = vld [vmem:[%s15986_s3 + $0xec] ss:$16 sps:$4 sm:$0xff]  }
 0x450   :  { %9260 = vmatpush1.bf16.msra.mxu0 %v11350_v18  ;;  %v11388_v44 = vld [vmem:[%s15986_s3 + $0x504] ss:$16 sps:$4 sm:$0xff]   ;;  %v11386_v18 = vld [vmem:[%s15986_s3 + $0x500] ss:$16 sps:$4 sm:$0xff]  }
 0x451   :  { %9261 = vmatprep.subr.bf16.mxu0 %v11355_v3  ;;  %v11391_v3 = vld [vmem:[%s15986_s3 + $0x2ec] ss:$16 sps:$4 sm:$0xff]  }
 0x452   :  { %9301 = vmatpush1.bf16.msra.mxu1 %v11419_v34  ;;  %v11389_v34 = vld [vmem:[%s15986_s3 + $0x2e8] ss:$16 sps:$4 sm:$0xff]  }
 0x453   :  { %9302 = vmatprep.subr.bf16.mxu1 %v11427_v35  ;;  %v15460_v35 = vpack.c.bf16 %v7620_v51, %v7620_v51 }
 0x454   :  { %9262 = vmatpush1.bf16.msra.mxu0 %v11353_v26  ;;  %v11394_v26 = vld [vmem:[%s15986_s3 + $0x2cc] ss:$16 sps:$4 sm:$0xff]  }
 0x455   :  { %9263 = vmatprep.subr.bf16.mxu0 %v11358_v28  ;;  %v11392_v28 = vld [vmem:[%s15986_s3 + $0x2c8] ss:$16 sps:$4 sm:$0xff]  }
 0x456   :  { %9303 = vmatpush1.bf16.msra.mxu1 %v11425_v37  ;;  %v11397_v37 = vld [vmem:[%s15986_s3 + $0x2ac] ss:$16 sps:$4 sm:$0xff]  }
 0x457   :  { %9304 = vmatprep.subr.bf16.mxu1 %v11433_v38 }
 0x458   :  { %9264 = vmatpush1.bf16.msra.mxu0 %v11356_v15 }
 0x459   :  { %9265 = vmatprep.subr.bf16.mxu0 %v11361_v40 }
 0x45a   :  { %9305 = vmatpush1.bf16.msra.mxu1 %v11431_v6  ;;  %v11395_v6 = vld [vmem:[%s15986_s3 + $0x2a8] ss:$16 sps:$4 sm:$0xff]  }
 0x45b   :  { %9306 = vmatprep.subr.bf16.mxu1 %v11439_v42  ;;  %v11400_v42 = vld [vmem:[%s15986_s3 + $0x28c] ss:$16 sps:$4 sm:$0xff]  }
 0x45c   :  { %9266 = vmatpush1.bf16.msra.mxu0 %v11359_v61 }
 0x45d   :  { %9267 = vmatprep.subr.bf16.mxu0 %v11364_v46 }
 0x45e   :  { %9307 = vmatpush1.bf16.msra.mxu1 %v11437_v9  ;;  %v11398_v9 = vld [vmem:[%s15986_s3 + $0x288] ss:$16 sps:$4 sm:$0xff]  }
 0x45f   :  { %9308 = vmatprep.subr.bf16.mxu1 %v11445_v49 }
 0x460   :  { %9268 = vmatpush1.bf16.msra.mxu0 %v11362_v20  ;;  %v11406_v20 = vld [vmem:[%s15986_s3 + $0x26c] ss:$16 sps:$4 sm:$0xff]  }
 0x461   :  { %9269 = vmatprep.subr.bf16.mxu0 %v11367_v62  ;;  %v11412_v62 = vld [vmem:[%s15986_s3 + $0x24c] ss:$16 sps:$4 sm:$0xff]  }
 0x462   :  { %9309 = vmatpush1.bf16.msra.mxu1 %v11443_v0  ;;  %v11410_v0 = vld [vmem:[%s15986_s3 + $0x248] ss:$16 sps:$4 sm:$0xff]  }
 0x463   :  { %11158 = vmatprep.subr.msk.bf16.mxu1 %vm9158_vm2, %v11155_v13  ;;  %v11418_v13 = vld [vmem:[%s15986_s3 + $0x22c] ss:$16 sps:$4 sm:$0xff]  }
 0x464   :  { %9270 = vmatpush2.bf16.msra.mxu0 %v11365_v4  ;;  %v11424_v4 = vld [vmem:[%s15986_s3 + $0x20c] ss:$16 sps:$4 sm:$0xff]  }
 0x465   :  { %9271 = vmatprep.subr.bf16.mxu0 %v11370_v5  ;;  %v11422_v5 = vld [vmem:[%s15986_s3 + $0x208] ss:$16 sps:$4 sm:$0xff]  }
 0x466   :  { %9313 = vmatpush2.bf16.msra.mxu1 %v9160_v59  ;;  %v11430_v59 = vld [vmem:[%s15986_s3 + $0x3ec] ss:$16 sps:$4 sm:$0xff]  }
 0x467   :  { %9314 = vmatprep.subr.bf16.mxu1 %v11456_v8  ;;  %v11428_v8 = vld [vmem:[%s15986_s3 + $0x3e8] ss:$16 sps:$4 sm:$0xff]  }
 0x468   :  { %9272 = vmatpush2.bf16.msra.mxu0 %v11368_v41  ;;  %v11436_v41 = vld [vmem:[%s15986_s3 + $0x3cc] ss:$16 sps:$4 sm:$0xff]  }
 0x469   :  { %9273 = vmatprep.subr.bf16.mxu0 %v11373_v22  ;;  %v11434_v22 = vld [vmem:[%s15986_s3 + $0x3c8] ss:$16 sps:$4 sm:$0xff]  }
 0x46a   :  { %9315 = vmatpush2.bf16.msra.mxu1 %v11454_v11  ;;  %v11442_v11 = vld [vmem:[%s15986_s3 + $0x3ac] ss:$16 sps:$4 sm:$0xff]  }
 0x46b   :  { %9316 = vmatprep.subr.bf16.mxu1 %v11462_v25  ;;  %v11440_v25 = vld [vmem:[%s15986_s3 + $0x3a8] ss:$16 sps:$4 sm:$0xff]  }
 0x46c   :  { %9274 = vmatpush2.bf16.msra.mxu0 %v11371_v48  ;;  %v11448_v48 = vld [vmem:[%s15986_s3 + $0x38c] ss:$16 sps:$4 sm:$0xff]  }
 0x46d   :  { %9275 = vmatprep.subr.bf16.mxu0 %v11376_v16  ;;  %v11446_v16 = vld [vmem:[%s15986_s3 + $0x388] ss:$16 sps:$4 sm:$0xff]  }
 0x46e   :  { %9317 = vmatpush2.bf16.msra.mxu1 %v11460_v29  ;;  %v11453_v29 = vld [vmem:[%s15986_s3 + $0x36c] ss:$16 sps:$4 sm:$0xff]  }
 0x46f   :  { %9318 = vmatprep.subr.bf16.mxu1 %v11468_v17  ;;  %v11451_v17 = vld [vmem:[%s15986_s3 + $0x368] ss:$16 sps:$4 sm:$0xff]  }
 0x470   :  { %9276 = vmatpush2.bf16.msra.mxu0 %v11374_v21  ;;  %v11459_v21 = vld [vmem:[%s15986_s3 + $0x34c] ss:$16 sps:$4 sm:$0xff]  }
 0x471   :  { %9277 = vmatprep.subr.bf16.mxu0 %v11379_v30  ;;  %v11457_v30 = vld [vmem:[%s15986_s3 + $0x348] ss:$16 sps:$4 sm:$0xff]  }
 0x472   :  { %9319 = vmatpush2.bf16.msra.mxu1 %v11466_v53  ;;  %v11465_v53 = vld [vmem:[%s15986_s3 + $0x32c] ss:$16 sps:$4 sm:$0xff]  }
 0x473   :  { %9320 = vmatprep.subr.bf16.mxu1 %v11474_v47  ;;  %v11463_v47 = vld [vmem:[%s15986_s3 + $0x328] ss:$16 sps:$4 sm:$0xff]  }
 0x474   :  { %9278 = vmatpush2.bf16.msra.mxu0 %v11377_v19  ;;  %v11471_v19 = vld [vmem:[%s15986_s3 + $0x30c] ss:$16 sps:$4 sm:$0xff]  }
 0x475   :  { %9279 = vmatprep.subr.bf16.mxu0 %v11382_v23  ;;  %v11469_v23 = vld [vmem:[%s15986_s3 + $0x308] ss:$16 sps:$4 sm:$0xff]  }
 0x476   :  { %9321 = vmatpush2.bf16.msra.mxu1 %v11472_v31  ;;  %v11477_v31 = vld [vmem:[%s15986_s3 + $0x6ec] ss:$16 sps:$4 sm:$0xff]  }
 0x477   :  { %9322 = vmatprep.subr.bf16.mxu1 %v11480_v52  ;;  %v11475_v52 = vld [vmem:[%s15986_s3 + $0x6e8] ss:$16 sps:$4 sm:$0xff]  }
 0x478   :  { %9280 = vmatpush2.bf16.msra.mxu0 %v11380_v50 }
 0x479   :  { %9281 = vmatprep.subr.bf16.mxu0 %v11385_v55  ;;  %v11483_v55 = vld [vmem:[%s15986_s3 + $0x6cc] ss:$16 sps:$4 sm:$0xff]  }
 0x47a   :  { %9323 = vmatpush2.bf16.msra.mxu1 %v11478_v27 }
 0x47b   :  { %9324 = vmatprep.subr.bf16.mxu1 %v11486_v45 }
 0x47c   :  { %9282 = vmatpush2.bf16.msra.mxu0 %v11383_v56 }
 0x47d   :  { %9283 = vmatprep.subr.bf16.mxu0 %v11388_v44 }
 0x47e   :  { %9325 = vmatpush2.bf16.msra.mxu1 %v11484_v2  ;;  %v11481_v2 = vld [vmem:[%s15986_s3 + $0x6c8] ss:$16 sps:$4 sm:$0xff]  }
 0x47f   :  { %9335 = vmatprep.subr.bf16.mxu1 %v11492_v7 }
 0x480   :  { %9284 = vmatpush2.bf16.msra.mxu0 %v11386_v18 }
 0x481   :  { %9376 = vmatprep.subr.bf16.mxu0 %v11391_v3 }
 0x483   :  { %9286 = vmatmul.mubr.bf16.vlgmr.msra.gmra.mxu0 %v15460_v35 }
 0x484   :  { %9377 = vmatpush1.bf16.msra.mxu0 %v11389_v34  ;;  %9408 = vmatprep.mubr.bf16.mxu0 %v15064_v36 }
 0x485   :  { %v15466_v39 = vpop.f32.mrf.mxu1  ;;  %9378 = vmatprep.subr.bf16.mxu0 %v11394_v26 }
 0x486   :  { %v7487_v50 = vadd.f32 %v15466_v39, %v15291_v32  ;;  %v11487_v39 = vld [vmem:[%s15986_s3 + $0x6a8] ss:$16 sps:$4 sm:$0xff]  }
 0x487   :  { %v15475_v38 = vpop.f32.mrf.mxu1  ;;  %v15477_v15 = vpop.f32.mrf.mxu0 }
 0x488   :  { %9379 = vmatpush1.bf16.msra.mxu0 %v11392_v28  ;;  %v7489_v27 = vadd.f32 %v15475_v38, %v15299_v10  ;;  %v7528_v45 = vadd.f32 %v15477_v15, %v7487_v50  ;;  %v11489_v10 = vld [vmem:[%s15986_s3 + $0x6ac] ss:$16 sps:$4 sm:$0xff]   ;;  %v11531_v50 = vld [vmem:[%s15986_s3 + $0x8] ss:$16 sps:$4 sm:$0xff]  }
 0x489   :  { %v7490_v40 = vpop.f32.mrf.mxu1  ;;  %v15482_v36 = vpop.f32.mrf.mxu0  ;;  %9380 = vmatprep.subr.bf16.mxu0 %v11397_v37  ;;  %v11495_v38 = vld [vmem:[%s15986_s3 + $0x68c] ss:$16 sps:$4 sm:$0xff]  }
 0x48a   :  { %v7530_v32 = vadd.f32 %v15482_v36, %v7489_v27  ;;  %v11493_v36 = vld [vmem:[%s15986_s3 + $0x688] ss:$16 sps:$4 sm:$0xff]   ;;  %v11539_v27 = vld [vmem:[%s15986_s3 + $0x1ec] ss:$16 sps:$4 sm:$0xff]  }
 0x48b   :  { %v7491_v61 = vpop.f32.mrf.mxu1  ;;  %v7531_v46 = vpop.f32.mrf.mxu0 }
 0x48c   :  { %9381 = vmatpush1.bf16.msra.mxu0 %v11395_v6  ;;  %v11490_v61 = vld [vmem:[%s15986_s3 + $0xe8] ss:$16 sps:$4 sm:$0xff]  }
 0x48d   :  { %v7532_v49 = vpop.f32.mrf.mxu0  ;;  %9382 = vmatprep.subr.bf16.mxu0 %v11400_v42 }
 0x48e   :  { %v11501_v49 = vld [vmem:[%s15986_s3 + $0x66c] ss:$16 sps:$4 sm:$0xff]  }
 0x490   :  { %9383 = vmatpush1.bf16.msra.mxu0 %v11398_v9  ;;  %v11498_v9 = vld [vmem:[%s15986_s3 + $0xcc] ss:$16 sps:$4 sm:$0xff]  }
 0x491   :  { %9384 = vmatprep.subr.bf16.mxu0 %v11406_v20  ;;  %v11499_v20 = vld [vmem:[%s15986_s3 + $0x668] ss:$16 sps:$4 sm:$0xff]  }
 0x494   :  { %9385 = vmatpush1.bf16.msra.mxu0 %v11404_v54  ;;  %v11496_v54 = vld [vmem:[%s15986_s3 + $0xc8] ss:$16 sps:$4 sm:$0xff]  }
 0x495   :  { %9386 = vmatprep.subr.bf16.mxu0 %v11412_v62  ;;  %v11507_v62 = vld [vmem:[%s15986_s3 + $0x64c] ss:$16 sps:$4 sm:$0xff]  }
 0x498   :  { %9387 = vmatpush1.bf16.msra.mxu0 %v11410_v0  ;;  %v11504_v0 = vld [vmem:[%s15986_s3 + $0xac] ss:$16 sps:$4 sm:$0xff]  }
 0x499   :  { %9388 = vmatprep.subr.bf16.mxu0 %v11418_v13  ;;  %v11505_v13 = vld [vmem:[%s15986_s3 + $0x648] ss:$16 sps:$4 sm:$0xff]  }
 0x49c   :  { %9389 = vmatpush1.bf16.msra.mxu0 %v11416_v1  ;;  %v11513_v1 = vld [vmem:[%s15986_s3 + $0x62c] ss:$16 sps:$4 sm:$0xff]  }
 0x49d   :  { %9390 = vmatprep.subr.bf16.mxu0 %v11424_v4  ;;  %v11510_v4 = vld [vmem:[%s15986_s3 + $0x8c] ss:$16 sps:$4 sm:$0xff]  }
 0x4a0   :  { %9391 = vmatpush1.bf16.msra.mxu0 %v11422_v5  ;;  %v11511_v5 = vld [vmem:[%s15986_s3 + $0x628] ss:$16 sps:$4 sm:$0xff]  }
 0x4a1   :  { %9392 = vmatprep.subr.bf16.mxu0 %v11430_v59  ;;  %v11508_v59 = vld [vmem:[%s15986_s3 + $0x88] ss:$16 sps:$4 sm:$0xff]  }
 0x4a4   :  { %9393 = vmatpush2.bf16.msra.mxu0 %v11428_v8  ;;  %v11519_v8 = vld [vmem:[%s15986_s3 + $0x60c] ss:$16 sps:$4 sm:$0xff]  }
 0x4a5   :  { %9394 = vmatprep.subr.bf16.mxu0 %v11436_v41  ;;  %v11516_v41 = vld [vmem:[%s15986_s3 + $0x6c] ss:$16 sps:$4 sm:$0xff]  }
 0x4a8   :  { %9395 = vmatpush2.bf16.msra.mxu0 %v11434_v22  ;;  %v7881_v22 = vld [vmem:[%s15986_s3 + $0x7c8] sm:$0xff] }
 0x4a9   :  { %9396 = vmatprep.subr.bf16.mxu0 %v11442_v11  ;;  %v11517_v11 = vld [vmem:[%s15986_s3 + $0x608] ss:$16 sps:$4 sm:$0xff]  }
 0x4ac   :  { %9397 = vmatpush2.bf16.msra.mxu0 %v11440_v25  ;;  %v11514_v25 = vld [vmem:[%s15986_s3 + $0x68] ss:$16 sps:$4 sm:$0xff]  }
 0x4ad   :  { %9398 = vmatprep.subr.bf16.mxu0 %v11448_v48  ;;  %v11157_v48 = vcombine.high %v7881_v22, %v7881_v22 }
 0x4b0   :  { %9399 = vmatpush2.bf16.msra.mxu0 %v11446_v16  ;;  %v11156_v16 = vcombine.low %v7881_v22, %v7881_v22 }
 0x4b1   :  { %9400 = vmatprep.subr.bf16.mxu0 %v11453_v29  ;;  %v11522_v29 = vld [vmem:[%s15986_s3 + $0x4c] ss:$16 sps:$4 sm:$0xff]  }
 0x4b4   :  { %9401 = vmatpush2.bf16.msra.mxu0 %v11451_v17  ;;  %v11520_v17 = vld [vmem:[%s15986_s3 + $0x48] ss:$16 sps:$4 sm:$0xff]  }
 0x4b5   :  { %9402 = vmatprep.subr.bf16.mxu0 %v11459_v21  ;;  %v9166_v21 = vsel %vm9158_vm2, %v11156_v16, 0  ;;  %v11629_v16 = vld [vmem:[%s15988_s5 + $0x58] sm:$0xff]  }
 0x4b8   :  { %9403 = vmatpush2.bf16.msra.mxu0 %v11457_v30  ;;  %v11530_v30 = vld [vmem:[%s15986_s3 + $0x7ac] ss:$16 sps:$4 sm:$0xff]  }
 0x4b9   :  { %9404 = vmatprep.subr.bf16.mxu0 %v11465_v53  ;;  %v11527_v53 = vld [vmem:[%s15986_s3 + $0x2c] ss:$16 sps:$4 sm:$0xff]  }
 0x4bc   :  { %9405 = vmatpush2.bf16.msra.mxu0 %v11463_v47  ;;  %v11528_v47 = vld [vmem:[%s15986_s3 + $0x7a8] ss:$16 sps:$4 sm:$0xff]  }
 0x4bd   :  { %9406 = vmatprep.subr.bf16.mxu0 %v11471_v19  ;;  %v11525_v19 = vld [vmem:[%s15986_s3 + $0x28] ss:$16 sps:$4 sm:$0xff]  }
 0x4c0   :  { %9407 = vmatpush2.bf16.msra.mxu0 %v11469_v23  ;;  %v11536_v23 = vld [vmem:[%s15986_s3 + $0x78c] ss:$16 sps:$4 sm:$0xff]  }
 0x4c1   :  { %9458 = vmatprep.subr.bf16.mxu0 %v11477_v31  ;;  %v11533_v31 = vld [vmem:[%s15986_s3 + $0xc] ss:$16 sps:$4 sm:$0xff]  }
 0x4c3   :  { %v7609_v56 = vpop.f32.mrf.mxu0  ;;  %9409 = vmatmul.mubr.bf16.vlgmr.msra.gmra.mxu0 %v15264_v60 }
 0x4c4   :  { %9459 = vmatpush1.bf16.msra.mxu0 %v11475_v52  ;;  %v11534_v52 = vld [vmem:[%s15986_s3 + $0x788] ss:$16 sps:$4 sm:$0xff]  }
 0x4c5   :  { %v7568_v44 = vpop.f32.mrf.mxu1  ;;  %v7611_v18 = vpop.f32.mrf.mxu0  ;;  %9460 = vmatprep.subr.bf16.mxu0 %v11483_v55  ;;  %v11542_v55 = vld [vmem:[%s15986_s3 + $0x76c] ss:$16 sps:$4 sm:$0xff]  }
 0x4c6   :  { %v7569_v7 = vadd.f32 %v7568_v44, %v7528_v45  ;;  %v11540_v45 = vld [vmem:[%s15986_s3 + $0x768] ss:$16 sps:$4 sm:$0xff]   ;;  %v11548_v44 = vld [vmem:[%s15986_s3 + $0x74c] ss:$16 sps:$4 sm:$0xff]  }
 0x4c7   :  { %v7570_v51 = vpop.f32.mrf.mxu1  ;;  %v7613_v26 = vpop.f32.mrf.mxu0 }
 0x4c8   :  { %v7610_v3 = vadd.f32 %v7609_v56, %v7569_v7  ;;  %v7571_v34 = vadd.f32 %v7570_v51, %v7530_v32  ;;  %9461 = vmatpush1.bf16.msra.mxu0 %v11481_v2  ;;  %v11537_v56 = vld [vmem:[%s15986_s3 + $0x1e8] ss:$16 sps:$4 sm:$0xff]   ;;  %v11545_v2 = vld [vmem:[%s15986_s3 + $0x1cc] ss:$16 sps:$4 sm:$0xff]  }
 0x4c9   :  { %v7572_v60 = vpop.f32.mrf.mxu1  ;;  %v7614_v37 = vpop.f32.mrf.mxu0  ;;  %9462 = vmatprep.subr.bf16.mxu0 %v11489_v10  ;;  %v11546_v32 = vld [vmem:[%s15986_s3 + $0x748] ss:$16 sps:$4 sm:$0xff]   ;;  %v11551_v10 = vld [vmem:[%s15986_s3 + $0x1ac] ss:$16 sps:$4 sm:$0xff]  }
 0x4ca   :  { %v7612_v28 = vadd.f32 %v7611_v18, %v7571_v34  ;;  %v7622_v15 = vmax.f32 %v7610_v3, 0.0  ;;  %v11543_v7 = vld [vmem:[%s15986_s3 + $0x1c8] ss:$16 sps:$4 sm:$0xff]   ;;  %v11554_v18 = vld [vmem:[%s15986_s3 + $0x72c] ss:$16 sps:$4 sm:$0xff]  }
 0x4cb   :  { %v7573_v40 = vpop.f32.mrf.mxu1  ;;  %v11552_v51 = vld [vmem:[%s15986_s3 + $0x728] ss:$16 sps:$4 sm:$0xff]   ;;  %v11560_v34 = vld [vmem:[%s15986_s3 + $0x70c] ss:$16 sps:$4 sm:$0xff]  }
 0x4cc   :  { %v7623_v6 = vmax.f32 %v7612_v28, 0.0  ;;  %9463 = vmatpush1.bf16.msra.mxu0 %v11487_v39  ;;  %v15596_v46 = vpack.c.bf16 %v7622_v15, %v7622_v15  ;;  %v11549_v3 = vld [vmem:[%s15986_s3 + $0x1a8] ss:$16 sps:$4 sm:$0xff]   ;;  %v11557_v26 = vld [vmem:[%s15986_s3 + $0x18c] ss:$16 sps:$4 sm:$0xff]  }
 0x4cd   :  { %9464 = vmatprep.subr.bf16.mxu0 %v11495_v38  ;;  %v11558_v60 = vld [vmem:[%s15986_s3 + $0x708] ss:$16 sps:$4 sm:$0xff]   ;;  %v11563_v37 = vld [vmem:[%s15986_s3 + $0x16c] ss:$16 sps:$4 sm:$0xff]   ;;  %v15746_v40 = vld [vmem:[%s15987_s4] sm:$0xf] }
 0x4ce   :  { %v7631_v42 = vpack.c.bf16 %v7623_v6, %v7623_v6  ;;  %v11555_v39 = vld [vmem:[%s15986_s3 + $0x188] ss:$16 sps:$4 sm:$0xff]   ;;  %v11623_v6 = vld [vmem:[%s15988_s5 + $0x70] sm:$0xff]  }
 0x4cf   :  { %v11621_v28 = vld [vmem:[%s15988_s5 + $0x78] sm:$0xff]  }
 0x4d0   :  { %11159 = vmatprep.mubr.msk.bf16.mxu1 %vm9154_vm3, %v7631_v42  ;;  %11161 = vmatprep.mubr.msk.bf16.mxu0 %vm9154_vm3, %v7631_v42  ;;  %v11622_v38 = vld [vmem:[%s15988_s5 + $0x38] sm:$0xff]   ;;  %v7887_v42 = vrot.slane %v15746_v40, %v1050_v24  ;;  %v7891_v24 = vrot.slane %v15746_v40, %v1054_v14  ;;  %v11627_v14 = vld [vmem:[%s15988_s5 + $0x60] sm:$0xff]  }
 0x4d1   :  { %9327 = vmatmul.mubr.bf16.vlgmr.msra.gmra.mxu1 %v15596_v46  ;;  %9465 = vmatpush1.bf16.msra.mxu0 %v11493_v36  ;;  %v11561_v15 = vld [vmem:[%s15986_s3 + $0x168] ss:$16 sps:$4 sm:$0xff]   ;;  %v11566_v36 = vld [vmem:[%s15986_s3 + $0x14c] ss:$16 sps:$4 sm:$0xff]  }
 0x4d2   :  { %9336 = vmatpush1.bf16.msra.mxu1 %v11490_v61  ;;  %9367 = vmatprep.mubr.bf16.mxu1 %v15058_v33  ;;  %v11502_v33 = vld [vmem:[%s15986_s3 + $0xa8] ss:$16 sps:$4 sm:$0xff]   ;;  %v11624_v61 = vld [vmem:[%s15988_s5 + $0x30] sm:$0xff]  }
 0x4d3   :  { %9337 = vmatprep.subr.bf16.mxu1 %v11498_v9  ;;  %9466 = vmatprep.subr.bf16.mxu0 %v11501_v49  ;;  %v11564_v9 = vld [vmem:[%s15986_s3 + $0x148] ss:$16 sps:$4 sm:$0xff]  }
 0x4d4   :  { %v11625_v49 = vld [vmem:[%s15988_s5 + $0x68] sm:$0xff]  }
 0x4d5   :  { %9467 = vmatpush1.bf16.msra.mxu0 %v11499_v20 }
 0x4d6   :  { %9338 = vmatpush1.bf16.msra.mxu1 %v11496_v54  ;;  %9468 = vmatprep.subr.bf16.mxu0 %v11507_v62 }
 0x4d7   :  { %9339 = vmatprep.subr.bf16.mxu1 %v11504_v0  ;;  %v11626_v0 = vld [vmem:[%s15988_s5 + $0x28] sm:$0xff]  }
 0x4d9   :  { %9469 = vmatpush1.bf16.msra.mxu0 %v11505_v13 }
 0x4da   :  { %9340 = vmatpush1.bf16.msra.mxu1 %v11502_v33  ;;  %9470 = vmatprep.subr.bf16.mxu0 %v11513_v1  ;;  %v11567_v33 = vld [vmem:[%s15986_s3 + $0x128] ss:$16 sps:$4 sm:$0xff]  }
 0x4db   :  { %9341 = vmatprep.subr.bf16.mxu1 %v11510_v4 }
 0x4dd   :  { %9471 = vmatpush1.bf16.msra.mxu0 %v11511_v5 }
 0x4de   :  { %9342 = vmatpush1.bf16.msra.mxu1 %v11508_v59  ;;  %9472 = vmatprep.subr.bf16.mxu0 %v11519_v8  ;;  %v11572_v59 = vld [vmem:[%s15986_s3 + $0x10c] ss:$16 sps:$4 sm:$0xff]  }
 0x4df   :  { %9343 = vmatprep.subr.bf16.mxu1 %v11516_v41 }
 0x4e1   :  { %9473 = vmatpush1.bf16.msra.mxu0 %v11517_v11  ;;  %v11628_v11 = vld [vmem:[%s15988_s5 + $0x20] sm:$0xff]  }
 0x4e2   :  { %9344 = vmatpush1.bf16.msra.mxu1 %v11514_v25  ;;  %11160 = vmatprep.subr.msk.bf16.mxu0 %vm9158_vm2, %v11157_v48  ;;  %v11570_v48 = vld [vmem:[%s15986_s3 + $0x108] ss:$16 sps:$4 sm:$0xff]  }
 0x4e3   :  { %9345 = vmatprep.subr.bf16.mxu1 %v11522_v29 }
 0x4e5   :  { %9477 = vmatpush2.bf16.msra.mxu0 %v9166_v21  ;;  %v11630_v21 = vld [vmem:[%s15988_s5 + $0x18] sm:$0xff]  }
 0x4e6   :  { %9346 = vmatpush1.bf16.msra.mxu1 %v11520_v17  ;;  %9478 = vmatprep.subr.bf16.mxu0 %v11530_v30  ;;  %v11575_v17 = vld [vmem:[%s15986_s3 + $0x4ec] ss:$16 sps:$4 sm:$0xff]   ;;  %v11573_v30 = vld [vmem:[%s15986_s3 + $0x4e8] ss:$16 sps:$4 sm:$0xff]  }
 0x4e7   :  { %9347 = vmatprep.subr.bf16.mxu1 %v11527_v53  ;;  %v11578_v53 = vld [vmem:[%s15986_s3 + $0x4cc] ss:$16 sps:$4 sm:$0xff]  }
 0x4e9   :  { %9479 = vmatpush2.bf16.msra.mxu0 %v11528_v47  ;;  %v11631_v47 = vld [vmem:[%s15988_s5 + $0x50] sm:$0xff]  }
 0x4ea   :  { %9348 = vmatpush1.bf16.msra.mxu1 %v11525_v19  ;;  %9480 = vmatprep.subr.bf16.mxu0 %v11536_v23  ;;  %v11632_v19 = vld [vmem:[%s15988_s5 + $0x10] sm:$0xff]   ;;  %v11576_v23 = vld [vmem:[%s15986_s3 + $0x4c8] ss:$16 sps:$4 sm:$0xff]  }
 0x4eb   :  { %9349 = vmatprep.subr.bf16.mxu1 %v11533_v31  ;;  %v11633_v31 = vld [vmem:[%s15988_s5 + $0x48] sm:$0xff]  }
 0x4ed   :  { %9481 = vmatpush2.bf16.msra.mxu0 %v11534_v52  ;;  %v11634_v52 = vld [vmem:[%s15988_s5 + $0x8] sm:$0xff]  }
 0x4ee   :  { %9350 = vmatpush1.bf16.msra.mxu1 %v11531_v50  ;;  %9482 = vmatprep.subr.bf16.mxu0 %v11542_v55  ;;  %v11635_v50 = vld [vmem:[%s15988_s5 + $0x40] sm:$0xff]   ;;  %v11584_v55 = vld [vmem:[%s15986_s3 + $0x48c] ss:$16 sps:$4 sm:$0xff]  }
 0x4ef   :  { %9351 = vmatprep.subr.bf16.mxu1 %v11539_v27  ;;  %v11636_v27 = vld [vmem:[%s15988_s5] sm:$0xff]  }
 0x4f1   :  { %9483 = vmatpush2.bf16.msra.mxu0 %v11540_v45  ;;  %v11582_v45 = vld [vmem:[%s15986_s3 + $0x488] ss:$16 sps:$4 sm:$0xff]  }
 0x4f2   :  { %9352 = vmatpush2.bf16.msra.mxu1 %v11537_v56  ;;  %9484 = vmatprep.subr.bf16.mxu0 %v11548_v44  ;;  %v11587_v56 = vld [vmem:[%s15986_s3 + $0x46c] ss:$16 sps:$4 sm:$0xff]   ;;  %v11585_v44 = vld [vmem:[%s15986_s3 + $0x468] ss:$16 sps:$4 sm:$0xff]  }
 0x4f3   :  { %9353 = vmatprep.subr.bf16.mxu1 %v11545_v2  ;;  %v11590_v2 = vld [vmem:[%s15986_s3 + $0x44c] ss:$16 sps:$4 sm:$0xff]  }
 0x4f5   :  { %9485 = vmatpush2.bf16.msra.mxu0 %v11546_v32  ;;  %v11588_v32 = vld [vmem:[%s15986_s3 + $0x448] ss:$16 sps:$4 sm:$0xff]  }
 0x4f6   :  { %9354 = vmatpush2.bf16.msra.mxu1 %v11543_v7  ;;  %9486 = vmatprep.subr.bf16.mxu0 %v11554_v18  ;;  %v11593_v7 = vld [vmem:[%s15986_s3 + $0x42c] ss:$16 sps:$4 sm:$0xff]   ;;  %v11591_v18 = vld [vmem:[%s15986_s3 + $0x428] ss:$16 sps:$4 sm:$0xff]  }
 0x4f7   :  { %9355 = vmatprep.subr.bf16.mxu1 %v11551_v10  ;;  %v11596_v10 = vld [vmem:[%s15986_s3 + $0x40c] ss:$16 sps:$4 sm:$0xff]  }
 0x4f9   :  { %9487 = vmatpush2.bf16.msra.mxu0 %v11552_v51  ;;  %v11594_v51 = vld [vmem:[%s15986_s3 + $0x408] ss:$16 sps:$4 sm:$0xff]  }
 0x4fa   :  { %9356 = vmatpush2.bf16.msra.mxu1 %v11549_v3  ;;  %9488 = vmatprep.subr.bf16.mxu0 %v11560_v34  ;;  %v11599_v3 = vld [vmem:[%s15986_s3 + $0x5ec] ss:$16 sps:$4 sm:$0xff]   ;;  %v11597_v34 = vld [vmem:[%s15986_s3 + $0x5e8] ss:$16 sps:$4 sm:$0xff]  }
 0x4fb   :  { %9357 = vmatprep.subr.bf16.mxu1 %v11557_v26  ;;  %v11602_v26 = vld [vmem:[%s15986_s3 + $0x5cc] ss:$16 sps:$4 sm:$0xff]  }
 0x4fd   :  { %9489 = vmatpush2.bf16.msra.mxu0 %v11558_v60  ;;  %v11600_v60 = vld [vmem:[%s15986_s3 + $0x5c8] ss:$16 sps:$4 sm:$0xff]  }
 0x4fe   :  { %9358 = vmatpush2.bf16.msra.mxu1 %v11555_v39  ;;  %11196 = vmatprep.subr.bf16.mxu0 %v11621_v28  ;;  %v11605_v39 = vld [vmem:[%s15986_s3 + $0x5ac] ss:$16 sps:$4 sm:$0xff]   ;;  %v11603_v28 = vld [vmem:[%s15986_s3 + $0x5a8] ss:$16 sps:$4 sm:$0xff]  }
 0x4ff   :  { %9359 = vmatprep.subr.bf16.mxu1 %v11563_v37  ;;  %v11608_v37 = vld [vmem:[%s15986_s3 + $0x58c] ss:$16 sps:$4 sm:$0xff]  }
 0x500   :  { %9491 = vmatmul.mubr.bf16.vlgmr.msra.gmra.mxu0 %v15596_v46  ;;  %v11569_v46 = vld [vmem:[%s15986_s3 + $0x12c] ss:$16 sps:$4 sm:$0xff]  }
 0x501   :  { %11197 = vmatpush3.bf16.msra.mxu0 %v11622_v38  ;;  %v11606_v38 = vld [vmem:[%s15986_s3 + $0x588] ss:$16 sps:$4 sm:$0xff]  }
 0x502   :  { %9360 = vmatpush2.bf16.msra.mxu1 %v11561_v15  ;;  %11198 = vmatprep.subr.bf16.mxu0 %v11623_v6  ;;  %v11611_v15 = vld [vmem:[%s15986_s3 + $0x56c] ss:$16 sps:$4 sm:$0xff]   ;;  %v11609_v6 = vld [vmem:[%s15986_s3 + $0x568] ss:$16 sps:$4 sm:$0xff]  }
 0x503   :  { %9361 = vmatprep.subr.bf16.mxu1 %v11566_v36  ;;  %v9205_v20 = vpop.f32.mrf.mxu0  ;;  %v11614_v36 = vld [vmem:[%s15986_s3 + $0x54c] ss:$16 sps:$4 sm:$0xff]  }
 0x504   :  { %v9206_v54 = vadd.f32 %v9205_v20, %v7887_v42  ;;  %v11612_v42 = vld [vmem:[%s15986_s3 + $0x548] ss:$16 sps:$4 sm:$0xff]  }
 0x505   :  { %v9246_v62 = vpop.f32.mrf.mxu1  ;;  %11199 = vmatpush3.bf16.msra.mxu0 %v11624_v61  ;;  %v9207_v13 = vpop.f32.mrf.mxu0  ;;  %v11617_v61 = vld [vmem:[%s15986_s3 + $0x52c] ss:$16 sps:$4 sm:$0xff]  }
 0x506   :  { %9362 = vmatpush2.bf16.msra.mxu1 %v11564_v9  ;;  %11200 = vmatprep.subr.bf16.mxu0 %v11625_v49  ;;  %v15782_v1 = vadd.f32 %v9246_v62, %v9206_v54  ;;  %v9208_v4 = vadd.f32 %v9207_v13, %v7891_v24  ;;  %v11620_v54 = vld [vmem:[%s15986_s3 + $0x50c] ss:$16 sps:$4 sm:$0xff]   ;;  %v11618_v13 = vld [vmem:[%s15986_s3 + $0x508] ss:$16 sps:$4 sm:$0xff]  }
 0x507   :  { %v9248_v5 = vpop.f32.mrf.mxu1  ;;  %9363 = vmatprep.subr.bf16.mxu1 %v11569_v46  ;;  %v9209_v8 = vpop.f32.mrf.mxu0  ;;  %v11615_v46 = vld [vmem:[%s15986_s3 + $0x528] ss:$16 sps:$4 sm:$0xff]  }
 0x508   :  { %v15787_v41 = vadd.f32 %v9248_v5, %v9208_v4  ;;  %v11640_v4 = vld [vmem:[%s15988_s5 + $0xb0] sm:$0xff]   ;;  %v11642_v5 = vld [vmem:[%s15988_s5 + $0xa8] sm:$0xff]   ;;  %v11644_v8 = vld [vmem:[%s15988_s5 + $0xa0] sm:$0xff]  }
 0x509   :  { %v9250_v22 = vpop.f32.mrf.mxu1  ;;  %11201 = vmatpush3.bf16.msra.mxu0 %v11626_v0  ;;  %v9210_v25 = vpop.f32.mrf.mxu0 }
 0x50a   :  { %9364 = vmatpush2.bf16.msra.mxu1 %v11567_v33  ;;  %11202 = vmatprep.subr.bf16.mxu0 %v11627_v14  ;;  %v11637_v33 = vld [vmem:[%s15988_s5 + $0xf8] ss:$0 sps:$4 sm:$0x33]  }
 0x50b   :  { %v9251_v29 = vpop.f32.mrf.mxu1  ;;  %9365 = vmatprep.subr.bf16.mxu1 %v11572_v59  ;;  %v11638_v14 = vld [vmem:[%s15988_s5 + $0xb8] sm:$0xff]   ;;  %v11643_v59 = vld [vmem:[%s15988_s5 + $0xe0] sm:$0xff]  }
 0x50c   :  { %v11646_v22 = vld [vmem:[%s15988_s5 + $0x98] sm:$0xff]   ;;  %v11647_v29 = vld [vmem:[%s15988_s5 + $0xd0] sm:$0xff]  }
 0x50d   :  { %11203 = vmatpush3.bf16.msra.mxu0 %v11628_v11 }
 0x50e   :  { %9366 = vmatpush2.bf16.msra.mxu1 %v11570_v48  ;;  %11204 = vmatprep.subr.bf16.mxu0 %v11629_v16 }
 0x50f   :  { %9417 = vmatprep.subr.bf16.mxu1 %v11575_v17  ;;  %v11648_v17 = vld [vmem:[%s15988_s5 + $0x90] sm:$0xff]  }
 0x511   :  { %9368 = vmatmul.mubr.bf16.vlgmr.msra.gmra.mxu1 %v15259_v12  ;;  %11205 = vmatpush3.bf16.msra.mxu0 %v11630_v21  ;;  %v11581_v12 = vld [vmem:[%s15986_s3 + $0x4ac] ss:$16 sps:$4 sm:$0xff]  }
 0x512   :  { %9418 = vmatpush1.bf16.msra.mxu1 %v11573_v30  ;;  %9449 = vmatprep.mubr.bf16.mxu1 %v15269_v63  ;;  %v11579_v63 = vld [vmem:[%s15986_s3 + $0x4a8] ss:$16 sps:$4 sm:$0xff]  }
 0x513   :  { %9419 = vmatprep.subr.bf16.mxu1 %v11578_v53  ;;  %11206 = vmatprep.subr.bf16.mxu0 %v11631_v47  ;;  %v11649_v47 = vld [vmem:[%s15988_s5 + $0xc8] sm:$0xff]  }
 0x515   :  { %11207 = vmatpush3.bf16.msra.mxu0 %v11632_v19 }
 0x516   :  { %9420 = vmatpush1.bf16.msra.mxu1 %v11576_v23  ;;  %11208 = vmatprep.subr.bf16.mxu0 %v11633_v31  ;;  %v11650_v23 = vld [vmem:[%s15988_s5 + $0x88] sm:$0xff]  }
 0x517   :  { %9421 = vmatprep.subr.bf16.mxu1 %v11581_v12 }
 0x519   :  { %11209 = vmatpush3.bf16.msra.mxu0 %v11634_v52 }
 0x51a   :  { %9422 = vmatpush1.bf16.msra.mxu1 %v11579_v63  ;;  %11210 = vmatprep.subr.bf16.mxu0 %v11635_v50  ;;  %v11651_v50 = vld [vmem:[%s15988_s5 + $0xc0] sm:$0xff]  }
 0x51b   :  { %9423 = vmatprep.subr.bf16.mxu1 %v11584_v55 }
 0x51d   :  { %11211 = vmatpush3.bf16.msra.mxu0 %v11636_v27  ;;  %v11652_v27 = vld [vmem:[%s15988_s5 + $0x80] sm:$0xff]  }
 0x51e   :  { %9424 = vmatpush1.bf16.msra.mxu1 %v11582_v45 }
 0x51f   :  { %9425 = vmatprep.subr.bf16.mxu1 %v11587_v56 }
 0x522   :  { %9426 = vmatpush1.bf16.msra.mxu1 %v11585_v44 }
 0x523   :  { %9427 = vmatprep.subr.bf16.mxu1 %v11590_v2 }
 0x526   :  { %9428 = vmatpush1.bf16.msra.mxu1 %v11588_v32 }
 0x527   :  { %9429 = vmatprep.subr.bf16.mxu1 %v11593_v7 }
 0x52a   :  { %9430 = vmatpush1.bf16.msra.mxu1 %v11591_v18 }
 0x52b   :  { %9431 = vmatprep.subr.bf16.mxu1 %v11596_v10 }
 0x52e   :  { %9432 = vmatpush1.bf16.msra.mxu1 %v11594_v51 }
 0x52f   :  { %9433 = vmatprep.subr.bf16.mxu1 %v11599_v3  ;;  %v7895_v3 = vrot.slane %v15746_v40, %v1058_v58 }
 0x532   :  { %9434 = vmatpush2.bf16.msra.mxu1 %v11597_v34  ;;  %v7899_v34 = vrot.slane %v15746_v40, %v1062_v57 }
 0x533   :  { %9435 = vmatprep.subr.bf16.mxu1 %v11602_v26 }
 0x536   :  { %9436 = vmatpush2.bf16.msra.mxu1 %v11600_v60 }
 0x537   :  { %9437 = vmatprep.subr.bf16.mxu1 %v11605_v39 }
 0x53a   :  { %9438 = vmatpush2.bf16.msra.mxu1 %v11603_v28 }
 0x53b   :  { %9439 = vmatprep.subr.bf16.mxu1 %v11608_v37 }
 0x53e   :  { %9440 = vmatpush2.bf16.msra.mxu1 %v11606_v38 }
 0x53f   :  { %9441 = vmatprep.subr.bf16.mxu1 %v11611_v15 }
 0x542   :  { %9442 = vmatpush2.bf16.msra.mxu1 %v11609_v6 }
 0x543   :  { %9443 = vmatprep.subr.bf16.mxu1 %v11614_v36  ;;  %v9287_v9 = vpop.f32.mrf.mxu0 }
 0x544   :  { %v9288_v49 = vadd.f32 %v9287_v9, %v15782_v1  ;;  %v11639_v1 = vld [vmem:[%s15988_s5 + $0xf0] sm:$0xff]  }
 0x545   :  { %v9289_v24 = vpop.f32.mrf.mxu0 }
 0x546   :  { %9444 = vmatpush2.bf16.msra.mxu1 %v11612_v42  ;;  %v9290_v20 = vadd.f32 %v9289_v24, %v15787_v41  ;;  %v11645_v41 = vld [vmem:[%s15988_s5 + $0xd8] sm:$0xff]  }
 0x547   :  { %9445 = vmatprep.subr.bf16.mxu1 %v11617_v61  ;;  %v9291_v62 = vpop.f32.mrf.mxu0 }
 0x548   :  { %v11162_v62 = vld [vmem:[%s15989_s6] ss:$0 sm:$0xff]  ;;  %s11683_s6 = smov [#allocation2]  }
 0x549   :  { %v9292_v0 = vpop.f32.mrf.mxu0  ;;  %s9874_s28 = sshll.u32 %s11683_s6, 4  ;;  %s9875_s28 = int_to_ptr.vmem [resolvable:$true] %s9874_s28 }
 0x54a   :  { %9446 = vmatpush2.bf16.msra.mxu1 %v11615_v46  ;;  %s11660_s3 = scalar_lea.vmem %s9875_s28, 32  ;;  %p11665_p1 = scmp.lt.s32.totalorder %s9875_s28, %s9875_s28 }
 0x54b   :  { %9447 = vmatprep.subr.bf16.mxu1 %v11620_v54  ;;  %p11661_p0 = scmp.ne.s32.totalorder %s9875_s28, %s11660_s3  ;;  %p11666_p2 = scmp.lt.s32.totalorder %s11660_s3, %s11660_s3 }
 0x54d   :  { %p11667_p3 = por %p11666_p2, %p11665_p1 }
 0x54e   :  { %9448 = vmatpush2.bf16.msra.mxu1 %v11618_v13 }
 0x54f   :  { %11240 = vmatprep.subr.msk.bf16.mxu1 %vm9770_vm4, %v11637_v33  ;;  %p11668_p4 = pnand %p11667_p3, %p11661_p0 }
 0x551   :  { %9450 = vmatmul.mubr.bf16.vlgmr.msra.gmra.mxu1 %v15460_v35  ;;  %v11641_v35 = vld [vmem:[%s15988_s5 + $0xe8] sm:$0xff]  }
 0x552   :  { %11219 = vmatpush3.bf16.msra.mxu1 %v11638_v14 }
 0x553   :  { %11220 = vmatprep.subr.bf16.mxu1 %v11639_v1 }
 0x556   :  { %11221 = vmatpush3.bf16.msra.mxu1 %v11640_v4 }
 0x557   :  { %11222 = vmatprep.subr.bf16.mxu1 %v11641_v35 }
 0x55a   :  { %11223 = vmatpush3.bf16.msra.mxu1 %v11642_v5 }
 0x55b   :  { %11224 = vmatprep.subr.bf16.mxu1 %v11643_v59 }
 0x55e   :  { %11225 = vmatpush3.bf16.msra.mxu1 %v11644_v8 }
 0x55f   :  { %11226 = vmatprep.subr.bf16.mxu1 %v11645_v41 }
 0x562   :  { %11227 = vmatpush3.bf16.msra.mxu1 %v11646_v22 }
 0x563   :  { %11228 = vmatprep.subr.bf16.mxu1 %v11647_v29 }
 0x566   :  { %11229 = vmatpush3.bf16.msra.mxu1 %v11648_v17 }
 0x567   :  { %11230 = vmatprep.subr.bf16.mxu1 %v11649_v47 }
 0x56a   :  { %11231 = vmatpush3.bf16.msra.mxu1 %v11650_v23 }
 0x56b   :  { %11232 = vmatprep.subr.bf16.mxu1 %v11651_v50 }
 0x56e   :  { %11233 = vmatpush3.bf16.msra.mxu1 %v11652_v27 }
 0x583   :  { %v9410_v11 = vpop.f32.mrf.mxu0 }
 0x585   :  { %v9412_v25 = vpop.f32.mrf.mxu0 }
 0x587   :  { %v9414_v48 = vpop.f32.mrf.mxu0 }
 0x589   :  { %v9415_v16 = vpop.f32.mrf.mxu0 }
 0x591   :  { %v9328_v21 = vpop.f32.mrf.mxu1 }
 0x592   :  { %v9329_v30 = vadd.f32 %v9328_v21, %v9288_v49 }
 0x593   :  { %v9330_v53 = vpop.f32.mrf.mxu1 }
 0x594   :  { %v9331_v19 = vadd.f32 %v9330_v53, %v9290_v20  ;;  %v9499_v31 = vmax.f32 %v9329_v30, 0.0 }
 0x595   :  { %v9332_v12 = vpop.f32.mrf.mxu1 }
 0x596   :  { %v9500_v52 = vmax.f32 %v9331_v19, 0.0  ;;  %v9503_v45 = vpack.c.bf16 %v9499_v31, %v9499_v31 }
 0x597   :  { %v9333_v63 = vpop.f32.mrf.mxu1 }
 0x598   :  { %v9504_v55 = vpack.c.bf16 %v9500_v52, %v9500_v52 }
 0x59a   :  { %9806 = vmatprep.mubr.bf16.mxu0 %v9504_v55 }
 0x59b   :  { %9807 = vmatmul.mubr.bf16.vlgmr.msra.gmra.mxu0 %v9503_v45 }
 0x5c0   :  { %v9492_v56 = vpop.f32.mrf.mxu0 }
 0x5c2   :  { %v9494_v44 = vpop.f32.mrf.mxu0 }
 0x5c4   :  { %v9496_v2 = vpop.f32.mrf.mxu0 }
 0x5c6   :  { %v9497_v32 = vpop.f32.mrf.mxu0 }
 0x5d1   :  { %v9369_v7 = vpop.f32.mrf.mxu1 }
 0x5d2   :  { %v9370_v26 = vadd.f32 %v9369_v7, %v7895_v3 }
 0x5d3   :  { %v9371_v18 = vpop.f32.mrf.mxu1 }
 0x5d4   :  { %v9372_v60 = vadd.f32 %v9371_v18, %v7899_v34  ;;  %v9411_v39 = vadd.f32 %v9410_v11, %v9370_v26 }
 0x5d5   :  { %v9373_v10 = vpop.f32.mrf.mxu1 }
 0x5d6   :  { %v9413_v38 = vadd.f32 %v9412_v25, %v9372_v60 }
 0x5d7   :  { %v9374_v51 = vpop.f32.mrf.mxu1 }
 0x611   :  { %v9451_v28 = vpop.f32.mrf.mxu1 }
 0x612   :  { %v9452_v37 = vadd.f32 %v9451_v28, %v9411_v39 }
 0x613   :  { %v9453_v15 = vpop.f32.mrf.mxu1 }
 0x614   :  { %v9493_v6 = vadd.f32 %v9492_v56, %v9452_v37  ;;  %v9454_v36 = vadd.f32 %v9453_v15, %v9413_v38 }
 0x615   :  { %v9455_v42 = vpop.f32.mrf.mxu1 }
 0x616   :  { %v9495_v61 = vadd.f32 %v9494_v44, %v9454_v36  ;;  %v9501_v9 = vmax.f32 %v9493_v6, 0.0 }
 0x617   :  { %v9456_v49 = vpop.f32.mrf.mxu1 }
 0x618   :  { %v9502_v24 = vmax.f32 %v9495_v61, 0.0  ;;  %v9505_v46 = vpack.c.bf16 %v9501_v9, %v9501_v9 }
 0x61a   :  { %v9506_v58 = vpack.c.bf16 %v9502_v24, %v9502_v24 }
 0x61c   :  { %11195 = vmatprep.mubr.msk.bf16.mxu1 %vm9766_vm5, %v9506_v58 }
 0x61d   :  { %9847 = vmatmul.mubr.bf16.vlgmr.msra.gmra.mxu1 %v9505_v46 }
 0x65b   :  { %v11212_v43 = vpop.f32.mrf.mxu0 }
 0x65d   :  { %v11213_v57 = vpop.f32.mrf.mxu0 }
 0x65e   :  { %v11214_v40 = vadd.f32 %v11213_v57, %v11212_v43 }
 0x65f   :  { %v11215_v20 = vpop.f32.mrf.mxu0 }
 0x660   :  { %v9809_v33 = vadd.f32 %v11214_v40, %v11162_v62 }
 0x661   :  { %v11216_v54 = vpop.f32.mrf.mxu0 }
 0x6dd   :  { %v11234_v0 = vpop.f32.mrf.mxu1 }
 0x6df   :  { %v11235_v13 = vpop.f32.mrf.mxu1 }
 0x6e0   :  { %v11236_v14 = vadd.f32 %v11235_v13, %v11234_v0 }
 0x6e1   :  { %v11237_v1 = vpop.f32.mrf.mxu1 }
 0x6e2   :  { %v9849_v4 = vadd.f32 %v11236_v14, %v9809_v33 }
 0x6e3   :  { %v11238_v35 = vpop.f32.mrf.mxu1 }
 0x6e4   :  { %v9855_v5 = vsel %vm9854_vm6, %v9849_v4, -inf }
 0x6e5   :  { %9856 = vmax.xlane.f32.xlu0 %v9855_v5 }
 0x76e   :  { %v9857_v59 = vpop.xlane.xlu0 %9856 }
 0x76f   :  { %v9858_v8 = vsub.f32 %v9849_v4, %v9857_v59 }
 0x771   :  { %v9859_v41 = vmul.f32 1.442695, %v9858_v8 }
 0x773   :  { %11653 = vpow2.f32 %v9859_v41 }
 0x780   :  { %v11654_v22 = vpop.eup %11653 }
 0x781   :  { %v9861_v11 = vsel %vm9854_vm6, %v11654_v22, 0.0 }
 0x782   :  { %9862 = vadd.xlane.f32.xlu0 %v9861_v11 }
 0x80b   :  { %v9863_v25 = vpop.xlane.xlu0 %9862 }
 0x80c   :  { %11655 = vlog2.f32 %v9863_v25 }
 0x819   :  { %v11656_v48 = vpop.eup %11655 }
 0x81a   :  { %v9865_v16 = vmul.f32 0.6931472, %v11656_v48 }
 0x81c   :  { %v9866_v29 = vsub.f32 %v9858_v8, %v9865_v16 }
 0x81e   :  { %9867 = vst.msk [vmem:[#allocation2] sm:$0x3] %vm9854_vm6, %v9866_v29 }
 0x81f   :  { %11671 = shalt.err (!%p11668_p4)
}
 0x820   :  { %9877 = dma.vmem_to_hbm [thread:$0]  %s9875_s28, 32, %s15990_s7, [#allocation3]  }
 0x821   :  { %11680 = dma.done.wait [#allocation3], 32  }
 0x822   :  { %11681 = vsyncadd [#allocation3], 4294967264 }
 0x823   :  { %9881 = vsyncpa [#allocation3], 1 }

</bundles_post_ra>
